<compile_context>
chip_gen: v5e
topology: v5e:2x2
jax: 0.10.0
libtpu: 0.0.40
codegen_flags: <defaults>
</compile_context>

<pallas_src>
import functools
import math

import jax
import jax.numpy as jnp
from jax.experimental import pallas as pl
from jax.experimental.pallas import tpu as pltpu

K_TILE_CAP = 2304          # max K tile (multiple of 128)
TE_CAP = 2048              # elementwise row-tile cap
MM_VMEM_LIMIT = 40 * 1024 * 1024


def _round_up(x, m):
    return (x + m - 1) // m * m


# ----------------------------- Pallas kernels -----------------------------

def _matmul_kernel(a_ref, b_ref, bias_ref, o_ref, acc_ref, *, relu):
    """out = [relu](A @ B + bias); bf16 operands, f32 accumulator."""
    @pl.when(pl.program_id(2) == 0)
    def _():
        acc_ref[...] = jnp.zeros_like(acc_ref)

    acc_ref[...] += jnp.dot(a_ref[...], b_ref[...],
                            preferred_element_type=jnp.float32)

    @pl.when(pl.program_id(2) == pl.num_programs(2) - 1)
    def _():
        r = acc_ref[...] + bias_ref[...]
        if relu:
            r = jnp.maximum(r, 0.0)
        o_ref[...] = r.astype(o_ref.dtype)


def _affine_relu_kernel(y_ref, s_ref, b_ref, o_ref):
    o_ref[...] = jnp.maximum(y_ref[...] * s_ref[...] + b_ref[...],
                             0.0).astype(o_ref.dtype)


def _pool_kernel(x_ref, o_ref):
    v = x_ref[...]                            # (tb, 2, W2, 2*C)
    hmax = jnp.maximum(v[:, 0], v[:, 1])      # (tb, W2, 2*C)
    c = o_ref.shape[-1]
    o_ref[...] = jnp.maximum(hmax[..., :c], hmax[..., c:])


def _add_kernel(a_ref, b_ref, o_ref):
    o_ref[...] = a_ref[...] + b_ref[...]


# ----------------------------- kernel wrappers -----------------------------

def _pick_k_tile(k):
    """Return (tk, num_k_steps, padded_k): K is never ragged inside the grid."""
    if k <= K_TILE_CAP:
        return k, 1, k
    if k % 128 == 0:
        q = k // 128
        for d in range(K_TILE_CAP // 128, 0, -1):
            if q % d == 0:
                return 128 * d, q // d, k
    kp = _round_up(k, K_TILE_CAP)          # safety fallback (unused for VGG shapes)
    return K_TILE_CAP, kp // K_TILE_CAP, kp


def matmul_bias(a, b, bias, relu=False, out_dtype=jnp.float32):
    """(M,K) @ (K,N) + bias[N] (optional ReLU) on the MXU, bf16 in / f32 acc."""
    m, k = a.shape
    kb, n = b.shape
    assert k == kb
    tk, kt, kp = _pick_k_tile(k)
    if kp != k:  # zero-pad the reduction dim only (correctness of accumulation)
        a = jnp.pad(a, ((0, 0), (0, kp - k)))
        b = jnp.pad(b, ((0, kp - k), (0, 0)))

    if n <= 64:
        tm_cap = 4096
    elif n <= 128:
        tm_cap = 2048
    elif n <= 256:
        tm_cap = 1024
    else:
        tm_cap = 512
    tm = min(tm_cap, _round_up(m, 16))

    if m <= 16:
        tn_cap = 2048
    elif m <= 256:
        tn_cap = 1024
    else:
        tn_cap = 512
    tn = n if n <= tn_cap else tn_cap

    grid = (pl.cdiv(m, tm), pl.cdiv(n, tn), kt)
    out = pl.pallas_call(
        functools.partial(_matmul_kernel, relu=relu),
        out_shape=jax.ShapeDtypeStruct((m, n), out_dtype),
        grid=grid,
        in_specs=[
            pl.BlockSpec((tm, tk), lambda i, j, kk: (i, kk)),
            pl.BlockSpec((tk, tn), lambda i, j, kk: (kk, j)),
            pl.BlockSpec((1, tn), lambda i, j, kk: (0, j)),
        ],
        out_specs=pl.BlockSpec((tm, tn), lambda i, j, kk: (i, j)),
        scratch_shapes=[pltpu.VMEM((tm, tn), jnp.float32)],
        compiler_params=pltpu.CompilerParams(
            dimension_semantics=("parallel", "parallel", "arbitrary"),
            vmem_limit_bytes=MM_VMEM_LIMIT),
    )(a.astype(jnp.bfloat16), b.astype(jnp.bfloat16),
      bias.astype(jnp.float32).reshape(1, n))
    return out


# ----------------------------- NN building blocks -----------------------------

def conv2d(x, w, b=None, padding=0, relu=False, out_dtype=jnp.float32):
    """Stride-1 conv.  x: (N,H,W,Cin) NHWC;  w: (Cout,Cin,KH,KW) PyTorch OIHW."""
    n = x.shape[0]
    cin = x.shape[3]
    cout, cin2, kh, kw = w.shape
    assert cin == cin2
    xb = x.astype(jnp.bfloat16)
    if padding:
        xb = jnp.pad(xb, ((0, 0), (padding, padding), (padding, padding), (0, 0)))
    hp, wp = xb.shape[1], xb.shape[2]
    ho, wo = hp - kh + 1, wp - kw + 1
    if kh == 1 and kw == 1:
        patches = xb.reshape(n * ho * wo, cin)
    else:
        # TODO(synk): fold the (kh,kw) taps into the matmul K grid axis via a
        # manual-DMA gather instead of materializing the (bf16) im2col patches.
        cols = [xb[:, i:i + ho, j:j + wo, :] for i in range(kh) for j in range(kw)]
        patches = jnp.concatenate(cols, axis=-1).reshape(n * ho * wo, kh * kw * cin)
    w_mat = jnp.transpose(w, (2, 3, 1, 0)).reshape(kh * kw * cin, cout)
    bias = b if b is not None else jnp.zeros((cout,), jnp.float32)
    y = matmul_bias(patches, w_mat, bias, relu=relu, out_dtype=out_dtype)
    return y.reshape(n, ho, wo, cout)


def conv_transpose2d(x, w, stride):
    """ConvTranspose2d (no bias, padding=0, K == 2*stride) via sub-pixel matmul.

    x: (N,H,W,Cin) ; w: (Cin, Cout, K, K) (PyTorch layout).
    """
    n, h, wi, cin = x.shape
    cin2, cout, k, _ = w.shape
    assert cin == cin2
    s = stride
    assert k == 2 * s
    w_mat = jnp.transpose(w, (0, 2, 3, 1)).reshape(cin, k * k * cout)
    x2 = x.reshape(n * h * wi, cin)
    zero_bias = jnp.zeros((k * k * cout,), jnp.float32)
    cols = matmul_bias(x2, w_mat, zero_bias, relu=False, out_dtype=jnp.float32)
    cols = cols.reshape(n, h, wi, 2, s, 2, s, cout)
    # out[(iy+ay)*s + py, (ix+ax)*s + px] += cols[iy, ix, ay, py, ax, px]
    out5 = jnp.zeros((n, h + 1, wi + 1, s, s, cout), jnp.float32)
    out5 = out5.at[:, 0:h,     0:wi].add(cols[:, :, :, 0, :, 0, :, :])
    out5 = out5.at[:, 1:h + 1, 0:wi].add(cols[:, :, :, 1, :, 0, :, :])
    out5 = out5.at[:, 0:h,     1:wi + 1].add(cols[:, :, :, 0, :, 1, :, :])
    out5 = out5.at[:, 1:h + 1, 1:wi + 1].add(cols[:, :, :, 1, :, 1, :, :])
    out = out5.transpose(0, 1, 3, 2, 4, 5).reshape(
        n, (h + 1) * s, (wi + 1) * s, cout)
    return out   # size (H-1)*s + 2s == (H+1)*s, matching PyTorch


def bn_relu(y, gamma, beta, eps=1e-5):
    """Training-mode BatchNorm (batch statistics, f32) + ReLU; returns bf16."""
    n, h, w, c = y.shape
    m = n * h * w
    y2 = y.reshape(m, c)
    s1 = jnp.sum(y2, axis=0)
    s2 = jnp.sum(y2 * y2, axis=0)
    mean = s1 / m
    var = jnp.maximum(s2 / m - mean * mean, 0.0)    # biased var, as BatchNorm
    scale = gamma * jax.lax.rsqrt(var + eps)
    shift = beta - mean * scale

    # Lane-dense fold: pack r spatial positions per row so the last dim >= 128.
    r = 1
    if c < 128 and 128 % c == 0 and m % (128 // c) == 0:
        r = 128 // c
    y2 = y2.reshape(m // r, c * r)
    scale = jnp.tile(scale, r).reshape(1, c * r)
    shift = jnp.tile(shift, r).reshape(1, c * r)

    rows, cc = y2.shape
    te = min(TE_CAP, _round_up(rows, 16))
    out = pl.pallas_call(
        _affine_relu_kernel,
        out_shape=jax.ShapeDtypeStruct((rows, cc), jnp.bfloat16),
        grid=(pl.cdiv(rows, te),),
        in_specs=[pl.BlockSpec((te, cc), lambda i: (i, 0)),
                  pl.BlockSpec((1, cc), lambda i: (0, 0)),
                  pl.BlockSpec((1, cc), lambda i: (0, 0))],
        out_specs=pl.BlockSpec((te, cc), lambda i: (i, 0)),
        compiler_params=pltpu.CompilerParams(dimension_semantics=("parallel",)),
    )(y2, scale, shift)
    return out.reshape(n, h, w, c)


def block_forward(x, p, padding):
    """Block = Conv3x3 -> BatchNorm2d (train-mode batch stats) -> ReLU."""
    y = conv2d(x, p["w"], p["b"], padding=padding, relu=False,
               out_dtype=jnp.float32)
    return bn_relu(y, p["gamma"], p["beta"])


def maxpool2x2(x):
    n, h, w, c = x.shape
    h2, w2 = h // 2, w // 2
    x = x[:, :2 * h2, :2 * w2, :]
    xr = x.reshape(n * h2, 2, w2, 2 * c)      # pure reshape, no transpose
    rows = n * h2
    tb = min(64, rows)
    out = pl.pallas_call(
        _pool_kernel,
        out_shape=jax.ShapeDtypeStruct((rows, w2, c), x.dtype),
        grid=(pl.cdiv(rows, tb),),
        in_specs=[pl.BlockSpec((tb, 2, w2, 2 * c), lambda i: (i, 0, 0, 0))],
        out_specs=pl.BlockSpec((tb, w2, c), lambda i: (i, 0, 0)),
        compiler_params=pltpu.CompilerParams(dimension_semantics=("parallel",)),
    )(xr)
    return out.reshape(n, h2, w2, c)


def add_nhwc(a, b):
    s = a.shape
    c = s[-1]
    a2 = a.reshape(-1, c)
    b2 = b.reshape(-1, c)
    out = pl.pallas_call(
        _add_kernel,
        out_shape=jax.ShapeDtypeStruct(a2.shape, a.dtype),
        in_specs=[pl.BlockSpec(a2.shape, lambda: (0, 0)),
                  pl.BlockSpec(a2.shape, lambda: (0, 0))],
        out_specs=pl.BlockSpec(a2.shape, lambda: (0, 0)),
    )(a2, b2)
    return out.reshape(s)


# ----------------------------- parameters -----------------------------

def init_params(key, n_class=21):
    keys = iter(jax.random.split(key, 64))

    def conv_w(cout, cin, k):
        fan_in = cin * k * k
        return (jax.random.normal(next(keys), (cout, cin, k, k), jnp.float32)
                / math.sqrt(fan_in))

    def block(cin, cout):
        return {
            "w": conv_w(cout, cin, 3),
            "b": 0.01 * jax.random.normal(next(keys), (cout,), jnp.float32),
            "gamma": 1.0 + 0.1 * jax.random.normal(next(keys), (cout,), jnp.float32),
            "beta": 0.1 * jax.random.normal(next(keys), (cout,), jnp.float32),
        }

    return {
        "layer1": [block(3, 64), block(64, 64)],
        "layer2": [block(64, 128), block(128, 128)],
        # padding_list default [1,1] truncates layer_list -> only 2 blocks each:
        "layer3": [block(128, 256), block(256, 256)],
        "layer4": [block(256, 512), block(512, 512)],
        "layer5": [block(512, 512), block(512, 512)],
        "conv6_w": conv_w(4096, 512, 7),
        "conv7_w": conv_w(4096, 4096, 1),
        "pred_ds32_w": conv_w(n_class, 4096, 1),
        "pred_ds16_w": conv_w(n_class, 512, 1),
        "pred_ds8_w": conv_w(n_class, 256, 1),
        # ConvTranspose2d weights have layout (in_ch, out_ch, k, k)
        "up2_w": jax.random.normal(next(keys), (n_class, n_class, 4, 4),
                                   jnp.float32) / math.sqrt(n_class * 16),
        "up8_w": jax.random.normal(next(keys), (n_class, n_class, 16, 16),
                                   jnp.float32) / math.sqrt(n_class * 256),
    }


# ----------------------------- full forward -----------------------------

def vgg16bn_fcn8s(params, x_nchw):
    x = jnp.transpose(x_nchw, (0, 2, 3, 1)).astype(jnp.float32)  # NCHW -> NHWC

    h = x
    for p, pad in zip(params["layer1"], (100, 1)):
        h = block_forward(h, p, pad)
    f1 = maxpool2x2(h)

    h = f1
    for p in params["layer2"]:
        h = block_forward(h, p, 1)
    f2 = maxpool2x2(h)

    h = f2
    for p in params["layer3"]:
        h = block_forward(h, p, 1)
    f3 = maxpool2x2(h)

    h = f3
    for p in params["layer4"]:
        h = block_forward(h, p, 1)
    f4 = maxpool2x2(h)

    h = f4
    for p in params["layer5"]:
        h = block_forward(h, p, 1)
    f5 = maxpool2x2(h)

    # FCN head: ReLU fused into the matmul epilogue for conv6/conv7.
    h = conv2d(f5, params["conv6_w"], None, 0, relu=True, out_dtype=jnp.bfloat16)
    h = conv2d(h, params["conv7_w"], None, 0, relu=True, out_dtype=jnp.bfloat16)
    h = conv2d(h, params["pred_ds32_w"], None, 0, out_dtype=jnp.float32)
    scale_ds32 = conv_transpose2d(h, params["up2_w"], 2)

    h = conv2d(f4, params["pred_ds16_w"], None, 0, out_dtype=jnp.float32)
    h32, w32 = scale_ds32.shape[1], scale_ds32.shape[2]
    pred_ds16 = h[:, 5:5 + h32, 5:5 + w32, :]
    h = add_nhwc(pred_ds16, scale_ds32)
    scale_ds16 = conv_transpose2d(h, params["up2_w"], 2)

    h = conv2d(f3, params["pred_ds8_w"], None, 0, out_dtype=jnp.float32)
    h16, w16 = scale_ds16.shape[1], scale_ds16.shape[2]
    pred_ds8 = h[:, 9:9 + h16, 9:9 + w16, :]
    h = add_nhwc(pred_ds8, scale_ds16)
    h = conv_transpose2d(h, params["up8_w"], 8)
    h = h[:, 28:28 + h16, 28:28 + w16, :]

    return jnp.transpose(h, (0, 3, 1, 2))  # back to NCHW


if __name__ == "__main__":
    key = jax.random.PRNGKey(0)
    pkey, xkey = jax.random.split(key)
    n_class = 21
    params = init_params(pkey, n_class)

    # Small input (PyTorch NCHW): batch=1, 3 channels, 32x32 spatial.
    x = jax.random.normal(xkey, (1, 3, 32, 32), jnp.float32)

    out = vgg16bn_fcn8s(params, x)
    out = jax.block_until_ready(out)

    # 32x32 input -> (after pad-100 VGG stem, FCN8s fusion & crops) 10x10 output
    assert out.shape == (1, n_class, 10, 10), out.shape
    assert bool(jnp.all(jnp.isfinite(out)))
    print("KERNEL_OK")
</pallas_src>

<mosaic_0001>
module attributes {stable_mosaic.version = 11 : i64} {
  func.func @_matmul_kernel(%arg0: i32, %arg1: i32, %arg2: i32, %arg3: memref<4096x27xbf16, #tpu.memory_space<vmem>>, %arg4: memref<27x64xbf16, #tpu.memory_space<vmem>>, %arg5: memref<1x64xf32, #tpu.memory_space<vmem>>, %arg6: memref<4096x64xf32, #tpu.memory_space<vmem>>, %arg7: memref<4096x64xf32, #tpu.memory_space<vmem>>) attributes {dimension_semantics = [#tpu.dimension_semantics<parallel>, #tpu.dimension_semantics<parallel>, #tpu.dimension_semantics<arbitrary>], iteration_bounds = array<i64: 13, 1, 1>, scalar_prefetch = 0 : i64, scratch_operands = 1 : i64, tpu.core_type = #tpu.core_type<tc>, window_params = [{transform_indices = @transform_0, window_bounds = array<i64: 4096, 27>}, {transform_indices = @transform_1, window_bounds = array<i64: 27, 64>}, {transform_indices = @transform_2, window_bounds = array<i64: 1, 64>}, {transform_indices = @transform_3, window_bounds = array<i64: 4096, 64>}]} {
    %c0_i32 = arith.constant 0 : i32
    %0 = arith.cmpi eq, %arg2, %c0_i32 : i32
    %1 = arith.extui %0 : i1 to i32
    %c0_i32_0 = arith.constant 0 : i32
    %2 = arith.cmpi ne, %1, %c0_i32_0 : i32
    scf.if %2 {
      %cst_10 = arith.constant 0.000000e+00 : f32
      %12 = vector.broadcast %cst_10 : f32 to vector<4096x64xf32>
      %c0_11 = arith.constant 0 : index
      %c0_12 = arith.constant 0 : index
      %13 = vector.load %arg7[%c0_11, %c0_12] : memref<4096x64xf32, #tpu.memory_space<vmem>>, vector<4096x64xf32>
      tpu.vector_store %arg7[%c0_11, %c0_12], %12 {strides = array<i32>} : memref<4096x64xf32, #tpu.memory_space<vmem>>, vector<4096x64xf32>,
    } else {
    }
    %c0 = arith.constant 0 : index
    %c0_1 = arith.constant 0 : index
    %3 = vector.load %arg7[%c0, %c0_1] : memref<4096x64xf32, #tpu.memory_space<vmem>>, vector<4096x64xf32>
    %c0_2 = arith.constant 0 : index
    %c0_3 = arith.constant 0 : index
    %4 = vector.load %arg3[%c0_2, %c0_3] : memref<4096x27xbf16, #tpu.memory_space<vmem>>, vector<4096x27xbf16>
    %c0_4 = arith.constant 0 : index
    %c0_5 = arith.constant 0 : index
    %5 = vector.load %arg4[%c0_4, %c0_5] : memref<27x64xbf16, #tpu.memory_space<vmem>>, vector<27x64xbf16>
    %cst = arith.constant dense<0.000000e+00> : vector<4096x64xf32>
    %6 = tpu.matmul %4, %5, %cst {dimension_numbers = #tpu.dot_dimension_numbers<[1], [0], [0], [1], [0, 0, 1, 1], [], []>} : vector<4096x27xbf16>, vector<27x64xbf16>, vector<4096x64xf32> -> vector<4096x64xf32>
    %7 = arith.addf %3, %6 : vector<4096x64xf32>
    %c0_6 = arith.constant 0 : index
    %c0_7 = arith.constant 0 : index
    %8 = vector.load %arg7[%c0_6, %c0_7] : memref<4096x64xf32, #tpu.memory_space<vmem>>, vector<4096x64xf32>
    tpu.vector_store %arg7[%c0_6, %c0_7], %7 {strides = array<i32>} : memref<4096x64xf32, #tpu.memory_space<vmem>>, vector<4096x64xf32>,
    %c0_i32_8 = arith.constant 0 : i32
    %9 = arith.cmpi eq, %arg2, %c0_i32_8 : i32
    %10 = arith.extui %9 : i1 to i32
    %c0_i32_9 = arith.constant 0 : i32
    %11 = arith.cmpi ne, %10, %c0_i32_9 : i32
    scf.if %11 {
      %c0_10 = arith.constant 0 : index
      %c0_11 = arith.constant 0 : index
      %12 = vector.load %arg7[%c0_10, %c0_11] : memref<4096x64xf32, #tpu.memory_space<vmem>>, vector<4096x64xf32>
      %c0_12 = arith.constant 0 : index
      %c0_13 = arith.constant 0 : index
      %13 = vector.load %arg5[%c0_12, %c0_13] : memref<1x64xf32, #tpu.memory_space<vmem>>, vector<1x64xf32>
      %14 = vector.broadcast %13 : vector<1x64xf32> to vector<4096x64xf32>
      %15 = arith.addf %12, %14 : vector<4096x64xf32>
      %c0_14 = arith.constant 0 : index
      %c0_15 = arith.constant 0 : index
      %16 = vector.load %arg6[%c0_14, %c0_15] : memref<4096x64xf32, #tpu.memory_space<vmem>>, vector<4096x64xf32>
      tpu.vector_store %arg6[%c0_14, %c0_15], %15 {strides = array<i32>} : memref<4096x64xf32, #tpu.memory_space<vmem>>, vector<4096x64xf32>,
    } else {
    }
    return
  }
  func.func @transform_0(%arg0: i32, %arg1: i32, %arg2: i32) -> (i32, i32) {
    %c0_i32 = arith.constant 0 : i32
    return %arg0, %arg2 : i32, i32
  }
  func.func @transform_1(%arg0: i32, %arg1: i32, %arg2: i32) -> (i32, i32) {
    %c0_i32 = arith.constant 0 : i32
    return %arg2, %arg1 : i32, i32
  }
  func.func @transform_2(%arg0: i32, %arg1: i32, %arg2: i32) -> (i32, i32) {
    %c0_i32 = arith.constant 0 : i32
    %c0_i32_0 = arith.constant 0 : i32
    return %c0_i32, %arg1 : i32, i32
  }
  func.func @transform_3(%arg0: i32, %arg1: i32, %arg2: i32) -> (i32, i32) {
    %c0_i32 = arith.constant 0 : i32
    return %arg0, %arg1 : i32, i32
  }
}

</mosaic_0001>

<bundles_post_ra>
// kernel: tpu_custom_call.1
= control target key start
LH: loop header
LB: loop body
LE: loop exit
PB: predicated region body
PF: predicated region fallthrough
CT: control target
= control target key end

     0   :  { %s9951_s12 = smov 0   ;;  %s9953_s13 = smov 0   ;;  %s15223_s0 = inlined_call_operand.vmem [shape: bf16[52900,27], index: 0, kind: input, shape index: {}]   ;;  %s15224_s1 = inlined_call_operand.vmem [shape: bf16[27,64], index: 1, kind: input, shape index: {}]   ;;  %s15225_s2 = inlined_call_operand.vmem [shape: f32[1,64], index: 2, kind: input, shape index: {}]   ;;  %s15226_s3 = inlined_call_operand.vmem [shape: f32[52900,64], index: 3, kind: output, shape index: {}]  }
   0x1   :  { %s9955_s14 = smov 0   ;;  %s9957_s15 = smov 0  }
   0x2   :  { %s9959_s16 = smov 0  }
   0x3 LB: > { %s8128_s17 = sadd.s32 4294967295, %s9895_s16   ;;  %s32_s18 = sadd.s32 1, %s9891_s15  ;;  %s9895_s16 = sphi %s9959_s16, %s13_s16   ;;  %s9891_s15 = sphi %s9957_s15, %s15236_s15   ;;  %s9887_s14 = sphi %s9955_s14, %s15235_s14   ;;  %s9883_s13 = sphi %s9953_s13, %s15234_s13   ;;  %s9879_s12 = sphi %s9951_s12, %s15233_s12  }
   0x4   : > { %p34_p0 = scmp.ge.s32.totalorder %s32_s18, 13  ;;  %s123_s19 = sadd.s32 1, %s9883_s13 }
   0x5   : > { %p133_p1 = scmp.ne.s32.totalorder %s9883_s13, %s9879_s12  ;;  %p134_p2 = scmp.eq.s32.totalorder %s8128_s17, 12 }
   0x6   : > { %s15238_s18 = smov (%p34_p0, %s32_s18), 0  ;;  %p8134_p4 = scmp.ge.s32.totalorder %s9895_s16, 1 }
   0x7   : > { %p9983_p3 = por %p134_p2, %p133_p1  ;;  %s118_s21 = ssub.s32 %s9891_s15, %s15238_s18 }
   0x8   : > { %p196_p5 = scmp.lt.s32.totalorder %s9895_s16, 14  ;;  %p121_p6 = scmp.eq.s32.totalorder %s118_s21, 0 }
   0xa   : > { %p197_p7 = pnand %p8134_p4, %p196_p5 }
   0xb   : > { %s9992_s22 = scalar_select %p121_p6, %s9883_s13, %s123_s19  }
   0xc   : > { %200 = sbr.rel (%p197_p7) target bundleno = 1629 (0x65d), region = 32  ;;  %s10001_s27 = sshll.u32 (!%p197_p7), %s9887_s14, 9 }
   0xd   : > { %p242_p8 = scmp.lt.s32.totalorder (!%p197_p7), %s10001_s27, 6612  ;;  %s234_s8 = sand.u32 (!%p197_p7), 1, %s9879_s12  }
   0xe   : > { %s8135_s9 = sshll.u32 (!%p197_p7), %s234_s8, 12 }
   0xf   : > { %s10192_s12 = scalar_lea.vmem (!%p197_p7), [#allocation3], %s8135_s9  }
  0x11   : > { %v9168_v0 = vld [vmem:[%s15224_s1 + $0x8] sm:$0xf]  ;;  %v9700_v1 = vld [vmem:[%s15224_s1 + $0x8] sm:$0x30]  ;;  %vm3877_vm0 = vcmask 1044480   ;;  %vm3878_vm1 = vcmask 1045504  }
  0x12   : > { %v9169_v2 = vor.u32 %v9700_v1, %v9168_v0  ;;  %v9929_v3 = vmov 65535   ;;  %s243_s28 = scalar_select %p242_p8, %s10001_s27, 6612  ;;  %v9699_v7 = vld [vmem:[%s15224_s1] sm:$0xff]  ;;  %vm3108_vm2 = vcmask 220160   ;;  %vm276_vm3 = vcmask 523264  }
  0x13   : > { %v3879_v4 = vsel %vm3877_vm0, 4294967295, %v9929_v3  ;;  %v9930_v32 = vmov 0.0   ;;  %v9816_v44 = vld [vmem:[%s15225_s2] ss:$0 sm:$0xff]  ;;  %s7749_s10 = ssub.s32 (%p9983_p3), 6613, %s10001_s27  ;;  %s9701_s11 = sshll.u32 (%p9983_p3), %s9887_s14, 12 }
  0x14   : > { %v3880_v5 = vsel %vm3878_vm1, %v3879_v4, 0  ;;  %s8137_s4 = sshll.u32 %s243_s28, 2  ;;  %277 = vst.msk [vmem:[#allocation2] sm:$0xff] %vm276_vm3, %v9930_v32  ;;  %p7750_p9 = scmp.lt.s32.totalorder (%p9983_p3), %s7749_s10, 512 }
  0x15   : > { %v3882_v6 = vand.u32 %v9169_v2, %v3880_v5  ;;  %s10011_s7 = scalar_lea.vmem %s15223_s0, %s8137_s4  ;;  %278 = vst.msk [vmem:[#allocation2 + $0x8] sm:$0xff] %vm276_vm3, %v9930_v32  ;;  %s15083_s21 = scalar_lea.vmem (%p9983_p3), %s15226_s3, %s9701_s11  }
  0x16   : > { %v9443_v8 = vld [vmem:[%s10011_s7] sm:$0xff]  ;;  %v9444_v12 = vld [vmem:[%s10011_s7 + $0x8] sm:$0xff]  ;;  %v9445_v16 = vld [vmem:[%s10011_s7 + $0x10] sm:$0xff]  ;;  %279 = vst.msk [vmem:[#allocation2 + $0x10] sm:$0xff] %vm276_vm3, %v9930_v32 }
  0x17   : > { %3890 = vmatpush.bf16.msra.mxu0 %v3882_v6  ;;  %9704 = vmatpush.bf16.msra.mxu1 %v3882_v6  ;;  %v9507_v9 = vld [vmem:[%s10011_s7 + $0x200] sm:$0xff]  ;;  %v9508_v13 = vld [vmem:[%s10011_s7 + $0x208] sm:$0xff]  ;;  %v9509_v17 = vld [vmem:[%s10011_s7 + $0x210] sm:$0xff]  ;;  %280 = vst.msk [vmem:[#allocation2 + $0x18] sm:$0xff] %vm276_vm3, %v9930_v32 }
  0x18   : > { %9705 = vmatpush.bf16.msra.mxu2 %v3882_v6  ;;  %9706 = vmatpush.bf16.msra.mxu3 %v3882_v6  ;;  %v9571_v10 = vld [vmem:[%s10011_s7 + $0x400] sm:$0xff]  ;;  %v9572_v14 = vld [vmem:[%s10011_s7 + $0x408] sm:$0xff]  ;;  %v9573_v18 = vld [vmem:[%s10011_s7 + $0x410] sm:$0xff]  ;;  %281 = vst.msk [vmem:[#allocation2 + $0x20] sm:$0xff] %vm276_vm3, %v9930_v32 }
  0x19   : > { %v9635_v11 = vld [vmem:[%s10011_s7 + $0x600] sm:$0xff]  ;;  %v9636_v15 = vld [vmem:[%s10011_s7 + $0x608] sm:$0xff]  ;;  %v9637_v19 = vld [vmem:[%s10011_s7 + $0x610] sm:$0xff]  ;;  %282 = vst.msk [vmem:[#allocation2 + $0x28] sm:$0xff] %vm276_vm3, %v9930_v32 }
  0x1a   : > { %v9446_v20 = vld [vmem:[%s10011_s7 + $0x18] sm:$0xff]  ;;  %v9447_v24 = vld [vmem:[%s10011_s7 + $0x20] sm:$0xff]  ;;  %v9448_v28 = vld [vmem:[%s10011_s7 + $0x28] sm:$0xff]  ;;  %283 = vst.msk [vmem:[#allocation2 + $0x30] sm:$0xff] %vm276_vm3, %v9930_v32 }
  0x1b   : > { %3891 = vmatpush.bf16.msra.mxu0 %v9699_v7  ;;  %9707 = vmatpush.bf16.msra.mxu1 %v9699_v7  ;;  %v9510_v21 = vld [vmem:[%s10011_s7 + $0x218] sm:$0xff]  ;;  %v9511_v25 = vld [vmem:[%s10011_s7 + $0x220] sm:$0xff]  ;;  %v9512_v29 = vld [vmem:[%s10011_s7 + $0x228] sm:$0xff]  ;;  %284 = vst.msk [vmem:[#allocation2 + $0x38] sm:$0xff] %vm276_vm3, %v9930_v32 }
  0x1c   : > { %9708 = vmatpush.bf16.msra.mxu2 %v9699_v7  ;;  %9709 = vmatpush.bf16.msra.mxu3 %v9699_v7  ;;  %v9574_v22 = vld [vmem:[%s10011_s7 + $0x418] sm:$0xff]  ;;  %v9575_v26 = vld [vmem:[%s10011_s7 + $0x420] sm:$0xff]  ;;  %v9576_v30 = vld [vmem:[%s10011_s7 + $0x428] sm:$0xff]  ;;  %285 = vst.msk [vmem:[#allocation2 + $0x40] sm:$0xff] %vm276_vm3, %v9930_v32 }
  0x1d   : > { %v9638_v23 = vld [vmem:[%s10011_s7 + $0x618] sm:$0xff]  ;;  %v9639_v27 = vld [vmem:[%s10011_s7 + $0x620] sm:$0xff]  ;;  %v9640_v31 = vld [vmem:[%s10011_s7 + $0x628] sm:$0xff]  ;;  %286 = vst.msk [vmem:[#allocation2 + $0x48] sm:$0xff] %vm276_vm3, %v9930_v32 }
  0x1e   : > { %9170 = vmatmul.msk.bf16.vlgmr.msra.gmra.mxu0 %vm3108_vm2, %v9443_v8  ;;  %9234 = vmatmul.msk.bf16.vlgmr.msra.gmra.mxu1 %vm3108_vm2, %v9507_v9  ;;  %v9449_v33 = vld [vmem:[%s10011_s7 + $0x30] sm:$0xff]  ;;  %287 = vst.msk [vmem:[#allocation2 + $0x50] sm:$0xff] %vm276_vm3, %v9930_v32  ;;  %v9450_v37 = vld [vmem:[%s10011_s7 + $0x38] sm:$0xff]  ;;  %v789_v41 = vld [vmem:[#allocation2] sm:$0xff] }
  0x1f   : > { %9298 = vmatmul.msk.bf16.vlgmr.msra.gmra.mxu2 %vm3108_vm2, %v9571_v10  ;;  %9362 = vmatmul.msk.bf16.vlgmr.msra.gmra.mxu3 %vm3108_vm2, %v9635_v11  ;;  %v9513_v34 = vld [vmem:[%s10011_s7 + $0x230] sm:$0xff]  ;;  %288 = vst.msk [vmem:[#allocation2 + $0x58] sm:$0xff] %vm276_vm3, %v9930_v32  ;;  %v9514_v38 = vld [vmem:[%s10011_s7 + $0x238] sm:$0xff]  ;;  %v9451_v48 = vld [vmem:[%s10011_s7 + $0x40] sm:$0xff] }
  0x20   : > { %v9577_v35 = vld [vmem:[%s10011_s7 + $0x430] sm:$0xff]  ;;  %289 = vst.msk [vmem:[#allocation2 + $0x60] sm:$0xff] %vm276_vm3, %v9930_v32  ;;  %v9578_v39 = vld [vmem:[%s10011_s7 + $0x438] sm:$0xff]  ;;  %v9515_v49 = vld [vmem:[%s10011_s7 + $0x240] sm:$0xff] }
  0x21   : > { %v9641_v36 = vld [vmem:[%s10011_s7 + $0x630] sm:$0xff]  ;;  %290 = vst.msk [vmem:[#allocation2 + $0x68] sm:$0xff] %vm276_vm3, %v9930_v32  ;;  %v9642_v40 = vld [vmem:[%s10011_s7 + $0x638] sm:$0xff]  ;;  %v9579_v50 = vld [vmem:[%s10011_s7 + $0x440] sm:$0xff] }
  0x22   : > { %291 = vst.msk [vmem:[#allocation2 + $0x70] sm:$0xff] %vm276_vm3, %v9930_v32  ;;  %v9643_v51 = vld [vmem:[%s10011_s7 + $0x640] sm:$0xff]  ;;  %v9452_v60 = vld [vmem:[%s10011_s7 + $0x48] sm:$0xff] }
  0x23   : > { %292 = vst.msk [vmem:[#allocation2 + $0x78] sm:$0xff] %vm276_vm3, %v9930_v32  ;;  %v9516_v61 = vld [vmem:[%s10011_s7 + $0x248] sm:$0xff] }
  0x24   : > { %293 = vst.msk [vmem:[#allocation2 + $0x80] sm:$0xff] %vm276_vm3, %v9930_v32  ;;  %v9580_v62 = vld [vmem:[%s10011_s7 + $0x448] sm:$0xff] }
  0x25   : > { %294 = vst.msk [vmem:[#allocation2 + $0x88] sm:$0xff] %vm276_vm3, %v9930_v32  ;;  %v9644_v63 = vld [vmem:[%s10011_s7 + $0x648] sm:$0xff] }
  0x26   : > { %295 = vst.msk [vmem:[#allocation2 + $0x90] sm:$0xff] %vm276_vm3, %v9930_v32  ;;  %v790_v9 = vld [vmem:[#allocation2 + $0x8] sm:$0xff] }
  0x27   : > { %296 = vst.msk [vmem:[#allocation2 + $0x98] sm:$0xff] %vm276_vm3, %v9930_v32 }
  0x28   : > { %297 = vst.msk [vmem:[#allocation2 + $0xa0] sm:$0xff] %vm276_vm3, %v9930_v32 }
  0x29   : > { %298 = vst.msk [vmem:[#allocation2 + $0xa8] sm:$0xff] %vm276_vm3, %v9930_v32 }
  0x2a   : > { %299 = vst.msk [vmem:[#allocation2 + $0xb0] sm:$0xff] %vm276_vm3, %v9930_v32 }
  0x2b   : > { %300 = vst.msk [vmem:[#allocation2 + $0xb8] sm:$0xff] %vm276_vm3, %v9930_v32 }
  0x2c   : > { %301 = vst.msk [vmem:[#allocation2 + $0xc0] sm:$0xff] %vm276_vm3, %v9930_v32 }
  0x2d   : > { %302 = vst.msk [vmem:[#allocation2 + $0xc8] sm:$0xff] %vm276_vm3, %v9930_v32 }
  0x2e   : > { %9171 = vmatmul.msk.bf16.gmra.mxu0 %vm3108_vm2, %v9444_v12  ;;  %9235 = vmatmul.msk.bf16.gmra.mxu1 %vm3108_vm2, %v9508_v13  ;;  %303 = vst.msk [vmem:[#allocation2 + $0xd0] sm:$0xff] %vm276_vm3, %v9930_v32  ;;  %v9453_v13 = vld [vmem:[%s10011_s7 + $0x50] sm:$0xff] }
  0x2f   : > { %9299 = vmatmul.msk.bf16.gmra.mxu2 %vm3108_vm2, %v9572_v14  ;;  %9363 = vmatmul.msk.bf16.gmra.mxu3 %vm3108_vm2, %v9636_v15  ;;  %304 = vst.msk [vmem:[#allocation2 + $0xd8] sm:$0xff] %vm276_vm3, %v9930_v32  ;;  %v9517_v14 = vld [vmem:[%s10011_s7 + $0x250] sm:$0xff] }
  0x30   : > { %305 = vst.msk [vmem:[#allocation2 + $0xe0] sm:$0xff] %vm276_vm3, %v9930_v32  ;;  %v9581_v15 = vld [vmem:[%s10011_s7 + $0x450] sm:$0xff] }
  0x31   : > { %306 = vst.msk [vmem:[#allocation2 + $0xe8] sm:$0xff] %vm276_vm3, %v9930_v32 }
  0x32   : > { %307 = vst.msk [vmem:[#allocation2 + $0xf0] sm:$0xff] %vm276_vm3, %v9930_v32 }
  0x33   : > { %308 = vst.msk [vmem:[#allocation2 + $0xf8] sm:$0xff] %vm276_vm3, %v9930_v32 }
  0x34   : > { %309 = vst.msk [vmem:[#allocation2 + $0x100] sm:$0xff] %vm276_vm3, %v9930_v32 }
  0x35   : > { %310 = vst.msk [vmem:[#allocation2 + $0x108] sm:$0xff] %vm276_vm3, %v9930_v32 }
  0x36   : > { %311 = vst.msk [vmem:[#allocation2 + $0x110] sm:$0xff] %vm276_vm3, %v9930_v32 }
  0x37   : > { %312 = vst.msk [vmem:[#allocation2 + $0x118] sm:$0xff] %vm276_vm3, %v9930_v32 }
  0x38   : > { %313 = vst.msk [vmem:[#allocation2 + $0x120] sm:$0xff] %vm276_vm3, %v9930_v32 }
  0x39   : > { %314 = vst.msk [vmem:[#allocation2 + $0x128] sm:$0xff] %vm276_vm3, %v9930_v32 }
  0x3a   : > { %315 = vst.msk [vmem:[#allocation2 + $0x130] sm:$0xff] %vm276_vm3, %v9930_v32 }
  0x3b   : > { %316 = vst.msk [vmem:[#allocation2 + $0x138] sm:$0xff] %vm276_vm3, %v9930_v32 }
  0x3c   : > { %317 = vst.msk [vmem:[#allocation2 + $0x140] sm:$0xff] %vm276_vm3, %v9930_v32 }
  0x3d   : > { %318 = vst.msk [vmem:[#allocation2 + $0x148] sm:$0xff] %vm276_vm3, %v9930_v32 }
  0x3e   : > { %9172 = vmatmul.msk.bf16.gmra.mxu0 %vm3108_vm2, %v9445_v16  ;;  %9236 = vmatmul.msk.bf16.gmra.mxu1 %vm3108_vm2, %v9509_v17  ;;  %319 = vst.msk [vmem:[#allocation2 + $0x150] sm:$0xff] %vm276_vm3, %v9930_v32 }
  0x3f   : > { %9300 = vmatmul.msk.bf16.gmra.mxu2 %vm3108_vm2, %v9573_v18  ;;  %9364 = vmatmul.msk.bf16.gmra.mxu3 %vm3108_vm2, %v9637_v19  ;;  %320 = vst.msk [vmem:[#allocation2 + $0x158] sm:$0xff] %vm276_vm3, %v9930_v32  ;;  %v9645_v18 = vld [vmem:[%s10011_s7 + $0x650] sm:$0xff] }
  0x40   : > { %321 = vst.msk [vmem:[#allocation2 + $0x160] sm:$0xff] %vm276_vm3, %v9930_v32 }
  0x41   : > { %322 = vst.msk [vmem:[#allocation2 + $0x168] sm:$0xff] %vm276_vm3, %v9930_v32 }
  0x42   : > { %323 = vst.msk [vmem:[#allocation2 + $0x170] sm:$0xff] %vm276_vm3, %v9930_v32 }
  0x43   : > { %324 = vst.msk [vmem:[#allocation2 + $0x178] sm:$0xff] %vm276_vm3, %v9930_v32 }
  0x44   : > { %325 = vst.msk [vmem:[#allocation2 + $0x180] sm:$0xff] %vm276_vm3, %v9930_v32 }
  0x45   : > { %326 = vst.msk [vmem:[#allocation2 + $0x188] sm:$0xff] %vm276_vm3, %v9930_v32 }
  0x46   : > { %327 = vst.msk [vmem:[#allocation2 + $0x190] sm:$0xff] %vm276_vm3, %v9930_v32 }
  0x47   : > { %328 = vst.msk [vmem:[#allocation2 + $0x198] sm:$0xff] %vm276_vm3, %v9930_v32 }
  0x48   : > { %329 = vst.msk [vmem:[#allocation2 + $0x1a0] sm:$0xff] %vm276_vm3, %v9930_v32 }
  0x49   : > { %330 = vst.msk [vmem:[#allocation2 + $0x1a8] sm:$0xff] %vm276_vm3, %v9930_v32 }
  0x4a   : > { %331 = vst.msk [vmem:[#allocation2 + $0x1b0] sm:$0xff] %vm276_vm3, %v9930_v32 }
  0x4b   : > { %332 = vst.msk [vmem:[#allocation2 + $0x1b8] sm:$0xff] %vm276_vm3, %v9930_v32 }
  0x4c   : > { %333 = vst.msk [vmem:[#allocation2 + $0x1c0] sm:$0xff] %vm276_vm3, %v9930_v32 }
  0x4d   : > { %334 = vst.msk [vmem:[#allocation2 + $0x1c8] sm:$0xff] %vm276_vm3, %v9930_v32 }
  0x4e   : > { %9173 = vmatmul.msk.bf16.gmra.mxu0 %vm3108_vm2, %v9446_v20  ;;  %9237 = vmatmul.msk.bf16.gmra.mxu1 %vm3108_vm2, %v9510_v21  ;;  %335 = vst.msk [vmem:[#allocation2 + $0x1d0] sm:$0xff] %vm276_vm3, %v9930_v32 }
  0x4f   : > { %9301 = vmatmul.msk.bf16.gmra.mxu2 %vm3108_vm2, %v9574_v22  ;;  %9365 = vmatmul.msk.bf16.gmra.mxu3 %vm3108_vm2, %v9638_v23  ;;  %336 = vst.msk [vmem:[#allocation2 + $0x1d8] sm:$0xff] %vm276_vm3, %v9930_v32 }
  0x50   : > { %337 = vst.msk [vmem:[#allocation2 + $0x1e0] sm:$0xff] %vm276_vm3, %v9930_v32 }
  0x51   : > { %338 = vst.msk [vmem:[#allocation2 + $0x1e8] sm:$0xff] %vm276_vm3, %v9930_v32 }
  0x52   : > { %339 = vst.msk [vmem:[#allocation2 + $0x1f0] sm:$0xff] %vm276_vm3, %v9930_v32 }
  0x53   : > { %340 = vst.msk [vmem:[#allocation2 + $0x1f8] sm:$0xff] %vm276_vm3, %v9930_v32 }
  0x54   : > { %341 = vst.msk [vmem:[#allocation2 + $0x200] sm:$0xff] %vm276_vm3, %v9930_v32 }
  0x55   : > { %342 = vst.msk [vmem:[#allocation2 + $0x208] sm:$0xff] %vm276_vm3, %v9930_v32 }
  0x56   : > { %343 = vst.msk [vmem:[#allocation2 + $0x210] sm:$0xff] %vm276_vm3, %v9930_v32 }
  0x57   : > { %344 = vst.msk [vmem:[#allocation2 + $0x218] sm:$0xff] %vm276_vm3, %v9930_v32 }
  0x58   : > { %345 = vst.msk [vmem:[#allocation2 + $0x220] sm:$0xff] %vm276_vm3, %v9930_v32 }
  0x59   : > { %346 = vst.msk [vmem:[#allocation2 + $0x228] sm:$0xff] %vm276_vm3, %v9930_v32 }
  0x5a   : > { %347 = vst.msk [vmem:[#allocation2 + $0x230] sm:$0xff] %vm276_vm3, %v9930_v32 }
  0x5b   : > { %348 = vst.msk [vmem:[#allocation2 + $0x238] sm:$0xff] %vm276_vm3, %v9930_v32 }
  0x5c   : > { %349 = vst.msk [vmem:[#allocation2 + $0x240] sm:$0xff] %vm276_vm3, %v9930_v32 }
  0x5d   : > { %350 = vst.msk [vmem:[#allocation2 + $0x248] sm:$0xff] %vm276_vm3, %v9930_v32 }
  0x5e   : > { %9174 = vmatmul.msk.bf16.gmra.mxu0 %vm3108_vm2, %v9447_v24  ;;  %9238 = vmatmul.msk.bf16.gmra.mxu1 %vm3108_vm2, %v9511_v25  ;;  %351 = vst.msk [vmem:[#allocation2 + $0x250] sm:$0xff] %vm276_vm3, %v9930_v32  ;;  %v791_v24 = vld [vmem:[#allocation2 + $0x10] sm:$0xff] }
  0x5f   : > { %9302 = vmatmul.msk.bf16.gmra.mxu2 %vm3108_vm2, %v9575_v26  ;;  %9366 = vmatmul.msk.bf16.gmra.mxu3 %vm3108_vm2, %v9639_v27  ;;  %352 = vst.msk [vmem:[#allocation2 + $0x258] sm:$0xff] %vm276_vm3, %v9930_v32 }
  0x60   : > { %353 = vst.msk [vmem:[#allocation2 + $0x260] sm:$0xff] %vm276_vm3, %v9930_v32 }
  0x61   : > { %354 = vst.msk [vmem:[#allocation2 + $0x268] sm:$0xff] %vm276_vm3, %v9930_v32 }
  0x62   : > { %355 = vst.msk [vmem:[#allocation2 + $0x270] sm:$0xff] %vm276_vm3, %v9930_v32 }
  0x63   : > { %356 = vst.msk [vmem:[#allocation2 + $0x278] sm:$0xff] %vm276_vm3, %v9930_v32 }
  0x64   : > { %357 = vst.msk [vmem:[#allocation2 + $0x280] sm:$0xff] %vm276_vm3, %v9930_v32 }
  0x65   : > { %358 = vst.msk [vmem:[#allocation2 + $0x288] sm:$0xff] %vm276_vm3, %v9930_v32 }
  0x66   : > { %359 = vst.msk [vmem:[#allocation2 + $0x290] sm:$0xff] %vm276_vm3, %v9930_v32 }
  0x67   : > { %360 = vst.msk [vmem:[#allocation2 + $0x298] sm:$0xff] %vm276_vm3, %v9930_v32 }
  0x68   : > { %361 = vst.msk [vmem:[#allocation2 + $0x2a0] sm:$0xff] %vm276_vm3, %v9930_v32 }
  0x69   : > { %362 = vst.msk [vmem:[#allocation2 + $0x2a8] sm:$0xff] %vm276_vm3, %v9930_v32 }
  0x6a   : > { %363 = vst.msk [vmem:[#allocation2 + $0x2b0] sm:$0xff] %vm276_vm3, %v9930_v32 }
  0x6b   : > { %364 = vst.msk [vmem:[#allocation2 + $0x2b8] sm:$0xff] %vm276_vm3, %v9930_v32 }
  0x6c   : > { %365 = vst.msk [vmem:[#allocation2 + $0x2c0] sm:$0xff] %vm276_vm3, %v9930_v32 }
  0x6d   : > { %366 = vst.msk [vmem:[#allocation2 + $0x2c8] sm:$0xff] %vm276_vm3, %v9930_v32 }
  0x6e   : > { %9175 = vmatmul.msk.bf16.gmra.mxu0 %vm3108_vm2, %v9448_v28  ;;  %9239 = vmatmul.msk.bf16.gmra.mxu1 %vm3108_vm2, %v9512_v29  ;;  %367 = vst.msk [vmem:[#allocation2 + $0x2d0] sm:$0xff] %vm276_vm3, %v9930_v32 }
  0x6f   : > { %9303 = vmatmul.msk.bf16.gmra.mxu2 %vm3108_vm2, %v9576_v30  ;;  %9367 = vmatmul.msk.bf16.gmra.mxu3 %vm3108_vm2, %v9640_v31  ;;  %368 = vst.msk [vmem:[#allocation2 + $0x2d8] sm:$0xff] %vm276_vm3, %v9930_v32 }
  0x70   : > { %369 = vst.msk [vmem:[#allocation2 + $0x2e0] sm:$0xff] %vm276_vm3, %v9930_v32 }
  0x71   : > { %370 = vst.msk [vmem:[#allocation2 + $0x2e8] sm:$0xff] %vm276_vm3, %v9930_v32 }
  0x72   : > { %371 = vst.msk [vmem:[#allocation2 + $0x2f0] sm:$0xff] %vm276_vm3, %v9930_v32 }
  0x73   : > { %372 = vst.msk [vmem:[#allocation2 + $0x2f8] sm:$0xff] %vm276_vm3, %v9930_v32 }
  0x74   : > { %373 = vst.msk [vmem:[#allocation2 + $0x300] sm:$0xff] %vm276_vm3, %v9930_v32 }
  0x75   : > { %374 = vst.msk [vmem:[#allocation2 + $0x308] sm:$0xff] %vm276_vm3, %v9930_v32 }
  0x76   : > { %375 = vst.msk [vmem:[#allocation2 + $0x310] sm:$0xff] %vm276_vm3, %v9930_v32 }
  0x77   : > { %376 = vst.msk [vmem:[#allocation2 + $0x318] sm:$0xff] %vm276_vm3, %v9930_v32 }
  0x78   : > { %377 = vst.msk [vmem:[#allocation2 + $0x320] sm:$0xff] %vm276_vm3, %v9930_v32 }
  0x79   : > { %378 = vst.msk [vmem:[#allocation2 + $0x328] sm:$0xff] %vm276_vm3, %v9930_v32 }
  0x7a   : > { %379 = vst.msk [vmem:[#allocation2 + $0x330] sm:$0xff] %vm276_vm3, %v9930_v32 }
  0x7b   : > { %380 = vst.msk [vmem:[#allocation2 + $0x338] sm:$0xff] %vm276_vm3, %v9930_v32 }
  0x7c   : > { %381 = vst.msk [vmem:[#allocation2 + $0x340] sm:$0xff] %vm276_vm3, %v9930_v32 }
  0x7d   : > { %382 = vst.msk [vmem:[#allocation2 + $0x348] sm:$0xff] %vm276_vm3, %v9930_v32 }
  0x7e   : > { %9176 = vmatmul.msk.bf16.gmra.mxu0 %vm3108_vm2, %v9449_v33  ;;  %9240 = vmatmul.msk.bf16.gmra.mxu1 %vm3108_vm2, %v9513_v34  ;;  %383 = vst.msk [vmem:[#allocation2 + $0x350] sm:$0xff] %vm276_vm3, %v9930_v32 }
  0x7f   : > { %9304 = vmatmul.msk.bf16.gmra.mxu2 %vm3108_vm2, %v9577_v35  ;;  %9368 = vmatmul.msk.bf16.gmra.mxu3 %vm3108_vm2, %v9641_v36  ;;  %384 = vst.msk [vmem:[#allocation2 + $0x358] sm:$0xff] %vm276_vm3, %v9930_v32 }
  0x80   : > { %385 = vst.msk [vmem:[#allocation2 + $0x360] sm:$0xff] %vm276_vm3, %v9930_v32 }
  0x81   : > { %386 = vst.msk [vmem:[#allocation2 + $0x368] sm:$0xff] %vm276_vm3, %v9930_v32 }
  0x82   : > { %387 = vst.msk [vmem:[#allocation2 + $0x370] sm:$0xff] %vm276_vm3, %v9930_v32 }
  0x83   : > { %388 = vst.msk [vmem:[#allocation2 + $0x378] sm:$0xff] %vm276_vm3, %v9930_v32 }
  0x84   : > { %389 = vst.msk [vmem:[#allocation2 + $0x380] sm:$0xff] %vm276_vm3, %v9930_v32 }
  0x85   : > { %390 = vst.msk [vmem:[#allocation2 + $0x388] sm:$0xff] %vm276_vm3, %v9930_v32 }
  0x86   : > { %391 = vst.msk [vmem:[#allocation2 + $0x390] sm:$0xff] %vm276_vm3, %v9930_v32 }
  0x87   : > { %392 = vst.msk [vmem:[#allocation2 + $0x398] sm:$0xff] %vm276_vm3, %v9930_v32 }
  0x88   : > { %393 = vst.msk [vmem:[#allocation2 + $0x3a0] sm:$0xff] %vm276_vm3, %v9930_v32 }
  0x89   : > { %394 = vst.msk [vmem:[#allocation2 + $0x3a8] sm:$0xff] %vm276_vm3, %v9930_v32 }
  0x8a   : > { %395 = vst.msk [vmem:[#allocation2 + $0x3b0] sm:$0xff] %vm276_vm3, %v9930_v32 }
  0x8b   : > { %396 = vst.msk [vmem:[#allocation2 + $0x3b8] sm:$0xff] %vm276_vm3, %v9930_v32 }
  0x8c   : > { %397 = vst.msk [vmem:[#allocation2 + $0x3c0] sm:$0xff] %vm276_vm3, %v9930_v32 }
  0x8d   : > { %398 = vst.msk [vmem:[#allocation2 + $0x3c8] sm:$0xff] %vm276_vm3, %v9930_v32 }
  0x8e   : > { %9177 = vmatmul.msk.bf16.gmra.mxu0 %vm3108_vm2, %v9450_v37  ;;  %9241 = vmatmul.msk.bf16.gmra.mxu1 %vm3108_vm2, %v9514_v38  ;;  %399 = vst.msk [vmem:[#allocation2 + $0x3d0] sm:$0xff] %vm276_vm3, %v9930_v32  ;;  %v11194_v37 = vld [vmem:[%s15225_s2] ss:$0 sm:$0xff] }
  0x8f   : > { %9305 = vmatmul.msk.bf16.gmra.mxu2 %vm3108_vm2, %v9578_v39  ;;  %9369 = vmatmul.msk.bf16.gmra.mxu3 %vm3108_vm2, %v9642_v40  ;;  %400 = vst.msk [vmem:[#allocation2 + $0x3d8] sm:$0xff] %vm276_vm3, %v9930_v32 }
  0x90   : > { %401 = vst.msk [vmem:[#allocation2 + $0x3e0] sm:$0xff] %vm276_vm3, %v9930_v32 }
  0x91   : > { %402 = vst.msk [vmem:[#allocation2 + $0x3e8] sm:$0xff] %vm276_vm3, %v9930_v32 }
  0x92   : > { %403 = vst.msk [vmem:[#allocation2 + $0x3f0] sm:$0xff] %vm276_vm3, %v9930_v32 }
  0x93   : > { %404 = vst.msk [vmem:[#allocation2 + $0x3f8] sm:$0xff] %vm276_vm3, %v9930_v32 }
  0x94   : > { %405 = vst.msk [vmem:[#allocation2 + $0x400] sm:$0xff] %vm276_vm3, %v9930_v32 }
  0x95   : > { %406 = vst.msk [vmem:[#allocation2 + $0x408] sm:$0xff] %vm276_vm3, %v9930_v32 }
  0x96   : > { %407 = vst.msk [vmem:[#allocation2 + $0x410] sm:$0xff] %vm276_vm3, %v9930_v32 }
  0x97   : > { %408 = vst.msk [vmem:[#allocation2 + $0x418] sm:$0xff] %vm276_vm3, %v9930_v32 }
  0x98   : > { %409 = vst.msk [vmem:[#allocation2 + $0x420] sm:$0xff] %vm276_vm3, %v9930_v32 }
  0x99   : > { %410 = vst.msk [vmem:[#allocation2 + $0x428] sm:$0xff] %vm276_vm3, %v9930_v32 }
  0x9a   : > { %411 = vst.msk [vmem:[#allocation2 + $0x430] sm:$0xff] %vm276_vm3, %v9930_v32 }
  0x9b   : > { %v3893_v42 = vpop.f32.mrf.mxu0  ;;  %412 = vst.msk [vmem:[#allocation2 + $0x438] sm:$0xff] %vm276_vm3, %v9930_v32  ;;  %v11030_v47 = vpop.f32.mrf.mxu1  ;;  %v917_v4 = vld [vmem:[#allocation2 + $0x400] sm:$0xff] }
  0x9c   : > { %v5173_v43 = vadd.f32 %v3893_v42, %v789_v41  ;;  %413 = vst.msk [vmem:[#allocation2 + $0x440] sm:$0xff] %vm276_vm3, %v9930_v32  ;;  %v5301_v12 = vadd.f32 %v11030_v47, %v917_v4  ;;  %v918_v17 = vld [vmem:[#allocation2 + $0x408] sm:$0xff] }
  0x9d   : > { %414 = vst.msk [vmem:[#allocation2 + $0x448] sm:$0xff] %vm276_vm3, %v9930_v32  ;;  %v919_v26 = vld [vmem:[#allocation2 + $0x410] sm:$0xff] }
  0x9e   : > { %5686 = vst.msk [vmem:[#allocation2] sm:$0xff] %vm276_vm3, %v5173_v43  ;;  %9178 = vmatmul.msk.bf16.gmra.mxu0 %vm3108_vm2, %v9451_v48  ;;  %9242 = vmatmul.msk.bf16.gmra.mxu1 %vm3108_vm2, %v9515_v49 }
  0x9f   : > { %415 = vst.msk [vmem:[#allocation2 + $0x450] sm:$0xff] %vm276_vm3, %v9930_v32  ;;  %9306 = vmatmul.msk.bf16.gmra.mxu2 %vm3108_vm2, %v9579_v50  ;;  %9370 = vmatmul.msk.bf16.gmra.mxu3 %vm3108_vm2, %v9643_v51 }
  0xa0   : > { %416 = vst.msk [vmem:[#allocation2 + $0x458] sm:$0xff] %vm276_vm3, %v9930_v32 }
  0xa1   : > { %417 = vst.msk [vmem:[#allocation2 + $0x460] sm:$0xff] %vm276_vm3, %v9930_v32 }
  0xa2   : > { %418 = vst.msk [vmem:[#allocation2 + $0x468] sm:$0xff] %vm276_vm3, %v9930_v32  ;;  %v11052_v52 = vpop.f32.mrf.mxu2  ;;  %v11056_v53 = vpop.f32.mrf.mxu3 }
  0xa3   : > { %419 = vst.msk [vmem:[#allocation2 + $0x470] sm:$0xff] %vm276_vm3, %v9930_v32  ;;  %v11064_v54 = vpop.f32.mrf.mxu0  ;;  %v11066_v55 = vpop.f32.mrf.mxu1 }
  0xa4   : > { %420 = vst.msk [vmem:[#allocation2 + $0x478] sm:$0xff] %vm276_vm3, %v9930_v32  ;;  %v5174_v21 = vadd.f32 %v11064_v54, %v790_v9  ;;  %v5302_v23 = vadd.f32 %v11066_v55, %v918_v17  ;;  %v920_v54 = vld [vmem:[#allocation2 + $0x418] sm:$0xff]  ;;  %v921_v17 = vld [vmem:[#allocation2 + $0x420] sm:$0xff] }
  0xa5   : > { %v6201_v45 = vld [vmem:[#allocation2] sm:$0xff]  ;;  %421 = vst.msk [vmem:[#allocation2 + $0x480] sm:$0xff] %vm276_vm3, %v9930_v32 }
  0xa6   : > { %v6717_v46 = vadd.f32 %v9816_v44, %v6201_v45  ;;  %422 = vst.msk [vmem:[#allocation2 + $0x488] sm:$0xff] %vm276_vm3, %v9930_v32 }
  0xa7   : > { %423 = vst.msk [vmem:[#allocation2 + $0x490] sm:$0xff] %vm276_vm3, %v9930_v32 }
  0xa8   : > { %7229 = vst.msk [vmem:[%s10192_s12] sm:$0xff] %vm276_vm3, %v6717_v46 }
  0xa9   : > { %424 = vst.msk [vmem:[#allocation2 + $0x498] sm:$0xff] %vm276_vm3, %v9930_v32 }
  0xaa   : > { %425 = vst.msk [vmem:[#allocation2 + $0x4a0] sm:$0xff] %vm276_vm3, %v9930_v32  ;;  %v11080_v56 = vpop.f32.mrf.mxu2  ;;  %v11082_v57 = vpop.f32.mrf.mxu3 }
  0xab   : > { %426 = vst.msk [vmem:[#allocation2 + $0x4a8] sm:$0xff] %vm276_vm3, %v9930_v32  ;;  %v11088_v58 = vpop.f32.mrf.mxu0  ;;  %v11090_v59 = vpop.f32.mrf.mxu1 }
  0xac   : > { %427 = vst.msk [vmem:[#allocation2 + $0x4b0] sm:$0xff] %vm276_vm3, %v9930_v32  ;;  %v5175_v31 = vadd.f32 %v11088_v58, %v791_v24  ;;  %v5303_v34 = vadd.f32 %v11090_v59, %v919_v26  ;;  %v9454_v59 = vld [vmem:[%s10011_s7 + $0x58] sm:$0xff]  ;;  %v794_v24 = vld [vmem:[#allocation2 + $0x28] sm:$0xff] }
  0xad   : > { %428 = vst.msk [vmem:[#allocation2 + $0x4b8] sm:$0xff] %vm276_vm3, %v9930_v32 }
  0xae   : > { %429 = vst.msk [vmem:[#allocation2 + $0x4c0] sm:$0xff] %vm276_vm3, %v9930_v32  ;;  %9179 = vmatmul.msk.bf16.gmra.mxu0 %vm3108_vm2, %v9452_v60  ;;  %9243 = vmatmul.msk.bf16.gmra.mxu1 %vm3108_vm2, %v9516_v61  ;;  %v9518_v60 = vld [vmem:[%s10011_s7 + $0x258] sm:$0xff] }
  0xaf   : > { %430 = vst.msk [vmem:[#allocation2 + $0x4c8] sm:$0xff] %vm276_vm3, %v9930_v32  ;;  %9307 = vmatmul.msk.bf16.gmra.mxu2 %vm3108_vm2, %v9580_v62  ;;  %9371 = vmatmul.msk.bf16.gmra.mxu3 %vm3108_vm2, %v9644_v63  ;;  %v9582_v63 = vld [vmem:[%s10011_s7 + $0x458] sm:$0xff] }
  0xb0   : > { %431 = vst.msk [vmem:[#allocation2 + $0x4d0] sm:$0xff] %vm276_vm3, %v9930_v32 }
  0xb1   : > { %432 = vst.msk [vmem:[#allocation2 + $0x4d8] sm:$0xff] %vm276_vm3, %v9930_v32 }
  0xb2   : > { %433 = vst.msk [vmem:[#allocation2 + $0x4e0] sm:$0xff] %vm276_vm3, %v9930_v32  ;;  %v4538_v0 = vpop.f32.mrf.mxu2  ;;  %v11112_v1 = vpop.f32.mrf.mxu3 }
  0xb3   : > { %434 = vst.msk [vmem:[#allocation2 + $0x4e8] sm:$0xff] %vm276_vm3, %v9930_v32  ;;  %v11122_v2 = vpop.f32.mrf.mxu0  ;;  %v11124_v3 = vpop.f32.mrf.mxu1 }
  0xb4   : > { %435 = vst.msk [vmem:[#allocation2 + $0x4f0] sm:$0xff] %vm276_vm3, %v9930_v32 }
  0xb5   : > { %436 = vst.msk [vmem:[#allocation2 + $0x4f8] sm:$0xff] %vm276_vm3, %v9930_v32 }
  0xb6   : > { %437 = vst.msk [vmem:[#allocation2 + $0x500] sm:$0xff] %vm276_vm3, %v9930_v32 }
  0xb7   : > { %438 = vst.msk [vmem:[#allocation2 + $0x508] sm:$0xff] %vm276_vm3, %v9930_v32 }
  0xb8   : > { %439 = vst.msk [vmem:[#allocation2 + $0x510] sm:$0xff] %vm276_vm3, %v9930_v32 }
  0xb9   : > { %440 = vst.msk [vmem:[#allocation2 + $0x518] sm:$0xff] %vm276_vm3, %v9930_v32 }
  0xba   : > { %441 = vst.msk [vmem:[#allocation2 + $0x520] sm:$0xff] %vm276_vm3, %v9930_v32  ;;  %v11138_v5 = vpop.f32.mrf.mxu2  ;;  %v11140_v6 = vpop.f32.mrf.mxu3 }
  0xbb   : > { %442 = vst.msk [vmem:[#allocation2 + $0x528] sm:$0xff] %vm276_vm3, %v9930_v32  ;;  %v11146_v10 = vpop.f32.mrf.mxu0  ;;  %v11148_v11 = vpop.f32.mrf.mxu1 }
  0xbc   : > { %443 = vst.msk [vmem:[#allocation2 + $0x530] sm:$0xff] %vm276_vm3, %v9930_v32 }
  0xbd   : > { %444 = vst.msk [vmem:[#allocation2 + $0x538] sm:$0xff] %vm276_vm3, %v9930_v32 }
  0xbe   : > { %445 = vst.msk [vmem:[#allocation2 + $0x540] sm:$0xff] %vm276_vm3, %v9930_v32  ;;  %9180 = vmatmul.msk.bf16.gmra.mxu0 %vm3108_vm2, %v9453_v13  ;;  %9244 = vmatmul.msk.bf16.gmra.mxu1 %vm3108_vm2, %v9517_v14 }
  0xbf   : > { %446 = vst.msk [vmem:[#allocation2 + $0x548] sm:$0xff] %vm276_vm3, %v9930_v32  ;;  %9308 = vmatmul.msk.bf16.gmra.mxu2 %vm3108_vm2, %v9581_v15  ;;  %9372 = vmatmul.msk.bf16.gmra.mxu3 %vm3108_vm2, %v9645_v18  ;;  %v793_v15 = vld [vmem:[#allocation2 + $0x20] sm:$0xff] }
  0xc0   : > { %447 = vst.msk [vmem:[#allocation2 + $0x550] sm:$0xff] %vm276_vm3, %v9930_v32 }
  0xc1   : > { %448 = vst.msk [vmem:[#allocation2 + $0x558] sm:$0xff] %vm276_vm3, %v9930_v32 }
  0xc2   : > { %449 = vst.msk [vmem:[#allocation2 + $0x560] sm:$0xff] %vm276_vm3, %v9930_v32  ;;  %v11174_v27 = vpop.f32.mrf.mxu2  ;;  %v11176_v28 = vpop.f32.mrf.mxu3 }
  0xc3   : > { %450 = vst.msk [vmem:[#allocation2 + $0x568] sm:$0xff] %vm276_vm3, %v9930_v32  ;;  %v11184_v33 = vpop.f32.mrf.mxu1 }
  0xc4   : > { %451 = vst.msk [vmem:[#allocation2 + $0x570] sm:$0xff] %vm276_vm3, %v9930_v32 }
  0xc5   : > { %452 = vst.msk [vmem:[#allocation2 + $0x578] sm:$0xff] %vm276_vm3, %v9930_v32 }
  0xc6   : > { %453 = vst.msk [vmem:[#allocation2 + $0x580] sm:$0xff] %vm276_vm3, %v9930_v32 }
  0xc7   : > { %454 = vst.msk [vmem:[#allocation2 + $0x588] sm:$0xff] %vm276_vm3, %v9930_v32 }
  0xc8   : > { %455 = vst.msk [vmem:[#allocation2 + $0x590] sm:$0xff] %vm276_vm3, %v9930_v32 }
  0xc9   : > { %456 = vst.msk [vmem:[#allocation2 + $0x598] sm:$0xff] %vm276_vm3, %v9930_v32 }
  0xca   : > { %457 = vst.msk [vmem:[#allocation2 + $0x5a0] sm:$0xff] %vm276_vm3, %v9930_v32  ;;  %v11206_v46 = vpop.f32.mrf.mxu2  ;;  %v11208_v47 = vpop.f32.mrf.mxu3 }
  0xcb   : > { %458 = vst.msk [vmem:[#allocation2 + $0x5a8] sm:$0xff] %vm276_vm3, %v9930_v32 }
  0xcc   : > { %459 = vst.msk [vmem:[#allocation2 + $0x5b0] sm:$0xff] %vm276_vm3, %v9930_v32 }
  0xcd   : > { %460 = vst.msk [vmem:[#allocation2 + $0x5b8] sm:$0xff] %vm276_vm3, %v9930_v32 }
  0xce   : > { %461 = vst.msk [vmem:[#allocation2 + $0x5c0] sm:$0xff] %vm276_vm3, %v9930_v32  ;;  %9181 = vmatmul.msk.bf16.gmra.mxu0 %vm3108_vm2, %v9454_v59  ;;  %9245 = vmatmul.msk.bf16.gmra.mxu1 %vm3108_vm2, %v9518_v60 }
  0xcf   : > { %462 = vst.msk [vmem:[#allocation2 + $0x5c8] sm:$0xff] %vm276_vm3, %v9930_v32  ;;  %9309 = vmatmul.msk.bf16.gmra.mxu2 %vm3108_vm2, %v9582_v63 }
  0xd0   : > { %463 = vst.msk [vmem:[#allocation2 + $0x5d0] sm:$0xff] %vm276_vm3, %v9930_v32 }
  0xd1   : > { %464 = vst.msk [vmem:[#allocation2 + $0x5d8] sm:$0xff] %vm276_vm3, %v9930_v32 }
  0xd2   : > { %465 = vst.msk [vmem:[#allocation2 + $0x5e0] sm:$0xff] %vm276_vm3, %v9930_v32  ;;  %v11248_v18 = vpop.f32.mrf.mxu2 }
  0xd3   : > { %466 = vst.msk [vmem:[#allocation2 + $0x5e8] sm:$0xff] %vm276_vm3, %v9930_v32 }
  0xd4   : > { %467 = vst.msk [vmem:[#allocation2 + $0x5f0] sm:$0xff] %vm276_vm3, %v9930_v32 }
  0xd5   : > { %468 = vst.msk [vmem:[#allocation2 + $0x5f8] sm:$0xff] %vm276_vm3, %v9930_v32 }
  0xd6   : > { %469 = vst.msk [vmem:[#allocation2 + $0x600] sm:$0xff] %vm276_vm3, %v9930_v32 }
  0xd7   : > { %470 = vst.msk [vmem:[#allocation2 + $0x608] sm:$0xff] %vm276_vm3, %v9930_v32 }
  0xd8   : > { %471 = vst.msk [vmem:[#allocation2 + $0x610] sm:$0xff] %vm276_vm3, %v9930_v32 }
  0xd9   : > { %472 = vst.msk [vmem:[#allocation2 + $0x618] sm:$0xff] %vm276_vm3, %v9930_v32 }
  0xda   : > { %473 = vst.msk [vmem:[#allocation2 + $0x620] sm:$0xff] %vm276_vm3, %v9930_v32 }
  0xdb   : > { %474 = vst.msk [vmem:[#allocation2 + $0x628] sm:$0xff] %vm276_vm3, %v9930_v32 }
  0xdc   : > { %475 = vst.msk [vmem:[#allocation2 + $0x630] sm:$0xff] %vm276_vm3, %v9930_v32 }
  0xdd   : > { %476 = vst.msk [vmem:[#allocation2 + $0x638] sm:$0xff] %vm276_vm3, %v9930_v32 }
  0xde   : > { %477 = vst.msk [vmem:[#allocation2 + $0x640] sm:$0xff] %vm276_vm3, %v9930_v32 }
  0xdf   : > { %478 = vst.msk [vmem:[#allocation2 + $0x648] sm:$0xff] %vm276_vm3, %v9930_v32 }
  0xe0   : > { %479 = vst.msk [vmem:[#allocation2 + $0x650] sm:$0xff] %vm276_vm3, %v9930_v32 }
  0xe1   : > { %480 = vst.msk [vmem:[#allocation2 + $0x658] sm:$0xff] %vm276_vm3, %v9930_v32 }
  0xe2   : > { %481 = vst.msk [vmem:[#allocation2 + $0x660] sm:$0xff] %vm276_vm3, %v9930_v32 }
  0xe3   : > { %482 = vst.msk [vmem:[#allocation2 + $0x668] sm:$0xff] %vm276_vm3, %v9930_v32 }
  0xe4   : > { %483 = vst.msk [vmem:[#allocation2 + $0x670] sm:$0xff] %vm276_vm3, %v9930_v32 }
  0xe5   : > { %484 = vst.msk [vmem:[#allocation2 + $0x678] sm:$0xff] %vm276_vm3, %v9930_v32 }
  0xe6   : > { %485 = vst.msk [vmem:[#allocation2 + $0x680] sm:$0xff] %vm276_vm3, %v9930_v32 }
  0xe7   : > { %486 = vst.msk [vmem:[#allocation2 + $0x688] sm:$0xff] %vm276_vm3, %v9930_v32 }
  0xe8   : > { %487 = vst.msk [vmem:[#allocation2 + $0x690] sm:$0xff] %vm276_vm3, %v9930_v32 }
  0xe9   : > { %488 = vst.msk [vmem:[#allocation2 + $0x698] sm:$0xff] %vm276_vm3, %v9930_v32 }
  0xea   : > { %489 = vst.msk [vmem:[#allocation2 + $0x6a0] sm:$0xff] %vm276_vm3, %v9930_v32 }
  0xeb   : > { %490 = vst.msk [vmem:[#allocation2 + $0x6a8] sm:$0xff] %vm276_vm3, %v9930_v32 }
  0xec   : > { %491 = vst.msk [vmem:[#allocation2 + $0x6b0] sm:$0xff] %vm276_vm3, %v9930_v32 }
  0xed   : > { %492 = vst.msk [vmem:[#allocation2 + $0x6b8] sm:$0xff] %vm276_vm3, %v9930_v32 }
  0xee   : > { %493 = vst.msk [vmem:[#allocation2 + $0x6c0] sm:$0xff] %vm276_vm3, %v9930_v32 }
  0xef   : > { %494 = vst.msk [vmem:[#allocation2 + $0x6c8] sm:$0xff] %vm276_vm3, %v9930_v32 }
  0xf0   : > { %495 = vst.msk [vmem:[#allocation2 + $0x6d0] sm:$0xff] %vm276_vm3, %v9930_v32 }
  0xf1   : > { %496 = vst.msk [vmem:[#allocation2 + $0x6d8] sm:$0xff] %vm276_vm3, %v9930_v32 }
  0xf2   : > { %497 = vst.msk [vmem:[#allocation2 + $0x6e0] sm:$0xff] %vm276_vm3, %v9930_v32 }
  0xf3   : > { %498 = vst.msk [vmem:[#allocation2 + $0x6e8] sm:$0xff] %vm276_vm3, %v9930_v32 }
  0xf4   : > { %499 = vst.msk [vmem:[#allocation2 + $0x6f0] sm:$0xff] %vm276_vm3, %v9930_v32 }
  0xf5   : > { %500 = vst.msk [vmem:[#allocation2 + $0x6f8] sm:$0xff] %vm276_vm3, %v9930_v32 }
  0xf6   : > { %501 = vst.msk [vmem:[#allocation2 + $0x700] sm:$0xff] %vm276_vm3, %v9930_v32 }
  0xf7   : > { %502 = vst.msk [vmem:[#allocation2 + $0x708] sm:$0xff] %vm276_vm3, %v9930_v32 }
  0xf8   : > { %503 = vst.msk [vmem:[#allocation2 + $0x710] sm:$0xff] %vm276_vm3, %v9930_v32 }
  0xf9   : > { %504 = vst.msk [vmem:[#allocation2 + $0x718] sm:$0xff] %vm276_vm3, %v9930_v32 }
  0xfa   : > { %505 = vst.msk [vmem:[#allocation2 + $0x720] sm:$0xff] %vm276_vm3, %v9930_v32 }
  0xfb   : > { %506 = vst.msk [vmem:[#allocation2 + $0x728] sm:$0xff] %vm276_vm3, %v9930_v32 }
  0xfc   : > { %507 = vst.msk [vmem:[#allocation2 + $0x730] sm:$0xff] %vm276_vm3, %v9930_v32 }
  0xfd   : > { %508 = vst.msk [vmem:[#allocation2 + $0x738] sm:$0xff] %vm276_vm3, %v9930_v32 }
  0xfe   : > { %509 = vst.msk [vmem:[#allocation2 + $0x740] sm:$0xff] %vm276_vm3, %v9930_v32 }
  0xff   : > { %510 = vst.msk [vmem:[#allocation2 + $0x748] sm:$0xff] %vm276_vm3, %v9930_v32 }
 0x100   : > { %511 = vst.msk [vmem:[#allocation2 + $0x750] sm:$0xff] %vm276_vm3, %v9930_v32 }
 0x101   : > { %512 = vst.msk [vmem:[#allocation2 + $0x758] sm:$0xff] %vm276_vm3, %v9930_v32 }
 0x102   : > { %513 = vst.msk [vmem:[#allocation2 + $0x760] sm:$0xff] %vm276_vm3, %v9930_v32 }
 0x103   : > { %514 = vst.msk [vmem:[#allocation2 + $0x768] sm:$0xff] %vm276_vm3, %v9930_v32 }
 0x104   : > { %515 = vst.msk [vmem:[#allocation2 + $0x770] sm:$0xff] %vm276_vm3, %v9930_v32 }
 0x105   : > { %516 = vst.msk [vmem:[#allocation2 + $0x778] sm:$0xff] %vm276_vm3, %v9930_v32 }
 0x106   : > { %517 = vst.msk [vmem:[#allocation2 + $0x780] sm:$0xff] %vm276_vm3, %v9930_v32 }
 0x107   : > { %518 = vst.msk [vmem:[#allocation2 + $0x788] sm:$0xff] %vm276_vm3, %v9930_v32 }
 0x108   : > { %519 = vst.msk [vmem:[#allocation2 + $0x790] sm:$0xff] %vm276_vm3, %v9930_v32 }
 0x109   : > { %520 = vst.msk [vmem:[#allocation2 + $0x798] sm:$0xff] %vm276_vm3, %v9930_v32 }
 0x10a   : > { %521 = vst.msk [vmem:[#allocation2 + $0x7a0] sm:$0xff] %vm276_vm3, %v9930_v32 }
 0x10b   : > { %522 = vst.msk [vmem:[#allocation2 + $0x7a8] sm:$0xff] %vm276_vm3, %v9930_v32 }
 0x10c   : > { %523 = vst.msk [vmem:[#allocation2 + $0x7b0] sm:$0xff] %vm276_vm3, %v9930_v32 }
 0x10d   : > { %524 = vst.msk [vmem:[#allocation2 + $0x7b8] sm:$0xff] %vm276_vm3, %v9930_v32 }
 0x10e   : > { %525 = vst.msk [vmem:[#allocation2 + $0x7c0] sm:$0xff] %vm276_vm3, %v9930_v32 }
 0x10f   : > { %526 = vst.msk [vmem:[#allocation2 + $0x7c8] sm:$0xff] %vm276_vm3, %v9930_v32 }
 0x110   : > { %527 = vst.msk [vmem:[#allocation2 + $0x7d0] sm:$0xff] %vm276_vm3, %v9930_v32 }
 0x111   : > { %528 = vst.msk [vmem:[#allocation2 + $0x7d8] sm:$0xff] %vm276_vm3, %v9930_v32 }
 0x112   : > { %529 = vst.msk [vmem:[#allocation2 + $0x7e0] sm:$0xff] %vm276_vm3, %v9930_v32 }
 0x113   : > { %530 = vst.msk [vmem:[#allocation2 + $0x7e8] sm:$0xff] %vm276_vm3, %v9930_v32 }
 0x114   : > { %531 = vst.msk [vmem:[#allocation2 + $0x7f0] sm:$0xff] %vm276_vm3, %v9930_v32 }
 0x115   : > { %532 = vst.msk [vmem:[#allocation2 + $0x7f8] sm:$0xff] %vm276_vm3, %v9930_v32 }
 0x116   : > { %533 = vst.msk [vmem:[#allocation2 + $0x800] sm:$0xff] %vm276_vm3, %v9930_v32 }
 0x117   : > { %534 = vst.msk [vmem:[#allocation2 + $0x808] sm:$0xff] %vm276_vm3, %v9930_v32 }
 0x118   : > { %535 = vst.msk [vmem:[#allocation2 + $0x810] sm:$0xff] %vm276_vm3, %v9930_v32 }
 0x119   : > { %536 = vst.msk [vmem:[#allocation2 + $0x818] sm:$0xff] %vm276_vm3, %v9930_v32 }
 0x11a   : > { %537 = vst.msk [vmem:[#allocation2 + $0x820] sm:$0xff] %vm276_vm3, %v9930_v32 }
 0x11b   : > { %538 = vst.msk [vmem:[#allocation2 + $0x828] sm:$0xff] %vm276_vm3, %v9930_v32 }
 0x11c   : > { %539 = vst.msk [vmem:[#allocation2 + $0x830] sm:$0xff] %vm276_vm3, %v9930_v32 }
 0x11d   : > { %540 = vst.msk [vmem:[#allocation2 + $0x838] sm:$0xff] %vm276_vm3, %v9930_v32  ;;  %v1045_v7 = vld [vmem:[#allocation2 + $0x800] sm:$0xff] }
 0x11e   : > { %541 = vst.msk [vmem:[#allocation2 + $0x840] sm:$0xff] %vm276_vm3, %v9930_v32  ;;  %v5429_v16 = vadd.f32 %v11052_v52, %v1045_v7  ;;  %v1046_v20 = vld [vmem:[#allocation2 + $0x808] sm:$0xff] }
 0x11f   : > { %542 = vst.msk [vmem:[#allocation2 + $0x848] sm:$0xff] %vm276_vm3, %v9930_v32  ;;  %v5430_v25 = vadd.f32 %v11080_v56, %v1046_v20  ;;  %v1047_v30 = vld [vmem:[#allocation2 + $0x810] sm:$0xff]  ;;  %v11218_v56 = vpop.f32.mrf.mxu1 }
 0x120   : > { %543 = vst.msk [vmem:[#allocation2 + $0x850] sm:$0xff] %vm276_vm3, %v9930_v32  ;;  %v5431_v35 = vadd.f32 %v4538_v0, %v1047_v30  ;;  %v9646_v0 = vld [vmem:[%s10011_s7 + $0x658] sm:$0xff] }
 0x121   : > { %544 = vst.msk [vmem:[#allocation2 + $0x858] sm:$0xff] %vm276_vm3, %v9930_v32  ;;  %v1048_v9 = vld [vmem:[#allocation2 + $0x818] sm:$0xff]  ;;  %9373 = vmatmul.msk.bf16.gmra.mxu3 %vm3108_vm2, %v9646_v0  ;;  %v1049_v20 = vld [vmem:[#allocation2 + $0x820] sm:$0xff]  ;;  %v795_v0 = vld [vmem:[#allocation2 + $0x30] sm:$0xff] }
 0x122   : > { %545 = vst.msk [vmem:[#allocation2 + $0x860] sm:$0xff] %vm276_vm3, %v9930_v32 }
 0x123   : > { %546 = vst.msk [vmem:[#allocation2 + $0x868] sm:$0xff] %vm276_vm3, %v9930_v32 }
 0x124   : > { %547 = vst.msk [vmem:[#allocation2 + $0x870] sm:$0xff] %vm276_vm3, %v9930_v32 }
 0x125   : > { %548 = vst.msk [vmem:[#allocation2 + $0x878] sm:$0xff] %vm276_vm3, %v9930_v32 }
 0x126   : > { %549 = vst.msk [vmem:[#allocation2 + $0x880] sm:$0xff] %vm276_vm3, %v9930_v32 }
 0x127   : > { %550 = vst.msk [vmem:[#allocation2 + $0x888] sm:$0xff] %vm276_vm3, %v9930_v32 }
 0x128   : > { %551 = vst.msk [vmem:[#allocation2 + $0x890] sm:$0xff] %vm276_vm3, %v9930_v32 }
 0x129   : > { %552 = vst.msk [vmem:[#allocation2 + $0x898] sm:$0xff] %vm276_vm3, %v9930_v32 }
 0x12a   : > { %553 = vst.msk [vmem:[#allocation2 + $0x8a0] sm:$0xff] %vm276_vm3, %v9930_v32 }
 0x12b   : > { %554 = vst.msk [vmem:[#allocation2 + $0x8a8] sm:$0xff] %vm276_vm3, %v9930_v32 }
 0x12c   : > { %555 = vst.msk [vmem:[#allocation2 + $0x8b0] sm:$0xff] %vm276_vm3, %v9930_v32 }
 0x12d   : > { %556 = vst.msk [vmem:[#allocation2 + $0x8b8] sm:$0xff] %vm276_vm3, %v9930_v32 }
 0x12e   : > { %557 = vst.msk [vmem:[#allocation2 + $0x8c0] sm:$0xff] %vm276_vm3, %v9930_v32 }
 0x12f   : > { %558 = vst.msk [vmem:[#allocation2 + $0x8c8] sm:$0xff] %vm276_vm3, %v9930_v32 }
 0x130   : > { %559 = vst.msk [vmem:[#allocation2 + $0x8d0] sm:$0xff] %vm276_vm3, %v9930_v32 }
 0x131   : > { %560 = vst.msk [vmem:[#allocation2 + $0x8d8] sm:$0xff] %vm276_vm3, %v9930_v32 }
 0x132   : > { %561 = vst.msk [vmem:[#allocation2 + $0x8e0] sm:$0xff] %vm276_vm3, %v9930_v32 }
 0x133   : > { %562 = vst.msk [vmem:[#allocation2 + $0x8e8] sm:$0xff] %vm276_vm3, %v9930_v32 }
 0x134   : > { %563 = vst.msk [vmem:[#allocation2 + $0x8f0] sm:$0xff] %vm276_vm3, %v9930_v32 }
 0x135   : > { %564 = vst.msk [vmem:[#allocation2 + $0x8f8] sm:$0xff] %vm276_vm3, %v9930_v32 }
 0x136   : > { %565 = vst.msk [vmem:[#allocation2 + $0x900] sm:$0xff] %vm276_vm3, %v9930_v32 }
 0x137   : > { %566 = vst.msk [vmem:[#allocation2 + $0x908] sm:$0xff] %vm276_vm3, %v9930_v32 }
 0x138   : > { %567 = vst.msk [vmem:[#allocation2 + $0x910] sm:$0xff] %vm276_vm3, %v9930_v32 }
 0x139   : > { %568 = vst.msk [vmem:[#allocation2 + $0x918] sm:$0xff] %vm276_vm3, %v9930_v32 }
 0x13a   : > { %569 = vst.msk [vmem:[#allocation2 + $0x920] sm:$0xff] %vm276_vm3, %v9930_v32 }
 0x13b   : > { %570 = vst.msk [vmem:[#allocation2 + $0x928] sm:$0xff] %vm276_vm3, %v9930_v32 }
 0x13c   : > { %571 = vst.msk [vmem:[#allocation2 + $0x930] sm:$0xff] %vm276_vm3, %v9930_v32 }
 0x13d   : > { %572 = vst.msk [vmem:[#allocation2 + $0x938] sm:$0xff] %vm276_vm3, %v9930_v32 }
 0x13e   : > { %573 = vst.msk [vmem:[#allocation2 + $0x940] sm:$0xff] %vm276_vm3, %v9930_v32 }
 0x13f   : > { %574 = vst.msk [vmem:[#allocation2 + $0x948] sm:$0xff] %vm276_vm3, %v9930_v32 }
 0x140   : > { %575 = vst.msk [vmem:[#allocation2 + $0x950] sm:$0xff] %vm276_vm3, %v9930_v32 }
 0x141   : > { %576 = vst.msk [vmem:[#allocation2 + $0x958] sm:$0xff] %vm276_vm3, %v9930_v32 }
 0x142   : > { %577 = vst.msk [vmem:[#allocation2 + $0x960] sm:$0xff] %vm276_vm3, %v9930_v32 }
 0x143   : > { %578 = vst.msk [vmem:[#allocation2 + $0x968] sm:$0xff] %vm276_vm3, %v9930_v32 }
 0x144   : > { %579 = vst.msk [vmem:[#allocation2 + $0x970] sm:$0xff] %vm276_vm3, %v9930_v32 }
 0x145   : > { %580 = vst.msk [vmem:[#allocation2 + $0x978] sm:$0xff] %vm276_vm3, %v9930_v32 }
 0x146   : > { %581 = vst.msk [vmem:[#allocation2 + $0x980] sm:$0xff] %vm276_vm3, %v9930_v32 }
 0x147   : > { %582 = vst.msk [vmem:[#allocation2 + $0x988] sm:$0xff] %vm276_vm3, %v9930_v32 }
 0x148   : > { %583 = vst.msk [vmem:[#allocation2 + $0x990] sm:$0xff] %vm276_vm3, %v9930_v32 }
 0x149   : > { %584 = vst.msk [vmem:[#allocation2 + $0x998] sm:$0xff] %vm276_vm3, %v9930_v32 }
 0x14a   : > { %585 = vst.msk [vmem:[#allocation2 + $0x9a0] sm:$0xff] %vm276_vm3, %v9930_v32 }
 0x14b   : > { %586 = vst.msk [vmem:[#allocation2 + $0x9a8] sm:$0xff] %vm276_vm3, %v9930_v32 }
 0x14c   : > { %587 = vst.msk [vmem:[#allocation2 + $0x9b0] sm:$0xff] %vm276_vm3, %v9930_v32 }
 0x14d   : > { %588 = vst.msk [vmem:[#allocation2 + $0x9b8] sm:$0xff] %vm276_vm3, %v9930_v32 }
 0x14e   : > { %589 = vst.msk [vmem:[#allocation2 + $0x9c0] sm:$0xff] %vm276_vm3, %v9930_v32 }
 0x14f   : > { %590 = vst.msk [vmem:[#allocation2 + $0x9c8] sm:$0xff] %vm276_vm3, %v9930_v32 }
 0x150   : > { %591 = vst.msk [vmem:[#allocation2 + $0x9d0] sm:$0xff] %vm276_vm3, %v9930_v32 }
 0x151   : > { %592 = vst.msk [vmem:[#allocation2 + $0x9d8] sm:$0xff] %vm276_vm3, %v9930_v32 }
 0x152   : > { %593 = vst.msk [vmem:[#allocation2 + $0x9e0] sm:$0xff] %vm276_vm3, %v9930_v32 }
 0x153   : > { %594 = vst.msk [vmem:[#allocation2 + $0x9e8] sm:$0xff] %vm276_vm3, %v9930_v32 }
 0x154   : > { %595 = vst.msk [vmem:[#allocation2 + $0x9f0] sm:$0xff] %vm276_vm3, %v9930_v32 }
 0x155   : > { %596 = vst.msk [vmem:[#allocation2 + $0x9f8] sm:$0xff] %vm276_vm3, %v9930_v32 }
 0x156   : > { %597 = vst.msk [vmem:[#allocation2 + $0xa00] sm:$0xff] %vm276_vm3, %v9930_v32 }
 0x157   : > { %598 = vst.msk [vmem:[#allocation2 + $0xa08] sm:$0xff] %vm276_vm3, %v9930_v32 }
 0x158   : > { %599 = vst.msk [vmem:[#allocation2 + $0xa10] sm:$0xff] %vm276_vm3, %v9930_v32 }
 0x159   : > { %600 = vst.msk [vmem:[#allocation2 + $0xa18] sm:$0xff] %vm276_vm3, %v9930_v32 }
 0x15a   : > { %601 = vst.msk [vmem:[#allocation2 + $0xa20] sm:$0xff] %vm276_vm3, %v9930_v32 }
 0x15b   : > { %602 = vst.msk [vmem:[#allocation2 + $0xa28] sm:$0xff] %vm276_vm3, %v9930_v32 }
 0x15c   : > { %603 = vst.msk [vmem:[#allocation2 + $0xa30] sm:$0xff] %vm276_vm3, %v9930_v32 }
 0x15d   : > { %604 = vst.msk [vmem:[#allocation2 + $0xa38] sm:$0xff] %vm276_vm3, %v9930_v32 }
 0x15e   : > { %605 = vst.msk [vmem:[#allocation2 + $0xa40] sm:$0xff] %vm276_vm3, %v9930_v32 }
 0x15f   : > { %606 = vst.msk [vmem:[#allocation2 + $0xa48] sm:$0xff] %vm276_vm3, %v9930_v32 }
 0x160   : > { %607 = vst.msk [vmem:[#allocation2 + $0xa50] sm:$0xff] %vm276_vm3, %v9930_v32 }
 0x161   : > { %608 = vst.msk [vmem:[#allocation2 + $0xa58] sm:$0xff] %vm276_vm3, %v9930_v32 }
 0x162   : > { %609 = vst.msk [vmem:[#allocation2 + $0xa60] sm:$0xff] %vm276_vm3, %v9930_v32 }
 0x163   : > { %610 = vst.msk [vmem:[#allocation2 + $0xa68] sm:$0xff] %vm276_vm3, %v9930_v32 }
 0x164   : > { %611 = vst.msk [vmem:[#allocation2 + $0xa70] sm:$0xff] %vm276_vm3, %v9930_v32 }
 0x165   : > { %612 = vst.msk [vmem:[#allocation2 + $0xa78] sm:$0xff] %vm276_vm3, %v9930_v32 }
 0x166   : > { %613 = vst.msk [vmem:[#allocation2 + $0xa80] sm:$0xff] %vm276_vm3, %v9930_v32 }
 0x167   : > { %614 = vst.msk [vmem:[#allocation2 + $0xa88] sm:$0xff] %vm276_vm3, %v9930_v32 }
 0x168   : > { %615 = vst.msk [vmem:[#allocation2 + $0xa90] sm:$0xff] %vm276_vm3, %v9930_v32 }
 0x169   : > { %616 = vst.msk [vmem:[#allocation2 + $0xa98] sm:$0xff] %vm276_vm3, %v9930_v32 }
 0x16a   : > { %617 = vst.msk [vmem:[#allocation2 + $0xaa0] sm:$0xff] %vm276_vm3, %v9930_v32 }
 0x16b   : > { %618 = vst.msk [vmem:[#allocation2 + $0xaa8] sm:$0xff] %vm276_vm3, %v9930_v32 }
 0x16c   : > { %619 = vst.msk [vmem:[#allocation2 + $0xab0] sm:$0xff] %vm276_vm3, %v9930_v32 }
 0x16d   : > { %620 = vst.msk [vmem:[#allocation2 + $0xab8] sm:$0xff] %vm276_vm3, %v9930_v32 }
 0x16e   : > { %621 = vst.msk [vmem:[#allocation2 + $0xac0] sm:$0xff] %vm276_vm3, %v9930_v32 }
 0x16f   : > { %622 = vst.msk [vmem:[#allocation2 + $0xac8] sm:$0xff] %vm276_vm3, %v9930_v32 }
 0x170   : > { %623 = vst.msk [vmem:[#allocation2 + $0xad0] sm:$0xff] %vm276_vm3, %v9930_v32 }
 0x171   : > { %624 = vst.msk [vmem:[#allocation2 + $0xad8] sm:$0xff] %vm276_vm3, %v9930_v32 }
 0x172   : > { %625 = vst.msk [vmem:[#allocation2 + $0xae0] sm:$0xff] %vm276_vm3, %v9930_v32 }
 0x173   : > { %626 = vst.msk [vmem:[#allocation2 + $0xae8] sm:$0xff] %vm276_vm3, %v9930_v32 }
 0x174   : > { %627 = vst.msk [vmem:[#allocation2 + $0xaf0] sm:$0xff] %vm276_vm3, %v9930_v32 }
 0x175   : > { %628 = vst.msk [vmem:[#allocation2 + $0xaf8] sm:$0xff] %vm276_vm3, %v9930_v32 }
 0x176   : > { %629 = vst.msk [vmem:[#allocation2 + $0xb00] sm:$0xff] %vm276_vm3, %v9930_v32 }
 0x177   : > { %630 = vst.msk [vmem:[#allocation2 + $0xb08] sm:$0xff] %vm276_vm3, %v9930_v32 }
 0x178   : > { %631 = vst.msk [vmem:[#allocation2 + $0xb10] sm:$0xff] %vm276_vm3, %v9930_v32 }
 0x179   : > { %632 = vst.msk [vmem:[#allocation2 + $0xb18] sm:$0xff] %vm276_vm3, %v9930_v32 }
 0x17a   : > { %633 = vst.msk [vmem:[#allocation2 + $0xb20] sm:$0xff] %vm276_vm3, %v9930_v32 }
 0x17b   : > { %634 = vst.msk [vmem:[#allocation2 + $0xb28] sm:$0xff] %vm276_vm3, %v9930_v32 }
 0x17c   : > { %635 = vst.msk [vmem:[#allocation2 + $0xb30] sm:$0xff] %vm276_vm3, %v9930_v32 }
 0x17d   : > { %636 = vst.msk [vmem:[#allocation2 + $0xb38] sm:$0xff] %vm276_vm3, %v9930_v32 }
 0x17e   : > { %637 = vst.msk [vmem:[#allocation2 + $0xb40] sm:$0xff] %vm276_vm3, %v9930_v32 }
 0x17f   : > { %638 = vst.msk [vmem:[#allocation2 + $0xb48] sm:$0xff] %vm276_vm3, %v9930_v32 }
 0x180   : > { %639 = vst.msk [vmem:[#allocation2 + $0xb50] sm:$0xff] %vm276_vm3, %v9930_v32 }
 0x181   : > { %640 = vst.msk [vmem:[#allocation2 + $0xb58] sm:$0xff] %vm276_vm3, %v9930_v32 }
 0x182   : > { %641 = vst.msk [vmem:[#allocation2 + $0xb60] sm:$0xff] %vm276_vm3, %v9930_v32 }
 0x183   : > { %642 = vst.msk [vmem:[#allocation2 + $0xb68] sm:$0xff] %vm276_vm3, %v9930_v32 }
 0x184   : > { %643 = vst.msk [vmem:[#allocation2 + $0xb70] sm:$0xff] %vm276_vm3, %v9930_v32 }
 0x185   : > { %644 = vst.msk [vmem:[#allocation2 + $0xb78] sm:$0xff] %vm276_vm3, %v9930_v32 }
 0x186   : > { %645 = vst.msk [vmem:[#allocation2 + $0xb80] sm:$0xff] %vm276_vm3, %v9930_v32 }
 0x187   : > { %646 = vst.msk [vmem:[#allocation2 + $0xb88] sm:$0xff] %vm276_vm3, %v9930_v32 }
 0x188   : > { %647 = vst.msk [vmem:[#allocation2 + $0xb90] sm:$0xff] %vm276_vm3, %v9930_v32 }
 0x189   : > { %648 = vst.msk [vmem:[#allocation2 + $0xb98] sm:$0xff] %vm276_vm3, %v9930_v32 }
 0x18a   : > { %649 = vst.msk [vmem:[#allocation2 + $0xba0] sm:$0xff] %vm276_vm3, %v9930_v32 }
 0x18b   : > { %650 = vst.msk [vmem:[#allocation2 + $0xba8] sm:$0xff] %vm276_vm3, %v9930_v32 }
 0x18c   : > { %651 = vst.msk [vmem:[#allocation2 + $0xbb0] sm:$0xff] %vm276_vm3, %v9930_v32 }
 0x18d   : > { %652 = vst.msk [vmem:[#allocation2 + $0xbb8] sm:$0xff] %vm276_vm3, %v9930_v32 }
 0x18e   : > { %653 = vst.msk [vmem:[#allocation2 + $0xbc0] sm:$0xff] %vm276_vm3, %v9930_v32 }
 0x18f   : > { %654 = vst.msk [vmem:[#allocation2 + $0xbc8] sm:$0xff] %vm276_vm3, %v9930_v32 }
 0x190   : > { %655 = vst.msk [vmem:[#allocation2 + $0xbd0] sm:$0xff] %vm276_vm3, %v9930_v32 }
 0x191   : > { %656 = vst.msk [vmem:[#allocation2 + $0xbd8] sm:$0xff] %vm276_vm3, %v9930_v32 }
 0x192   : > { %657 = vst.msk [vmem:[#allocation2 + $0xbe0] sm:$0xff] %vm276_vm3, %v9930_v32 }
 0x193   : > { %658 = vst.msk [vmem:[#allocation2 + $0xbe8] sm:$0xff] %vm276_vm3, %v9930_v32 }
 0x194   : > { %659 = vst.msk [vmem:[#allocation2 + $0xbf0] sm:$0xff] %vm276_vm3, %v9930_v32 }
 0x195   : > { %660 = vst.msk [vmem:[#allocation2 + $0xbf8] sm:$0xff] %vm276_vm3, %v9930_v32 }
 0x196   : > { %661 = vst.msk [vmem:[#allocation2 + $0xc00] sm:$0xff] %vm276_vm3, %v9930_v32 }
 0x197   : > { %662 = vst.msk [vmem:[#allocation2 + $0xc08] sm:$0xff] %vm276_vm3, %v9930_v32 }
 0x198   : > { %663 = vst.msk [vmem:[#allocation2 + $0xc10] sm:$0xff] %vm276_vm3, %v9930_v32 }
 0x199   : > { %664 = vst.msk [vmem:[#allocation2 + $0xc18] sm:$0xff] %vm276_vm3, %v9930_v32 }
 0x19a   : > { %665 = vst.msk [vmem:[#allocation2 + $0xc20] sm:$0xff] %vm276_vm3, %v9930_v32 }
 0x19b   : > { %666 = vst.msk [vmem:[#allocation2 + $0xc28] sm:$0xff] %vm276_vm3, %v9930_v32 }
 0x19c   : > { %667 = vst.msk [vmem:[#allocation2 + $0xc30] sm:$0xff] %vm276_vm3, %v9930_v32 }
 0x19d   : > { %668 = vst.msk [vmem:[#allocation2 + $0xc38] sm:$0xff] %vm276_vm3, %v9930_v32  ;;  %v1173_v8 = vld [vmem:[#allocation2 + $0xc00] sm:$0xff] }
 0x19e   : > { %669 = vst.msk [vmem:[#allocation2 + $0xc40] sm:$0xff] %vm276_vm3, %v9930_v32  ;;  %v5557_v19 = vadd.f32 %v11056_v53, %v1173_v8  ;;  %v1174_v22 = vld [vmem:[#allocation2 + $0xc08] sm:$0xff]  ;;  %v792_v53 = vld [vmem:[#allocation2 + $0x18] sm:$0xff] }
 0x19f   : > { %670 = vst.msk [vmem:[#allocation2 + $0xc48] sm:$0xff] %vm276_vm3, %v9930_v32  ;;  %v5558_v29 = vadd.f32 %v11082_v57, %v1174_v22  ;;  %v1175_v50 = vld [vmem:[#allocation2 + $0xc10] sm:$0xff]  ;;  %v5176_v13 = vadd.f32 %v11122_v2, %v792_v53  ;;  %v1050_v53 = vld [vmem:[#allocation2 + $0x828] sm:$0xff] }
 0x1a0   : > { %671 = vst.msk [vmem:[#allocation2 + $0xc50] sm:$0xff] %vm276_vm3, %v9930_v32  ;;  %v5559_v8 = vadd.f32 %v11112_v1, %v1175_v50  ;;  %v1176_v14 = vld [vmem:[#allocation2 + $0xc18] sm:$0xff]  ;;  %v5304_v1 = vadd.f32 %v11124_v3, %v920_v54  ;;  %v922_v50 = vld [vmem:[#allocation2 + $0x428] sm:$0xff] }
 0x1a1   : > { %672 = vst.msk [vmem:[#allocation2 + $0xc58] sm:$0xff] %vm276_vm3, %v9930_v32  ;;  %v5560_v2 = vadd.f32 %v11140_v6, %v1176_v14  ;;  %v1177_v3 = vld [vmem:[#allocation2 + $0xc20] sm:$0xff]  ;;  %v5306_v63 = vadd.f32 %v11184_v33, %v922_v50  ;;  %v1051_v14 = vld [vmem:[#allocation2 + $0x830] sm:$0xff] }
 0x1a2   : > { %673 = vst.msk [vmem:[#allocation2 + $0xc60] sm:$0xff] %vm276_vm3, %v9930_v32  ;;  %v5561_v6 = vadd.f32 %v11176_v28, %v1177_v3 }
 0x1a3   : > { %674 = vst.msk [vmem:[#allocation2 + $0xc68] sm:$0xff] %vm276_vm3, %v9930_v32 }
 0x1a4   : > { %675 = vst.msk [vmem:[#allocation2 + $0xc70] sm:$0xff] %vm276_vm3, %v9930_v32 }
 0x1a5   : > { %676 = vst.msk [vmem:[#allocation2 + $0xc78] sm:$0xff] %vm276_vm3, %v9930_v32 }
 0x1a6   : > { %677 = vst.msk [vmem:[#allocation2 + $0xc80] sm:$0xff] %vm276_vm3, %v9930_v32 }
 0x1a7   : > { %678 = vst.msk [vmem:[#allocation2 + $0xc88] sm:$0xff] %vm276_vm3, %v9930_v32 }
 0x1a8   : > { %679 = vst.msk [vmem:[#allocation2 + $0xc90] sm:$0xff] %vm276_vm3, %v9930_v32 }
 0x1a9   : > { %680 = vst.msk [vmem:[#allocation2 + $0xc98] sm:$0xff] %vm276_vm3, %v9930_v32 }
 0x1aa   : > { %681 = vst.msk [vmem:[#allocation2 + $0xca0] sm:$0xff] %vm276_vm3, %v9930_v32 }
 0x1ab   : > { %682 = vst.msk [vmem:[#allocation2 + $0xca8] sm:$0xff] %vm276_vm3, %v9930_v32 }
 0x1ac   : > { %683 = vst.msk [vmem:[#allocation2 + $0xcb0] sm:$0xff] %vm276_vm3, %v9930_v32 }
 0x1ad   : > { %684 = vst.msk [vmem:[#allocation2 + $0xcb8] sm:$0xff] %vm276_vm3, %v9930_v32 }
 0x1ae   : > { %685 = vst.msk [vmem:[#allocation2 + $0xcc0] sm:$0xff] %vm276_vm3, %v9930_v32 }
 0x1af   : > { %686 = vst.msk [vmem:[#allocation2 + $0xcc8] sm:$0xff] %vm276_vm3, %v9930_v32 }
 0x1b0   : > { %687 = vst.msk [vmem:[#allocation2 + $0xcd0] sm:$0xff] %vm276_vm3, %v9930_v32 }
 0x1b1   : > { %688 = vst.msk [vmem:[#allocation2 + $0xcd8] sm:$0xff] %vm276_vm3, %v9930_v32 }
 0x1b2   : > { %689 = vst.msk [vmem:[#allocation2 + $0xce0] sm:$0xff] %vm276_vm3, %v9930_v32 }
 0x1b3   : > { %690 = vst.msk [vmem:[#allocation2 + $0xce8] sm:$0xff] %vm276_vm3, %v9930_v32 }
 0x1b4   : > { %691 = vst.msk [vmem:[#allocation2 + $0xcf0] sm:$0xff] %vm276_vm3, %v9930_v32 }
 0x1b5   : > { %692 = vst.msk [vmem:[#allocation2 + $0xcf8] sm:$0xff] %vm276_vm3, %v9930_v32 }
 0x1b6   : > { %693 = vst.msk [vmem:[#allocation2 + $0xd00] sm:$0xff] %vm276_vm3, %v9930_v32 }
 0x1b7   : > { %694 = vst.msk [vmem:[#allocation2 + $0xd08] sm:$0xff] %vm276_vm3, %v9930_v32 }
 0x1b8   : > { %695 = vst.msk [vmem:[#allocation2 + $0xd10] sm:$0xff] %vm276_vm3, %v9930_v32 }
 0x1b9   : > { %696 = vst.msk [vmem:[#allocation2 + $0xd18] sm:$0xff] %vm276_vm3, %v9930_v32 }
 0x1ba   : > { %697 = vst.msk [vmem:[#allocation2 + $0xd20] sm:$0xff] %vm276_vm3, %v9930_v32 }
 0x1bb   : > { %698 = vst.msk [vmem:[#allocation2 + $0xd28] sm:$0xff] %vm276_vm3, %v9930_v32 }
 0x1bc   : > { %699 = vst.msk [vmem:[#allocation2 + $0xd30] sm:$0xff] %vm276_vm3, %v9930_v32 }
 0x1bd   : > { %700 = vst.msk [vmem:[#allocation2 + $0xd38] sm:$0xff] %vm276_vm3, %v9930_v32 }
 0x1be   : > { %701 = vst.msk [vmem:[#allocation2 + $0xd40] sm:$0xff] %vm276_vm3, %v9930_v32 }
 0x1bf   : > { %702 = vst.msk [vmem:[#allocation2 + $0xd48] sm:$0xff] %vm276_vm3, %v9930_v32 }
 0x1c0   : > { %703 = vst.msk [vmem:[#allocation2 + $0xd50] sm:$0xff] %vm276_vm3, %v9930_v32 }
 0x1c1   : > { %704 = vst.msk [vmem:[#allocation2 + $0xd58] sm:$0xff] %vm276_vm3, %v9930_v32 }
 0x1c2   : > { %705 = vst.msk [vmem:[#allocation2 + $0xd60] sm:$0xff] %vm276_vm3, %v9930_v32 }
 0x1c3   : > { %706 = vst.msk [vmem:[#allocation2 + $0xd68] sm:$0xff] %vm276_vm3, %v9930_v32 }
 0x1c4   : > { %707 = vst.msk [vmem:[#allocation2 + $0xd70] sm:$0xff] %vm276_vm3, %v9930_v32 }
 0x1c5   : > { %708 = vst.msk [vmem:[#allocation2 + $0xd78] sm:$0xff] %vm276_vm3, %v9930_v32 }
 0x1c6   : > { %709 = vst.msk [vmem:[#allocation2 + $0xd80] sm:$0xff] %vm276_vm3, %v9930_v32 }
 0x1c7   : > { %710 = vst.msk [vmem:[#allocation2 + $0xd88] sm:$0xff] %vm276_vm3, %v9930_v32 }
 0x1c8   : > { %711 = vst.msk [vmem:[#allocation2 + $0xd90] sm:$0xff] %vm276_vm3, %v9930_v32 }
 0x1c9   : > { %712 = vst.msk [vmem:[#allocation2 + $0xd98] sm:$0xff] %vm276_vm3, %v9930_v32 }
 0x1ca   : > { %713 = vst.msk [vmem:[#allocation2 + $0xda0] sm:$0xff] %vm276_vm3, %v9930_v32 }
 0x1cb   : > { %714 = vst.msk [vmem:[#allocation2 + $0xda8] sm:$0xff] %vm276_vm3, %v9930_v32 }
 0x1cc   : > { %715 = vst.msk [vmem:[#allocation2 + $0xdb0] sm:$0xff] %vm276_vm3, %v9930_v32 }
 0x1cd   : > { %716 = vst.msk [vmem:[#allocation2 + $0xdb8] sm:$0xff] %vm276_vm3, %v9930_v32 }
 0x1ce   : > { %717 = vst.msk [vmem:[#allocation2 + $0xdc0] sm:$0xff] %vm276_vm3, %v9930_v32 }
 0x1cf   : > { %718 = vst.msk [vmem:[#allocation2 + $0xdc8] sm:$0xff] %vm276_vm3, %v9930_v32 }
 0x1d0   : > { %719 = vst.msk [vmem:[#allocation2 + $0xdd0] sm:$0xff] %vm276_vm3, %v9930_v32 }
 0x1d1   : > { %720 = vst.msk [vmem:[#allocation2 + $0xdd8] sm:$0xff] %vm276_vm3, %v9930_v32 }
 0x1d2   : > { %721 = vst.msk [vmem:[#allocation2 + $0xde0] sm:$0xff] %vm276_vm3, %v9930_v32 }
 0x1d3   : > { %722 = vst.msk [vmem:[#allocation2 + $0xde8] sm:$0xff] %vm276_vm3, %v9930_v32 }
 0x1d4   : > { %723 = vst.msk [vmem:[#allocation2 + $0xdf0] sm:$0xff] %vm276_vm3, %v9930_v32 }
 0x1d5   : > { %724 = vst.msk [vmem:[#allocation2 + $0xdf8] sm:$0xff] %vm276_vm3, %v9930_v32 }
 0x1d6   : > { %725 = vst.msk [vmem:[#allocation2 + $0xe00] sm:$0xff] %vm276_vm3, %v9930_v32 }
 0x1d7   : > { %726 = vst.msk [vmem:[#allocation2 + $0xe08] sm:$0xff] %vm276_vm3, %v9930_v32 }
 0x1d8   : > { %727 = vst.msk [vmem:[#allocation2 + $0xe10] sm:$0xff] %vm276_vm3, %v9930_v32 }
 0x1d9   : > { %728 = vst.msk [vmem:[#allocation2 + $0xe18] sm:$0xff] %vm276_vm3, %v9930_v32 }
 0x1da   : > { %729 = vst.msk [vmem:[#allocation2 + $0xe20] sm:$0xff] %vm276_vm3, %v9930_v32 }
 0x1db   : > { %730 = vst.msk [vmem:[#allocation2 + $0xe28] sm:$0xff] %vm276_vm3, %v9930_v32 }
 0x1dc   : > { %731 = vst.msk [vmem:[#allocation2 + $0xe30] sm:$0xff] %vm276_vm3, %v9930_v32 }
 0x1dd   : > { %732 = vst.msk [vmem:[#allocation2 + $0xe38] sm:$0xff] %vm276_vm3, %v9930_v32 }
 0x1de   : > { %733 = vst.msk [vmem:[#allocation2 + $0xe40] sm:$0xff] %vm276_vm3, %v9930_v32 }
 0x1df   : > { %734 = vst.msk [vmem:[#allocation2 + $0xe48] sm:$0xff] %vm276_vm3, %v9930_v32 }
 0x1e0   : > { %735 = vst.msk [vmem:[#allocation2 + $0xe50] sm:$0xff] %vm276_vm3, %v9930_v32 }
 0x1e1   : > { %736 = vst.msk [vmem:[#allocation2 + $0xe58] sm:$0xff] %vm276_vm3, %v9930_v32 }
 0x1e2   : > { %737 = vst.msk [vmem:[#allocation2 + $0xe60] sm:$0xff] %vm276_vm3, %v9930_v32 }
 0x1e3   : > { %738 = vst.msk [vmem:[#allocation2 + $0xe68] sm:$0xff] %vm276_vm3, %v9930_v32 }
 0x1e4   : > { %739 = vst.msk [vmem:[#allocation2 + $0xe70] sm:$0xff] %vm276_vm3, %v9930_v32 }
 0x1e5   : > { %740 = vst.msk [vmem:[#allocation2 + $0xe78] sm:$0xff] %vm276_vm3, %v9930_v32 }
 0x1e6   : > { %741 = vst.msk [vmem:[#allocation2 + $0xe80] sm:$0xff] %vm276_vm3, %v9930_v32 }
 0x1e7   : > { %742 = vst.msk [vmem:[#allocation2 + $0xe88] sm:$0xff] %vm276_vm3, %v9930_v32 }
 0x1e8   : > { %743 = vst.msk [vmem:[#allocation2 + $0xe90] sm:$0xff] %vm276_vm3, %v9930_v32 }
 0x1e9   : > { %744 = vst.msk [vmem:[#allocation2 + $0xe98] sm:$0xff] %vm276_vm3, %v9930_v32 }
 0x1ea   : > { %745 = vst.msk [vmem:[#allocation2 + $0xea0] sm:$0xff] %vm276_vm3, %v9930_v32 }
 0x1eb   : > { %746 = vst.msk [vmem:[#allocation2 + $0xea8] sm:$0xff] %vm276_vm3, %v9930_v32 }
 0x1ec   : > { %747 = vst.msk [vmem:[#allocation2 + $0xeb0] sm:$0xff] %vm276_vm3, %v9930_v32 }
 0x1ed   : > { %748 = vst.msk [vmem:[#allocation2 + $0xeb8] sm:$0xff] %vm276_vm3, %v9930_v32 }
 0x1ee   : > { %749 = vst.msk [vmem:[#allocation2 + $0xec0] sm:$0xff] %vm276_vm3, %v9930_v32 }
 0x1ef   : > { %750 = vst.msk [vmem:[#allocation2 + $0xec8] sm:$0xff] %vm276_vm3, %v9930_v32 }
 0x1f0   : > { %751 = vst.msk [vmem:[#allocation2 + $0xed0] sm:$0xff] %vm276_vm3, %v9930_v32 }
 0x1f1   : > { %752 = vst.msk [vmem:[#allocation2 + $0xed8] sm:$0xff] %vm276_vm3, %v9930_v32 }
 0x1f2   : > { %753 = vst.msk [vmem:[#allocation2 + $0xee0] sm:$0xff] %vm276_vm3, %v9930_v32 }
 0x1f3   : > { %754 = vst.msk [vmem:[#allocation2 + $0xee8] sm:$0xff] %vm276_vm3, %v9930_v32 }
 0x1f4   : > { %755 = vst.msk [vmem:[#allocation2 + $0xef0] sm:$0xff] %vm276_vm3, %v9930_v32 }
 0x1f5   : > { %756 = vst.msk [vmem:[#allocation2 + $0xef8] sm:$0xff] %vm276_vm3, %v9930_v32 }
 0x1f6   : > { %757 = vst.msk [vmem:[#allocation2 + $0xf00] sm:$0xff] %vm276_vm3, %v9930_v32 }
 0x1f7   : > { %758 = vst.msk [vmem:[#allocation2 + $0xf08] sm:$0xff] %vm276_vm3, %v9930_v32 }
 0x1f8   : > { %759 = vst.msk [vmem:[#allocation2 + $0xf10] sm:$0xff] %vm276_vm3, %v9930_v32 }
 0x1f9   : > { %760 = vst.msk [vmem:[#allocation2 + $0xf18] sm:$0xff] %vm276_vm3, %v9930_v32 }
 0x1fa   : > { %761 = vst.msk [vmem:[#allocation2 + $0xf20] sm:$0xff] %vm276_vm3, %v9930_v32 }
 0x1fb   : > { %762 = vst.msk [vmem:[#allocation2 + $0xf28] sm:$0xff] %vm276_vm3, %v9930_v32 }
 0x1fc   : > { %763 = vst.msk [vmem:[#allocation2 + $0xf30] sm:$0xff] %vm276_vm3, %v9930_v32 }
 0x1fd   : > { %764 = vst.msk [vmem:[#allocation2 + $0xf38] sm:$0xff] %vm276_vm3, %v9930_v32 }
 0x1fe   : > { %765 = vst.msk [vmem:[#allocation2 + $0xf40] sm:$0xff] %vm276_vm3, %v9930_v32 }
 0x1ff   : > { %766 = vst.msk [vmem:[#allocation2 + $0xf48] sm:$0xff] %vm276_vm3, %v9930_v32 }
 0x200   : > { %767 = vst.msk [vmem:[#allocation2 + $0xf50] sm:$0xff] %vm276_vm3, %v9930_v32 }
 0x201   : > { %768 = vst.msk [vmem:[#allocation2 + $0xf58] sm:$0xff] %vm276_vm3, %v9930_v32 }
 0x202   : > { %769 = vst.msk [vmem:[#allocation2 + $0xf60] sm:$0xff] %vm276_vm3, %v9930_v32 }
 0x203   : > { %770 = vst.msk [vmem:[#allocation2 + $0xf68] sm:$0xff] %vm276_vm3, %v9930_v32 }
 0x204   : > { %771 = vst.msk [vmem:[#allocation2 + $0xf70] sm:$0xff] %vm276_vm3, %v9930_v32 }
 0x205   : > { %772 = vst.msk [vmem:[#allocation2 + $0xf78] sm:$0xff] %vm276_vm3, %v9930_v32 }
 0x206   : > { %773 = vst.msk [vmem:[#allocation2 + $0xf80] sm:$0xff] %vm276_vm3, %v9930_v32 }
 0x207   : > { %774 = vst.msk [vmem:[#allocation2 + $0xf88] sm:$0xff] %vm276_vm3, %v9930_v32 }
 0x208   : > { %775 = vst.msk [vmem:[#allocation2 + $0xf90] sm:$0xff] %vm276_vm3, %v9930_v32 }
 0x209   : > { %776 = vst.msk [vmem:[#allocation2 + $0xf98] sm:$0xff] %vm276_vm3, %v9930_v32 }
 0x20a   : > { %777 = vst.msk [vmem:[#allocation2 + $0xfa0] sm:$0xff] %vm276_vm3, %v9930_v32 }
 0x20b   : > { %778 = vst.msk [vmem:[#allocation2 + $0xfa8] sm:$0xff] %vm276_vm3, %v9930_v32 }
 0x20c   : > { %779 = vst.msk [vmem:[#allocation2 + $0xfb0] sm:$0xff] %vm276_vm3, %v9930_v32 }
 0x20d   : > { %780 = vst.msk [vmem:[#allocation2 + $0xfb8] sm:$0xff] %vm276_vm3, %v9930_v32 }
 0x20e   : > { %781 = vst.msk [vmem:[#allocation2 + $0xfc0] sm:$0xff] %vm276_vm3, %v9930_v32 }
 0x20f   : > { %782 = vst.msk [vmem:[#allocation2 + $0xfc8] sm:$0xff] %vm276_vm3, %v9930_v32 }
 0x210   : > { %783 = vst.msk [vmem:[#allocation2 + $0xfd0] sm:$0xff] %vm276_vm3, %v9930_v32 }
 0x211   : > { %784 = vst.msk [vmem:[#allocation2 + $0xfd8] sm:$0xff] %vm276_vm3, %v9930_v32 }
 0x212   : > { %785 = vst.msk [vmem:[#allocation2 + $0xfe0] sm:$0xff] %vm276_vm3, %v9930_v32 }
 0x213   : > { %786 = vst.msk [vmem:[#allocation2 + $0xfe8] sm:$0xff] %vm276_vm3, %v9930_v32 }
 0x214   : > { %787 = vst.msk [vmem:[#allocation2 + $0xff0] sm:$0xff] %vm276_vm3, %v9930_v32 }
 0x215   : > { %788 = vst.msk [vmem:[#allocation2 + $0xff8] sm:$0xff] %vm276_vm3, %v9930_v32  ;;  %v11182_v32 = vpop.f32.mrf.mxu0 }
 0x216   : > { %5814 = vst.msk [vmem:[#allocation2 + $0x400] sm:$0xff] %vm276_vm3, %v5301_v12 }
 0x217   : > { %5942 = vst.msk [vmem:[#allocation2 + $0x800] sm:$0xff] %vm276_vm3, %v5429_v16  ;;  %v5432_v16 = vadd.f32 %v11138_v5, %v1048_v9  ;;  %v5305_v5 = vadd.f32 %v11148_v11, %v921_v17  ;;  %v11270_v11 = vpop.f32.mrf.mxu2  ;;  %v924_v17 = vld [vmem:[#allocation2 + $0x438] sm:$0xff] }
 0x218   : > { %6070 = vst.msk [vmem:[#allocation2 + $0xc00] sm:$0xff] %vm276_vm3, %v5557_v19  ;;  %v11250_v19 = vpop.f32.mrf.mxu3 }
 0x219   : > { %5687 = vst.msk [vmem:[#allocation2 + $0x8] sm:$0xff] %vm276_vm3, %v5174_v21  ;;  %v5177_v21 = vadd.f32 %v11146_v10, %v793_v15  ;;  %v5178_v10 = vadd.f32 %v11182_v32, %v794_v24 }
 0x21a   : > { %5815 = vst.msk [vmem:[#allocation2 + $0x408] sm:$0xff] %vm276_vm3, %v5302_v23  ;;  %v11258_v23 = vpop.f32.mrf.mxu1 }
 0x21b   : > { %5943 = vst.msk [vmem:[#allocation2 + $0x808] sm:$0xff] %vm276_vm3, %v5430_v25  ;;  %v5433_v25 = vadd.f32 %v11174_v27, %v1049_v20 }
 0x21c   : > { %6071 = vst.msk [vmem:[#allocation2 + $0xc08] sm:$0xff] %vm276_vm3, %v5558_v29 }
 0x21d   : > { %v6329_v36 = vld [vmem:[#allocation2 + $0x400] sm:$0xff]  ;;  %5688 = vst.msk [vmem:[#allocation2 + $0x10] sm:$0xff] %vm276_vm3, %v5175_v31  ;;  %v11216_v55 = vpop.f32.mrf.mxu0 }
 0x21e   : > { %v6845_v38 = vadd.f32 %v11194_v37, %v6329_v36  ;;  %v6457_v39 = vld [vmem:[#allocation2 + $0x800] sm:$0xff]  ;;  %5816 = vst.msk [vmem:[#allocation2 + $0x410] sm:$0xff] %vm276_vm3, %v5303_v34  ;;  %v5179_v33 = vadd.f32 %v11216_v55, %v795_v0 }
 0x21f   : > { %v6973_v40 = vadd.f32 %v11194_v37, %v6457_v39  ;;  %v6585_v41 = vld [vmem:[#allocation2 + $0xc00] sm:$0xff]  ;;  %5944 = vst.msk [vmem:[#allocation2 + $0x810] sm:$0xff] %vm276_vm3, %v5431_v35  ;;  %v11308_v59 = vpop.f32.mrf.mxu2 }
 0x220   : > { %7357 = vst.msk [vmem:[%s10192_s12 + $0x400] sm:$0xff] %vm276_vm3, %v6845_v38  ;;  %v7101_v42 = vadd.f32 %v11194_v37, %v6585_v41  ;;  %v6202_v43 = vld [vmem:[#allocation2 + $0x8] sm:$0xff]  ;;  %v11272_v27 = vpop.f32.mrf.mxu3  ;;  %v9455_v38 = vld [vmem:[%s10011_s7 + $0x60] sm:$0xff] }
 0x221   : > { %7485 = vst.msk [vmem:[%s10192_s12 + $0x800] sm:$0xff] %vm276_vm3, %v6973_v40  ;;  %v6718_v44 = vadd.f32 %v11194_v37, %v6202_v43  ;;  %v6330_v45 = vld [vmem:[#allocation2 + $0x408] sm:$0xff]  ;;  %v9519_v39 = vld [vmem:[%s10011_s7 + $0x260] sm:$0xff]  ;;  %9182 = vmatmul.msk.bf16.gmra.mxu0 %vm3108_vm2, %v9455_v38 }
 0x222   : > { %7613 = vst.msk [vmem:[%s10192_s12 + $0xc00] sm:$0xff] %vm276_vm3, %v7101_v42  ;;  %v6846_v48 = vadd.f32 %v11194_v37, %v6330_v45  ;;  %v6458_v49 = vld [vmem:[#allocation2 + $0x808] sm:$0xff]  ;;  %v11280_v34 = vpop.f32.mrf.mxu1  ;;  %v9583_v42 = vld [vmem:[%s10011_s7 + $0x460] sm:$0xff]  ;;  %9246 = vmatmul.msk.bf16.gmra.mxu1 %vm3108_vm2, %v9519_v39 }
 0x223   : > { %7230 = vst.msk [vmem:[%s10192_s12 + $0x8] sm:$0xff] %vm276_vm3, %v6718_v44  ;;  %v6974_v51 = vadd.f32 %v11194_v37, %v6458_v49  ;;  %v6586_v52 = vld [vmem:[#allocation2 + $0xc08] sm:$0xff]  ;;  %v9647_v43 = vld [vmem:[%s10011_s7 + $0x660] sm:$0xff]  ;;  %9310 = vmatmul.msk.bf16.gmra.mxu2 %vm3108_vm2, %v9583_v42  ;;  %v1180_v42 = vld [vmem:[#allocation2 + $0xc38] sm:$0xff] }
 0x224   : > { %7358 = vst.msk [vmem:[%s10192_s12 + $0x408] sm:$0xff] %vm276_vm3, %v6846_v48  ;;  %v7102_v57 = vadd.f32 %v11194_v37, %v6586_v52  ;;  %v6203_v58 = vld [vmem:[#allocation2 + $0x10] sm:$0xff]  ;;  %9374 = vmatmul.msk.bf16.gmra.mxu3 %vm3108_vm2, %v9647_v43 }
 0x225   : > { %7486 = vst.msk [vmem:[%s10192_s12 + $0x808] sm:$0xff] %vm276_vm3, %v6974_v51  ;;  %v6719_v61 = vadd.f32 %v11194_v37, %v6203_v58  ;;  %v6331_v62 = vld [vmem:[#allocation2 + $0x410] sm:$0xff]  ;;  %v11256_v22 = vpop.f32.mrf.mxu0  ;;  %v1178_v58 = vld [vmem:[#allocation2 + $0xc28] sm:$0xff] }
 0x226   : > { %7614 = vst.msk [vmem:[%s10192_s12 + $0xc08] sm:$0xff] %vm276_vm3, %v7102_v57  ;;  %v6847_v4 = vadd.f32 %v11194_v37, %v6331_v62  ;;  %v6459_v7 = vld [vmem:[#allocation2 + $0x810] sm:$0xff] }
 0x227   : > { %7231 = vst.msk [vmem:[%s10192_s12 + $0x10] sm:$0xff] %vm276_vm3, %v6719_v61  ;;  %v6975_v12 = vadd.f32 %v11194_v37, %v6459_v7  ;;  %v5434_v7 = vadd.f32 %v11206_v46, %v1050_v53  ;;  %v796_v46 = vld [vmem:[#allocation2 + $0x38] sm:$0xff]  ;;  %v11338_v20 = vpop.f32.mrf.mxu2 }
 0x228   : > { %7359 = vst.msk [vmem:[%s10192_s12 + $0x410] sm:$0xff] %vm276_vm3, %v6847_v4  ;;  %v11310_v60 = vpop.f32.mrf.mxu3  ;;  %v5180_v55 = vadd.f32 %v11256_v22, %v796_v46  ;;  %v9456_v22 = vld [vmem:[%s10011_s7 + $0x68] sm:$0xff] }
 0x229   : > { %7487 = vst.msk [vmem:[%s10192_s12 + $0x810] sm:$0xff] %vm276_vm3, %v6975_v12 }
 0x22a   : > { %6072 = vst.msk [vmem:[#allocation2 + $0xc10] sm:$0xff] %vm276_vm3, %v5559_v8  ;;  %v923_v8 = vld [vmem:[#allocation2 + $0x430] sm:$0xff]  ;;  %v11322_v12 = vpop.f32.mrf.mxu1 }
 0x22b   : > { %5689 = vst.msk [vmem:[#allocation2 + $0x18] sm:$0xff] %vm276_vm3, %v5176_v13  ;;  %v5562_v13 = vadd.f32 %v11208_v47, %v1178_v58  ;;  %v5307_v15 = vadd.f32 %v11218_v56, %v923_v8  ;;  %v1053_v58 = vld [vmem:[#allocation2 + $0x840] sm:$0xff] }
 0x22c   : > { %5817 = vst.msk [vmem:[#allocation2 + $0x418] sm:$0xff] %vm276_vm3, %v5304_v1  ;;  %v1179_v1 = vld [vmem:[#allocation2 + $0xc30] sm:$0xff] }
 0x22d   : > { %5945 = vst.msk [vmem:[#allocation2 + $0x818] sm:$0xff] %vm276_vm3, %v5432_v16  ;;  %v11278_v32 = vpop.f32.mrf.mxu0  ;;  %v5435_v16 = vadd.f32 %v11248_v18, %v1051_v14  ;;  %v5563_v47 = vadd.f32 %v11250_v19, %v1179_v1  ;;  %v5308_v18 = vadd.f32 %v11258_v23, %v924_v17  ;;  %v1054_v14 = vld [vmem:[#allocation2 + $0x848] sm:$0xff]  ;;  %v799_v1 = vld [vmem:[#allocation2 + $0x50] sm:$0xff] }
 0x22e   : > { %6073 = vst.msk [vmem:[#allocation2 + $0xc18] sm:$0xff] %vm276_vm3, %v5560_v2  ;;  %v1052_v2 = vld [vmem:[#allocation2 + $0x838] sm:$0xff]  ;;  %v9521_v17 = vld [vmem:[%s10011_s7 + $0x270] sm:$0xff] }
 0x22f   : > { %5690 = vst.msk [vmem:[#allocation2 + $0x20] sm:$0xff] %vm276_vm3, %v5177_v21  ;;  %v5436_v21 = vadd.f32 %v11270_v11, %v1052_v2  ;;  %v9649_v2 = vld [vmem:[%s10011_s7 + $0x670] sm:$0xff] }
 0x230   : > { %5818 = vst.msk [vmem:[#allocation2 + $0x420] sm:$0xff] %vm276_vm3, %v5305_v5  ;;  %v11340_v56 = vpop.f32.mrf.mxu3  ;;  %v9520_v5 = vld [vmem:[%s10011_s7 + $0x268] sm:$0xff] }
 0x231   : > { %v6587_v26 = vld [vmem:[#allocation2 + $0xc10] sm:$0xff]  ;;  %5946 = vst.msk [vmem:[#allocation2 + $0x820] sm:$0xff] %vm276_vm3, %v5433_v25  ;;  %v9584_v25 = vld [vmem:[%s10011_s7 + $0x468] sm:$0xff]  ;;  %9183 = vmatmul.msk.bf16.gmra.mxu0 %vm3108_vm2, %v9456_v22 }
 0x232   : > { %v7103_v29 = vadd.f32 %v11194_v37, %v6587_v26  ;;  %v6204_v28 = vld [vmem:[#allocation2 + $0x18] sm:$0xff]  ;;  %6074 = vst.msk [vmem:[#allocation2 + $0xc20] sm:$0xff] %vm276_vm3, %v5561_v6  ;;  %v11348_v3 = vpop.f32.mrf.mxu1  ;;  %9247 = vmatmul.msk.bf16.gmra.mxu1 %vm3108_vm2, %v9520_v5 }
 0x233   : > { %v6720_v30 = vadd.f32 %v11194_v37, %v6204_v28  ;;  %v6332_v31 = vld [vmem:[#allocation2 + $0x418] sm:$0xff]  ;;  %5691 = vst.msk [vmem:[#allocation2 + $0x28] sm:$0xff] %vm276_vm3, %v5178_v10  ;;  %v9648_v10 = vld [vmem:[%s10011_s7 + $0x668] sm:$0xff]  ;;  %9311 = vmatmul.msk.bf16.gmra.mxu2 %vm3108_vm2, %v9584_v25 }
 0x234   : > { %7615 = vst.msk [vmem:[%s10192_s12 + $0xc10] sm:$0xff] %vm276_vm3, %v7103_v29  ;;  %v6848_v35 = vadd.f32 %v11194_v37, %v6332_v31  ;;  %v6460_v36 = vld [vmem:[#allocation2 + $0x818] sm:$0xff]  ;;  %9375 = vmatmul.msk.bf16.gmra.mxu3 %vm3108_vm2, %v9648_v10 }
 0x235   : > { %7232 = vst.msk [vmem:[%s10192_s12 + $0x18] sm:$0xff] %vm276_vm3, %v6720_v30  ;;  %v6976_v40 = vadd.f32 %v11194_v37, %v6460_v36  ;;  %v6588_v41 = vld [vmem:[#allocation2 + $0xc18] sm:$0xff]  ;;  %v11320_v9 = vpop.f32.mrf.mxu0 }
 0x236   : > { %7360 = vst.msk [vmem:[%s10192_s12 + $0x418] sm:$0xff] %vm276_vm3, %v6848_v35  ;;  %v7104_v44 = vadd.f32 %v11194_v37, %v6588_v41  ;;  %v6205_v45 = vld [vmem:[#allocation2 + $0x20] sm:$0xff]  ;;  %v11370_v35 = vpop.f32.mrf.mxu2 }
 0x237   : > { %7488 = vst.msk [vmem:[%s10192_s12 + $0x818] sm:$0xff] %vm276_vm3, %v6976_v40  ;;  %v6721_v48 = vadd.f32 %v11194_v37, %v6205_v45  ;;  %v6333_v49 = vld [vmem:[#allocation2 + $0x420] sm:$0xff] }
 0x238   : > { %7616 = vst.msk [vmem:[%s10192_s12 + $0xc18] sm:$0xff] %vm276_vm3, %v7104_v44  ;;  %v6849_v51 = vadd.f32 %v11194_v37, %v6333_v49  ;;  %v6461_v52 = vld [vmem:[#allocation2 + $0x820] sm:$0xff]  ;;  %v11372_v36 = vpop.f32.mrf.mxu3 }
 0x239   : > { %7233 = vst.msk [vmem:[%s10192_s12 + $0x20] sm:$0xff] %vm276_vm3, %v6721_v48  ;;  %v6977_v54 = vadd.f32 %v11194_v37, %v6461_v52  ;;  %v6589_v57 = vld [vmem:[#allocation2 + $0xc20] sm:$0xff] }
 0x23a   : > { %7361 = vst.msk [vmem:[%s10192_s12 + $0x420] sm:$0xff] %vm276_vm3, %v6849_v51  ;;  %v7105_v61 = vadd.f32 %v11194_v37, %v6589_v57  ;;  %v6206_v62 = vld [vmem:[#allocation2 + $0x28] sm:$0xff]  ;;  %v11382_v44 = vpop.f32.mrf.mxu1  ;;  %v797_v49 = vld [vmem:[#allocation2 + $0x40] sm:$0xff]  ;;  %v5564_v57 = vadd.f32 %v11272_v27, %v1180_v42  ;;  %v1183_v42 = vld [vmem:[#allocation2 + $0xc50] sm:$0xff] }
 0x23b   : > { %7489 = vst.msk [vmem:[%s10192_s12 + $0x820] sm:$0xff] %vm276_vm3, %v6977_v54  ;;  %v6722_v4 = vadd.f32 %v11194_v37, %v6206_v62  ;;  %v925_v52 = vld [vmem:[#allocation2 + $0x440] sm:$0xff]  ;;  %v5181_v62 = vadd.f32 %v11278_v32, %v797_v49  ;;  %v926_v27 = vld [vmem:[#allocation2 + $0x448] sm:$0xff] }
 0x23c   : > { %7617 = vst.msk [vmem:[%s10192_s12 + $0xc20] sm:$0xff] %vm276_vm3, %v7105_v61  ;;  %v5309_v0 = vadd.f32 %v11280_v34, %v925_v52  ;;  %v5310_v46 = vadd.f32 %v11322_v12, %v926_v27  ;;  %v800_v52 = vld [vmem:[#allocation2 + $0x58] sm:$0xff] }
 0x23d   : > { %7234 = vst.msk [vmem:[%s10192_s12 + $0x28] sm:$0xff] %vm276_vm3, %v6722_v4  ;;  %v11346_v19 = vpop.f32.mrf.mxu0  ;;  %v798_v4 = vld [vmem:[#allocation2 + $0x48] sm:$0xff]  ;;  %v1184_v27 = vld [vmem:[#allocation2 + $0xc58] sm:$0xff] }
 0x23e   : > { %5819 = vst.msk [vmem:[#allocation2 + $0x428] sm:$0xff] %vm276_vm3, %v5306_v63  ;;  %v1181_v63 = vld [vmem:[#allocation2 + $0xc40] sm:$0xff]  ;;  %v11404_v8 = vpop.f32.mrf.mxu2  ;;  %v5182_v34 = vadd.f32 %v11320_v9, %v798_v4  ;;  %v5183_v12 = vadd.f32 %v11346_v19, %v799_v1  ;;  %v9586_v4 = vld [vmem:[%s10011_s7 + $0x478] sm:$0xff] }
 0x23f   : > { %5947 = vst.msk [vmem:[#allocation2 + $0x828] sm:$0xff] %vm276_vm3, %v5434_v7  ;;  %v5437_v7 = vadd.f32 %v11308_v59, %v1053_v58  ;;  %v5565_v32 = vadd.f32 %v11310_v60, %v1181_v63  ;;  %v5438_v60 = vadd.f32 %v11338_v20, %v1054_v14  ;;  %v1056_v58 = vld [vmem:[#allocation2 + $0x858] sm:$0xff]  ;;  %v5567_v63 = vadd.f32 %v11372_v36, %v1183_v42  ;;  %v801_v14 = vld [vmem:[#allocation2 + $0x60] sm:$0xff] }
 0x240   : > { %6075 = vst.msk [vmem:[#allocation2 + $0xc28] sm:$0xff] %vm276_vm3, %v5562_v13  ;;  %v11406_v13 = vpop.f32.mrf.mxu3  ;;  %v5440_v36 = vadd.f32 %v11404_v8, %v1056_v58  ;;  %v9651_v42 = vld [vmem:[%s10011_s7 + $0x680] sm:$0xff] }
 0x241   : > { %5692 = vst.msk [vmem:[#allocation2 + $0x30] sm:$0xff] %vm276_vm3, %v5179_v33  ;;  %v1182_v33 = vld [vmem:[#allocation2 + $0xc48] sm:$0xff] }
 0x242   : > { %5820 = vst.msk [vmem:[#allocation2 + $0x430] sm:$0xff] %vm276_vm3, %v5307_v15  ;;  %v11414_v15 = vpop.f32.mrf.mxu1  ;;  %v5566_v9 = vadd.f32 %v11340_v56, %v1182_v33  ;;  %9248 = vmatmul.msk.bf16.gmra.mxu1 %vm3108_vm2, %v9521_v17  ;;  %v1057_v33 = vld [vmem:[#allocation2 + $0x860] sm:$0xff] }
 0x243   : > { %5948 = vst.msk [vmem:[#allocation2 + $0x830] sm:$0xff] %vm276_vm3, %v5435_v16  ;;  %v9457_v16 = vld [vmem:[%s10011_s7 + $0x70] sm:$0xff] }
 0x244   : > { %6076 = vst.msk [vmem:[#allocation2 + $0xc30] sm:$0xff] %vm276_vm3, %v5563_v47  ;;  %v9585_v47 = vld [vmem:[%s10011_s7 + $0x470] sm:$0xff]  ;;  %9184 = vmatmul.msk.bf16.gmra.mxu0 %vm3108_vm2, %v9457_v16  ;;  %9376 = vmatmul.msk.bf16.gmra.mxu3 %vm3108_vm2, %v9649_v2 }
 0x245   : > { %v6334_v24 = vld [vmem:[#allocation2 + $0x428] sm:$0xff]  ;;  %5693 = vst.msk [vmem:[#allocation2 + $0x38] sm:$0xff] %vm276_vm3, %v5180_v55  ;;  %v11380_v43 = vpop.f32.mrf.mxu0  ;;  %9312 = vmatmul.msk.bf16.gmra.mxu2 %vm3108_vm2, %v9585_v47 }
 0x246   : > { %v6850_v23 = vadd.f32 %v11194_v37, %v6334_v24  ;;  %v6462_v6 = vld [vmem:[#allocation2 + $0x828] sm:$0xff]  ;;  %5821 = vst.msk [vmem:[#allocation2 + $0x438] sm:$0xff] %vm276_vm3, %v5308_v18  ;;  %v11434_v20 = vpop.f32.mrf.mxu2 }
 0x247   : > { %v6978_v26 = vadd.f32 %v11194_v37, %v6462_v6  ;;  %v6590_v11 = vld [vmem:[#allocation2 + $0xc28] sm:$0xff]  ;;  %5949 = vst.msk [vmem:[#allocation2 + $0x838] sm:$0xff] %vm276_vm3, %v5436_v21 }
 0x248   : > { %7362 = vst.msk [vmem:[%s10192_s12 + $0x428] sm:$0xff] %vm276_vm3, %v6850_v23  ;;  %v7106_v29 = vadd.f32 %v11194_v37, %v6590_v11  ;;  %v6207_v28 = vld [vmem:[#allocation2 + $0x30] sm:$0xff]  ;;  %v11436_v56 = vpop.f32.mrf.mxu3 }
 0x249   : > { %7490 = vst.msk [vmem:[%s10192_s12 + $0x828] sm:$0xff] %vm276_vm3, %v6978_v26  ;;  %v6723_v30 = vadd.f32 %v11194_v37, %v6207_v28  ;;  %v6335_v31 = vld [vmem:[#allocation2 + $0x430] sm:$0xff] }
 0x24a   : > { %7618 = vst.msk [vmem:[%s10192_s12 + $0xc28] sm:$0xff] %vm276_vm3, %v7106_v29  ;;  %v6851_v38 = vadd.f32 %v11194_v37, %v6335_v31  ;;  %v6463_v39 = vld [vmem:[#allocation2 + $0x830] sm:$0xff]  ;;  %v11444_v24 = vpop.f32.mrf.mxu1 }
 0x24b   : > { %7235 = vst.msk [vmem:[%s10192_s12 + $0x30] sm:$0xff] %vm276_vm3, %v6723_v30  ;;  %v6979_v40 = vadd.f32 %v11194_v37, %v6463_v39  ;;  %v6591_v41 = vld [vmem:[#allocation2 + $0xc30] sm:$0xff] }
 0x24c   : > { %7363 = vst.msk [vmem:[%s10192_s12 + $0x430] sm:$0xff] %vm276_vm3, %v6851_v38  ;;  %v7107_v45 = vadd.f32 %v11194_v37, %v6591_v41  ;;  %v6208_v48 = vld [vmem:[#allocation2 + $0x38] sm:$0xff]  ;;  %v927_v30 = vld [vmem:[#allocation2 + $0x450] sm:$0xff] }
 0x24d   : > { %7491 = vst.msk [vmem:[%s10192_s12 + $0x830] sm:$0xff] %vm276_vm3, %v6979_v40  ;;  %v6724_v50 = vadd.f32 %v11194_v37, %v6208_v48  ;;  %v6336_v51 = vld [vmem:[#allocation2 + $0x438] sm:$0xff]  ;;  %v11412_v59 = vpop.f32.mrf.mxu0  ;;  %v1055_v39 = vld [vmem:[#allocation2 + $0x850] sm:$0xff] }
 0x24e   : > { %7619 = vst.msk [vmem:[%s10192_s12 + $0xc30] sm:$0xff] %vm276_vm3, %v7107_v45  ;;  %v6852_v53 = vadd.f32 %v11194_v37, %v6336_v51  ;;  %v6464_v54 = vld [vmem:[#allocation2 + $0x838] sm:$0xff]  ;;  %v11464_v45 = vpop.f32.mrf.mxu2  ;;  %v5311_v51 = vadd.f32 %v11348_v3, %v927_v30 }
 0x24f   : > { %7236 = vst.msk [vmem:[%s10192_s12 + $0x38] sm:$0xff] %vm276_vm3, %v6724_v50  ;;  %v6980_v61 = vadd.f32 %v11194_v37, %v6464_v54  ;;  %v5439_v54 = vadd.f32 %v11370_v35, %v1055_v39  ;;  %v9522_v3 = vld [vmem:[%s10011_s7 + $0x278] sm:$0xff] }
 0x250   : > { %7364 = vst.msk [vmem:[%s10192_s12 + $0x438] sm:$0xff] %vm276_vm3, %v6852_v53  ;;  %v11466_v48 = vpop.f32.mrf.mxu3 }
 0x251   : > { %7492 = vst.msk [vmem:[%s10192_s12 + $0x838] sm:$0xff] %vm276_vm3, %v6980_v61 }
 0x252   : > { %6077 = vst.msk [vmem:[#allocation2 + $0xc38] sm:$0xff] %vm276_vm3, %v5564_v57  ;;  %v928_v57 = vld [vmem:[#allocation2 + $0x458] sm:$0xff]  ;;  %9249 = vmatmul.msk.bf16.gmra.mxu1 %vm3108_vm2, %v9522_v3 }
 0x253   : > { %5694 = vst.msk [vmem:[#allocation2 + $0x40] sm:$0xff] %vm276_vm3, %v5181_v62  ;;  %v11478_v62 = vpop.f32.mrf.mxu1  ;;  %v5312_v35 = vadd.f32 %v11382_v44, %v928_v57  ;;  %v5185_v44 = vadd.f32 %v11412_v59, %v801_v14  ;;  %v1186_v57 = vld [vmem:[#allocation2 + $0xc68] sm:$0xff]  ;;  %v804_v14 = vld [vmem:[#allocation2 + $0x78] sm:$0xff] }
 0x254   : > { %5822 = vst.msk [vmem:[#allocation2 + $0x440] sm:$0xff] %vm276_vm3, %v5309_v0  ;;  %v9458_v0 = vld [vmem:[%s10011_s7 + $0x78] sm:$0xff] }
 0x255   : > { %5950 = vst.msk [vmem:[#allocation2 + $0x840] sm:$0xff] %vm276_vm3, %v5437_v7  ;;  %v11442_v5 = vpop.f32.mrf.mxu0  ;;  %v5184_v7 = vadd.f32 %v11380_v43, %v800_v52  ;;  %9185 = vmatmul.msk.bf16.gmra.mxu0 %vm3108_vm2, %v9458_v0  ;;  %9313 = vmatmul.msk.bf16.gmra.mxu2 %vm3108_vm2, %v9586_v4  ;;  %v5568_v43 = vadd.f32 %v11406_v13, %v1184_v27  ;;  %v1058_v52 = vld [vmem:[#allocation2 + $0x868] sm:$0xff]  ;;  %v931_v0 = vld [vmem:[#allocation2 + $0x470] sm:$0xff] }
 0x256   : > { %6078 = vst.msk [vmem:[#allocation2 + $0xc40] sm:$0xff] %vm276_vm3, %v5565_v32  ;;  %v9650_v32 = vld [vmem:[%s10011_s7 + $0x678] sm:$0xff]  ;;  %v11502_v1 = vpop.f32.mrf.mxu2  ;;  %v5441_v13 = vadd.f32 %v11434_v20, %v1057_v33  ;;  %v1187_v27 = vld [vmem:[#allocation2 + $0xc70] sm:$0xff] }
 0x257   : > { %5695 = vst.msk [vmem:[#allocation2 + $0x48] sm:$0xff] %vm276_vm3, %v5182_v34  ;;  %v929_v34 = vld [vmem:[#allocation2 + $0x460] sm:$0xff]  ;;  %9377 = vmatmul.msk.bf16.gmra.mxu3 %vm3108_vm2, %v9650_v32 }
 0x258   : > { %5823 = vst.msk [vmem:[#allocation2 + $0x448] sm:$0xff] %vm276_vm3, %v5310_v46  ;;  %v11504_v46 = vpop.f32.mrf.mxu3  ;;  %v5313_v8 = vadd.f32 %v11414_v15, %v929_v34 }
 0x259   : > { %v6592_v55 = vld [vmem:[#allocation2 + $0xc38] sm:$0xff]  ;;  %5951 = vst.msk [vmem:[#allocation2 + $0x848] sm:$0xff] %vm276_vm3, %v5438_v60 }
 0x25a   : > { %v7108_v18 = vadd.f32 %v11194_v37, %v6592_v55  ;;  %v6209_v21 = vld [vmem:[#allocation2 + $0x40] sm:$0xff]  ;;  %6079 = vst.msk [vmem:[#allocation2 + $0xc48] sm:$0xff] %vm276_vm3, %v5566_v9 }
 0x25b   : > { %v6725_v19 = vadd.f32 %v11194_v37, %v6209_v21  ;;  %v6337_v22 = vld [vmem:[#allocation2 + $0x440] sm:$0xff]  ;;  %5696 = vst.msk [vmem:[#allocation2 + $0x50] sm:$0xff] %vm276_vm3, %v5183_v12  ;;  %v11512_v17 = vpop.f32.mrf.mxu1 }
 0x25c   : > { %7620 = vst.msk [vmem:[%s10192_s12 + $0xc38] sm:$0xff] %vm276_vm3, %v7108_v18  ;;  %v6853_v25 = vadd.f32 %v11194_v37, %v6337_v22  ;;  %v6465_v23 = vld [vmem:[#allocation2 + $0x840] sm:$0xff] }
 0x25d   : > { %7237 = vst.msk [vmem:[%s10192_s12 + $0x40] sm:$0xff] %vm276_vm3, %v6725_v19  ;;  %v6981_v6 = vadd.f32 %v11194_v37, %v6465_v23  ;;  %v6593_v10 = vld [vmem:[#allocation2 + $0xc40] sm:$0xff]  ;;  %v11476_v61 = vpop.f32.mrf.mxu0 }
 0x25e   : > { %7365 = vst.msk [vmem:[%s10192_s12 + $0x440] sm:$0xff] %vm276_vm3, %v6853_v25  ;;  %v7109_v26 = vadd.f32 %v11194_v37, %v6593_v10  ;;  %v6210_v11 = vld [vmem:[#allocation2 + $0x48] sm:$0xff]  ;;  %v11526_v18 = vpop.f32.mrf.mxu2  ;;  %v1185_v25 = vld [vmem:[#allocation2 + $0xc60] sm:$0xff] }
 0x25f   : > { %7493 = vst.msk [vmem:[%s10192_s12 + $0x840] sm:$0xff] %vm276_vm3, %v6981_v6  ;;  %v6726_v29 = vadd.f32 %v11194_v37, %v6210_v11  ;;  %v6338_v28 = vld [vmem:[#allocation2 + $0x448] sm:$0xff] }
 0x260   : > { %7621 = vst.msk [vmem:[%s10192_s12 + $0xc40] sm:$0xff] %vm276_vm3, %v7109_v26  ;;  %v6854_v31 = vadd.f32 %v11194_v37, %v6338_v28  ;;  %v6466_v38 = vld [vmem:[#allocation2 + $0x848] sm:$0xff]  ;;  %v11528_v21 = vpop.f32.mrf.mxu3 }
 0x261   : > { %7238 = vst.msk [vmem:[%s10192_s12 + $0x48] sm:$0xff] %vm276_vm3, %v6726_v29  ;;  %v6982_v40 = vadd.f32 %v11194_v37, %v6466_v38  ;;  %v6594_v41 = vld [vmem:[#allocation2 + $0xc48] sm:$0xff]  ;;  %v9523_v38 = vld [vmem:[%s10011_s7 + $0x280] sm:$0xff] }
 0x262   : > { %7366 = vst.msk [vmem:[%s10192_s12 + $0x448] sm:$0xff] %vm276_vm3, %v6854_v31  ;;  %v7110_v49 = vadd.f32 %v11194_v37, %v6594_v41  ;;  %v6211_v50 = vld [vmem:[#allocation2 + $0x50] sm:$0xff]  ;;  %v802_v10 = vld [vmem:[#allocation2 + $0x68] sm:$0xff]  ;;  %v9459_v31 = vld [vmem:[%s10011_s7 + $0x80] sm:$0xff]  ;;  %9250 = vmatmul.msk.bf16.gmra.mxu1 %vm3108_vm2, %v9523_v38 }
 0x263   : > { %7494 = vst.msk [vmem:[%s10192_s12 + $0x848] sm:$0xff] %vm276_vm3, %v6982_v40  ;;  %v6727_v53 = vadd.f32 %v11194_v37, %v6211_v50  ;;  %v930_v26 = vld [vmem:[#allocation2 + $0x468] sm:$0xff]  ;;  %v11538_v29 = vpop.f32.mrf.mxu1  ;;  %v9587_v41 = vld [vmem:[%s10011_s7 + $0x480] sm:$0xff] }
 0x264   : > { %7622 = vst.msk [vmem:[%s10192_s12 + $0xc48] sm:$0xff] %vm276_vm3, %v7110_v49  ;;  %v5314_v58 = vadd.f32 %v11444_v24, %v930_v26 }
 0x265   : > { %7239 = vst.msk [vmem:[%s10192_s12 + $0x50] sm:$0xff] %vm276_vm3, %v6727_v53  ;;  %v11510_v16 = vpop.f32.mrf.mxu0  ;;  %9186 = vmatmul.msk.bf16.gmra.mxu0 %vm3108_vm2, %v9459_v31  ;;  %9314 = vmatmul.msk.bf16.gmra.mxu2 %vm3108_vm2, %v9587_v41 }
 0x266   : > { %5824 = vst.msk [vmem:[#allocation2 + $0x450] sm:$0xff] %vm276_vm3, %v5311_v51  ;;  %v5569_v51 = vadd.f32 %v11436_v56, %v1185_v25  ;;  %v5442_v56 = vadd.f32 %v11464_v45, %v1058_v52  ;;  %v11568_v3 = vpop.f32.mrf.mxu2  ;;  %v5315_v45 = vadd.f32 %v11478_v62, %v931_v0  ;;  %v932_v25 = vld [vmem:[#allocation2 + $0x478] sm:$0xff]  ;;  %v934_v0 = vld [vmem:[#allocation2 + $0x488] sm:$0xff] }
 0x267   : > { %5952 = vst.msk [vmem:[#allocation2 + $0x850] sm:$0xff] %vm276_vm3, %v5439_v54  ;;  %v5186_v54 = vadd.f32 %v11442_v5, %v802_v10  ;;  %9378 = vmatmul.msk.bf16.gmra.mxu3 %vm3108_vm2, %v9651_v42  ;;  %v5570_v5 = vadd.f32 %v11466_v48, %v1186_v57  ;;  %v5571_v48 = vadd.f32 %v11504_v46, %v1187_v27  ;;  %v1060_v10 = vld [vmem:[#allocation2 + $0x878] sm:$0xff]  ;;  %v805_v42 = vld [vmem:[#allocation2 + $0x80] sm:$0xff] }
 0x268   : > { %6080 = vst.msk [vmem:[#allocation2 + $0xc50] sm:$0xff] %vm276_vm3, %v5567_v63  ;;  %v803_v63 = vld [vmem:[#allocation2 + $0x70] sm:$0xff]  ;;  %v11570_v4 = vpop.f32.mrf.mxu3  ;;  %v5316_v41 = vadd.f32 %v11512_v17, %v932_v25  ;;  %v1061_v57 = vld [vmem:[#allocation2 + $0x880] sm:$0xff] }
 0x269   : > { %5697 = vst.msk [vmem:[#allocation2 + $0x58] sm:$0xff] %vm276_vm3, %v5184_v7  ;;  %v1059_v7 = vld [vmem:[#allocation2 + $0x870] sm:$0xff]  ;;  %v5187_v24 = vadd.f32 %v11476_v61, %v803_v63  ;;  %v5188_v61 = vadd.f32 %v11510_v16, %v804_v14  ;;  %v11712_v25 = vld [vmem:[%s15225_s2] ss:$0 sm:$0xff] }
 0x26a   : > { %5825 = vst.msk [vmem:[#allocation2 + $0x458] sm:$0xff] %vm276_vm3, %v5312_v35 }
 0x26b   : > { %5953 = vst.msk [vmem:[#allocation2 + $0x858] sm:$0xff] %vm276_vm3, %v5440_v36  ;;  %v11578_v35 = vpop.f32.mrf.mxu1  ;;  %v5443_v36 = vadd.f32 %v11502_v1, %v1059_v7 }
 0x26c   : > { %6081 = vst.msk [vmem:[#allocation2 + $0xc58] sm:$0xff] %vm276_vm3, %v5568_v43 }
 0x26d   : > { %v6339_v59 = vld [vmem:[#allocation2 + $0x450] sm:$0xff]  ;;  %5698 = vst.msk [vmem:[#allocation2 + $0x60] sm:$0xff] %vm276_vm3, %v5185_v44  ;;  %v11536_v11 = vpop.f32.mrf.mxu0 }
 0x26e   : > { %v6855_v47 = vadd.f32 %v11194_v37, %v6339_v59  ;;  %v6467_v60 = vld [vmem:[#allocation2 + $0x850] sm:$0xff]  ;;  %5826 = vst.msk [vmem:[#allocation2 + $0x460] sm:$0xff] %vm276_vm3, %v5313_v8  ;;  %v11590_v62 = vpop.f32.mrf.mxu2  ;;  %v5189_v17 = vadd.f32 %v11536_v11, %v805_v42 }
 0x26f   : > { %v6983_v15 = vadd.f32 %v11194_v37, %v6467_v60  ;;  %v6595_v2 = vld [vmem:[#allocation2 + $0xc50] sm:$0xff]  ;;  %5954 = vst.msk [vmem:[#allocation2 + $0x860] sm:$0xff] %vm276_vm3, %v5441_v13  ;;  %v9524_v60 = vld [vmem:[%s10011_s7 + $0x288] sm:$0xff] }
 0x270   : > { %7367 = vst.msk [vmem:[%s10192_s12 + $0x450] sm:$0xff] %vm276_vm3, %v6855_v47  ;;  %v7111_v9 = vadd.f32 %v11194_v37, %v6595_v2  ;;  %v6212_v12 = vld [vmem:[#allocation2 + $0x58] sm:$0xff]  ;;  %v11592_v43 = vpop.f32.mrf.mxu3  ;;  %v9460_v47 = vld [vmem:[%s10011_s7 + $0x88] sm:$0xff] }
 0x271   : > { %7495 = vst.msk [vmem:[%s10192_s12 + $0x850] sm:$0xff] %vm276_vm3, %v6983_v15  ;;  %v6728_v55 = vadd.f32 %v11194_v37, %v6212_v12  ;;  %v6340_v20 = vld [vmem:[#allocation2 + $0x458] sm:$0xff]  ;;  %v9652_v12 = vld [vmem:[%s10011_s7 + $0x688] sm:$0xff] }
 0x272   : > { %7623 = vst.msk [vmem:[%s10192_s12 + $0xc50] sm:$0xff] %vm276_vm3, %v7111_v9  ;;  %v6856_v19 = vadd.f32 %v11194_v37, %v6340_v20  ;;  %v6468_v22 = vld [vmem:[#allocation2 + $0x858] sm:$0xff]  ;;  %v9588_v9 = vld [vmem:[%s10011_s7 + $0x488] sm:$0xff]  ;;  %9251 = vmatmul.msk.bf16.gmra.mxu1 %vm3108_vm2, %v9524_v60 }
 0x273   : > { %7240 = vst.msk [vmem:[%s10192_s12 + $0x58] sm:$0xff] %vm276_vm3, %v6728_v55  ;;  %v6984_v23 = vadd.f32 %v11194_v37, %v6468_v22  ;;  %v6596_v6 = vld [vmem:[#allocation2 + $0xc58] sm:$0xff]  ;;  %v11600_v13 = vpop.f32.mrf.mxu1 }
 0x274   : > { %7368 = vst.msk [vmem:[%s10192_s12 + $0x458] sm:$0xff] %vm276_vm3, %v6856_v19  ;;  %v7112_v28 = vadd.f32 %v11194_v37, %v6596_v6  ;;  %v6213_v30 = vld [vmem:[#allocation2 + $0x60] sm:$0xff] }
 0x275   : > { %7496 = vst.msk [vmem:[%s10192_s12 + $0x858] sm:$0xff] %vm276_vm3, %v6984_v23  ;;  %v6729_v39 = vadd.f32 %v11194_v37, %v6213_v30  ;;  %v6341_v40 = vld [vmem:[#allocation2 + $0x460] sm:$0xff]  ;;  %v11576_v32 = vpop.f32.mrf.mxu0  ;;  %9187 = vmatmul.msk.bf16.gmra.mxu0 %vm3108_vm2, %v9460_v47  ;;  %9315 = vmatmul.msk.bf16.gmra.mxu2 %vm3108_vm2, %v9588_v9  ;;  %v1188_v30 = vld [vmem:[#allocation2 + $0xc78] sm:$0xff]  ;;  %v1190_v9 = vld [vmem:[#allocation2 + $0xc88] sm:$0xff] }
 0x276   : > { %7624 = vst.msk [vmem:[%s10192_s12 + $0xc58] sm:$0xff] %vm276_vm3, %v7112_v28  ;;  %v6857_v49 = vadd.f32 %v11194_v37, %v6341_v40  ;;  %v6469_v50 = vld [vmem:[#allocation2 + $0x860] sm:$0xff]  ;;  %v11628_v31 = vpop.f32.mrf.mxu2 }
 0x277   : > { %7241 = vst.msk [vmem:[%s10192_s12 + $0x60] sm:$0xff] %vm276_vm3, %v6729_v39  ;;  %v6985_v53 = vadd.f32 %v11194_v37, %v6469_v50  ;;  %9379 = vmatmul.msk.bf16.gmra.mxu3 %vm3108_vm2, %v9652_v12  ;;  %v5444_v50 = vadd.f32 %v11526_v18, %v1060_v10  ;;  %v806_v18 = vld [vmem:[#allocation2 + $0x88] sm:$0xff]  ;;  %v935_v10 = vld [vmem:[#allocation2 + $0x490] sm:$0xff] }
 0x278   : > { %7369 = vst.msk [vmem:[%s10192_s12 + $0x460] sm:$0xff] %vm276_vm3, %v6857_v49  ;;  %v11630_v38 = vpop.f32.mrf.mxu3  ;;  %v5190_v11 = vadd.f32 %v11576_v32, %v806_v18  ;;  %v9461_v32 = vld [vmem:[%s10011_s7 + $0x90] sm:$0xff]  ;;  %v5319_v42 = vadd.f32 %v11600_v13, %v935_v10 }
 0x279   : > { %7497 = vst.msk [vmem:[%s10192_s12 + $0x860] sm:$0xff] %vm276_vm3, %v6985_v53 }
 0x27a   : > { %6082 = vst.msk [vmem:[#allocation2 + $0xc60] sm:$0xff] %vm276_vm3, %v5569_v51  ;;  %v933_v51 = vld [vmem:[#allocation2 + $0x480] sm:$0xff] }
 0x27b   : > { %5699 = vst.msk [vmem:[#allocation2 + $0x68] sm:$0xff] %vm276_vm3, %v5186_v54  ;;  %v11642_v53 = vpop.f32.mrf.mxu1  ;;  %v5572_v54 = vadd.f32 %v11528_v21, %v1188_v30  ;;  %v5317_v63 = vadd.f32 %v11538_v29, %v933_v51  ;;  %v1063_v30 = vld [vmem:[#allocation2 + $0x890] sm:$0xff] }
 0x27c   : > { %5827 = vst.msk [vmem:[#allocation2 + $0x468] sm:$0xff] %vm276_vm3, %v5314_v58  ;;  %v1189_v58 = vld [vmem:[#allocation2 + $0xc80] sm:$0xff] }
 0x27d   : > { %5955 = vst.msk [vmem:[#allocation2 + $0x868] sm:$0xff] %vm276_vm3, %v5442_v56  ;;  %v11598_v8 = vpop.f32.mrf.mxu0  ;;  %v5445_v56 = vadd.f32 %v11568_v3, %v1061_v57  ;;  %v5573_v21 = vadd.f32 %v11570_v4, %v1189_v58  ;;  %v5318_v3 = vadd.f32 %v11578_v35, %v934_v0  ;;  %v1064_v57 = vld [vmem:[#allocation2 + $0x898] sm:$0xff]  ;;  %v809_v58 = vld [vmem:[#allocation2 + $0xa0] sm:$0xff] }
 0x27e   : > { %6083 = vst.msk [vmem:[#allocation2 + $0xc68] sm:$0xff] %vm276_vm3, %v5570_v5  ;;  %v1062_v5 = vld [vmem:[#allocation2 + $0x888] sm:$0xff]  ;;  %v11658_v7 = vpop.f32.mrf.mxu2  ;;  %v9526_v0 = vld [vmem:[%s10011_s7 + $0x298] sm:$0xff] }
 0x27f   : > { %5700 = vst.msk [vmem:[#allocation2 + $0x70] sm:$0xff] %vm276_vm3, %v5187_v24  ;;  %v5446_v24 = vadd.f32 %v11590_v62, %v1062_v5  ;;  %v9654_v5 = vld [vmem:[%s10011_s7 + $0x698] sm:$0xff] }
 0x280   : > { %5828 = vst.msk [vmem:[#allocation2 + $0x470] sm:$0xff] %vm276_vm3, %v5315_v45  ;;  %v11660_v29 = vpop.f32.mrf.mxu3  ;;  %v9525_v45 = vld [vmem:[%s10011_s7 + $0x290] sm:$0xff] }
 0x281   : > { %v6597_v34 = vld [vmem:[#allocation2 + $0xc60] sm:$0xff]  ;;  %5956 = vst.msk [vmem:[#allocation2 + $0x870] sm:$0xff] %vm276_vm3, %v5443_v36  ;;  %v9589_v36 = vld [vmem:[%s10011_s7 + $0x490] sm:$0xff] }
 0x282   : > { %v7113_v33 = vadd.f32 %v11194_v37, %v6597_v34  ;;  %v6214_v44 = vld [vmem:[#allocation2 + $0x68] sm:$0xff]  ;;  %6084 = vst.msk [vmem:[#allocation2 + $0xc70] sm:$0xff] %vm276_vm3, %v5571_v48  ;;  %9252 = vmatmul.msk.bf16.gmra.mxu1 %vm3108_vm2, %v9525_v45 }
 0x283   : > { %v6730_v1 = vadd.f32 %v11194_v37, %v6214_v44  ;;  %v6342_v46 = vld [vmem:[#allocation2 + $0x468] sm:$0xff]  ;;  %5701 = vst.msk [vmem:[#allocation2 + $0x78] sm:$0xff] %vm276_vm3, %v5188_v61  ;;  %v11668_v27 = vpop.f32.mrf.mxu1  ;;  %v9653_v61 = vld [vmem:[%s10011_s7 + $0x690] sm:$0xff] }
 0x284   : > { %7625 = vst.msk [vmem:[%s10192_s12 + $0xc60] sm:$0xff] %vm276_vm3, %v7113_v33  ;;  %v6858_v16 = vadd.f32 %v11194_v37, %v6342_v46  ;;  %v6470_v59 = vld [vmem:[#allocation2 + $0x868] sm:$0xff] }
 0x285   : > { %7242 = vst.msk [vmem:[%s10192_s12 + $0x68] sm:$0xff] %vm276_vm3, %v6730_v1  ;;  %v6986_v15 = vadd.f32 %v11194_v37, %v6470_v59  ;;  %v6598_v2 = vld [vmem:[#allocation2 + $0xc68] sm:$0xff]  ;;  %v11640_v52 = vpop.f32.mrf.mxu0  ;;  %9188 = vmatmul.msk.bf16.gmra.mxu0 %vm3108_vm2, %v9461_v32  ;;  %9316 = vmatmul.msk.bf16.gmra.mxu2 %vm3108_vm2, %v9589_v36 }
 0x286   : > { %7370 = vst.msk [vmem:[%s10192_s12 + $0x468] sm:$0xff] %vm276_vm3, %v6858_v16  ;;  %v7114_v55 = vadd.f32 %v11194_v37, %v6598_v2  ;;  %v6215_v20 = vld [vmem:[#allocation2 + $0x70] sm:$0xff]  ;;  %v11690_v16 = vpop.f32.mrf.mxu2 }
 0x287   : > { %7498 = vst.msk [vmem:[%s10192_s12 + $0x868] sm:$0xff] %vm276_vm3, %v6986_v15  ;;  %v6731_v19 = vadd.f32 %v11194_v37, %v6215_v20  ;;  %v6343_v22 = vld [vmem:[#allocation2 + $0x470] sm:$0xff]  ;;  %9380 = vmatmul.msk.bf16.gmra.mxu3 %vm3108_vm2, %v9653_v61 }
 0x288   : > { %7626 = vst.msk [vmem:[%s10192_s12 + $0xc68] sm:$0xff] %vm276_vm3, %v7114_v55  ;;  %v6859_v23 = vadd.f32 %v11194_v37, %v6343_v22  ;;  %v6471_v6 = vld [vmem:[#allocation2 + $0x870] sm:$0xff]  ;;  %v11692_v59 = vpop.f32.mrf.mxu3 }
 0x289   : > { %7243 = vst.msk [vmem:[%s10192_s12 + $0x70] sm:$0xff] %vm276_vm3, %v6731_v19  ;;  %v6987_v26 = vadd.f32 %v11194_v37, %v6471_v6  ;;  %v6599_v28 = vld [vmem:[#allocation2 + $0xc70] sm:$0xff] }
 0x28a   : > { %7371 = vst.msk [vmem:[%s10192_s12 + $0x470] sm:$0xff] %vm276_vm3, %v6859_v23  ;;  %v7115_v39 = vadd.f32 %v11194_v37, %v6599_v28  ;;  %v6216_v40 = vld [vmem:[#allocation2 + $0x78] sm:$0xff]  ;;  %v807_v22 = vld [vmem:[#allocation2 + $0x90] sm:$0xff]  ;;  %v5574_v28 = vadd.f32 %v11592_v43, %v1190_v9  ;;  %v1193_v9 = vld [vmem:[#allocation2 + $0xca0] sm:$0xff] }
 0x28b   : > { %7499 = vst.msk [vmem:[%s10192_s12 + $0x870] sm:$0xff] %vm276_vm3, %v6987_v26  ;;  %v6732_v49 = vadd.f32 %v11194_v37, %v6216_v40  ;;  %v11702_v55 = vpop.f32.mrf.mxu1  ;;  %v5191_v40 = vadd.f32 %v11598_v8, %v807_v22  ;;  %v936_v43 = vld [vmem:[#allocation2 + $0x498] sm:$0xff] }
 0x28c   : > { %7627 = vst.msk [vmem:[%s10192_s12 + $0xc70] sm:$0xff] %vm276_vm3, %v7115_v39  ;;  %v5320_v18 = vadd.f32 %v11642_v53, %v936_v43  ;;  %v1194_v43 = vld [vmem:[#allocation2 + $0xca8] sm:$0xff] }
 0x28d   : > { %7244 = vst.msk [vmem:[%s10192_s12 + $0x78] sm:$0xff] %vm276_vm3, %v6732_v49  ;;  %v11666_v4 = vpop.f32.mrf.mxu0  ;;  %v808_v49 = vld [vmem:[#allocation2 + $0x98] sm:$0xff] }
 0x28e   : > { %5829 = vst.msk [vmem:[#allocation2 + $0x478] sm:$0xff] %vm276_vm3, %v5316_v41  ;;  %v1191_v41 = vld [vmem:[#allocation2 + $0xc90] sm:$0xff]  ;;  %v11729_v51 = vpop.f32.mrf.mxu2  ;;  %v5192_v13 = vadd.f32 %v11640_v52, %v808_v49  ;;  %v5193_v53 = vadd.f32 %v11666_v4, %v809_v58  ;;  %v9591_v49 = vld [vmem:[%s10011_s7 + $0x4a0] sm:$0xff] }
 0x28f   : > { %5957 = vst.msk [vmem:[#allocation2 + $0x878] sm:$0xff] %vm276_vm3, %v5444_v50  ;;  %v5447_v50 = vadd.f32 %v11628_v31, %v1063_v30  ;;  %v5575_v8 = vadd.f32 %v11630_v38, %v1191_v41  ;;  %v5448_v38 = vadd.f32 %v11658_v7, %v1064_v57  ;;  %v1066_v30 = vld [vmem:[#allocation2 + $0x8a8] sm:$0xff]  ;;  %v9463_v41 = vld [vmem:[%s10011_s7 + $0xa0] sm:$0xff]  ;;  %v811_v57 = vld [vmem:[#allocation2 + $0xb0] sm:$0xff] }
 0x290   : > { %6085 = vst.msk [vmem:[#allocation2 + $0xc78] sm:$0xff] %vm276_vm3, %v5572_v54  ;;  %v11731_v54 = vpop.f32.mrf.mxu3 }
 0x291   : > { %5702 = vst.msk [vmem:[#allocation2 + $0x80] sm:$0xff] %vm276_vm3, %v5189_v17  ;;  %v1192_v17 = vld [vmem:[#allocation2 + $0xc98] sm:$0xff] }
 0x292   : > { %5830 = vst.msk [vmem:[#allocation2 + $0x480] sm:$0xff] %vm276_vm3, %v5317_v63  ;;  %v5576_v52 = vadd.f32 %v11660_v29, %v1192_v17  ;;  %9253 = vmatmul.msk.bf16.gmra.mxu1 %vm3108_vm2, %v9526_v0  ;;  %v1067_v17 = vld [vmem:[#allocation2 + $0x8b0] sm:$0xff] }
 0x293   : > { %5958 = vst.msk [vmem:[#allocation2 + $0x880] sm:$0xff] %vm276_vm3, %v5445_v56  ;;  %v11739_v63 = vpop.f32.mrf.mxu1  ;;  %v9462_v56 = vld [vmem:[%s10011_s7 + $0x98] sm:$0xff] }
 0x294   : > { %6086 = vst.msk [vmem:[#allocation2 + $0xc80] sm:$0xff] %vm276_vm3, %v5573_v21  ;;  %v9590_v21 = vld [vmem:[%s10011_s7 + $0x498] sm:$0xff] }
 0x295   : > { %v6344_v14 = vld [vmem:[#allocation2 + $0x478] sm:$0xff]  ;;  %5703 = vst.msk [vmem:[#allocation2 + $0x88] sm:$0xff] %vm276_vm3, %v5190_v11  ;;  %v11700_v12 = vpop.f32.mrf.mxu0  ;;  %9189 = vmatmul.msk.bf16.gmra.mxu0 %vm3108_vm2, %v9462_v56  ;;  %9317 = vmatmul.msk.bf16.gmra.mxu2 %vm3108_vm2, %v9590_v21 }
 0x296   : > { %v6860_v35 = vadd.f32 %v11194_v37, %v6344_v14  ;;  %v6472_v48 = vld [vmem:[#allocation2 + $0x878] sm:$0xff]  ;;  %5831 = vst.msk [vmem:[#allocation2 + $0x488] sm:$0xff] %vm276_vm3, %v5318_v3  ;;  %v11761_v3 = vpop.f32.mrf.mxu2 }
 0x297   : > { %v6988_v34 = vadd.f32 %v11194_v37, %v6472_v48  ;;  %v6600_v62 = vld [vmem:[#allocation2 + $0xc78] sm:$0xff]  ;;  %5959 = vst.msk [vmem:[#allocation2 + $0x888] sm:$0xff] %vm276_vm3, %v5446_v24  ;;  %9381 = vmatmul.msk.bf16.gmra.mxu3 %vm3108_vm2, %v9654_v5 }
 0x298   : > { %7372 = vst.msk [vmem:[%s10192_s12 + $0x478] sm:$0xff] %vm276_vm3, %v6860_v35  ;;  %v7116_v33 = vadd.f32 %v11194_v37, %v6600_v62  ;;  %v6217_v44 = vld [vmem:[#allocation2 + $0x80] sm:$0xff]  ;;  %v11763_v24 = vpop.f32.mrf.mxu3 }
 0x299   : > { %7500 = vst.msk [vmem:[%s10192_s12 + $0x878] sm:$0xff] %vm276_vm3, %v6988_v34  ;;  %v6733_v1 = vadd.f32 %v11194_v37, %v6217_v44  ;;  %v6345_v46 = vld [vmem:[#allocation2 + $0x480] sm:$0xff] }
 0x29a   : > { %7628 = vst.msk [vmem:[%s10192_s12 + $0xc78] sm:$0xff] %vm276_vm3, %v7116_v33  ;;  %v6861_v47 = vadd.f32 %v11194_v37, %v6345_v46  ;;  %v6473_v60 = vld [vmem:[#allocation2 + $0x880] sm:$0xff] }
 0x29b   : > { %7245 = vst.msk [vmem:[%s10192_s12 + $0x80] sm:$0xff] %vm276_vm3, %v6733_v1  ;;  %v6989_v15 = vadd.f32 %v11194_v37, %v6473_v60  ;;  %v6601_v2 = vld [vmem:[#allocation2 + $0xc80] sm:$0xff]  ;;  %v11769_v14 = vpop.f32.mrf.mxu1 }
 0x29c   : > { %7373 = vst.msk [vmem:[%s10192_s12 + $0x480] sm:$0xff] %vm276_vm3, %v6861_v47  ;;  %v7117_v20 = vadd.f32 %v11194_v37, %v6601_v2  ;;  %v6218_v19 = vld [vmem:[#allocation2 + $0x88] sm:$0xff]  ;;  %v937_v1 = vld [vmem:[#allocation2 + $0x4a0] sm:$0xff] }
 0x29d   : > { %7501 = vst.msk [vmem:[%s10192_s12 + $0x880] sm:$0xff] %vm276_vm3, %v6989_v15  ;;  %v6734_v23 = vadd.f32 %v11712_v25, %v6218_v19  ;;  %v6346_v6 = vld [vmem:[#allocation2 + $0x488] sm:$0xff]  ;;  %v11737_v31 = vpop.f32.mrf.mxu0  ;;  %v1065_v60 = vld [vmem:[#allocation2 + $0x8a0] sm:$0xff]  ;;  %v5321_v22 = vadd.f32 %v11668_v27, %v937_v1  ;;  %v5577_v27 = vadd.f32 %v11692_v59, %v1193_v9  ;;  %v5450_v59 = vadd.f32 %v11729_v51, %v1066_v30 }
 0x29e   : > { %7629 = vst.msk [vmem:[%s10192_s12 + $0xc80] sm:$0xff] %vm276_vm3, %v7117_v20  ;;  %v6862_v26 = vadd.f32 %v11712_v25, %v6346_v6  ;;  %v6474_v37 = vld [vmem:[#allocation2 + $0x888] sm:$0xff]  ;;  %v11793_v6 = vpop.f32.mrf.mxu2 }
 0x29f   : > { %7246 = vst.msk [vmem:[%s10192_s12 + $0x88] sm:$0xff] %vm276_vm3, %v6734_v23  ;;  %v6990_v39 = vadd.f32 %v11712_v25, %v6474_v37  ;;  %v810_v23 = vld [vmem:[#allocation2 + $0xa8] sm:$0xff]  ;;  %v5449_v37 = vadd.f32 %v11690_v16, %v1065_v60 }
 0x2a0   : > { %7374 = vst.msk [vmem:[%s10192_s12 + $0x488] sm:$0xff] %vm276_vm3, %v6862_v26  ;;  %v11795_v10 = vpop.f32.mrf.mxu3  ;;  %v9656_v9 = vld [vmem:[%s10011_s7 + $0x6a8] sm:$0xff] }
 0x2a1   : > { %7502 = vst.msk [vmem:[%s10192_s12 + $0x888] sm:$0xff] %vm276_vm3, %v6990_v39 }
 0x2a2   : > { %6087 = vst.msk [vmem:[#allocation2 + $0xc88] sm:$0xff] %vm276_vm3, %v5574_v28  ;;  %v938_v28 = vld [vmem:[#allocation2 + $0x4a8] sm:$0xff] }
 0x2a3   : > { %5704 = vst.msk [vmem:[#allocation2 + $0x90] sm:$0xff] %vm276_vm3, %v5191_v40  ;;  %v11803_v40 = vpop.f32.mrf.mxu1  ;;  %v5322_v16 = vadd.f32 %v11702_v55, %v938_v28  ;;  %v5195_v55 = vadd.f32 %v11737_v31, %v811_v57  ;;  %v1196_v28 = vld [vmem:[#allocation2 + $0xcb8] sm:$0xff] }
 0x2a4   : > { %5832 = vst.msk [vmem:[#allocation2 + $0x490] sm:$0xff] %vm276_vm3, %v5319_v42  ;;  %v9527_v42 = vld [vmem:[%s10011_s7 + $0x2a0] sm:$0xff] }
 0x2a5   : > { %5960 = vst.msk [vmem:[#allocation2 + $0x890] sm:$0xff] %vm276_vm3, %v5447_v50  ;;  %v11767_v45 = vpop.f32.mrf.mxu0  ;;  %v5194_v50 = vadd.f32 %v11700_v12, %v810_v23  ;;  %9190 = vmatmul.msk.bf16.gmra.mxu0 %vm3108_vm2, %v9463_v41  ;;  %9254 = vmatmul.msk.bf16.gmra.mxu1 %vm3108_vm2, %v9527_v42  ;;  %v5578_v12 = vadd.f32 %v11731_v54, %v1194_v43  ;;  %v1068_v23 = vld [vmem:[#allocation2 + $0x8b8] sm:$0xff]  ;;  %v941_v41 = vld [vmem:[#allocation2 + $0x4c0] sm:$0xff] }
 0x2a6   : > { %6088 = vst.msk [vmem:[#allocation2 + $0xc90] sm:$0xff] %vm276_vm3, %v5575_v8  ;;  %v9655_v8 = vld [vmem:[%s10011_s7 + $0x6a0] sm:$0xff]  ;;  %9318 = vmatmul.msk.bf16.gmra.mxu2 %vm3108_vm2, %v9591_v49  ;;  %v11829_v51 = vpop.f32.mrf.mxu2  ;;  %v5451_v54 = vadd.f32 %v11761_v3, %v1067_v17  ;;  %v5580_v42 = vadd.f32 %v11795_v10, %v1196_v28 }
 0x2a7   : > { %5705 = vst.msk [vmem:[#allocation2 + $0x98] sm:$0xff] %vm276_vm3, %v5192_v13  ;;  %v939_v13 = vld [vmem:[#allocation2 + $0x4b0] sm:$0xff]  ;;  %9382 = vmatmul.msk.bf16.gmra.mxu3 %vm3108_vm2, %v9655_v8 }
 0x2a8   : > { %5833 = vst.msk [vmem:[#allocation2 + $0x498] sm:$0xff] %vm276_vm3, %v5320_v18  ;;  %v5323_v58 = vadd.f32 %v11739_v63, %v939_v13  ;;  %v11831_v18 = vpop.f32.mrf.mxu3 }
 0x2a9   : > { %v6602_v11 = vld [vmem:[#allocation2 + $0xc88] sm:$0xff]  ;;  %5961 = vst.msk [vmem:[#allocation2 + $0x898] sm:$0xff] %vm276_vm3, %v5448_v38 }
 0x2aa   : > { %v7118_v7 = vadd.f32 %v11712_v25, %v6602_v11  ;;  %v6219_v29 = vld [vmem:[#allocation2 + $0x90] sm:$0xff]  ;;  %6089 = vst.msk [vmem:[#allocation2 + $0xc98] sm:$0xff] %vm276_vm3, %v5576_v52 }
 0x2ab   : > { %v6735_v4 = vadd.f32 %v11712_v25, %v6219_v29  ;;  %v6347_v32 = vld [vmem:[#allocation2 + $0x490] sm:$0xff]  ;;  %5706 = vst.msk [vmem:[#allocation2 + $0xa0] sm:$0xff] %vm276_vm3, %v5193_v53  ;;  %v11837_v0 = vpop.f32.mrf.mxu1 }
 0x2ac   : > { %7630 = vst.msk [vmem:[%s10192_s12 + $0xc88] sm:$0xff] %vm276_vm3, %v7118_v7  ;;  %v6863_v36 = vadd.f32 %v11712_v25, %v6347_v32  ;;  %v6475_v35 = vld [vmem:[#allocation2 + $0x890] sm:$0xff] }
 0x2ad   : > { %7247 = vst.msk [vmem:[%s10192_s12 + $0x90] sm:$0xff] %vm276_vm3, %v6735_v4  ;;  %v6991_v48 = vadd.f32 %v11712_v25, %v6475_v35  ;;  %v6603_v61 = vld [vmem:[#allocation2 + $0xc90] sm:$0xff]  ;;  %v11801_v39 = vpop.f32.mrf.mxu0 }
 0x2ae   : > { %7375 = vst.msk [vmem:[%s10192_s12 + $0x490] sm:$0xff] %vm276_vm3, %v6863_v36  ;;  %v7119_v34 = vadd.f32 %v11712_v25, %v6603_v61  ;;  %v6220_v62 = vld [vmem:[#allocation2 + $0x98] sm:$0xff]  ;;  %v1195_v4 = vld [vmem:[#allocation2 + $0xcb0] sm:$0xff]  ;;  %v11854_v32 = vpop.f32.mrf.mxu2 }
 0x2af   : > { %7503 = vst.msk [vmem:[%s10192_s12 + $0x890] sm:$0xff] %vm276_vm3, %v6991_v48  ;;  %v6736_v33 = vadd.f32 %v11712_v25, %v6220_v62  ;;  %v6348_v44 = vld [vmem:[#allocation2 + $0x498] sm:$0xff] }
 0x2b0   : > { %7631 = vst.msk [vmem:[%s10192_s12 + $0xc90] sm:$0xff] %vm276_vm3, %v7119_v34  ;;  %v6864_v46 = vadd.f32 %v11712_v25, %v6348_v44  ;;  %v6476_v47 = vld [vmem:[#allocation2 + $0x898] sm:$0xff]  ;;  %v11856_v36 = vpop.f32.mrf.mxu3 }
 0x2b1   : > { %7248 = vst.msk [vmem:[%s10192_s12 + $0x98] sm:$0xff] %vm276_vm3, %v6736_v33  ;;  %v6992_v15 = vadd.f32 %v11712_v25, %v6476_v47  ;;  %v6604_v2 = vld [vmem:[#allocation2 + $0xc98] sm:$0xff]  ;;  %v9528_v47 = vld [vmem:[%s10011_s7 + $0x2a8] sm:$0xff] }
 0x2b2   : > { %7376 = vst.msk [vmem:[%s10192_s12 + $0x498] sm:$0xff] %vm276_vm3, %v6864_v46  ;;  %v7120_v20 = vadd.f32 %v11712_v25, %v6604_v2  ;;  %v6221_v19 = vld [vmem:[#allocation2 + $0xa0] sm:$0xff]  ;;  %v812_v61 = vld [vmem:[#allocation2 + $0xb8] sm:$0xff]  ;;  %v9464_v46 = vld [vmem:[%s10011_s7 + $0xa8] sm:$0xff] }
 0x2b3   : > { %7504 = vst.msk [vmem:[%s10192_s12 + $0x898] sm:$0xff] %vm276_vm3, %v6992_v15  ;;  %v6737_v26 = vadd.f32 %v11712_v25, %v6221_v19  ;;  %v940_v34 = vld [vmem:[#allocation2 + $0x4b8] sm:$0xff]  ;;  %v11863_v33 = vpop.f32.mrf.mxu1  ;;  %v9592_v2 = vld [vmem:[%s10011_s7 + $0x4a8] sm:$0xff] }
 0x2b4   : > { %7632 = vst.msk [vmem:[%s10192_s12 + $0xc98] sm:$0xff] %vm276_vm3, %v7120_v20  ;;  %v5324_v30 = vadd.f32 %v11769_v14, %v940_v34  ;;  %v1197_v14 = vld [vmem:[#allocation2 + $0xcc0] sm:$0xff] }
 0x2b5   : > { %7249 = vst.msk [vmem:[%s10192_s12 + $0xa0] sm:$0xff] %vm276_vm3, %v6737_v26  ;;  %v11835_v56 = vpop.f32.mrf.mxu0  ;;  %9191 = vmatmul.msk.bf16.gmra.mxu0 %vm3108_vm2, %v9464_v46  ;;  %9255 = vmatmul.msk.bf16.gmra.mxu1 %vm3108_vm2, %v9528_v47 }
 0x2b6   : > { %5834 = vst.msk [vmem:[#allocation2 + $0x4a0] sm:$0xff] %vm276_vm3, %v5321_v22  ;;  %v5579_v22 = vadd.f32 %v11763_v24, %v1195_v4  ;;  %9319 = vmatmul.msk.bf16.gmra.mxu2 %vm3108_vm2, %v9592_v2  ;;  %v5452_v24 = vadd.f32 %v11793_v6, %v1068_v23  ;;  %v11895_v49 = vpop.f32.mrf.mxu2  ;;  %v5325_v6 = vadd.f32 %v11803_v40, %v941_v41  ;;  %v942_v4 = vld [vmem:[#allocation2 + $0x4c8] sm:$0xff]  ;;  %v944_v41 = vld [vmem:[#allocation2 + $0x4d8] sm:$0xff] }
 0x2b7   : > { %5962 = vst.msk [vmem:[#allocation2 + $0x8a0] sm:$0xff] %vm276_vm3, %v5449_v37  ;;  %v5196_v37 = vadd.f32 %v11767_v45, %v812_v61  ;;  %9383 = vmatmul.msk.bf16.gmra.mxu3 %vm3108_vm2, %v9656_v9  ;;  %v1069_v45 = vld [vmem:[#allocation2 + $0x8c0] sm:$0xff]  ;;  %v1070_v61 = vld [vmem:[#allocation2 + $0x8c8] sm:$0xff] }
 0x2b8   : > { %6090 = vst.msk [vmem:[#allocation2 + $0xca0] sm:$0xff] %vm276_vm3, %v5577_v27  ;;  %v813_v27 = vld [vmem:[#allocation2 + $0xc0] sm:$0xff]  ;;  %v11899_v43 = vpop.f32.mrf.mxu3  ;;  %v5453_v10 = vadd.f32 %v11829_v51, %v1069_v45 }
 0x2b9   : > { %5707 = vst.msk [vmem:[#allocation2 + $0xa8] sm:$0xff] %vm276_vm3, %v5194_v50  ;;  %v5197_v50 = vadd.f32 %v11801_v39, %v813_v27  ;;  %v5581_v39 = vadd.f32 %v11831_v18, %v1197_v14  ;;  %v816_v27 = vld [vmem:[#allocation2 + $0xd8] sm:$0xff] }
 0x2ba   : > { %5835 = vst.msk [vmem:[#allocation2 + $0x4a8] sm:$0xff] %vm276_vm3, %v5322_v16  ;;  %v814_v16 = vld [vmem:[#allocation2 + $0xc8] sm:$0xff] }
 0x2bb   : > { %5963 = vst.msk [vmem:[#allocation2 + $0x8a8] sm:$0xff] %vm276_vm3, %v5450_v59  ;;  %v11905_v57 = vpop.f32.mrf.mxu1  ;;  %v5198_v59 = vadd.f32 %v11835_v56, %v814_v16 }
 0x2bc   : > { %6091 = vst.msk [vmem:[#allocation2 + $0xca8] sm:$0xff] %vm276_vm3, %v5578_v12 }
 0x2bd   : > { %v6349_v31 = vld [vmem:[#allocation2 + $0x4a0] sm:$0xff]  ;;  %5708 = vst.msk [vmem:[#allocation2 + $0xb0] sm:$0xff] %vm276_vm3, %v5195_v55  ;;  %v11861_v62 = vpop.f32.mrf.mxu0 }
 0x2be   : > { %v6865_v63 = vadd.f32 %v11712_v25, %v6349_v31  ;;  %v6477_v21 = vld [vmem:[#allocation2 + $0x8a0] sm:$0xff]  ;;  %5836 = vst.msk [vmem:[#allocation2 + $0x4b0] sm:$0xff] %vm276_vm3, %v5323_v58  ;;  %v11917_v17 = vpop.f32.mrf.mxu2 }
 0x2bf   : > { %v6993_v38 = vadd.f32 %v11712_v25, %v6477_v21  ;;  %v6605_v5 = vld [vmem:[#allocation2 + $0xca0] sm:$0xff]  ;;  %5964 = vst.msk [vmem:[#allocation2 + $0x8b0] sm:$0xff] %vm276_vm3, %v5451_v54  ;;  %v9529_v21 = vld [vmem:[%s10011_s7 + $0x2b0] sm:$0xff] }
 0x2c0   : > { %7377 = vst.msk [vmem:[%s10192_s12 + $0x4a0] sm:$0xff] %vm276_vm3, %v6865_v63  ;;  %v7121_v52 = vadd.f32 %v11712_v25, %v6605_v5  ;;  %v6222_v53 = vld [vmem:[#allocation2 + $0xa8] sm:$0xff]  ;;  %v11921_v51 = vpop.f32.mrf.mxu3  ;;  %v9465_v63 = vld [vmem:[%s10011_s7 + $0xb0] sm:$0xff] }
 0x2c1   : > { %7505 = vst.msk [vmem:[%s10192_s12 + $0x8a0] sm:$0xff] %vm276_vm3, %v6993_v38  ;;  %v6738_v11 = vadd.f32 %v11712_v25, %v6222_v53  ;;  %v6350_v7 = vld [vmem:[#allocation2 + $0x4a8] sm:$0xff]  ;;  %v9657_v53 = vld [vmem:[%s10011_s7 + $0x6b0] sm:$0xff] }
 0x2c2   : > { %7633 = vst.msk [vmem:[%s10192_s12 + $0xca0] sm:$0xff] %vm276_vm3, %v7121_v52  ;;  %v6866_v29 = vadd.f32 %v11712_v25, %v6350_v7  ;;  %v6478_v3 = vld [vmem:[#allocation2 + $0x8a8] sm:$0xff]  ;;  %v9593_v52 = vld [vmem:[%s10011_s7 + $0x4b0] sm:$0xff] }
 0x2c3   : > { %7250 = vst.msk [vmem:[%s10192_s12 + $0xa8] sm:$0xff] %vm276_vm3, %v6738_v11  ;;  %v6994_v35 = vadd.f32 %v11712_v25, %v6478_v3  ;;  %v6606_v48 = vld [vmem:[#allocation2 + $0xca8] sm:$0xff]  ;;  %v11928_v31 = vpop.f32.mrf.mxu1 }
 0x2c4   : > { %7378 = vst.msk [vmem:[%s10192_s12 + $0x4a8] sm:$0xff] %vm276_vm3, %v6866_v29  ;;  %v7122_v44 = vadd.f32 %v11712_v25, %v6606_v48  ;;  %v6223_v1 = vld [vmem:[#allocation2 + $0xb0] sm:$0xff] }
 0x2c5   : > { %7506 = vst.msk [vmem:[%s10192_s12 + $0x8a8] sm:$0xff] %vm276_vm3, %v6994_v35  ;;  %v6739_v60 = vadd.f32 %v11712_v25, %v6223_v1  ;;  %v6351_v15 = vld [vmem:[#allocation2 + $0x4b0] sm:$0xff]  ;;  %v11901_v8 = vpop.f32.mrf.mxu0  ;;  %9192 = vmatmul.msk.bf16.gmra.mxu0 %vm3108_vm2, %v9465_v63  ;;  %9256 = vmatmul.msk.bf16.gmra.mxu1 %vm3108_vm2, %v9529_v21  ;;  %v1198_v1 = vld [vmem:[#allocation2 + $0xcc8] sm:$0xff] }
 0x2c6   : > { %7634 = vst.msk [vmem:[%s10192_s12 + $0xca8] sm:$0xff] %vm276_vm3, %v7122_v44  ;;  %v6867_v20 = vadd.f32 %v11712_v25, %v6351_v15  ;;  %v6479_v19 = vld [vmem:[#allocation2 + $0x8b0] sm:$0xff]  ;;  %9320 = vmatmul.msk.bf16.gmra.mxu2 %vm3108_vm2, %v9593_v52 }
 0x2c7   : > { %7251 = vst.msk [vmem:[%s10192_s12 + $0xb0] sm:$0xff] %vm276_vm3, %v6739_v60  ;;  %v6995_v26 = vadd.f32 %v11712_v25, %v6479_v19  ;;  %9384 = vmatmul.msk.bf16.gmra.mxu3 %vm3108_vm2, %v9657_v53  ;;  %v5326_v60 = vadd.f32 %v11837_v0, %v942_v4  ;;  %v815_v15 = vld [vmem:[#allocation2 + $0xd0] sm:$0xff] }
 0x2c8   : > { %7379 = vst.msk [vmem:[%s10192_s12 + $0x4b0] sm:$0xff] %vm276_vm3, %v6867_v20  ;;  %v11957_v2 = vpop.f32.mrf.mxu2  ;;  %v5454_v20 = vadd.f32 %v11854_v32, %v1070_v61  ;;  %v943_v19 = vld [vmem:[#allocation2 + $0x4d0] sm:$0xff]  ;;  %v5199_v28 = vadd.f32 %v11861_v62, %v815_v15  ;;  %v5200_v62 = vadd.f32 %v11901_v8, %v816_v27  ;;  %v9466_v8 = vld [vmem:[%s10011_s7 + $0xb8] sm:$0xff] }
 0x2c9   : > { %7507 = vst.msk [vmem:[%s10192_s12 + $0x8b0] sm:$0xff] %vm276_vm3, %v6995_v26  ;;  %v5582_v26 = vadd.f32 %v11856_v36, %v1198_v1  ;;  %v5327_v32 = vadd.f32 %v11863_v33, %v943_v19  ;;  %v5328_v33 = vadd.f32 %v11905_v57, %v944_v41  ;;  %v9594_v57 = vld [vmem:[%s10011_s7 + $0x4b8] sm:$0xff]  ;;  %v1073_v1 = vld [vmem:[#allocation2 + $0x8e0] sm:$0xff] }
 0x2ca   : > { %6092 = vst.msk [vmem:[#allocation2 + $0xcb0] sm:$0xff] %vm276_vm3, %v5579_v22  ;;  %v11963_v22 = vpop.f32.mrf.mxu3  ;;  %v9595_v41 = vld [vmem:[%s10011_s7 + $0x4c0] sm:$0xff] }
 0x2cb   : > { %5709 = vst.msk [vmem:[#allocation2 + $0xb8] sm:$0xff] %vm276_vm3, %v5196_v37  ;;  %v1071_v37 = vld [vmem:[#allocation2 + $0x8d0] sm:$0xff]  ;;  %v11970_v0 = vpop.f32.mrf.mxu1 }
 0x2cc   : > { %5837 = vst.msk [vmem:[#allocation2 + $0x4b8] sm:$0xff] %vm276_vm3, %v5324_v30  ;;  %v1199_v30 = vld [vmem:[#allocation2 + $0xcd0] sm:$0xff] }
 0x2cd   : > { %5965 = vst.msk [vmem:[#allocation2 + $0x8b8] sm:$0xff] %vm276_vm3, %v5452_v24  ;;  %v11923_v18 = vpop.f32.mrf.mxu0  ;;  %v5455_v24 = vadd.f32 %v11895_v49, %v1071_v37  ;;  %v5583_v36 = vadd.f32 %v11899_v43, %v1199_v30  ;;  %v1202_v37 = vld [vmem:[#allocation2 + $0xce8] sm:$0xff] }
 0x2ce   : > { %6093 = vst.msk [vmem:[#allocation2 + $0xcb8] sm:$0xff] %vm276_vm3, %v5580_v42  ;;  %v1072_v42 = vld [vmem:[#allocation2 + $0x8d8] sm:$0xff] }
 0x2cf   : > { %5710 = vst.msk [vmem:[#allocation2 + $0xc0] sm:$0xff] %vm276_vm3, %v5197_v50  ;;  %v5456_v49 = vadd.f32 %v11917_v17, %v1072_v42 }
 0x2d0   : > { %5838 = vst.msk [vmem:[#allocation2 + $0x4c0] sm:$0xff] %vm276_vm3, %v5325_v6  ;;  %v11985_v45 = vpop.f32.mrf.mxu2  ;;  %v9530_v6 = vld [vmem:[%s10011_s7 + $0x2b8] sm:$0xff] }
 0x2d1   : > { %v6607_v40 = vld [vmem:[#allocation2 + $0xcb0] sm:$0xff]  ;;  %5966 = vst.msk [vmem:[#allocation2 + $0x8c0] sm:$0xff] %vm276_vm3, %v5453_v10 }
 0x2d2   : > { %v7123_v13 = vadd.f32 %v11712_v25, %v6607_v40  ;;  %v6224_v12 = vld [vmem:[#allocation2 + $0xb8] sm:$0xff]  ;;  %6094 = vst.msk [vmem:[#allocation2 + $0xcc0] sm:$0xff] %vm276_vm3, %v5581_v39  ;;  %v11989_v50 = vpop.f32.mrf.mxu3 }
 0x2d3   : > { %v6740_v55 = vadd.f32 %v11712_v25, %v6224_v12  ;;  %v6352_v58 = vld [vmem:[#allocation2 + $0x4b8] sm:$0xff]  ;;  %5711 = vst.msk [vmem:[#allocation2 + $0xc8] sm:$0xff] %vm276_vm3, %v5198_v59  ;;  %v11994_v43 = vpop.f32.mrf.mxu1  ;;  %v5586_v42 = vadd.f32 %v11989_v50, %v1202_v37  ;;  %v1077_v37 = vld [vmem:[#allocation2 + $0x900] sm:$0xff] }
 0x2d4   : > { %7635 = vst.msk [vmem:[%s10192_s12 + $0xcb0] sm:$0xff] %vm276_vm3, %v7123_v13  ;;  %v6868_v54 = vadd.f32 %v11712_v25, %v6352_v58  ;;  %v6480_v56 = vld [vmem:[#allocation2 + $0x8b8] sm:$0xff] }
 0x2d5   : > { %7252 = vst.msk [vmem:[%s10192_s12 + $0xb8] sm:$0xff] %vm276_vm3, %v6740_v55  ;;  %v6996_v38 = vadd.f32 %v11712_v25, %v6480_v56  ;;  %v6608_v5 = vld [vmem:[#allocation2 + $0xcb8] sm:$0xff]  ;;  %v11965_v23 = vpop.f32.mrf.mxu0  ;;  %9193 = vmatmul.msk.bf16.gmra.mxu0 %vm3108_vm2, %v9466_v8  ;;  %9257 = vmatmul.msk.bf16.gmra.mxu1 %vm3108_vm2, %v9530_v6 }
 0x2d6   : > { %7380 = vst.msk [vmem:[%s10192_s12 + $0x4b8] sm:$0xff] %vm276_vm3, %v6868_v54  ;;  %v7124_v11 = vadd.f32 %v11712_v25, %v6608_v5  ;;  %v6225_v7 = vld [vmem:[#allocation2 + $0xc0] sm:$0xff]  ;;  %v9658_v59 = vld [vmem:[%s10011_s7 + $0x6b8] sm:$0xff]  ;;  %9321 = vmatmul.msk.bf16.gmra.mxu2 %vm3108_vm2, %v9594_v57 }
 0x2d7   : > { %7508 = vst.msk [vmem:[%s10192_s12 + $0x8b8] sm:$0xff] %vm276_vm3, %v6996_v38  ;;  %v6741_v29 = vadd.f32 %v11712_v25, %v6225_v7  ;;  %v6353_v3 = vld [vmem:[#allocation2 + $0x4c0] sm:$0xff]  ;;  %9385 = vmatmul.msk.bf16.gmra.mxu3 %vm3108_vm2, %v9658_v59  ;;  %v1200_v5 = vld [vmem:[#allocation2 + $0xcd8] sm:$0xff] }
 0x2d8   : > { %7636 = vst.msk [vmem:[%s10192_s12 + $0xcb8] sm:$0xff] %vm276_vm3, %v7124_v11  ;;  %v6869_v35 = vadd.f32 %v11712_v25, %v6353_v3  ;;  %v6481_v48 = vld [vmem:[#allocation2 + $0x8c0] sm:$0xff]  ;;  %v12018_v63 = vpop.f32.mrf.mxu2 }
 0x2d9   : > { %7253 = vst.msk [vmem:[%s10192_s12 + $0xc0] sm:$0xff] %vm276_vm3, %v6741_v29  ;;  %v6997_v34 = vadd.f32 %v11712_v25, %v6481_v48  ;;  %v6609_v44 = vld [vmem:[#allocation2 + $0xcc0] sm:$0xff] }
 0x2da   : > { %7381 = vst.msk [vmem:[%s10192_s12 + $0x4c0] sm:$0xff] %vm276_vm3, %v6869_v35  ;;  %v7125_v46 = vadd.f32 %v11712_v25, %v6609_v44  ;;  %v6226_v47 = vld [vmem:[#allocation2 + $0xc8] sm:$0xff]  ;;  %v12023_v52 = vpop.f32.mrf.mxu3  ;;  %v817_v29 = vld [vmem:[#allocation2 + $0xe0] sm:$0xff]  ;;  %v5584_v44 = vadd.f32 %v11921_v51, %v1200_v5  ;;  %v1203_v5 = vld [vmem:[#allocation2 + $0xcf0] sm:$0xff] }
 0x2db   : > { %7509 = vst.msk [vmem:[%s10192_s12 + $0x8c0] sm:$0xff] %vm276_vm3, %v6997_v34  ;;  %v6742_v9 = vadd.f32 %v11712_v25, %v6226_v47  ;;  %v12030_v3 = vpop.f32.mrf.mxu1  ;;  %v945_v48 = vld [vmem:[#allocation2 + $0x4e0] sm:$0xff]  ;;  %v5201_v47 = vadd.f32 %v11923_v18, %v817_v29  ;;  %v946_v51 = vld [vmem:[#allocation2 + $0x4e8] sm:$0xff] }
 0x2dc   : > { %7637 = vst.msk [vmem:[%s10192_s12 + $0xcc0] sm:$0xff] %vm276_vm3, %v7125_v46  ;;  %v5329_v15 = vadd.f32 %v11928_v31, %v945_v48 }
 0x2dd   : > { %7254 = vst.msk [vmem:[%s10192_s12 + $0xc8] sm:$0xff] %vm276_vm3, %v6742_v9  ;;  %v11991_v14 = vpop.f32.mrf.mxu0  ;;  %v818_v9 = vld [vmem:[#allocation2 + $0xe8] sm:$0xff] }
 0x2de   : > { %5839 = vst.msk [vmem:[#allocation2 + $0x4c8] sm:$0xff] %vm276_vm3, %v5326_v60  ;;  %v1201_v60 = vld [vmem:[#allocation2 + $0xce0] sm:$0xff]  ;;  %v5202_v31 = vadd.f32 %v11965_v23, %v818_v9  ;;  %v9596_v9 = vld [vmem:[%s10011_s7 + $0x4c8] sm:$0xff] }
 0x2df   : > { %5967 = vst.msk [vmem:[#allocation2 + $0x8c8] sm:$0xff] %vm276_vm3, %v5454_v20  ;;  %v5457_v20 = vadd.f32 %v11957_v2, %v1073_v1  ;;  %v5585_v19 = vadd.f32 %v11963_v22, %v1201_v60  ;;  %v9467_v22 = vld [vmem:[%s10011_s7 + $0xc0] sm:$0xff]  ;;  %v9468_v60 = vld [vmem:[%s10011_s7 + $0xc8] sm:$0xff] }
 0x2e0   : > { %6095 = vst.msk [vmem:[#allocation2 + $0xcc8] sm:$0xff] %vm276_vm3, %v5582_v26  ;;  %v1074_v26 = vld [vmem:[#allocation2 + $0x8e8] sm:$0xff]  ;;  %v12051_v18 = vpop.f32.mrf.mxu2  ;;  %v9659_v23 = vld [vmem:[%s10011_s7 + $0x6c0] sm:$0xff] }
 0x2e1   : > { %5712 = vst.msk [vmem:[#allocation2 + $0xd0] sm:$0xff] %vm276_vm3, %v5199_v28  ;;  %v819_v28 = vld [vmem:[#allocation2 + $0xf0] sm:$0xff] }
 0x2e2   : > { %5840 = vst.msk [vmem:[#allocation2 + $0x4d0] sm:$0xff] %vm276_vm3, %v5327_v32  ;;  %v12055_v30 = vpop.f32.mrf.mxu3  ;;  %v5330_v32 = vadd.f32 %v11970_v0, %v946_v51  ;;  %v5203_v0 = vadd.f32 %v11991_v14, %v819_v28  ;;  %v9660_v51 = vld [vmem:[%s10011_s7 + $0x6c8] sm:$0xff] }
 0x2e3   : > { %5968 = vst.msk [vmem:[#allocation2 + $0x8d0] sm:$0xff] %vm276_vm3, %v5455_v24  ;;  %v12061_v27 = vpop.f32.mrf.mxu1  ;;  %v9531_v24 = vld [vmem:[%s10011_s7 + $0x2c0] sm:$0xff] }
 0x2e4   : > { %6096 = vst.msk [vmem:[#allocation2 + $0xcd0] sm:$0xff] %vm276_vm3, %v5583_v36  ;;  %v5458_v36 = vadd.f32 %v11985_v45, %v1074_v26  ;;  %v821_v26 = vld [vmem:[#allocation2 + $0x100] sm:$0xff] }
 0x2e5   : > { %v6354_v16 = vld [vmem:[#allocation2 + $0x4c8] sm:$0xff]  ;;  %5713 = vst.msk [vmem:[#allocation2 + $0xd8] sm:$0xff] %vm276_vm3, %v5200_v62  ;;  %v12025_v53 = vpop.f32.mrf.mxu0  ;;  %9194 = vmatmul.msk.bf16.gmra.mxu0 %vm3108_vm2, %v9467_v22  ;;  %9258 = vmatmul.msk.bf16.gmra.mxu1 %vm3108_vm2, %v9531_v24 }
 0x2e6   : > { %v6870_v10 = vadd.f32 %v11712_v25, %v6354_v16  ;;  %v6482_v39 = vld [vmem:[#allocation2 + $0x8c8] sm:$0xff]  ;;  %5841 = vst.msk [vmem:[#allocation2 + $0x4d8] sm:$0xff] %vm276_vm3, %v5328_v33  ;;  %9322 = vmatmul.msk.bf16.gmra.mxu2 %vm3108_vm2, %v9595_v41 }
 0x2e7   : > { %v6998_v40 = vadd.f32 %v11712_v25, %v6482_v39  ;;  %v6610_v13 = vld [vmem:[#allocation2 + $0xcc8] sm:$0xff]  ;;  %5969 = vst.msk [vmem:[#allocation2 + $0x8d8] sm:$0xff] %vm276_vm3, %v5456_v49  ;;  %9386 = vmatmul.msk.bf16.gmra.mxu3 %vm3108_vm2, %v9659_v23 }
 0x2e8   : > { %7382 = vst.msk [vmem:[%s10192_s12 + $0x4c8] sm:$0xff] %vm276_vm3, %v6870_v10  ;;  %v7126_v12 = vadd.f32 %v11712_v25, %v6610_v13  ;;  %v6227_v17 = vld [vmem:[#allocation2 + $0xd0] sm:$0xff]  ;;  %v12081_v49 = vpop.f32.mrf.mxu2 }
 0x2e9   : > { %7510 = vst.msk [vmem:[%s10192_s12 + $0x8c8] sm:$0xff] %vm276_vm3, %v6998_v40  ;;  %v6743_v55 = vadd.f32 %v11712_v25, %v6227_v17  ;;  %v6355_v58 = vld [vmem:[#allocation2 + $0x4d0] sm:$0xff] }
 0x2ea   : > { %7638 = vst.msk [vmem:[%s10192_s12 + $0xcc8] sm:$0xff] %vm276_vm3, %v7126_v12  ;;  %v6871_v54 = vadd.f32 %v11712_v25, %v6355_v58  ;;  %v6483_v56 = vld [vmem:[#allocation2 + $0x8d0] sm:$0xff]  ;;  %v12085_v8 = vpop.f32.mrf.mxu3 }
 0x2eb   : > { %7255 = vst.msk [vmem:[%s10192_s12 + $0xd0] sm:$0xff] %vm276_vm3, %v6743_v55  ;;  %v6999_v21 = vadd.f32 %v11712_v25, %v6483_v56  ;;  %v6611_v38 = vld [vmem:[#allocation2 + $0xcd0] sm:$0xff]  ;;  %v12092_v10 = vpop.f32.mrf.mxu1 }
 0x2ec   : > { %7383 = vst.msk [vmem:[%s10192_s12 + $0x4d0] sm:$0xff] %vm276_vm3, %v6871_v54  ;;  %v7127_v11 = vadd.f32 %v11712_v25, %v6611_v38  ;;  %v6228_v7 = vld [vmem:[#allocation2 + $0xd8] sm:$0xff]  ;;  %v947_v55 = vld [vmem:[#allocation2 + $0x4f0] sm:$0xff] }
 0x2ed   : > { %7511 = vst.msk [vmem:[%s10192_s12 + $0x8d0] sm:$0xff] %vm276_vm3, %v6999_v21  ;;  %v6744_v4 = vadd.f32 %v11712_v25, %v6228_v7  ;;  %v6356_v35 = vld [vmem:[#allocation2 + $0x4d8] sm:$0xff]  ;;  %v12057_v2 = vpop.f32.mrf.mxu0  ;;  %v1075_v56 = vld [vmem:[#allocation2 + $0x8f0] sm:$0xff]  ;;  %v5331_v29 = vadd.f32 %v11994_v43, %v947_v55  ;;  %v5587_v43 = vadd.f32 %v12023_v52, %v1203_v5 }
 0x2ee   : > { %7639 = vst.msk [vmem:[%s10192_s12 + $0xcd0] sm:$0xff] %vm276_vm3, %v7127_v11  ;;  %v6872_v61 = vadd.f32 %v11712_v25, %v6356_v35  ;;  %v6484_v34 = vld [vmem:[#allocation2 + $0x8d8] sm:$0xff]  ;;  %v9661_v5 = vld [vmem:[%s10011_s7 + $0x6d0] sm:$0xff] }
 0x2ef   : > { %7256 = vst.msk [vmem:[%s10192_s12 + $0xd8] sm:$0xff] %vm276_vm3, %v6744_v4  ;;  %v7000_v46 = vadd.f32 %v11712_v25, %v6484_v34  ;;  %v820_v4 = vld [vmem:[#allocation2 + $0xf8] sm:$0xff] }
 0x2f0   : > { %7384 = vst.msk [vmem:[%s10192_s12 + $0x4d8] sm:$0xff] %vm276_vm3, %v6872_v61  ;;  %v12113_v35 = vpop.f32.mrf.mxu2  ;;  %v5459_v61 = vadd.f32 %v12018_v63, %v1075_v56  ;;  %v948_v34 = vld [vmem:[#allocation2 + $0x4f8] sm:$0xff] }
 0x2f1   : > { %7512 = vst.msk [vmem:[%s10192_s12 + $0x8d8] sm:$0xff] %vm276_vm3, %v7000_v46  ;;  %v1204_v63 = vld [vmem:[#allocation2 + $0xcf8] sm:$0xff] }
 0x2f2   : > { %6097 = vst.msk [vmem:[#allocation2 + $0xcd8] sm:$0xff] %vm276_vm3, %v5584_v44  ;;  %v1076_v44 = vld [vmem:[#allocation2 + $0x8f8] sm:$0xff]  ;;  %v12119_v1 = vpop.f32.mrf.mxu3 }
 0x2f3   : > { %5714 = vst.msk [vmem:[#allocation2 + $0xe0] sm:$0xff] %vm276_vm3, %v5201_v47  ;;  %v12126_v47 = vpop.f32.mrf.mxu1  ;;  %v5460_v52 = vadd.f32 %v12051_v18, %v1076_v44 }
 0x2f4   : > { %5842 = vst.msk [vmem:[#allocation2 + $0x4e0] sm:$0xff] %vm276_vm3, %v5329_v15  ;;  %v9532_v15 = vld [vmem:[%s10011_s7 + $0x2c8] sm:$0xff] }
 0x2f5   : > { %5970 = vst.msk [vmem:[#allocation2 + $0x8e0] sm:$0xff] %vm276_vm3, %v5457_v20  ;;  %v12087_v6 = vpop.f32.mrf.mxu0  ;;  %v5204_v20 = vadd.f32 %v12025_v53, %v820_v4  ;;  %9195 = vmatmul.msk.bf16.gmra.mxu0 %vm3108_vm2, %v9468_v60  ;;  %9259 = vmatmul.msk.bf16.gmra.mxu1 %vm3108_vm2, %v9532_v15  ;;  %v5588_v53 = vadd.f32 %v12055_v30, %v1204_v63  ;;  %v1078_v4 = vld [vmem:[#allocation2 + $0x908] sm:$0xff]  ;;  %v951_v60 = vld [vmem:[#allocation2 + $0x510] sm:$0xff] }
 0x2f6   : > { %6098 = vst.msk [vmem:[#allocation2 + $0xce0] sm:$0xff] %vm276_vm3, %v5585_v19  ;;  %v5332_v19 = vadd.f32 %v12030_v3, %v948_v34  ;;  %9323 = vmatmul.msk.bf16.gmra.mxu2 %vm3108_vm2, %v9596_v9  ;;  %v5205_v3 = vadd.f32 %v12057_v2, %v821_v26  ;;  %v1206_v34 = vld [vmem:[#allocation2 + $0xd08] sm:$0xff] }
 0x2f7   : > { %5715 = vst.msk [vmem:[#allocation2 + $0xe8] sm:$0xff] %vm276_vm3, %v5202_v31  ;;  %v949_v31 = vld [vmem:[#allocation2 + $0x500] sm:$0xff]  ;;  %9387 = vmatmul.msk.bf16.gmra.mxu3 %vm3108_vm2, %v9660_v51  ;;  %v824_v51 = vld [vmem:[#allocation2 + $0x118] sm:$0xff] }
 0x2f8   : > { %5843 = vst.msk [vmem:[#allocation2 + $0x4e8] sm:$0xff] %vm276_vm3, %v5330_v32  ;;  %v5333_v28 = vadd.f32 %v12061_v27, %v949_v31  ;;  %v12149_v18 = vpop.f32.mrf.mxu2  ;;  %v5461_v32 = vadd.f32 %v12081_v49, %v1077_v37 }
 0x2f9   : > { %v6612_v62 = vld [vmem:[#allocation2 + $0xcd8] sm:$0xff]  ;;  %5971 = vst.msk [vmem:[#allocation2 + $0x8e8] sm:$0xff] %vm276_vm3, %v5458_v36 }
 0x2fa   : > { %v7128_v33 = vadd.f32 %v11712_v25, %v6612_v62  ;;  %v6229_v45 = vld [vmem:[#allocation2 + $0xe0] sm:$0xff]  ;;  %6099 = vst.msk [vmem:[#allocation2 + $0xce8] sm:$0xff] %vm276_vm3, %v5586_v42  ;;  %v12153_v30 = vpop.f32.mrf.mxu3 }
 0x2fb   : > { %v6745_v50 = vadd.f32 %v11712_v25, %v6229_v45  ;;  %v6357_v14 = vld [vmem:[#allocation2 + $0x4e0] sm:$0xff]  ;;  %5716 = vst.msk [vmem:[#allocation2 + $0xf0] sm:$0xff] %vm276_vm3, %v5203_v0  ;;  %v12158_v2 = vpop.f32.mrf.mxu1 }
 0x2fc   : > { %7640 = vst.msk [vmem:[%s10192_s12 + $0xcd8] sm:$0xff] %vm276_vm3, %v7128_v33  ;;  %v6873_v16 = vadd.f32 %v11712_v25, %v6357_v14  ;;  %v6485_v57 = vld [vmem:[#allocation2 + $0x8e0] sm:$0xff] }
 0x2fd   : > { %7257 = vst.msk [vmem:[%s10192_s12 + $0xe0] sm:$0xff] %vm276_vm3, %v6745_v50  ;;  %v7001_v39 = vadd.f32 %v11712_v25, %v6485_v57  ;;  %v6613_v59 = vld [vmem:[#allocation2 + $0xce0] sm:$0xff]  ;;  %v12121_v46 = vpop.f32.mrf.mxu0 }
 0x2fe   : > { %7385 = vst.msk [vmem:[%s10192_s12 + $0x4e0] sm:$0xff] %vm276_vm3, %v6873_v16  ;;  %v7129_v40 = vadd.f32 %v11712_v25, %v6613_v59  ;;  %v6230_v13 = vld [vmem:[#allocation2 + $0xe8] sm:$0xff]  ;;  %v1205_v50 = vld [vmem:[#allocation2 + $0xd00] sm:$0xff] }
 0x2ff   : > { %7513 = vst.msk [vmem:[%s10192_s12 + $0x8e0] sm:$0xff] %vm276_vm3, %v7001_v39  ;;  %v6746_v12 = vadd.f32 %v11712_v25, %v6230_v13  ;;  %v6358_v17 = vld [vmem:[#allocation2 + $0x4e8] sm:$0xff] }
 0x300   : > { %7641 = vst.msk [vmem:[%s10192_s12 + $0xce0] sm:$0xff] %vm276_vm3, %v7129_v40  ;;  %v6874_v58 = vadd.f32 %v11712_v25, %v6358_v17  ;;  %v6486_v54 = vld [vmem:[#allocation2 + $0x8e8] sm:$0xff]  ;;  %v12174_v14 = vpop.f32.mrf.mxu2 }
 0x301   : > { %7258 = vst.msk [vmem:[%s10192_s12 + $0xe8] sm:$0xff] %vm276_vm3, %v6746_v12  ;;  %v7002_v21 = vadd.f32 %v11712_v25, %v6486_v54  ;;  %v6614_v38 = vld [vmem:[#allocation2 + $0xce8] sm:$0xff]  ;;  %v9533_v54 = vld [vmem:[%s10011_s7 + $0x2d0] sm:$0xff] }
 0x302   : > { %7386 = vst.msk [vmem:[%s10192_s12 + $0x4e8] sm:$0xff] %vm276_vm3, %v6874_v58  ;;  %v7130_v11 = vadd.f32 %v11712_v25, %v6614_v38  ;;  %v6231_v7 = vld [vmem:[#allocation2 + $0xf0] sm:$0xff]  ;;  %v822_v39 = vld [vmem:[#allocation2 + $0x108] sm:$0xff]  ;;  %v12179_v40 = vpop.f32.mrf.mxu3 }
 0x303   : > { %7514 = vst.msk [vmem:[%s10192_s12 + $0x8e8] sm:$0xff] %vm276_vm3, %v7002_v21  ;;  %v6747_v48 = vadd.f32 %v11712_v25, %v6231_v7  ;;  %v950_v59 = vld [vmem:[#allocation2 + $0x508] sm:$0xff]  ;;  %v12186_v55 = vpop.f32.mrf.mxu1  ;;  %v9469_v58 = vld [vmem:[%s10011_s7 + $0xd0] sm:$0xff] }
 0x304   : > { %7642 = vst.msk [vmem:[%s10192_s12 + $0xce8] sm:$0xff] %vm276_vm3, %v7130_v11  ;;  %v9597_v38 = vld [vmem:[%s10011_s7 + $0x4d0] sm:$0xff]  ;;  %v5334_v44 = vadd.f32 %v12092_v10, %v950_v59 }
 0x305   : > { %7259 = vst.msk [vmem:[%s10192_s12 + $0xf0] sm:$0xff] %vm276_vm3, %v6747_v48  ;;  %v12155_v22 = vpop.f32.mrf.mxu0  ;;  %9196 = vmatmul.msk.bf16.gmra.mxu0 %vm3108_vm2, %v9469_v58  ;;  %9260 = vmatmul.msk.bf16.gmra.mxu1 %vm3108_vm2, %v9533_v54  ;;  %v1207_v10 = vld [vmem:[#allocation2 + $0xd10] sm:$0xff] }
 0x306   : > { %5844 = vst.msk [vmem:[#allocation2 + $0x4f0] sm:$0xff] %vm276_vm3, %v5331_v29  ;;  %v5589_v29 = vadd.f32 %v12085_v8, %v1205_v50  ;;  %9324 = vmatmul.msk.bf16.gmra.mxu2 %vm3108_vm2, %v9597_v38  ;;  %v5462_v8 = vadd.f32 %v12113_v35, %v1078_v4  ;;  %v5335_v35 = vadd.f32 %v12126_v47, %v951_v60  ;;  %v12238_v47 = vld [vmem:[%s15225_s2] ss:$0 sm:$0xff]  ;;  %v952_v50 = vld [vmem:[#allocation2 + $0x518] sm:$0xff]  ;;  %v954_v60 = vld [vmem:[#allocation2 + $0x528] sm:$0xff] }
 0x307   : > { %5972 = vst.msk [vmem:[#allocation2 + $0x8f0] sm:$0xff] %vm276_vm3, %v5459_v61  ;;  %v5206_v61 = vadd.f32 %v12087_v6, %v822_v39  ;;  %9388 = vmatmul.msk.bf16.gmra.mxu3 %vm3108_vm2, %v9661_v5  ;;  %v1079_v6 = vld [vmem:[#allocation2 + $0x910] sm:$0xff]  ;;  %v5208_v26 = vadd.f32 %v12155_v22, %v824_v51  ;;  %v1080_v39 = vld [vmem:[#allocation2 + $0x918] sm:$0xff] }
 0x308   : > { %6100 = vst.msk [vmem:[#allocation2 + $0xcf0] sm:$0xff] %vm276_vm3, %v5587_v43  ;;  %v823_v43 = vld [vmem:[#allocation2 + $0x110] sm:$0xff]  ;;  %v12215_v15 = vpop.f32.mrf.mxu2 }
 0x309   : > { %5717 = vst.msk [vmem:[#allocation2 + $0xf8] sm:$0xff] %vm276_vm3, %v5204_v20  ;;  %v5207_v9 = vadd.f32 %v12121_v46, %v823_v43  ;;  %v5591_v46 = vadd.f32 %v12153_v30, %v1207_v10  ;;  %v826_v43 = vld [vmem:[#allocation2 + $0x128] sm:$0xff] }
 0x30a   : > { %5845 = vst.msk [vmem:[#allocation2 + $0x4f8] sm:$0xff] %vm276_vm3, %v5332_v19  ;;  %v12219_v20 = vpop.f32.mrf.mxu3 }
 0x30b   : > { %5973 = vst.msk [vmem:[#allocation2 + $0x8f8] sm:$0xff] %vm276_vm3, %v5460_v52  ;;  %v12225_v19 = vpop.f32.mrf.mxu1 }
 0x30c   : > { %6101 = vst.msk [vmem:[#allocation2 + $0xcf8] sm:$0xff] %vm276_vm3, %v5588_v53 }
 0x30d   : > { %v6359_v24 = vld [vmem:[#allocation2 + $0x4f0] sm:$0xff]  ;;  %5718 = vst.msk [vmem:[#allocation2 + $0x100] sm:$0xff] %vm276_vm3, %v5205_v3  ;;  %v12181_v13 = vpop.f32.mrf.mxu0 }
 0x30e   : > { %v6875_v27 = vadd.f32 %v11712_v25, %v6359_v24  ;;  %v6487_v41 = vld [vmem:[#allocation2 + $0x8f0] sm:$0xff]  ;;  %5846 = vst.msk [vmem:[#allocation2 + $0x500] sm:$0xff] %vm276_vm3, %v5333_v28 }
 0x30f   : > { %v7003_v36 = vadd.f32 %v11712_v25, %v6487_v41  ;;  %v6615_v23 = vld [vmem:[#allocation2 + $0xcf0] sm:$0xff]  ;;  %5974 = vst.msk [vmem:[#allocation2 + $0x900] sm:$0xff] %vm276_vm3, %v5461_v32  ;;  %v9534_v41 = vld [vmem:[%s10011_s7 + $0x2d8] sm:$0xff] }
 0x310   : > { %7387 = vst.msk [vmem:[%s10192_s12 + $0x4f0] sm:$0xff] %vm276_vm3, %v6875_v27  ;;  %v7131_v42 = vadd.f32 %v11712_v25, %v6615_v23  ;;  %v6232_v0 = vld [vmem:[#allocation2 + $0xf8] sm:$0xff]  ;;  %v12242_v37 = vpop.f32.mrf.mxu2 }
 0x311   : > { %7515 = vst.msk [vmem:[%s10192_s12 + $0x8f0] sm:$0xff] %vm276_vm3, %v7003_v36  ;;  %v6748_v62 = vadd.f32 %v11712_v25, %v6232_v0  ;;  %v6360_v33 = vld [vmem:[#allocation2 + $0x4f8] sm:$0xff] }
 0x312   : > { %7643 = vst.msk [vmem:[%s10192_s12 + $0xcf0] sm:$0xff] %vm276_vm3, %v7131_v42  ;;  %v6876_v45 = vadd.f32 %v11712_v25, %v6360_v33  ;;  %v6488_v49 = vld [vmem:[#allocation2 + $0x8f8] sm:$0xff] }
 0x313   : > { %7260 = vst.msk [vmem:[%s10192_s12 + $0xf8] sm:$0xff] %vm276_vm3, %v6748_v62  ;;  %v7004_v16 = vadd.f32 %v11712_v25, %v6488_v49  ;;  %v6616_v57 = vld [vmem:[#allocation2 + $0xcf8] sm:$0xff]  ;;  %v12253_v24 = vpop.f32.mrf.mxu1 }
 0x314   : > { %7388 = vst.msk [vmem:[%s10192_s12 + $0x4f8] sm:$0xff] %vm276_vm3, %v6876_v45  ;;  %v7132_v12 = vadd.f32 %v11712_v25, %v6616_v57  ;;  %v6233_v17 = vld [vmem:[#allocation2 + $0x100] sm:$0xff]  ;;  %v9470_v27 = vld [vmem:[%s10011_s7 + $0xd8] sm:$0xff] }
 0x315   : > { %7516 = vst.msk [vmem:[%s10192_s12 + $0x8f8] sm:$0xff] %vm276_vm3, %v7004_v16  ;;  %v6749_v56 = vadd.f32 %v11712_v25, %v6233_v17  ;;  %v6361_v21 = vld [vmem:[#allocation2 + $0x500] sm:$0xff]  ;;  %v12221_v63 = vpop.f32.mrf.mxu0  ;;  %v9598_v42 = vld [vmem:[%s10011_s7 + $0x4d8] sm:$0xff]  ;;  %9197 = vmatmul.msk.bf16.gmra.mxu0 %vm3108_vm2, %v9470_v27  ;;  %9261 = vmatmul.msk.bf16.gmra.mxu1 %vm3108_vm2, %v9534_v41 }
 0x316   : > { %7644 = vst.msk [vmem:[%s10192_s12 + $0xcf8] sm:$0xff] %vm276_vm3, %v7132_v12  ;;  %v6877_v11 = vadd.f32 %v11712_v25, %v6361_v21  ;;  %v6489_v7 = vld [vmem:[#allocation2 + $0x900] sm:$0xff]  ;;  %v9662_v0 = vld [vmem:[%s10011_s7 + $0x6d8] sm:$0xff]  ;;  %9325 = vmatmul.msk.bf16.gmra.mxu2 %vm3108_vm2, %v9598_v42 }
 0x317   : > { %7261 = vst.msk [vmem:[%s10192_s12 + $0x100] sm:$0xff] %vm276_vm3, %v6749_v56  ;;  %v7005_v48 = vadd.f32 %v11712_v25, %v6489_v7  ;;  %v5590_v25 = vadd.f32 %v12119_v1, %v1206_v34  ;;  %v5463_v1 = vadd.f32 %v12149_v18, %v1079_v6  ;;  %v12246_v18 = vpop.f32.mrf.mxu3  ;;  %9389 = vmatmul.msk.bf16.gmra.mxu3 %vm3108_vm2, %v9662_v0  ;;  %v1208_v17 = vld [vmem:[#allocation2 + $0xd18] sm:$0xff]  ;;  %v825_v21 = vld [vmem:[#allocation2 + $0x120] sm:$0xff] }
 0x318   : > { %7389 = vst.msk [vmem:[%s10192_s12 + $0x500] sm:$0xff] %vm276_vm3, %v6877_v11  ;;  %v5336_v56 = vadd.f32 %v12158_v2, %v952_v50  ;;  %v12282_v38 = vpop.f32.mrf.mxu2  ;;  %v5464_v11 = vadd.f32 %v12174_v14, %v1080_v39  ;;  %v953_v7 = vld [vmem:[#allocation2 + $0x520] sm:$0xff]  ;;  %v5209_v34 = vadd.f32 %v12181_v13, %v825_v21  ;;  %v5210_v13 = vadd.f32 %v12221_v63, %v826_v43 }
 0x319   : > { %7517 = vst.msk [vmem:[%s10192_s12 + $0x900] sm:$0xff] %vm276_vm3, %v7005_v48  ;;  %v5592_v48 = vadd.f32 %v12179_v40, %v1208_v17  ;;  %v5337_v14 = vadd.f32 %v12186_v55, %v953_v7  ;;  %v5338_v55 = vadd.f32 %v12225_v19, %v954_v60  ;;  %v9471_v63 = vld [vmem:[%s10011_s7 + $0xe0] sm:$0xff]  ;;  %v1083_v17 = vld [vmem:[#allocation2 + $0x930] sm:$0xff]  ;;  %v9600_v60 = vld [vmem:[%s10011_s7 + $0x4e8] sm:$0xff] }
 0x31a   : > { %6102 = vst.msk [vmem:[#allocation2 + $0xd00] sm:$0xff] %vm276_vm3, %v5589_v29  ;;  %v9599_v19 = vld [vmem:[%s10011_s7 + $0x4e0] sm:$0xff] }
 0x31b   : > { %5719 = vst.msk [vmem:[#allocation2 + $0x108] sm:$0xff] %vm276_vm3, %v5206_v61  ;;  %v1081_v61 = vld [vmem:[#allocation2 + $0x920] sm:$0xff]  ;;  %v12295_v2 = vpop.f32.mrf.mxu1 }
 0x31c   : > { %5847 = vst.msk [vmem:[#allocation2 + $0x508] sm:$0xff] %vm276_vm3, %v5334_v44  ;;  %v1209_v44 = vld [vmem:[#allocation2 + $0xd20] sm:$0xff] }
 0x31d   : > { %5975 = vst.msk [vmem:[#allocation2 + $0x908] sm:$0xff] %vm276_vm3, %v5462_v8  ;;  %v12248_v32 = vpop.f32.mrf.mxu0  ;;  %v5465_v8 = vadd.f32 %v12215_v15, %v1081_v61  ;;  %v5593_v40 = vadd.f32 %v12219_v20, %v1209_v44  ;;  %v1212_v61 = vld [vmem:[#allocation2 + $0xd38] sm:$0xff] }
 0x31e   : > { %6103 = vst.msk [vmem:[#allocation2 + $0xd08] sm:$0xff] %vm276_vm3, %v5590_v25  ;;  %v1082_v25 = vld [vmem:[#allocation2 + $0x928] sm:$0xff] }
 0x31f   : > { %5720 = vst.msk [vmem:[#allocation2 + $0x110] sm:$0xff] %vm276_vm3, %v5207_v9  ;;  %v12288_v29 = vpop.f32.mrf.mxu3  ;;  %v5466_v15 = vadd.f32 %v12242_v37, %v1082_v25 }
 0x320   : > { %5848 = vst.msk [vmem:[#allocation2 + $0x510] sm:$0xff] %vm276_vm3, %v5335_v35  ;;  %v12310_v6 = vpop.f32.mrf.mxu2  ;;  %v9535_v35 = vld [vmem:[%s10011_s7 + $0x2e0] sm:$0xff] }
 0x321   : > { %v6617_v52 = vld [vmem:[#allocation2 + $0xd00] sm:$0xff]  ;;  %5976 = vst.msk [vmem:[#allocation2 + $0x910] sm:$0xff] %vm276_vm3, %v5463_v1 }
 0x322   : > { %v7133_v31 = vadd.f32 %v12238_v47, %v6617_v52  ;;  %v6234_v53 = vld [vmem:[#allocation2 + $0x108] sm:$0xff]  ;;  %6104 = vst.msk [vmem:[#allocation2 + $0xd10] sm:$0xff] %vm276_vm3, %v5591_v46 }
 0x323   : > { %v6750_v3 = vadd.f32 %v12238_v47, %v6234_v53  ;;  %v6362_v28 = vld [vmem:[#allocation2 + $0x508] sm:$0xff]  ;;  %5721 = vst.msk [vmem:[#allocation2 + $0x118] sm:$0xff] %vm276_vm3, %v5208_v26  ;;  %v12319_v20 = vpop.f32.mrf.mxu1  ;;  %v9663_v26 = vld [vmem:[%s10011_s7 + $0x6e0] sm:$0xff] }
 0x324   : > { %7645 = vst.msk [vmem:[%s10192_s12 + $0xd00] sm:$0xff] %vm276_vm3, %v7133_v31  ;;  %v6878_v30 = vadd.f32 %v12238_v47, %v6362_v28  ;;  %v6490_v22 = vld [vmem:[#allocation2 + $0x908] sm:$0xff] }
 0x325   : > { %7262 = vst.msk [vmem:[%s10192_s12 + $0x108] sm:$0xff] %vm276_vm3, %v6750_v3  ;;  %v7006_v36 = vadd.f32 %v12238_v47, %v6490_v22  ;;  %v6618_v23 = vld [vmem:[#allocation2 + $0xd08] sm:$0xff]  ;;  %v12290_v4 = vpop.f32.mrf.mxu0  ;;  %9198 = vmatmul.msk.bf16.gmra.mxu0 %vm3108_vm2, %v9471_v63  ;;  %9262 = vmatmul.msk.bf16.gmra.mxu1 %vm3108_vm2, %v9535_v35 }
 0x326   : > { %7390 = vst.msk [vmem:[%s10192_s12 + $0x508] sm:$0xff] %vm276_vm3, %v6878_v30  ;;  %v7134_v62 = vadd.f32 %v12238_v47, %v6618_v23  ;;  %v6235_v33 = vld [vmem:[#allocation2 + $0x110] sm:$0xff]  ;;  %9326 = vmatmul.msk.bf16.gmra.mxu2 %vm3108_vm2, %v9599_v19  ;;  %v1210_v23 = vld [vmem:[#allocation2 + $0xd28] sm:$0xff] }
 0x327   : > { %7518 = vst.msk [vmem:[%s10192_s12 + $0x908] sm:$0xff] %vm276_vm3, %v7006_v36  ;;  %v6751_v45 = vadd.f32 %v12238_v47, %v6235_v33  ;;  %v6363_v49 = vld [vmem:[#allocation2 + $0x510] sm:$0xff]  ;;  %v12314_v9 = vpop.f32.mrf.mxu3  ;;  %9390 = vmatmul.msk.bf16.gmra.mxu3 %vm3108_vm2, %v9663_v26 }
 0x328   : > { %7646 = vst.msk [vmem:[%s10192_s12 + $0xd08] sm:$0xff] %vm276_vm3, %v7134_v62  ;;  %v6879_v16 = vadd.f32 %v12238_v47, %v6363_v49  ;;  %v6491_v57 = vld [vmem:[#allocation2 + $0x910] sm:$0xff]  ;;  %v5596_v25 = vadd.f32 %v12314_v9, %v1212_v61 }
 0x329   : > { %7263 = vst.msk [vmem:[%s10192_s12 + $0x110] sm:$0xff] %vm276_vm3, %v6751_v45  ;;  %v7007_v59 = vadd.f32 %v12238_v47, %v6491_v57  ;;  %v6619_v12 = vld [vmem:[#allocation2 + $0xd10] sm:$0xff]  ;;  %v12343_v27 = vpop.f32.mrf.mxu2 }
 0x32a   : > { %7391 = vst.msk [vmem:[%s10192_s12 + $0x510] sm:$0xff] %vm276_vm3, %v6879_v16  ;;  %v7135_v58 = vadd.f32 %v12238_v47, %v6619_v12  ;;  %v6236_v54 = vld [vmem:[#allocation2 + $0x118] sm:$0xff]  ;;  %v827_v45 = vld [vmem:[#allocation2 + $0x130] sm:$0xff]  ;;  %v5594_v12 = vadd.f32 %v12246_v18, %v1210_v23  ;;  %v1213_v23 = vld [vmem:[#allocation2 + $0xd40] sm:$0xff] }
 0x32b   : > { %7519 = vst.msk [vmem:[%s10192_s12 + $0x910] sm:$0xff] %vm276_vm3, %v7007_v59  ;;  %v6752_v5 = vadd.f32 %v12238_v47, %v6236_v54  ;;  %v12355_v49 = vpop.f32.mrf.mxu1  ;;  %v955_v57 = vld [vmem:[#allocation2 + $0x530] sm:$0xff]  ;;  %v5211_v54 = vadd.f32 %v12248_v32, %v827_v45  ;;  %v956_v18 = vld [vmem:[#allocation2 + $0x538] sm:$0xff] }
 0x32c   : > { %7647 = vst.msk [vmem:[%s10192_s12 + $0xd10] sm:$0xff] %vm276_vm3, %v7135_v58  ;;  %v5339_v21 = vadd.f32 %v12253_v24, %v955_v57  ;;  %v1087_v61 = vld [vmem:[#allocation2 + $0x950] sm:$0xff] }
 0x32d   : > { %7264 = vst.msk [vmem:[%s10192_s12 + $0x118] sm:$0xff] %vm276_vm3, %v6752_v5  ;;  %v12316_v10 = vpop.f32.mrf.mxu0  ;;  %v828_v5 = vld [vmem:[#allocation2 + $0x138] sm:$0xff] }
 0x32e   : > { %5849 = vst.msk [vmem:[#allocation2 + $0x518] sm:$0xff] %vm276_vm3, %v5336_v56  ;;  %v1211_v56 = vld [vmem:[#allocation2 + $0xd30] sm:$0xff]  ;;  %v5212_v24 = vadd.f32 %v12290_v4, %v828_v5  ;;  %v9664_v4 = vld [vmem:[%s10011_s7 + $0x6e8] sm:$0xff] }
 0x32f   : > { %5977 = vst.msk [vmem:[#allocation2 + $0x918] sm:$0xff] %vm276_vm3, %v5464_v11  ;;  %v12348_v42 = vpop.f32.mrf.mxu3  ;;  %v5467_v11 = vadd.f32 %v12282_v38, %v1083_v17  ;;  %v5595_v7 = vadd.f32 %v12288_v29, %v1211_v56  ;;  %v9472_v29 = vld [vmem:[%s10011_s7 + $0xe8] sm:$0xff]  ;;  %v9473_v56 = vld [vmem:[%s10011_s7 + $0xf0] sm:$0xff] }
 0x330   : > { %6105 = vst.msk [vmem:[#allocation2 + $0xd18] sm:$0xff] %vm276_vm3, %v5592_v48  ;;  %v1084_v48 = vld [vmem:[#allocation2 + $0x938] sm:$0xff]  ;;  %v9601_v5 = vld [vmem:[%s10011_s7 + $0x4f0] sm:$0xff] }
 0x331   : > { %5722 = vst.msk [vmem:[#allocation2 + $0x120] sm:$0xff] %vm276_vm3, %v5209_v34  ;;  %v12376_v32 = vpop.f32.mrf.mxu2  ;;  %v829_v34 = vld [vmem:[#allocation2 + $0x140] sm:$0xff] }
 0x332   : > { %5850 = vst.msk [vmem:[#allocation2 + $0x520] sm:$0xff] %vm276_vm3, %v5337_v14  ;;  %v5340_v14 = vadd.f32 %v12295_v2, %v956_v18  ;;  %v5213_v2 = vadd.f32 %v12316_v10, %v829_v34  ;;  %v9665_v18 = vld [vmem:[%s10011_s7 + $0x6f0] sm:$0xff] }
 0x333   : > { %5978 = vst.msk [vmem:[#allocation2 + $0x920] sm:$0xff] %vm276_vm3, %v5465_v8  ;;  %v12386_v43 = vpop.f32.mrf.mxu1  ;;  %v9536_v8 = vld [vmem:[%s10011_s7 + $0x2e8] sm:$0xff] }
 0x334   : > { %6106 = vst.msk [vmem:[#allocation2 + $0xd20] sm:$0xff] %vm276_vm3, %v5593_v40  ;;  %v5468_v40 = vadd.f32 %v12310_v6, %v1084_v48  ;;  %v831_v48 = vld [vmem:[#allocation2 + $0x150] sm:$0xff] }
 0x335   : > { %v6364_v51 = vld [vmem:[#allocation2 + $0x518] sm:$0xff]  ;;  %5723 = vst.msk [vmem:[#allocation2 + $0x128] sm:$0xff] %vm276_vm3, %v5210_v13  ;;  %v12350_v0 = vpop.f32.mrf.mxu0  ;;  %9199 = vmatmul.msk.bf16.gmra.mxu0 %vm3108_vm2, %v9472_v29  ;;  %9263 = vmatmul.msk.bf16.gmra.mxu1 %vm3108_vm2, %v9536_v8 }
 0x336   : > { %v6880_v1 = vadd.f32 %v12238_v47, %v6364_v51  ;;  %v6492_v46 = vld [vmem:[#allocation2 + $0x918] sm:$0xff]  ;;  %5851 = vst.msk [vmem:[#allocation2 + $0x528] sm:$0xff] %vm276_vm3, %v5338_v55  ;;  %9327 = vmatmul.msk.bf16.gmra.mxu2 %vm3108_vm2, %v9600_v60 }
 0x337   : > { %v7008_v52 = vadd.f32 %v12238_v47, %v6492_v46  ;;  %v6620_v31 = vld [vmem:[#allocation2 + $0xd18] sm:$0xff]  ;;  %5979 = vst.msk [vmem:[#allocation2 + $0x928] sm:$0xff] %vm276_vm3, %v5466_v15  ;;  %v12380_v44 = vpop.f32.mrf.mxu3  ;;  %9391 = vmatmul.msk.bf16.gmra.mxu3 %vm3108_vm2, %v9664_v4 }
 0x338   : > { %7392 = vst.msk [vmem:[%s10192_s12 + $0x518] sm:$0xff] %vm276_vm3, %v6880_v1  ;;  %v7136_v53 = vadd.f32 %v12238_v47, %v6620_v31  ;;  %v6237_v37 = vld [vmem:[#allocation2 + $0x120] sm:$0xff] }
 0x339   : > { %7520 = vst.msk [vmem:[%s10192_s12 + $0x918] sm:$0xff] %vm276_vm3, %v7008_v52  ;;  %v6753_v3 = vadd.f32 %v12238_v47, %v6237_v37  ;;  %v6365_v28 = vld [vmem:[#allocation2 + $0x520] sm:$0xff]  ;;  %v12406_v15 = vpop.f32.mrf.mxu2 }
 0x33a   : > { %7648 = vst.msk [vmem:[%s10192_s12 + $0xd18] sm:$0xff] %vm276_vm3, %v7136_v53  ;;  %v6881_v30 = vadd.f32 %v12238_v47, %v6365_v28  ;;  %v6493_v22 = vld [vmem:[#allocation2 + $0x920] sm:$0xff] }
 0x33b   : > { %7265 = vst.msk [vmem:[%s10192_s12 + $0x120] sm:$0xff] %vm276_vm3, %v6753_v3  ;;  %v7009_v41 = vadd.f32 %v12238_v47, %v6493_v22  ;;  %v6621_v36 = vld [vmem:[#allocation2 + $0xd20] sm:$0xff]  ;;  %v12417_v1 = vpop.f32.mrf.mxu1 }
 0x33c   : > { %7393 = vst.msk [vmem:[%s10192_s12 + $0x520] sm:$0xff] %vm276_vm3, %v6881_v30  ;;  %v7137_v62 = vadd.f32 %v12238_v47, %v6621_v36  ;;  %v6238_v33 = vld [vmem:[#allocation2 + $0x128] sm:$0xff]  ;;  %v957_v3 = vld [vmem:[#allocation2 + $0x540] sm:$0xff] }
 0x33d   : > { %7521 = vst.msk [vmem:[%s10192_s12 + $0x920] sm:$0xff] %vm276_vm3, %v7009_v41  ;;  %v6754_v50 = vadd.f32 %v12238_v47, %v6238_v33  ;;  %v6366_v16 = vld [vmem:[#allocation2 + $0x528] sm:$0xff]  ;;  %v12382_v38 = vpop.f32.mrf.mxu0  ;;  %v1085_v22 = vld [vmem:[#allocation2 + $0x940] sm:$0xff]  ;;  %v5341_v45 = vadd.f32 %v12319_v20, %v957_v3  ;;  %v5597_v20 = vadd.f32 %v12348_v42, %v1213_v23  ;;  %v9666_v23 = vld [vmem:[%s10011_s7 + $0x6f8] sm:$0xff] }
 0x33e   : > { %7649 = vst.msk [vmem:[%s10192_s12 + $0xd20] sm:$0xff] %vm276_vm3, %v7137_v62  ;;  %v6882_v39 = vadd.f32 %v12238_v47, %v6366_v16  ;;  %v6494_v59 = vld [vmem:[#allocation2 + $0x928] sm:$0xff] }
 0x33f   : > { %7266 = vst.msk [vmem:[%s10192_s12 + $0x128] sm:$0xff] %vm276_vm3, %v6754_v50  ;;  %v7010_v58 = vadd.f32 %v12238_v47, %v6494_v59  ;;  %v12410_v63 = vpop.f32.mrf.mxu3  ;;  %v830_v50 = vld [vmem:[#allocation2 + $0x148] sm:$0xff] }
 0x340   : > { %7394 = vst.msk [vmem:[%s10192_s12 + $0x528] sm:$0xff] %vm276_vm3, %v6882_v39  ;;  %v5469_v39 = vadd.f32 %v12343_v27, %v1085_v22  ;;  %v958_v59 = vld [vmem:[#allocation2 + $0x548] sm:$0xff] }
 0x341   : > { %7522 = vst.msk [vmem:[%s10192_s12 + $0x928] sm:$0xff] %vm276_vm3, %v7010_v58  ;;  %v12438_v16 = vpop.f32.mrf.mxu2  ;;  %v1214_v27 = vld [vmem:[#allocation2 + $0xd48] sm:$0xff] }
 0x342   : > { %6107 = vst.msk [vmem:[#allocation2 + $0xd28] sm:$0xff] %vm276_vm3, %v5594_v12  ;;  %v1086_v12 = vld [vmem:[#allocation2 + $0x948] sm:$0xff] }
 0x343   : > { %5724 = vst.msk [vmem:[#allocation2 + $0x130] sm:$0xff] %vm276_vm3, %v5211_v54  ;;  %v12451_v54 = vpop.f32.mrf.mxu1  ;;  %v5470_v42 = vadd.f32 %v12376_v32, %v1086_v12 }
 0x344   : > { %5852 = vst.msk [vmem:[#allocation2 + $0x530] sm:$0xff] %vm276_vm3, %v5339_v21  ;;  %v9537_v21 = vld [vmem:[%s10011_s7 + $0x2f0] sm:$0xff] }
 0x345   : > { %5980 = vst.msk [vmem:[#allocation2 + $0x930] sm:$0xff] %vm276_vm3, %v5467_v11  ;;  %v12412_v35 = vpop.f32.mrf.mxu0  ;;  %v5214_v11 = vadd.f32 %v12350_v0, %v830_v50  ;;  %9200 = vmatmul.msk.bf16.gmra.mxu0 %vm3108_vm2, %v9473_v56  ;;  %9264 = vmatmul.msk.bf16.gmra.mxu1 %vm3108_vm2, %v9537_v21  ;;  %v5598_v0 = vadd.f32 %v12380_v44, %v1214_v27  ;;  %v1088_v50 = vld [vmem:[#allocation2 + $0x958] sm:$0xff]  ;;  %v961_v56 = vld [vmem:[#allocation2 + $0x560] sm:$0xff] }
 0x346   : > { %6108 = vst.msk [vmem:[#allocation2 + $0xd30] sm:$0xff] %vm276_vm3, %v5595_v7  ;;  %v5342_v7 = vadd.f32 %v12355_v49, %v958_v59  ;;  %9328 = vmatmul.msk.bf16.gmra.mxu2 %vm3108_vm2, %v9601_v5  ;;  %v5215_v49 = vadd.f32 %v12382_v38, %v831_v48  ;;  %v1216_v59 = vld [vmem:[#allocation2 + $0xd58] sm:$0xff] }
 0x347   : > { %5725 = vst.msk [vmem:[#allocation2 + $0x138] sm:$0xff] %vm276_vm3, %v5212_v24  ;;  %v12444_v17 = vpop.f32.mrf.mxu3  ;;  %v959_v24 = vld [vmem:[#allocation2 + $0x550] sm:$0xff]  ;;  %9392 = vmatmul.msk.bf16.gmra.mxu3 %vm3108_vm2, %v9665_v18 }
 0x348   : > { %5853 = vst.msk [vmem:[#allocation2 + $0x538] sm:$0xff] %vm276_vm3, %v5340_v14  ;;  %v5343_v34 = vadd.f32 %v12386_v43, %v959_v24  ;;  %v5471_v14 = vadd.f32 %v12406_v15, %v1087_v61  ;;  %v5600_v21 = vadd.f32 %v12444_v17, %v1216_v59 }
 0x349   : > { %v6622_v13 = vld [vmem:[#allocation2 + $0xd28] sm:$0xff]  ;;  %5981 = vst.msk [vmem:[#allocation2 + $0x938] sm:$0xff] %vm276_vm3, %v5468_v40  ;;  %v12474_v32 = vpop.f32.mrf.mxu2 }
 0x34a   : > { %v7138_v55 = vadd.f32 %v12238_v47, %v6622_v13  ;;  %v6239_v6 = vld [vmem:[#allocation2 + $0x130] sm:$0xff]  ;;  %6109 = vst.msk [vmem:[#allocation2 + $0xd38] sm:$0xff] %vm276_vm3, %v5596_v25 }
 0x34b   : > { %v6755_v9 = vadd.f32 %v12238_v47, %v6239_v6  ;;  %v6367_v10 = vld [vmem:[#allocation2 + $0x530] sm:$0xff]  ;;  %5726 = vst.msk [vmem:[#allocation2 + $0x140] sm:$0xff] %vm276_vm3, %v5213_v2  ;;  %v12483_v38 = vpop.f32.mrf.mxu1 }
 0x34c   : > { %7650 = vst.msk [vmem:[%s10192_s12 + $0xd28] sm:$0xff] %vm276_vm3, %v7138_v55  ;;  %v6883_v51 = vadd.f32 %v12238_v47, %v6367_v10  ;;  %v6495_v19 = vld [vmem:[#allocation2 + $0x930] sm:$0xff] }
 0x34d   : > { %7267 = vst.msk [vmem:[%s10192_s12 + $0x130] sm:$0xff] %vm276_vm3, %v6755_v9  ;;  %v7011_v46 = vadd.f32 %v12238_v47, %v6495_v19  ;;  %v6623_v26 = vld [vmem:[#allocation2 + $0xd30] sm:$0xff]  ;;  %v12446_v58 = vpop.f32.mrf.mxu0 }
 0x34e   : > { %7395 = vst.msk [vmem:[%s10192_s12 + $0x530] sm:$0xff] %vm276_vm3, %v6883_v51  ;;  %v7139_v52 = vadd.f32 %v12238_v47, %v6623_v26  ;;  %v6240_v31 = vld [vmem:[#allocation2 + $0x138] sm:$0xff]  ;;  %v1215_v9 = vld [vmem:[#allocation2 + $0xd50] sm:$0xff] }
 0x34f   : > { %7523 = vst.msk [vmem:[%s10192_s12 + $0x930] sm:$0xff] %vm276_vm3, %v7011_v46  ;;  %v6756_v53 = vadd.f32 %v12238_v47, %v6240_v31  ;;  %v6368_v37 = vld [vmem:[#allocation2 + $0x538] sm:$0xff]  ;;  %v12478_v44 = vpop.f32.mrf.mxu3 }
 0x350   : > { %7651 = vst.msk [vmem:[%s10192_s12 + $0xd30] sm:$0xff] %vm276_vm3, %v7139_v52  ;;  %v6884_v28 = vadd.f32 %v12238_v47, %v6368_v37  ;;  %v6496_v30 = vld [vmem:[#allocation2 + $0x938] sm:$0xff] }
 0x351   : > { %7268 = vst.msk [vmem:[%s10192_s12 + $0x138] sm:$0xff] %vm276_vm3, %v6756_v53  ;;  %v7012_v41 = vadd.f32 %v12238_v47, %v6496_v30  ;;  %v6624_v36 = vld [vmem:[#allocation2 + $0xd38] sm:$0xff]  ;;  %v12499_v10 = vpop.f32.mrf.mxu2 }
 0x352   : > { %7396 = vst.msk [vmem:[%s10192_s12 + $0x538] sm:$0xff] %vm276_vm3, %v6884_v28  ;;  %v7140_v62 = vadd.f32 %v12238_v47, %v6624_v36  ;;  %v6241_v33 = vld [vmem:[#allocation2 + $0x140] sm:$0xff]  ;;  %v832_v46 = vld [vmem:[#allocation2 + $0x158] sm:$0xff] }
 0x353   : > { %7524 = vst.msk [vmem:[%s10192_s12 + $0x938] sm:$0xff] %vm276_vm3, %v7012_v41  ;;  %v6757_v57 = vadd.f32 %v12238_v47, %v6241_v33  ;;  %v960_v26 = vld [vmem:[#allocation2 + $0x558] sm:$0xff]  ;;  %v12511_v3 = vpop.f32.mrf.mxu1 }
 0x354   : > { %7652 = vst.msk [vmem:[%s10192_s12 + $0xd38] sm:$0xff] %vm276_vm3, %v7140_v62  ;;  %v9474_v28 = vld [vmem:[%s10011_s7 + $0xf8] sm:$0xff]  ;;  %v5344_v12 = vadd.f32 %v12417_v1, %v960_v26  ;;  %v1217_v1 = vld [vmem:[#allocation2 + $0xd60] sm:$0xff] }
 0x355   : > { %7269 = vst.msk [vmem:[%s10192_s12 + $0x140] sm:$0xff] %vm276_vm3, %v6757_v57  ;;  %v12480_v29 = vpop.f32.mrf.mxu0  ;;  %v9538_v30 = vld [vmem:[%s10011_s7 + $0x2f8] sm:$0xff]  ;;  %9201 = vmatmul.msk.bf16.gmra.mxu0 %vm3108_vm2, %v9474_v28 }
 0x356   : > { %5854 = vst.msk [vmem:[#allocation2 + $0x540] sm:$0xff] %vm276_vm3, %v5341_v45  ;;  %v9602_v36 = vld [vmem:[%s10011_s7 + $0x4f8] sm:$0xff]  ;;  %v5599_v45 = vadd.f32 %v12410_v63, %v1215_v9  ;;  %9265 = vmatmul.msk.bf16.gmra.mxu1 %vm3108_vm2, %v9538_v30  ;;  %v5472_v63 = vadd.f32 %v12438_v16, %v1088_v50  ;;  %v5345_v16 = vadd.f32 %v12451_v54, %v961_v56  ;;  %v962_v9 = vld [vmem:[#allocation2 + $0x568] sm:$0xff] }
 0x357   : > { %5982 = vst.msk [vmem:[#allocation2 + $0x940] sm:$0xff] %vm276_vm3, %v5469_v39  ;;  %v12504_v52 = vpop.f32.mrf.mxu3  ;;  %v5216_v39 = vadd.f32 %v12412_v35, %v832_v46  ;;  %9329 = vmatmul.msk.bf16.gmra.mxu2 %vm3108_vm2, %v9602_v36  ;;  %9393 = vmatmul.msk.bf16.gmra.mxu3 %vm3108_vm2, %v9666_v23  ;;  %v1089_v35 = vld [vmem:[#allocation2 + $0x960] sm:$0xff]  ;;  %v1090_v46 = vld [vmem:[#allocation2 + $0x968] sm:$0xff]  ;;  %v964_v56 = vld [vmem:[#allocation2 + $0x578] sm:$0xff] }
 0x358   : > { %6110 = vst.msk [vmem:[#allocation2 + $0xd40] sm:$0xff] %vm276_vm3, %v5597_v20  ;;  %v833_v20 = vld [vmem:[#allocation2 + $0x160] sm:$0xff]  ;;  %v5473_v17 = vadd.f32 %v12474_v32, %v1089_v35 }
 0x359   : > { %5727 = vst.msk [vmem:[#allocation2 + $0x148] sm:$0xff] %vm276_vm3, %v5214_v11  ;;  %v12540_v5 = vpop.f32.mrf.mxu2  ;;  %v5217_v11 = vadd.f32 %v12446_v58, %v833_v20  ;;  %v5601_v58 = vadd.f32 %v12478_v44, %v1217_v1  ;;  %v836_v20 = vld [vmem:[#allocation2 + $0x178] sm:$0xff] }
 0x35a   : > { %5855 = vst.msk [vmem:[#allocation2 + $0x548] sm:$0xff] %vm276_vm3, %v5342_v7  ;;  %v834_v7 = vld [vmem:[#allocation2 + $0x168] sm:$0xff] }
 0x35b   : > { %5983 = vst.msk [vmem:[#allocation2 + $0x948] sm:$0xff] %vm276_vm3, %v5470_v42  ;;  %v12550_v48 = vpop.f32.mrf.mxu1  ;;  %v5218_v42 = vadd.f32 %v12480_v29, %v834_v7 }
 0x35c   : > { %6111 = vst.msk [vmem:[#allocation2 + $0xd48] sm:$0xff] %vm276_vm3, %v5598_v0 }
 0x35d   : > { %v6369_v8 = vld [vmem:[#allocation2 + $0x540] sm:$0xff]  ;;  %5728 = vst.msk [vmem:[#allocation2 + $0x150] sm:$0xff] %vm276_vm3, %v5215_v49  ;;  %v12506_v31 = vpop.f32.mrf.mxu0 }
 0x35e   : > { %v6885_v43 = vadd.f32 %v12238_v47, %v6369_v8  ;;  %v6497_v60 = vld [vmem:[#allocation2 + $0x940] sm:$0xff]  ;;  %5856 = vst.msk [vmem:[#allocation2 + $0x550] sm:$0xff] %vm276_vm3, %v5343_v34 }
 0x35f   : > { %v7013_v40 = vadd.f32 %v12238_v47, %v6497_v60  ;;  %v6625_v4 = vld [vmem:[#allocation2 + $0xd40] sm:$0xff]  ;;  %5984 = vst.msk [vmem:[#allocation2 + $0x950] sm:$0xff] %vm276_vm3, %v5471_v14  ;;  %v12544_v27 = vpop.f32.mrf.mxu3 }
 0x360   : > { %7397 = vst.msk [vmem:[%s10192_s12 + $0x540] sm:$0xff] %vm276_vm3, %v6885_v43  ;;  %v7141_v25 = vadd.f32 %v12238_v47, %v6625_v4  ;;  %v6242_v2 = vld [vmem:[#allocation2 + $0x148] sm:$0xff]  ;;  %v9475_v43 = vld [vmem:[%s10011_s7 + $0x100] sm:$0xff] }
 0x361   : > { %7525 = vst.msk [vmem:[%s10192_s12 + $0x940] sm:$0xff] %vm276_vm3, %v7013_v40  ;;  %v6758_v13 = vadd.f32 %v12238_v47, %v6242_v2  ;;  %v6370_v55 = vld [vmem:[#allocation2 + $0x548] sm:$0xff]  ;;  %v12562_v61 = vpop.f32.mrf.mxu2  ;;  %v9539_v60 = vld [vmem:[%s10011_s7 + $0x300] sm:$0xff] }
 0x362   : > { %7653 = vst.msk [vmem:[%s10192_s12 + $0xd40] sm:$0xff] %vm276_vm3, %v7141_v25  ;;  %v6886_v6 = vadd.f32 %v12238_v47, %v6370_v55  ;;  %v6498_v15 = vld [vmem:[#allocation2 + $0x948] sm:$0xff]  ;;  %v9603_v25 = vld [vmem:[%s10011_s7 + $0x500] sm:$0xff] }
 0x363   : > { %7270 = vst.msk [vmem:[%s10192_s12 + $0x148] sm:$0xff] %vm276_vm3, %v6758_v13  ;;  %v7014_v51 = vadd.f32 %v12238_v47, %v6498_v15  ;;  %v6626_v19 = vld [vmem:[#allocation2 + $0xd48] sm:$0xff]  ;;  %v12573_v8 = vpop.f32.mrf.mxu1  ;;  %v9667_v2 = vld [vmem:[%s10011_s7 + $0x700] sm:$0xff] }
 0x364   : > { %7398 = vst.msk [vmem:[%s10192_s12 + $0x548] sm:$0xff] %vm276_vm3, %v6886_v6  ;;  %v7142_v53 = vadd.f32 %v12238_v47, %v6626_v19  ;;  %v6243_v37 = vld [vmem:[#allocation2 + $0x150] sm:$0xff] }
 0x365   : > { %7526 = vst.msk [vmem:[%s10192_s12 + $0x948] sm:$0xff] %vm276_vm3, %v7014_v51  ;;  %v6759_v22 = vadd.f32 %v12238_v47, %v6243_v37  ;;  %v6371_v41 = vld [vmem:[#allocation2 + $0x550] sm:$0xff]  ;;  %v12546_v18 = vpop.f32.mrf.mxu0  ;;  %9202 = vmatmul.msk.bf16.gmra.mxu0 %vm3108_vm2, %v9475_v43  ;;  %v1218_v37 = vld [vmem:[#allocation2 + $0xd68] sm:$0xff] }
 0x366   : > { %7654 = vst.msk [vmem:[%s10192_s12 + $0xd48] sm:$0xff] %vm276_vm3, %v7142_v53  ;;  %v6887_v62 = vadd.f32 %v12238_v47, %v6371_v41  ;;  %v6499_v33 = vld [vmem:[#allocation2 + $0x950] sm:$0xff]  ;;  %9266 = vmatmul.msk.bf16.gmra.mxu1 %vm3108_vm2, %v9539_v60 }
 0x367   : > { %7271 = vst.msk [vmem:[%s10192_s12 + $0x150] sm:$0xff] %vm276_vm3, %v6759_v22  ;;  %v7015_v57 = vadd.f32 %v12238_v47, %v6499_v33  ;;  %v12566_v32 = vpop.f32.mrf.mxu3  ;;  %9330 = vmatmul.msk.bf16.gmra.mxu2 %vm3108_vm2, %v9603_v25  ;;  %9394 = vmatmul.msk.bf16.gmra.mxu3 %vm3108_vm2, %v9667_v2  ;;  %v5346_v22 = vadd.f32 %v12483_v38, %v962_v9  ;;  %v835_v41 = vld [vmem:[#allocation2 + $0x170] sm:$0xff] }
 0x368   : > { %7399 = vst.msk [vmem:[%s10192_s12 + $0x550] sm:$0xff] %vm276_vm3, %v6887_v62  ;;  %v5474_v62 = vadd.f32 %v12499_v10, %v1090_v46  ;;  %v963_v33 = vld [vmem:[#allocation2 + $0x570] sm:$0xff]  ;;  %v5219_v59 = vadd.f32 %v12506_v31, %v835_v41  ;;  %v5220_v31 = vadd.f32 %v12546_v18, %v836_v20  ;;  %v9476_v18 = vld [vmem:[%s10011_s7 + $0x108] sm:$0xff] }
 0x369   : > { %7527 = vst.msk [vmem:[%s10192_s12 + $0x950] sm:$0xff] %vm276_vm3, %v7015_v57  ;;  %v12602_v36 = vpop.f32.mrf.mxu2  ;;  %v5602_v57 = vadd.f32 %v12504_v52, %v1218_v37  ;;  %v5347_v10 = vadd.f32 %v12511_v3, %v963_v33  ;;  %v5348_v3 = vadd.f32 %v12550_v48, %v964_v56  ;;  %v9604_v48 = vld [vmem:[%s10011_s7 + $0x508] sm:$0xff]  ;;  %v1093_v37 = vld [vmem:[#allocation2 + $0x980] sm:$0xff]  ;;  %v9605_v56 = vld [vmem:[%s10011_s7 + $0x510] sm:$0xff] }
 0x36a   : > { %6112 = vst.msk [vmem:[#allocation2 + $0xd50] sm:$0xff] %vm276_vm3, %v5599_v45 }
 0x36b   : > { %5729 = vst.msk [vmem:[#allocation2 + $0x158] sm:$0xff] %vm276_vm3, %v5216_v39  ;;  %v1091_v39 = vld [vmem:[#allocation2 + $0x970] sm:$0xff]  ;;  %v12615_v38 = vpop.f32.mrf.mxu1 }
 0x36c   : > { %5857 = vst.msk [vmem:[#allocation2 + $0x558] sm:$0xff] %vm276_vm3, %v5344_v12  ;;  %v1219_v12 = vld [vmem:[#allocation2 + $0xd70] sm:$0xff] }
 0x36d   : > { %5985 = vst.msk [vmem:[#allocation2 + $0x958] sm:$0xff] %vm276_vm3, %v5472_v63  ;;  %v12568_v14 = vpop.f32.mrf.mxu0  ;;  %v5475_v63 = vadd.f32 %v12540_v5, %v1091_v39  ;;  %v5603_v52 = vadd.f32 %v12544_v27, %v1219_v12  ;;  %v1222_v39 = vld [vmem:[#allocation2 + $0xd88] sm:$0xff] }
 0x36e   : > { %6113 = vst.msk [vmem:[#allocation2 + $0xd58] sm:$0xff] %vm276_vm3, %v5600_v21  ;;  %v1092_v21 = vld [vmem:[#allocation2 + $0x978] sm:$0xff] }
 0x36f   : > { %5730 = vst.msk [vmem:[#allocation2 + $0x160] sm:$0xff] %vm276_vm3, %v5217_v11  ;;  %v12608_v45 = vpop.f32.mrf.mxu3  ;;  %v5476_v5 = vadd.f32 %v12562_v61, %v1092_v21 }
 0x370   : > { %5858 = vst.msk [vmem:[#allocation2 + $0x560] sm:$0xff] %vm276_vm3, %v5345_v16  ;;  %v9540_v16 = vld [vmem:[%s10011_s7 + $0x308] sm:$0xff] }
 0x371   : > { %v6627_v54 = vld [vmem:[#allocation2 + $0xd50] sm:$0xff]  ;;  %5986 = vst.msk [vmem:[#allocation2 + $0x960] sm:$0xff] %vm276_vm3, %v5473_v17  ;;  %v12630_v35 = vpop.f32.mrf.mxu2 }
 0x372   : > { %v7143_v24 = vadd.f32 %v12238_v47, %v6627_v54  ;;  %v6244_v0 = vld [vmem:[#allocation2 + $0x158] sm:$0xff]  ;;  %6114 = vst.msk [vmem:[#allocation2 + $0xd60] sm:$0xff] %vm276_vm3, %v5601_v58 }
 0x373   : > { %v6760_v49 = vadd.f32 %v12238_v47, %v6244_v0  ;;  %v6372_v34 = vld [vmem:[#allocation2 + $0x558] sm:$0xff]  ;;  %5731 = vst.msk [vmem:[#allocation2 + $0x168] sm:$0xff] %vm276_vm3, %v5218_v42  ;;  %v12639_v27 = vpop.f32.mrf.mxu1  ;;  %v9668_v42 = vld [vmem:[%s10011_s7 + $0x708] sm:$0xff] }
 0x374   : > { %7655 = vst.msk [vmem:[%s10192_s12 + $0xd50] sm:$0xff] %vm276_vm3, %v7143_v24  ;;  %v6888_v44 = vadd.f32 %v12238_v47, %v6372_v34  ;;  %v6500_v29 = vld [vmem:[#allocation2 + $0x958] sm:$0xff] }
 0x375   : > { %7272 = vst.msk [vmem:[%s10192_s12 + $0x158] sm:$0xff] %vm276_vm3, %v6760_v49  ;;  %v7016_v40 = vadd.f32 %v12238_v47, %v6500_v29  ;;  %v6628_v4 = vld [vmem:[#allocation2 + $0xd58] sm:$0xff]  ;;  %v12610_v50 = vpop.f32.mrf.mxu0  ;;  %9203 = vmatmul.msk.bf16.gmra.mxu0 %vm3108_vm2, %v9476_v18 }
 0x376   : > { %7400 = vst.msk [vmem:[%s10192_s12 + $0x558] sm:$0xff] %vm276_vm3, %v6888_v44  ;;  %v7144_v13 = vadd.f32 %v12238_v47, %v6628_v4  ;;  %v6245_v55 = vld [vmem:[#allocation2 + $0x160] sm:$0xff]  ;;  %9267 = vmatmul.msk.bf16.gmra.mxu1 %vm3108_vm2, %v9540_v16  ;;  %v1220_v4 = vld [vmem:[#allocation2 + $0xd78] sm:$0xff] }
 0x377   : > { %7528 = vst.msk [vmem:[%s10192_s12 + $0x958] sm:$0xff] %vm276_vm3, %v7016_v40  ;;  %v6761_v6 = vadd.f32 %v12238_v47, %v6245_v55  ;;  %v6373_v15 = vld [vmem:[#allocation2 + $0x560] sm:$0xff]  ;;  %v12634_v11 = vpop.f32.mrf.mxu3  ;;  %9331 = vmatmul.msk.bf16.gmra.mxu2 %vm3108_vm2, %v9604_v48  ;;  %9395 = vmatmul.msk.bf16.gmra.mxu3 %vm3108_vm2, %v9668_v42 }
 0x378   : > { %7656 = vst.msk [vmem:[%s10192_s12 + $0xd58] sm:$0xff] %vm276_vm3, %v7144_v13  ;;  %v6889_v51 = vadd.f32 %v12238_v47, %v6373_v15  ;;  %v6501_v19 = vld [vmem:[#allocation2 + $0x960] sm:$0xff]  ;;  %v5606_v21 = vadd.f32 %v12634_v11, %v1222_v39 }
 0x379   : > { %7273 = vst.msk [vmem:[%s10192_s12 + $0x160] sm:$0xff] %vm276_vm3, %v6761_v6  ;;  %v7017_v26 = vadd.f32 %v12238_v47, %v6501_v19  ;;  %v6629_v53 = vld [vmem:[#allocation2 + $0xd60] sm:$0xff]  ;;  %v12663_v43 = vpop.f32.mrf.mxu2 }
 0x37a   : > { %7401 = vst.msk [vmem:[%s10192_s12 + $0x560] sm:$0xff] %vm276_vm3, %v6889_v51  ;;  %v7145_v28 = vadd.f32 %v12238_v47, %v6629_v53  ;;  %v6246_v30 = vld [vmem:[#allocation2 + $0x168] sm:$0xff]  ;;  %v837_v6 = vld [vmem:[#allocation2 + $0x180] sm:$0xff]  ;;  %v5604_v53 = vadd.f32 %v12566_v32, %v1220_v4 }
 0x37b   : > { %7529 = vst.msk [vmem:[%s10192_s12 + $0x960] sm:$0xff] %vm276_vm3, %v7017_v26  ;;  %v6762_v23 = vadd.f32 %v12238_v47, %v6246_v30  ;;  %v12675_v15 = vpop.f32.mrf.mxu1  ;;  %v965_v19 = vld [vmem:[#allocation2 + $0x580] sm:$0xff]  ;;  %v5221_v30 = vadd.f32 %v12568_v14, %v837_v6  ;;  %v966_v32 = vld [vmem:[#allocation2 + $0x588] sm:$0xff] }
 0x37c   : > { %7657 = vst.msk [vmem:[%s10192_s12 + $0xd60] sm:$0xff] %vm276_vm3, %v7145_v28  ;;  %v5349_v41 = vadd.f32 %v12573_v8, %v965_v19  ;;  %v1097_v39 = vld [vmem:[#allocation2 + $0x9a0] sm:$0xff] }
 0x37d   : > { %7274 = vst.msk [vmem:[%s10192_s12 + $0x168] sm:$0xff] %vm276_vm3, %v6762_v23  ;;  %v12636_v1 = vpop.f32.mrf.mxu0  ;;  %v838_v23 = vld [vmem:[#allocation2 + $0x188] sm:$0xff] }
 0x37e   : > { %5859 = vst.msk [vmem:[#allocation2 + $0x568] sm:$0xff] %vm276_vm3, %v5346_v22  ;;  %v1221_v22 = vld [vmem:[#allocation2 + $0xd80] sm:$0xff]  ;;  %v5222_v8 = vadd.f32 %v12610_v50, %v838_v23  ;;  %v9669_v50 = vld [vmem:[%s10011_s7 + $0x710] sm:$0xff]  ;;  %v9606_v23 = vld [vmem:[%s10011_s7 + $0x518] sm:$0xff] }
 0x37f   : > { %5987 = vst.msk [vmem:[#allocation2 + $0x968] sm:$0xff] %vm276_vm3, %v5474_v62  ;;  %v12668_v25 = vpop.f32.mrf.mxu3  ;;  %v5477_v62 = vadd.f32 %v12602_v36, %v1093_v37  ;;  %v5605_v33 = vadd.f32 %v12608_v45, %v1221_v22  ;;  %v9477_v45 = vld [vmem:[%s10011_s7 + $0x110] sm:$0xff]  ;;  %v9478_v22 = vld [vmem:[%s10011_s7 + $0x118] sm:$0xff] }
 0x380   : > { %6115 = vst.msk [vmem:[#allocation2 + $0xd68] sm:$0xff] %vm276_vm3, %v5602_v57  ;;  %v1094_v57 = vld [vmem:[#allocation2 + $0x988] sm:$0xff] }
 0x381   : > { %5732 = vst.msk [vmem:[#allocation2 + $0x170] sm:$0xff] %vm276_vm3, %v5219_v59  ;;  %v12696_v14 = vpop.f32.mrf.mxu2  ;;  %v839_v59 = vld [vmem:[#allocation2 + $0x190] sm:$0xff] }
 0x382   : > { %5860 = vst.msk [vmem:[#allocation2 + $0x570] sm:$0xff] %vm276_vm3, %v5347_v10  ;;  %v5350_v10 = vadd.f32 %v12615_v38, %v966_v32  ;;  %v5223_v38 = vadd.f32 %v12636_v1, %v839_v59  ;;  %v9670_v32 = vld [vmem:[%s10011_s7 + $0x718] sm:$0xff] }
 0x383   : > { %5988 = vst.msk [vmem:[#allocation2 + $0x970] sm:$0xff] %vm276_vm3, %v5475_v63  ;;  %v12706_v20 = vpop.f32.mrf.mxu1  ;;  %v9541_v63 = vld [vmem:[%s10011_s7 + $0x310] sm:$0xff] }
 0x384   : > { %6116 = vst.msk [vmem:[#allocation2 + $0xd70] sm:$0xff] %vm276_vm3, %v5603_v52  ;;  %v5478_v52 = vadd.f32 %v12630_v35, %v1094_v57  ;;  %v841_v57 = vld [vmem:[#allocation2 + $0x1a0] sm:$0xff] }
 0x385   : > { %v6374_v7 = vld [vmem:[#allocation2 + $0x568] sm:$0xff]  ;;  %5733 = vst.msk [vmem:[#allocation2 + $0x178] sm:$0xff] %vm276_vm3, %v5220_v31  ;;  %v12670_v2 = vpop.f32.mrf.mxu0  ;;  %9204 = vmatmul.msk.bf16.gmra.mxu0 %vm3108_vm2, %v9477_v45 }
 0x386   : > { %v6890_v17 = vadd.f32 %v12238_v47, %v6374_v7  ;;  %v6502_v58 = vld [vmem:[#allocation2 + $0x968] sm:$0xff]  ;;  %5861 = vst.msk [vmem:[#allocation2 + $0x578] sm:$0xff] %vm276_vm3, %v5348_v3  ;;  %9268 = vmatmul.msk.bf16.gmra.mxu1 %vm3108_vm2, %v9541_v63 }
 0x387   : > { %v7018_v54 = vadd.f32 %v12238_v47, %v6502_v58  ;;  %v6630_v24 = vld [vmem:[#allocation2 + $0xd68] sm:$0xff]  ;;  %5989 = vst.msk [vmem:[#allocation2 + $0x978] sm:$0xff] %vm276_vm3, %v5476_v5  ;;  %v12700_v12 = vpop.f32.mrf.mxu3  ;;  %9332 = vmatmul.msk.bf16.gmra.mxu2 %vm3108_vm2, %v9605_v56  ;;  %9396 = vmatmul.msk.bf16.gmra.mxu3 %vm3108_vm2, %v9669_v50 }
 0x388   : > { %7402 = vst.msk [vmem:[%s10192_s12 + $0x568] sm:$0xff] %vm276_vm3, %v6890_v17  ;;  %v7146_v0 = vadd.f32 %v12238_v47, %v6630_v24  ;;  %v6247_v61 = vld [vmem:[#allocation2 + $0x170] sm:$0xff] }
 0x389   : > { %7530 = vst.msk [vmem:[%s10192_s12 + $0x968] sm:$0xff] %vm276_vm3, %v7018_v54  ;;  %v6763_v49 = vadd.f32 %v12238_v47, %v6247_v61  ;;  %v6375_v34 = vld [vmem:[#allocation2 + $0x570] sm:$0xff]  ;;  %v12726_v5 = vpop.f32.mrf.mxu2 }
 0x38a   : > { %7658 = vst.msk [vmem:[%s10192_s12 + $0xd68] sm:$0xff] %vm276_vm3, %v7146_v0  ;;  %v6891_v44 = vadd.f32 %v12238_v47, %v6375_v34  ;;  %v6503_v29 = vld [vmem:[#allocation2 + $0x970] sm:$0xff] }
 0x38b   : > { %7275 = vst.msk [vmem:[%s10192_s12 + $0x170] sm:$0xff] %vm276_vm3, %v6763_v49  ;;  %v7019_v60 = vadd.f32 %v12238_v47, %v6503_v29  ;;  %v6631_v40 = vld [vmem:[#allocation2 + $0xd70] sm:$0xff]  ;;  %v12737_v17 = vpop.f32.mrf.mxu1 }
 0x38c   : > { %7403 = vst.msk [vmem:[%s10192_s12 + $0x570] sm:$0xff] %vm276_vm3, %v6891_v44  ;;  %v7147_v13 = vadd.f32 %v12238_v47, %v6631_v40  ;;  %v6248_v55 = vld [vmem:[#allocation2 + $0x178] sm:$0xff]  ;;  %v967_v49 = vld [vmem:[#allocation2 + $0x590] sm:$0xff] }
 0x38d   : > { %7531 = vst.msk [vmem:[%s10192_s12 + $0x970] sm:$0xff] %vm276_vm3, %v7019_v60  ;;  %v6764_v9 = vadd.f32 %v12238_v47, %v6248_v55  ;;  %v6376_v51 = vld [vmem:[#allocation2 + $0x578] sm:$0xff]  ;;  %v12702_v36 = vpop.f32.mrf.mxu0  ;;  %v1095_v29 = vld [vmem:[#allocation2 + $0x990] sm:$0xff]  ;;  %v12756_v60 = vld [vmem:[%s15225_s2] ss:$0 sm:$0xff]  ;;  %v5351_v6 = vadd.f32 %v12639_v27, %v967_v49 }
 0x38e   : > { %7659 = vst.msk [vmem:[%s10192_s12 + $0xd70] sm:$0xff] %vm276_vm3, %v7147_v13  ;;  %v6892_v46 = vadd.f32 %v12238_v47, %v6376_v51  ;;  %v6504_v26 = vld [vmem:[#allocation2 + $0x978] sm:$0xff]  ;;  %v1223_v13 = vld [vmem:[#allocation2 + $0xd90] sm:$0xff] }
 0x38f   : > { %7276 = vst.msk [vmem:[%s10192_s12 + $0x178] sm:$0xff] %vm276_vm3, %v6764_v9  ;;  %v7020_v28 = vadd.f32 %v12238_v47, %v6504_v26  ;;  %v12730_v18 = vpop.f32.mrf.mxu3  ;;  %v840_v9 = vld [vmem:[#allocation2 + $0x198] sm:$0xff]  ;;  %v5607_v27 = vadd.f32 %v12668_v25, %v1223_v13  ;;  %v9671_v13 = vld [vmem:[%s10011_s7 + $0x720] sm:$0xff] }
 0x390   : > { %7404 = vst.msk [vmem:[%s10192_s12 + $0x578] sm:$0xff] %vm276_vm3, %v6892_v46  ;;  %v5479_v46 = vadd.f32 %v12663_v43, %v1095_v29  ;;  %v968_v26 = vld [vmem:[#allocation2 + $0x598] sm:$0xff] }
 0x391   : > { %7532 = vst.msk [vmem:[%s10192_s12 + $0x978] sm:$0xff] %vm276_vm3, %v7020_v28  ;;  %v12763_v51 = vpop.f32.mrf.mxu2  ;;  %v1224_v43 = vld [vmem:[#allocation2 + $0xd98] sm:$0xff] }
 0x392   : > { %6117 = vst.msk [vmem:[#allocation2 + $0xd78] sm:$0xff] %vm276_vm3, %v5604_v53  ;;  %v1096_v53 = vld [vmem:[#allocation2 + $0x998] sm:$0xff] }
 0x393   : > { %5734 = vst.msk [vmem:[#allocation2 + $0x180] sm:$0xff] %vm276_vm3, %v5221_v30  ;;  %v12776_v30 = vpop.f32.mrf.mxu1  ;;  %v5480_v25 = vadd.f32 %v12696_v14, %v1096_v53 }
 0x394   : > { %5862 = vst.msk [vmem:[#allocation2 + $0x580] sm:$0xff] %vm276_vm3, %v5349_v41  ;;  %v9542_v41 = vld [vmem:[%s10011_s7 + $0x318] sm:$0xff] }
 0x395   : > { %5990 = vst.msk [vmem:[#allocation2 + $0x980] sm:$0xff] %vm276_vm3, %v5477_v62  ;;  %v12732_v16 = vpop.f32.mrf.mxu0  ;;  %v5224_v62 = vadd.f32 %v12670_v2, %v840_v9  ;;  %9205 = vmatmul.msk.bf16.gmra.mxu0 %vm3108_vm2, %v9478_v22  ;;  %v5608_v2 = vadd.f32 %v12700_v12, %v1224_v43  ;;  %v1098_v9 = vld [vmem:[#allocation2 + $0x9a8] sm:$0xff]  ;;  %v971_v22 = vld [vmem:[#allocation2 + $0x5b0] sm:$0xff] }
 0x396   : > { %6118 = vst.msk [vmem:[#allocation2 + $0xd80] sm:$0xff] %vm276_vm3, %v5605_v33  ;;  %v5352_v33 = vadd.f32 %v12675_v15, %v968_v26  ;;  %9269 = vmatmul.msk.bf16.gmra.mxu1 %vm3108_vm2, %v9542_v41  ;;  %v5225_v15 = vadd.f32 %v12702_v36, %v841_v57  ;;  %v1226_v26 = vld [vmem:[#allocation2 + $0xda8] sm:$0xff] }
 0x397   : > { %5735 = vst.msk [vmem:[#allocation2 + $0x188] sm:$0xff] %vm276_vm3, %v5222_v8  ;;  %v12769_v37 = vpop.f32.mrf.mxu3  ;;  %v969_v8 = vld [vmem:[#allocation2 + $0x5a0] sm:$0xff]  ;;  %9333 = vmatmul.msk.bf16.gmra.mxu2 %vm3108_vm2, %v9606_v23  ;;  %9397 = vmatmul.msk.bf16.gmra.mxu3 %vm3108_vm2, %v9670_v32 }
 0x398   : > { %5863 = vst.msk [vmem:[#allocation2 + $0x588] sm:$0xff] %vm276_vm3, %v5350_v10  ;;  %v5353_v59 = vadd.f32 %v12706_v20, %v969_v8  ;;  %v5481_v10 = vadd.f32 %v12726_v5, %v1097_v39  ;;  %v5610_v41 = vadd.f32 %v12769_v37, %v1226_v26 }
 0x399   : > { %v6632_v31 = vld [vmem:[#allocation2 + $0xd78] sm:$0xff]  ;;  %5991 = vst.msk [vmem:[#allocation2 + $0x988] sm:$0xff] %vm276_vm3, %v5478_v52  ;;  %v12799_v14 = vpop.f32.mrf.mxu2 }
 0x39a   : > { %v7148_v3 = vadd.f32 %v12238_v47, %v6632_v31  ;;  %v6249_v35 = vld [vmem:[#allocation2 + $0x180] sm:$0xff]  ;;  %6119 = vst.msk [vmem:[#allocation2 + $0xd88] sm:$0xff] %vm276_vm3, %v5606_v21 }
 0x39b   : > { %v6765_v11 = vadd.f32 %v12238_v47, %v6249_v35  ;;  %v6377_v1 = vld [vmem:[#allocation2 + $0x580] sm:$0xff]  ;;  %5736 = vst.msk [vmem:[#allocation2 + $0x190] sm:$0xff] %vm276_vm3, %v5223_v38  ;;  %v12808_v36 = vpop.f32.mrf.mxu1 }
 0x39c   : > { %7660 = vst.msk [vmem:[%s10192_s12 + $0xd78] sm:$0xff] %vm276_vm3, %v7148_v3  ;;  %v6893_v7 = vadd.f32 %v12238_v47, %v6377_v1  ;;  %v6505_v48 = vld [vmem:[#allocation2 + $0x980] sm:$0xff] }
 0x39d   : > { %7277 = vst.msk [vmem:[%s10192_s12 + $0x180] sm:$0xff] %vm276_vm3, %v6765_v11  ;;  %v7021_v58 = vadd.f32 %v12238_v47, %v6505_v48  ;;  %v6633_v42 = vld [vmem:[#allocation2 + $0xd80] sm:$0xff]  ;;  %v12771_v28 = vpop.f32.mrf.mxu0 }
 0x39e   : > { %7405 = vst.msk [vmem:[%s10192_s12 + $0x580] sm:$0xff] %vm276_vm3, %v6893_v7  ;;  %v7149_v54 = vadd.f32 %v12238_v47, %v6633_v42  ;;  %v6250_v24 = vld [vmem:[#allocation2 + $0x188] sm:$0xff]  ;;  %v1225_v11 = vld [vmem:[#allocation2 + $0xda0] sm:$0xff] }
 0x39f   : > { %7533 = vst.msk [vmem:[%s10192_s12 + $0x980] sm:$0xff] %vm276_vm3, %v7021_v58  ;;  %v6766_v0 = vadd.f32 %v12238_v47, %v6250_v24  ;;  %v6378_v61 = vld [vmem:[#allocation2 + $0x588] sm:$0xff]  ;;  %v12803_v12 = vpop.f32.mrf.mxu3 }
 0x3a0   : > { %7661 = vst.msk [vmem:[%s10192_s12 + $0xd80] sm:$0xff] %vm276_vm3, %v7149_v54  ;;  %v6894_v34 = vadd.f32 %v12238_v47, %v6378_v61  ;;  %v6506_v44 = vld [vmem:[#allocation2 + $0x988] sm:$0xff] }
 0x3a1   : > { %7278 = vst.msk [vmem:[%s10192_s12 + $0x188] sm:$0xff] %vm276_vm3, %v6766_v0  ;;  %v7022_v40 = vadd.f32 %v12756_v60, %v6506_v44  ;;  %v6634_v4 = vld [vmem:[#allocation2 + $0xd88] sm:$0xff]  ;;  %v12824_v1 = vpop.f32.mrf.mxu2  ;;  %v9543_v44 = vld [vmem:[%s10011_s7 + $0x320] sm:$0xff] }
 0x3a2   : > { %7406 = vst.msk [vmem:[%s10192_s12 + $0x588] sm:$0xff] %vm276_vm3, %v6894_v34  ;;  %v7150_v55 = vadd.f32 %v12756_v60, %v6634_v4  ;;  %v6251_v47 = vld [vmem:[#allocation2 + $0x190] sm:$0xff]  ;;  %v842_v58 = vld [vmem:[#allocation2 + $0x1a8] sm:$0xff]  ;;  %v9479_v34 = vld [vmem:[%s10011_s7 + $0x120] sm:$0xff] }
 0x3a3   : > { %7534 = vst.msk [vmem:[%s10192_s12 + $0x988] sm:$0xff] %vm276_vm3, %v7022_v40  ;;  %v6767_v19 = vadd.f32 %v12756_v60, %v6251_v47  ;;  %v970_v42 = vld [vmem:[#allocation2 + $0x5a8] sm:$0xff]  ;;  %v12836_v49 = vpop.f32.mrf.mxu1  ;;  %v9607_v4 = vld [vmem:[%s10011_s7 + $0x520] sm:$0xff] }
 0x3a4   : > { %7662 = vst.msk [vmem:[%s10192_s12 + $0xd88] sm:$0xff] %vm276_vm3, %v7150_v55  ;;  %v5354_v53 = vadd.f32 %v12737_v17, %v970_v42  ;;  %v1227_v17 = vld [vmem:[#allocation2 + $0xdb0] sm:$0xff] }
 0x3a5   : > { %7279 = vst.msk [vmem:[%s10192_s12 + $0x190] sm:$0xff] %vm276_vm3, %v6767_v19  ;;  %v12805_v45 = vpop.f32.mrf.mxu0  ;;  %9206 = vmatmul.msk.bf16.gmra.mxu0 %vm3108_vm2, %v9479_v34 }
 0x3a6   : > { %5864 = vst.msk [vmem:[#allocation2 + $0x590] sm:$0xff] %vm276_vm3, %v5351_v6  ;;  %v5609_v6 = vadd.f32 %v12730_v18, %v1225_v11  ;;  %9270 = vmatmul.msk.bf16.gmra.mxu1 %vm3108_vm2, %v9543_v44  ;;  %v5482_v18 = vadd.f32 %v12763_v51, %v1098_v9  ;;  %v5355_v51 = vadd.f32 %v12776_v30, %v971_v22  ;;  %v972_v11 = vld [vmem:[#allocation2 + $0x5b8] sm:$0xff]  ;;  %v974_v22 = vld [vmem:[#allocation2 + $0x5c8] sm:$0xff] }
 0x3a7   : > { %5992 = vst.msk [vmem:[#allocation2 + $0x990] sm:$0xff] %vm276_vm3, %v5479_v46  ;;  %v12829_v54 = vpop.f32.mrf.mxu3  ;;  %v5226_v46 = vadd.f32 %v12732_v16, %v842_v58  ;;  %9334 = vmatmul.msk.bf16.gmra.mxu2 %vm3108_vm2, %v9607_v4  ;;  %9398 = vmatmul.msk.bf16.gmra.mxu3 %vm3108_vm2, %v9671_v13  ;;  %v1099_v16 = vld [vmem:[#allocation2 + $0x9b0] sm:$0xff]  ;;  %v1100_v58 = vld [vmem:[#allocation2 + $0x9b8] sm:$0xff] }
 0x3a8   : > { %6120 = vst.msk [vmem:[#allocation2 + $0xd90] sm:$0xff] %vm276_vm3, %v5607_v27  ;;  %v843_v27 = vld [vmem:[#allocation2 + $0x1b0] sm:$0xff]  ;;  %v5483_v37 = vadd.f32 %v12799_v14, %v1099_v16 }
 0x3a9   : > { %5737 = vst.msk [vmem:[#allocation2 + $0x198] sm:$0xff] %vm276_vm3, %v5224_v62  ;;  %v12865_v23 = vpop.f32.mrf.mxu2  ;;  %v5227_v62 = vadd.f32 %v12771_v28, %v843_v27  ;;  %v5611_v28 = vadd.f32 %v12803_v12, %v1227_v17  ;;  %v846_v27 = vld [vmem:[#allocation2 + $0x1c8] sm:$0xff] }
 0x3aa   : > { %5865 = vst.msk [vmem:[#allocation2 + $0x598] sm:$0xff] %vm276_vm3, %v5352_v33  ;;  %v844_v33 = vld [vmem:[#allocation2 + $0x1b8] sm:$0xff] }
 0x3ab   : > { %5993 = vst.msk [vmem:[#allocation2 + $0x998] sm:$0xff] %vm276_vm3, %v5480_v25  ;;  %v12875_v57 = vpop.f32.mrf.mxu1  ;;  %v5228_v25 = vadd.f32 %v12805_v45, %v844_v33 }
 0x3ac   : > { %6121 = vst.msk [vmem:[#allocation2 + $0xd98] sm:$0xff] %vm276_vm3, %v5608_v2 }
 0x3ad   : > { %v6379_v63 = vld [vmem:[#allocation2 + $0x590] sm:$0xff]  ;;  %5738 = vst.msk [vmem:[#allocation2 + $0x1a0] sm:$0xff] %vm276_vm3, %v5225_v15  ;;  %v12831_v24 = vpop.f32.mrf.mxu0 }
 0x3ae   : > { %v6895_v20 = vadd.f32 %v12756_v60, %v6379_v63  ;;  %v6507_v56 = vld [vmem:[#allocation2 + $0x990] sm:$0xff]  ;;  %5866 = vst.msk [vmem:[#allocation2 + $0x5a0] sm:$0xff] %vm276_vm3, %v5353_v59 }
 0x3af   : > { %v7023_v52 = vadd.f32 %v12756_v60, %v6507_v56  ;;  %v6635_v50 = vld [vmem:[#allocation2 + $0xd90] sm:$0xff]  ;;  %5994 = vst.msk [vmem:[#allocation2 + $0x9a0] sm:$0xff] %vm276_vm3, %v5481_v10  ;;  %v12869_v43 = vpop.f32.mrf.mxu3  ;;  %v9544_v56 = vld [vmem:[%s10011_s7 + $0x328] sm:$0xff] }
 0x3b0   : > { %7407 = vst.msk [vmem:[%s10192_s12 + $0x590] sm:$0xff] %vm276_vm3, %v6895_v20  ;;  %v7151_v21 = vadd.f32 %v12756_v60, %v6635_v50  ;;  %v6252_v38 = vld [vmem:[#allocation2 + $0x198] sm:$0xff]  ;;  %v9480_v20 = vld [vmem:[%s10011_s7 + $0x128] sm:$0xff] }
 0x3b1   : > { %7535 = vst.msk [vmem:[%s10192_s12 + $0x990] sm:$0xff] %vm276_vm3, %v7023_v52  ;;  %v6768_v31 = vadd.f32 %v12756_v60, %v6252_v38  ;;  %v6380_v3 = vld [vmem:[#allocation2 + $0x598] sm:$0xff]  ;;  %v12887_v39 = vpop.f32.mrf.mxu2  ;;  %v9672_v38 = vld [vmem:[%s10011_s7 + $0x728] sm:$0xff] }
 0x3b2   : > { %7663 = vst.msk [vmem:[%s10192_s12 + $0xd90] sm:$0xff] %vm276_vm3, %v7151_v21  ;;  %v6896_v35 = vadd.f32 %v12756_v60, %v6380_v3  ;;  %v6508_v5 = vld [vmem:[#allocation2 + $0x998] sm:$0xff]  ;;  %v9608_v21 = vld [vmem:[%s10011_s7 + $0x528] sm:$0xff] }
 0x3b3   : > { %7280 = vst.msk [vmem:[%s10192_s12 + $0x198] sm:$0xff] %vm276_vm3, %v6768_v31  ;;  %v7024_v7 = vadd.f32 %v12756_v60, %v6508_v5  ;;  %v6636_v48 = vld [vmem:[#allocation2 + $0xd98] sm:$0xff]  ;;  %v12898_v63 = vpop.f32.mrf.mxu1 }
 0x3b4   : > { %7408 = vst.msk [vmem:[%s10192_s12 + $0x598] sm:$0xff] %vm276_vm3, %v6896_v35  ;;  %v7152_v0 = vadd.f32 %v12756_v60, %v6636_v48  ;;  %v6253_v61 = vld [vmem:[#allocation2 + $0x1a0] sm:$0xff] }
 0x3b5   : > { %7536 = vst.msk [vmem:[%s10192_s12 + $0x998] sm:$0xff] %vm276_vm3, %v7024_v7  ;;  %v6769_v29 = vadd.f32 %v12756_v60, %v6253_v61  ;;  %v6381_v40 = vld [vmem:[#allocation2 + $0x5a0] sm:$0xff]  ;;  %v12871_v32 = vpop.f32.mrf.mxu0  ;;  %9207 = vmatmul.msk.bf16.gmra.mxu0 %vm3108_vm2, %v9480_v20  ;;  %v1228_v61 = vld [vmem:[#allocation2 + $0xdb8] sm:$0xff] }
 0x3b6   : > { %7664 = vst.msk [vmem:[%s10192_s12 + $0xd98] sm:$0xff] %vm276_vm3, %v7152_v0  ;;  %v6897_v55 = vadd.f32 %v12756_v60, %v6381_v40  ;;  %v6509_v47 = vld [vmem:[#allocation2 + $0x9a0] sm:$0xff]  ;;  %9271 = vmatmul.msk.bf16.gmra.mxu1 %vm3108_vm2, %v9544_v56 }
 0x3b7   : > { %7281 = vst.msk [vmem:[%s10192_s12 + $0x1a0] sm:$0xff] %vm276_vm3, %v6769_v29  ;;  %v7025_v19 = vadd.f32 %v12756_v60, %v6509_v47  ;;  %v12891_v14 = vpop.f32.mrf.mxu3  ;;  %9335 = vmatmul.msk.bf16.gmra.mxu2 %vm3108_vm2, %v9608_v21  ;;  %9399 = vmatmul.msk.bf16.gmra.mxu3 %vm3108_vm2, %v9672_v38  ;;  %v5356_v29 = vadd.f32 %v12808_v36, %v972_v11  ;;  %v845_v40 = vld [vmem:[#allocation2 + $0x1c0] sm:$0xff] }
 0x3b8   : > { %7409 = vst.msk [vmem:[%s10192_s12 + $0x5a0] sm:$0xff] %vm276_vm3, %v6897_v55  ;;  %v5484_v55 = vadd.f32 %v12824_v1, %v1100_v58  ;;  %v973_v47 = vld [vmem:[#allocation2 + $0x5c0] sm:$0xff]  ;;  %v5229_v26 = vadd.f32 %v12831_v24, %v845_v40  ;;  %v5230_v24 = vadd.f32 %v12871_v32, %v846_v27  ;;  %v9481_v32 = vld [vmem:[%s10011_s7 + $0x130] sm:$0xff] }
 0x3b9   : > { %7537 = vst.msk [vmem:[%s10192_s12 + $0x9a0] sm:$0xff] %vm276_vm3, %v7025_v19  ;;  %v12927_v4 = vpop.f32.mrf.mxu2  ;;  %v5612_v19 = vadd.f32 %v12829_v54, %v1228_v61  ;;  %v5357_v1 = vadd.f32 %v12836_v49, %v973_v47  ;;  %v5358_v49 = vadd.f32 %v12875_v57, %v974_v22  ;;  %v9609_v57 = vld [vmem:[%s10011_s7 + $0x530] sm:$0xff]  ;;  %v9610_v22 = vld [vmem:[%s10011_s7 + $0x538] sm:$0xff] }
 0x3ba   : > { %6122 = vst.msk [vmem:[#allocation2 + $0xda0] sm:$0xff] %vm276_vm3, %v5609_v6  ;;  %v1103_v61 = vld [vmem:[#allocation2 + $0x9d0] sm:$0xff] }
 0x3bb   : > { %5739 = vst.msk [vmem:[#allocation2 + $0x1a8] sm:$0xff] %vm276_vm3, %v5226_v46  ;;  %v1101_v46 = vld [vmem:[#allocation2 + $0x9c0] sm:$0xff]  ;;  %v12940_v36 = vpop.f32.mrf.mxu1 }
 0x3bc   : > { %5867 = vst.msk [vmem:[#allocation2 + $0x5a8] sm:$0xff] %vm276_vm3, %v5354_v53  ;;  %v1229_v53 = vld [vmem:[#allocation2 + $0xdc0] sm:$0xff] }
 0x3bd   : > { %5995 = vst.msk [vmem:[#allocation2 + $0x9a8] sm:$0xff] %vm276_vm3, %v5482_v18  ;;  %v12893_v10 = vpop.f32.mrf.mxu0  ;;  %v5485_v18 = vadd.f32 %v12865_v23, %v1101_v46  ;;  %v5613_v54 = vadd.f32 %v12869_v43, %v1229_v53  ;;  %v1232_v46 = vld [vmem:[#allocation2 + $0xdd8] sm:$0xff] }
 0x3be   : > { %6123 = vst.msk [vmem:[#allocation2 + $0xda8] sm:$0xff] %vm276_vm3, %v5610_v41  ;;  %v1102_v41 = vld [vmem:[#allocation2 + $0x9c8] sm:$0xff] }
 0x3bf   : > { %5740 = vst.msk [vmem:[#allocation2 + $0x1b0] sm:$0xff] %vm276_vm3, %v5227_v62  ;;  %v12933_v6 = vpop.f32.mrf.mxu3  ;;  %v5486_v23 = vadd.f32 %v12887_v39, %v1102_v41 }
 0x3c0   : > { %5868 = vst.msk [vmem:[#allocation2 + $0x5b0] sm:$0xff] %vm276_vm3, %v5355_v51  ;;  %v9545_v51 = vld [vmem:[%s10011_s7 + $0x330] sm:$0xff] }
 0x3c1   : > { %v6637_v30 = vld [vmem:[#allocation2 + $0xda0] sm:$0xff]  ;;  %5996 = vst.msk [vmem:[#allocation2 + $0x9b0] sm:$0xff] %vm276_vm3, %v5483_v37  ;;  %v12955_v16 = vpop.f32.mrf.mxu2 }
 0x3c2   : > { %v7153_v8 = vadd.f32 %v12756_v60, %v6637_v30  ;;  %v6254_v2 = vld [vmem:[#allocation2 + $0x1a8] sm:$0xff]  ;;  %6124 = vst.msk [vmem:[#allocation2 + $0xdb0] sm:$0xff] %vm276_vm3, %v5611_v28 }
 0x3c3   : > { %v6770_v15 = vadd.f32 %v12756_v60, %v6254_v2  ;;  %v6382_v59 = vld [vmem:[#allocation2 + $0x5a8] sm:$0xff]  ;;  %5741 = vst.msk [vmem:[#allocation2 + $0x1b8] sm:$0xff] %vm276_vm3, %v5228_v25  ;;  %v12964_v43 = vpop.f32.mrf.mxu1  ;;  %v9673_v25 = vld [vmem:[%s10011_s7 + $0x730] sm:$0xff] }
 0x3c4   : > { %7665 = vst.msk [vmem:[%s10192_s12 + $0xda0] sm:$0xff] %vm276_vm3, %v7153_v8  ;;  %v6898_v12 = vadd.f32 %v12756_v60, %v6382_v59  ;;  %v6510_v45 = vld [vmem:[#allocation2 + $0x9a8] sm:$0xff] }
 0x3c5   : > { %7282 = vst.msk [vmem:[%s10192_s12 + $0x1a8] sm:$0xff] %vm276_vm3, %v6770_v15  ;;  %v7026_v52 = vadd.f32 %v12756_v60, %v6510_v45  ;;  %v6638_v50 = vld [vmem:[#allocation2 + $0xda8] sm:$0xff]  ;;  %v12935_v9 = vpop.f32.mrf.mxu0  ;;  %9208 = vmatmul.msk.bf16.gmra.mxu0 %vm3108_vm2, %v9481_v32 }
 0x3c6   : > { %7410 = vst.msk [vmem:[%s10192_s12 + $0x5a8] sm:$0xff] %vm276_vm3, %v6898_v12  ;;  %v7154_v31 = vadd.f32 %v12756_v60, %v6638_v50  ;;  %v6255_v3 = vld [vmem:[#allocation2 + $0x1b0] sm:$0xff]  ;;  %9272 = vmatmul.msk.bf16.gmra.mxu1 %vm3108_vm2, %v9545_v51  ;;  %v1230_v50 = vld [vmem:[#allocation2 + $0xdc8] sm:$0xff] }
 0x3c7   : > { %7538 = vst.msk [vmem:[%s10192_s12 + $0x9a8] sm:$0xff] %vm276_vm3, %v7026_v52  ;;  %v6771_v35 = vadd.f32 %v12756_v60, %v6255_v3  ;;  %v6383_v5 = vld [vmem:[#allocation2 + $0x5b0] sm:$0xff]  ;;  %v12959_v62 = vpop.f32.mrf.mxu3  ;;  %9336 = vmatmul.msk.bf16.gmra.mxu2 %vm3108_vm2, %v9609_v57  ;;  %9400 = vmatmul.msk.bf16.gmra.mxu3 %vm3108_vm2, %v9673_v25 }
 0x3c8   : > { %7666 = vst.msk [vmem:[%s10192_s12 + $0xda8] sm:$0xff] %vm276_vm3, %v7154_v31  ;;  %v6899_v7 = vadd.f32 %v12756_v60, %v6383_v5  ;;  %v6511_v48 = vld [vmem:[#allocation2 + $0x9b0] sm:$0xff]  ;;  %v5616_v41 = vadd.f32 %v12959_v62, %v1232_v46 }
 0x3c9   : > { %7283 = vst.msk [vmem:[%s10192_s12 + $0x1b0] sm:$0xff] %vm276_vm3, %v6771_v35  ;;  %v7027_v42 = vadd.f32 %v12756_v60, %v6511_v48  ;;  %v6639_v0 = vld [vmem:[#allocation2 + $0xdb0] sm:$0xff]  ;;  %v12988_v20 = vpop.f32.mrf.mxu2 }
 0x3ca   : > { %7411 = vst.msk [vmem:[%s10192_s12 + $0x5b0] sm:$0xff] %vm276_vm3, %v6899_v7  ;;  %v7155_v34 = vadd.f32 %v12756_v60, %v6639_v0  ;;  %v6256_v44 = vld [vmem:[#allocation2 + $0x1b8] sm:$0xff]  ;;  %v847_v35 = vld [vmem:[#allocation2 + $0x1d0] sm:$0xff]  ;;  %v5614_v0 = vadd.f32 %v12891_v14, %v1230_v50  ;;  %v1233_v50 = vld [vmem:[#allocation2 + $0xde0] sm:$0xff] }
 0x3cb   : > { %7539 = vst.msk [vmem:[%s10192_s12 + $0x9b0] sm:$0xff] %vm276_vm3, %v7027_v42  ;;  %v6772_v13 = vadd.f32 %v12756_v60, %v6256_v44  ;;  %v13000_v5 = vpop.f32.mrf.mxu1  ;;  %v975_v48 = vld [vmem:[#allocation2 + $0x5d0] sm:$0xff]  ;;  %v5231_v44 = vadd.f32 %v12893_v10, %v847_v35  ;;  %v976_v14 = vld [vmem:[#allocation2 + $0x5d8] sm:$0xff] }
 0x3cc   : > { %7667 = vst.msk [vmem:[%s10192_s12 + $0xdb0] sm:$0xff] %vm276_vm3, %v7155_v34  ;;  %v5359_v40 = vadd.f32 %v12898_v63, %v975_v48  ;;  %v1107_v46 = vld [vmem:[#allocation2 + $0x9f0] sm:$0xff] }
 0x3cd   : > { %7284 = vst.msk [vmem:[%s10192_s12 + $0x1b8] sm:$0xff] %vm276_vm3, %v6772_v13  ;;  %v12961_v17 = vpop.f32.mrf.mxu0  ;;  %v848_v13 = vld [vmem:[#allocation2 + $0x1d8] sm:$0xff] }
 0x3ce   : > { %5869 = vst.msk [vmem:[#allocation2 + $0x5b8] sm:$0xff] %vm276_vm3, %v5356_v29  ;;  %v1231_v29 = vld [vmem:[#allocation2 + $0xdd0] sm:$0xff]  ;;  %v5232_v63 = vadd.f32 %v12935_v9, %v848_v13  ;;  %v9674_v9 = vld [vmem:[%s10011_s7 + $0x738] sm:$0xff]  ;;  %v9611_v13 = vld [vmem:[%s10011_s7 + $0x540] sm:$0xff] }
 0x3cf   : > { %5997 = vst.msk [vmem:[#allocation2 + $0x9b8] sm:$0xff] %vm276_vm3, %v5484_v55  ;;  %v12993_v21 = vpop.f32.mrf.mxu3  ;;  %v5487_v55 = vadd.f32 %v12927_v4, %v1103_v61  ;;  %v5615_v47 = vadd.f32 %v12933_v6, %v1231_v29  ;;  %v9482_v6 = vld [vmem:[%s10011_s7 + $0x138] sm:$0xff]  ;;  %v9483_v29 = vld [vmem:[%s10011_s7 + $0x140] sm:$0xff] }
 0x3d0   : > { %6125 = vst.msk [vmem:[#allocation2 + $0xdb8] sm:$0xff] %vm276_vm3, %v5612_v19  ;;  %v1104_v19 = vld [vmem:[#allocation2 + $0x9d8] sm:$0xff] }
 0x3d1   : > { %5742 = vst.msk [vmem:[#allocation2 + $0x1c0] sm:$0xff] %vm276_vm3, %v5229_v26  ;;  %v13021_v10 = vpop.f32.mrf.mxu2  ;;  %v849_v26 = vld [vmem:[#allocation2 + $0x1e0] sm:$0xff] }
 0x3d2   : > { %5870 = vst.msk [vmem:[#allocation2 + $0x5c0] sm:$0xff] %vm276_vm3, %v5357_v1  ;;  %v5360_v1 = vadd.f32 %v12940_v36, %v976_v14  ;;  %v5233_v36 = vadd.f32 %v12961_v17, %v849_v26  ;;  %v9675_v14 = vld [vmem:[%s10011_s7 + $0x740] sm:$0xff] }
 0x3d3   : > { %5998 = vst.msk [vmem:[#allocation2 + $0x9c0] sm:$0xff] %vm276_vm3, %v5485_v18  ;;  %v13031_v27 = vpop.f32.mrf.mxu1  ;;  %v9546_v18 = vld [vmem:[%s10011_s7 + $0x338] sm:$0xff] }
 0x3d4   : > { %6126 = vst.msk [vmem:[#allocation2 + $0xdc0] sm:$0xff] %vm276_vm3, %v5613_v54  ;;  %v5488_v54 = vadd.f32 %v12955_v16, %v1104_v19  ;;  %v851_v19 = vld [vmem:[#allocation2 + $0x1f0] sm:$0xff] }
 0x3d5   : > { %v6384_v33 = vld [vmem:[#allocation2 + $0x5b8] sm:$0xff]  ;;  %5743 = vst.msk [vmem:[#allocation2 + $0x1c8] sm:$0xff] %vm276_vm3, %v5230_v24  ;;  %v12995_v38 = vpop.f32.mrf.mxu0  ;;  %9209 = vmatmul.msk.bf16.gmra.mxu0 %vm3108_vm2, %v9482_v6 }
 0x3d6   : > { %v6900_v37 = vadd.f32 %v12756_v60, %v6384_v33  ;;  %v6512_v28 = vld [vmem:[#allocation2 + $0x9b8] sm:$0xff]  ;;  %5871 = vst.msk [vmem:[#allocation2 + $0x5c8] sm:$0xff] %vm276_vm3, %v5358_v49  ;;  %9273 = vmatmul.msk.bf16.gmra.mxu1 %vm3108_vm2, %v9546_v18 }
 0x3d7   : > { %v7028_v30 = vadd.f32 %v12756_v60, %v6512_v28  ;;  %v6640_v8 = vld [vmem:[#allocation2 + $0xdb8] sm:$0xff]  ;;  %5999 = vst.msk [vmem:[#allocation2 + $0x9c8] sm:$0xff] %vm276_vm3, %v5486_v23  ;;  %v13025_v53 = vpop.f32.mrf.mxu3  ;;  %9337 = vmatmul.msk.bf16.gmra.mxu2 %vm3108_vm2, %v9610_v22  ;;  %9401 = vmatmul.msk.bf16.gmra.mxu3 %vm3108_vm2, %v9674_v9 }
 0x3d8   : > { %7412 = vst.msk [vmem:[%s10192_s12 + $0x5b8] sm:$0xff] %vm276_vm3, %v6900_v37  ;;  %v7156_v2 = vadd.f32 %v12756_v60, %v6640_v8  ;;  %v6257_v39 = vld [vmem:[#allocation2 + $0x1c0] sm:$0xff] }
 0x3d9   : > { %7540 = vst.msk [vmem:[%s10192_s12 + $0x9b8] sm:$0xff] %vm276_vm3, %v7028_v30  ;;  %v6773_v15 = vadd.f32 %v12756_v60, %v6257_v39  ;;  %v6385_v59 = vld [vmem:[#allocation2 + $0x5c0] sm:$0xff] }
 0x3da   : > { %7668 = vst.msk [vmem:[%s10192_s12 + $0xdb8] sm:$0xff] %vm276_vm3, %v7156_v2  ;;  %v6901_v12 = vadd.f32 %v12756_v60, %v6385_v59  ;;  %v6513_v45 = vld [vmem:[#allocation2 + $0x9c0] sm:$0xff]  ;;  %v13051_v23 = vpop.f32.mrf.mxu2 }
 0x3db   : > { %7285 = vst.msk [vmem:[%s10192_s12 + $0x1c0] sm:$0xff] %vm276_vm3, %v6773_v15  ;;  %v7029_v56 = vadd.f32 %v12756_v60, %v6513_v45  ;;  %v6641_v52 = vld [vmem:[#allocation2 + $0xdc0] sm:$0xff]  ;;  %v13062_v37 = vpop.f32.mrf.mxu1 }
 0x3dc   : > { %7413 = vst.msk [vmem:[%s10192_s12 + $0x5c0] sm:$0xff] %vm276_vm3, %v6901_v12  ;;  %v7157_v31 = vadd.f32 %v12756_v60, %v6641_v52  ;;  %v6258_v3 = vld [vmem:[#allocation2 + $0x1c8] sm:$0xff]  ;;  %v977_v15 = vld [vmem:[#allocation2 + $0x5e0] sm:$0xff] }
 0x3dd   : > { %7541 = vst.msk [vmem:[%s10192_s12 + $0x9c0] sm:$0xff] %vm276_vm3, %v7029_v56  ;;  %v6774_v11 = vadd.f32 %v12756_v60, %v6258_v3  ;;  %v6386_v7 = vld [vmem:[#allocation2 + $0x5c8] sm:$0xff]  ;;  %v13027_v4 = vpop.f32.mrf.mxu0  ;;  %v1105_v45 = vld [vmem:[#allocation2 + $0x9e0] sm:$0xff]  ;;  %v5361_v35 = vadd.f32 %v12964_v43, %v977_v15  ;;  %v5617_v43 = vadd.f32 %v12993_v21, %v1233_v50 }
 0x3de   : > { %7669 = vst.msk [vmem:[%s10192_s12 + $0xdc0] sm:$0xff] %vm276_vm3, %v7157_v31  ;;  %v6902_v58 = vadd.f32 %v12756_v60, %v6386_v7  ;;  %v6514_v42 = vld [vmem:[#allocation2 + $0x9c8] sm:$0xff] }
 0x3df   : > { %7286 = vst.msk [vmem:[%s10192_s12 + $0x1c8] sm:$0xff] %vm276_vm3, %v6774_v11  ;;  %v7030_v34 = vadd.f32 %v12756_v60, %v6514_v42  ;;  %v13055_v32 = vpop.f32.mrf.mxu3  ;;  %v850_v11 = vld [vmem:[#allocation2 + $0x1e8] sm:$0xff] }
 0x3e0   : > { %7414 = vst.msk [vmem:[%s10192_s12 + $0x5c8] sm:$0xff] %vm276_vm3, %v6902_v58  ;;  %v5489_v58 = vadd.f32 %v12988_v20, %v1105_v45  ;;  %v978_v42 = vld [vmem:[#allocation2 + $0x5e8] sm:$0xff] }
 0x3e1   : > { %7542 = vst.msk [vmem:[%s10192_s12 + $0x9c8] sm:$0xff] %vm276_vm3, %v7030_v34  ;;  %v1234_v20 = vld [vmem:[#allocation2 + $0xde8] sm:$0xff] }
 0x3e2   : > { %6127 = vst.msk [vmem:[#allocation2 + $0xdc8] sm:$0xff] %vm276_vm3, %v5614_v0  ;;  %v13083_v7 = vpop.f32.mrf.mxu2  ;;  %v1106_v0 = vld [vmem:[#allocation2 + $0x9e8] sm:$0xff] }
 0x3e3   : > { %5744 = vst.msk [vmem:[#allocation2 + $0x1d0] sm:$0xff] %vm276_vm3, %v5231_v44  ;;  %v13096_v44 = vpop.f32.mrf.mxu1  ;;  %v5490_v21 = vadd.f32 %v13021_v10, %v1106_v0  ;;  %v9676_v50 = vld [vmem:[%s10011_s7 + $0x748] sm:$0xff] }
 0x3e4   : > { %5872 = vst.msk [vmem:[#allocation2 + $0x5d0] sm:$0xff] %vm276_vm3, %v5359_v40  ;;  %v9547_v40 = vld [vmem:[%s10011_s7 + $0x340] sm:$0xff] }
 0x3e5   : > { %6000 = vst.msk [vmem:[#allocation2 + $0x9d0] sm:$0xff] %vm276_vm3, %v5487_v55  ;;  %v13057_v51 = vpop.f32.mrf.mxu0  ;;  %v5234_v55 = vadd.f32 %v12995_v38, %v850_v11  ;;  %9210 = vmatmul.msk.bf16.gmra.mxu0 %vm3108_vm2, %v9483_v29  ;;  %v5618_v38 = vadd.f32 %v13025_v53, %v1234_v20  ;;  %v1108_v11 = vld [vmem:[#allocation2 + $0x9f8] sm:$0xff]  ;;  %v981_v29 = vld [vmem:[#allocation2 + $0x600] sm:$0xff] }
 0x3e6   : > { %6128 = vst.msk [vmem:[#allocation2 + $0xdd0] sm:$0xff] %vm276_vm3, %v5615_v47  ;;  %v5362_v47 = vadd.f32 %v13000_v5, %v978_v42  ;;  %9274 = vmatmul.msk.bf16.gmra.mxu1 %vm3108_vm2, %v9547_v40  ;;  %v5235_v5 = vadd.f32 %v13027_v4, %v851_v19  ;;  %v1236_v42 = vld [vmem:[#allocation2 + $0xdf8] sm:$0xff] }
 0x3e7   : > { %5745 = vst.msk [vmem:[#allocation2 + $0x1d8] sm:$0xff] %vm276_vm3, %v5232_v63  ;;  %v13089_v61 = vpop.f32.mrf.mxu3  ;;  %v979_v63 = vld [vmem:[#allocation2 + $0x5f0] sm:$0xff]  ;;  %9338 = vmatmul.msk.bf16.gmra.mxu2 %vm3108_vm2, %v9611_v13  ;;  %9402 = vmatmul.msk.bf16.gmra.mxu3 %vm3108_vm2, %v9675_v14 }
 0x3e8   : > { %5873 = vst.msk [vmem:[#allocation2 + $0x5d8] sm:$0xff] %vm276_vm3, %v5360_v1  ;;  %v5363_v26 = vadd.f32 %v13031_v27, %v979_v63  ;;  %v5491_v1 = vadd.f32 %v13051_v23, %v1107_v46  ;;  %v5620_v40 = vadd.f32 %v13089_v61, %v1236_v42 }
 0x3e9   : > { %v6642_v24 = vld [vmem:[#allocation2 + $0xdc8] sm:$0xff]  ;;  %6001 = vst.msk [vmem:[#allocation2 + $0x9d8] sm:$0xff] %vm276_vm3, %v5488_v54 }
 0x3ea   : > { %v7158_v49 = vadd.f32 %v12756_v60, %v6642_v24  ;;  %v6259_v16 = vld [vmem:[#allocation2 + $0x1d0] sm:$0xff]  ;;  %6129 = vst.msk [vmem:[#allocation2 + $0xdd8] sm:$0xff] %vm276_vm3, %v5616_v41  ;;  %v13119_v10 = vpop.f32.mrf.mxu2 }
 0x3eb   : > { %v6775_v62 = vadd.f32 %v12756_v60, %v6259_v16  ;;  %v6387_v17 = vld [vmem:[#allocation2 + $0x5d0] sm:$0xff]  ;;  %5746 = vst.msk [vmem:[#allocation2 + $0x1e0] sm:$0xff] %vm276_vm3, %v5233_v36  ;;  %v13128_v4 = vpop.f32.mrf.mxu1 }
 0x3ec   : > { %7670 = vst.msk [vmem:[%s10192_s12 + $0xdc8] sm:$0xff] %vm276_vm3, %v7158_v49  ;;  %v6903_v33 = vadd.f32 %v12756_v60, %v6387_v17  ;;  %v6515_v57 = vld [vmem:[#allocation2 + $0x9d0] sm:$0xff] }
 0x3ed   : > { %7287 = vst.msk [vmem:[%s10192_s12 + $0x1d0] sm:$0xff] %vm276_vm3, %v6775_v62  ;;  %v7031_v28 = vadd.f32 %v12756_v60, %v6515_v57  ;;  %v6643_v25 = vld [vmem:[#allocation2 + $0xdd0] sm:$0xff]  ;;  %v13091_v34 = vpop.f32.mrf.mxu0 }
 0x3ee   : > { %7415 = vst.msk [vmem:[%s10192_s12 + $0x5d0] sm:$0xff] %vm276_vm3, %v6903_v33  ;;  %v7159_v30 = vadd.f32 %v12756_v60, %v6643_v25  ;;  %v6260_v8 = vld [vmem:[#allocation2 + $0x1d8] sm:$0xff]  ;;  %v1235_v62 = vld [vmem:[#allocation2 + $0xdf0] sm:$0xff] }
 0x3ef   : > { %7543 = vst.msk [vmem:[%s10192_s12 + $0x9d0] sm:$0xff] %vm276_vm3, %v7031_v28  ;;  %v6776_v2 = vadd.f32 %v12756_v60, %v6260_v8  ;;  %v6388_v39 = vld [vmem:[#allocation2 + $0x5d8] sm:$0xff]  ;;  %v13123_v53 = vpop.f32.mrf.mxu3 }
 0x3f0   : > { %7671 = vst.msk [vmem:[%s10192_s12 + $0xdd0] sm:$0xff] %vm276_vm3, %v7159_v30  ;;  %v6904_v59 = vadd.f32 %v12756_v60, %v6388_v39  ;;  %v6516_v12 = vld [vmem:[#allocation2 + $0x9d8] sm:$0xff] }
 0x3f1   : > { %7288 = vst.msk [vmem:[%s10192_s12 + $0x1d8] sm:$0xff] %vm276_vm3, %v6776_v2  ;;  %v7032_v56 = vadd.f32 %v12756_v60, %v6516_v12  ;;  %v6644_v52 = vld [vmem:[#allocation2 + $0xdd8] sm:$0xff]  ;;  %v9548_v12 = vld [vmem:[%s10011_s7 + $0x348] sm:$0xff] }
 0x3f2   : > { %7416 = vst.msk [vmem:[%s10192_s12 + $0x5d8] sm:$0xff] %vm276_vm3, %v6904_v59  ;;  %v7160_v31 = vadd.f32 %v12756_v60, %v6644_v52  ;;  %v6261_v3 = vld [vmem:[#allocation2 + $0x1e0] sm:$0xff]  ;;  %v13144_v17 = vpop.f32.mrf.mxu2  ;;  %v852_v28 = vld [vmem:[#allocation2 + $0x1f8] sm:$0xff]  ;;  %v9484_v59 = vld [vmem:[%s10011_s7 + $0x148] sm:$0xff] }
 0x3f3   : > { %7544 = vst.msk [vmem:[%s10192_s12 + $0x9d8] sm:$0xff] %vm276_vm3, %v7032_v56  ;;  %v6777_v48 = vadd.f32 %v12756_v60, %v6261_v3  ;;  %v980_v25 = vld [vmem:[#allocation2 + $0x5f8] sm:$0xff]  ;;  %v13156_v15 = vpop.f32.mrf.mxu1  ;;  %v9612_v52 = vld [vmem:[%s10011_s7 + $0x548] sm:$0xff] }
 0x3f4   : > { %7672 = vst.msk [vmem:[%s10192_s12 + $0xdd8] sm:$0xff] %vm276_vm3, %v7160_v31  ;;  %v5364_v0 = vadd.f32 %v13062_v37, %v980_v25  ;;  %v1237_v37 = vld [vmem:[#allocation2 + $0xe00] sm:$0xff] }
 0x3f5   : > { %7289 = vst.msk [vmem:[%s10192_s12 + $0x1e0] sm:$0xff] %vm276_vm3, %v6777_v48  ;;  %v13125_v6 = vpop.f32.mrf.mxu0  ;;  %9211 = vmatmul.msk.bf16.gmra.mxu0 %vm3108_vm2, %v9484_v59 }
 0x3f6   : > { %5874 = vst.msk [vmem:[#allocation2 + $0x5e0] sm:$0xff] %vm276_vm3, %v5361_v35  ;;  %v5619_v35 = vadd.f32 %v13055_v32, %v1235_v62  ;;  %9275 = vmatmul.msk.bf16.gmra.mxu1 %vm3108_vm2, %v9548_v12  ;;  %v5492_v32 = vadd.f32 %v13083_v7, %v1108_v11  ;;  %v5365_v7 = vadd.f32 %v13096_v44, %v981_v29  ;;  %v982_v62 = vld [vmem:[#allocation2 + $0x608] sm:$0xff]  ;;  %v1112_v29 = vld [vmem:[#allocation2 + $0xa18] sm:$0xff] }
 0x3f7   : > { %6002 = vst.msk [vmem:[#allocation2 + $0x9e0] sm:$0xff] %vm276_vm3, %v5489_v58  ;;  %v13149_v30 = vpop.f32.mrf.mxu3  ;;  %v5236_v58 = vadd.f32 %v13057_v51, %v852_v28  ;;  %9339 = vmatmul.msk.bf16.gmra.mxu2 %vm3108_vm2, %v9612_v52  ;;  %9403 = vmatmul.msk.bf16.gmra.mxu3 %vm3108_vm2, %v9676_v50  ;;  %v1109_v51 = vld [vmem:[#allocation2 + $0xa00] sm:$0xff]  ;;  %v1110_v28 = vld [vmem:[#allocation2 + $0xa08] sm:$0xff] }
 0x3f8   : > { %6130 = vst.msk [vmem:[#allocation2 + $0xde0] sm:$0xff] %vm276_vm3, %v5617_v43  ;;  %v853_v43 = vld [vmem:[#allocation2 + $0x200] sm:$0xff]  ;;  %v5493_v61 = vadd.f32 %v13119_v10, %v1109_v51 }
 0x3f9   : > { %5747 = vst.msk [vmem:[#allocation2 + $0x1e8] sm:$0xff] %vm276_vm3, %v5234_v55  ;;  %v5237_v55 = vadd.f32 %v13091_v34, %v853_v43  ;;  %v5621_v34 = vadd.f32 %v13123_v53, %v1237_v37 }
 0x3fa   : > { %5875 = vst.msk [vmem:[#allocation2 + $0x5e8] sm:$0xff] %vm276_vm3, %v5362_v47  ;;  %v13185_v13 = vpop.f32.mrf.mxu2  ;;  %v854_v47 = vld [vmem:[#allocation2 + $0x208] sm:$0xff] }
 0x3fb   : > { %6003 = vst.msk [vmem:[#allocation2 + $0x9e8] sm:$0xff] %vm276_vm3, %v5490_v21  ;;  %v13195_v19 = vpop.f32.mrf.mxu1  ;;  %v5238_v21 = vadd.f32 %v13125_v6, %v854_v47  ;;  %v9614_v47 = vld [vmem:[%s10011_s7 + $0x558] sm:$0xff] }
 0x3fc   : > { %6131 = vst.msk [vmem:[#allocation2 + $0xde8] sm:$0xff] %vm276_vm3, %v5618_v38 }
 0x3fd   : > { %v6389_v18 = vld [vmem:[#allocation2 + $0x5e0] sm:$0xff]  ;;  %5748 = vst.msk [vmem:[#allocation2 + $0x1f0] sm:$0xff] %vm276_vm3, %v5235_v5  ;;  %v13151_v8 = vpop.f32.mrf.mxu0 }
 0x3fe   : > { %v6905_v27 = vadd.f32 %v12756_v60, %v6389_v18  ;;  %v6517_v22 = vld [vmem:[#allocation2 + $0x9e0] sm:$0xff]  ;;  %5876 = vst.msk [vmem:[#allocation2 + $0x5f0] sm:$0xff] %vm276_vm3, %v5363_v26 }
 0x3ff   : > { %v7033_v54 = vadd.f32 %v12756_v60, %v6517_v22  ;;  %v6645_v9 = vld [vmem:[#allocation2 + $0xde0] sm:$0xff]  ;;  %6004 = vst.msk [vmem:[#allocation2 + $0x9f0] sm:$0xff] %vm276_vm3, %v5491_v1  ;;  %v13189_v20 = vpop.f32.mrf.mxu3  ;;  %v9549_v22 = vld [vmem:[%s10011_s7 + $0x350] sm:$0xff] }
 0x400   : > { %7417 = vst.msk [vmem:[%s10192_s12 + $0x5e0] sm:$0xff] %vm276_vm3, %v6905_v27  ;;  %v7161_v41 = vadd.f32 %v12756_v60, %v6645_v9  ;;  %v6262_v36 = vld [vmem:[#allocation2 + $0x1e8] sm:$0xff]  ;;  %v9485_v27 = vld [vmem:[%s10011_s7 + $0x150] sm:$0xff] }
 0x401   : > { %7545 = vst.msk [vmem:[%s10192_s12 + $0x9e0] sm:$0xff] %vm276_vm3, %v7033_v54  ;;  %v6778_v24 = vadd.f32 %v12756_v60, %v6262_v36  ;;  %v6390_v49 = vld [vmem:[#allocation2 + $0x5e8] sm:$0xff]  ;;  %v9677_v36 = vld [vmem:[%s10011_s7 + $0x750] sm:$0xff] }
 0x402   : > { %7673 = vst.msk [vmem:[%s10192_s12 + $0xde0] sm:$0xff] %vm276_vm3, %v7161_v41  ;;  %v6906_v16 = vadd.f32 %v12756_v60, %v6390_v49  ;;  %v6518_v23 = vld [vmem:[#allocation2 + $0x9e8] sm:$0xff]  ;;  %v13207_v46 = vpop.f32.mrf.mxu2  ;;  %v9613_v41 = vld [vmem:[%s10011_s7 + $0x550] sm:$0xff] }
 0x403   : > { %7290 = vst.msk [vmem:[%s10192_s12 + $0x1e8] sm:$0xff] %vm276_vm3, %v6778_v24  ;;  %v7034_v33 = vadd.f32 %v12756_v60, %v6518_v23  ;;  %v6646_v57 = vld [vmem:[#allocation2 + $0xde8] sm:$0xff]  ;;  %v13218_v18 = vpop.f32.mrf.mxu1  ;;  %v5496_v51 = vadd.f32 %v13207_v46, %v1112_v29 }
 0x404   : > { %7418 = vst.msk [vmem:[%s10192_s12 + $0x5e8] sm:$0xff] %vm276_vm3, %v6906_v16  ;;  %v7162_v2 = vadd.f32 %v12756_v60, %v6646_v57  ;;  %v6263_v39 = vld [vmem:[#allocation2 + $0x1f0] sm:$0xff] }
 0x405   : > { %7546 = vst.msk [vmem:[%s10192_s12 + $0x9e8] sm:$0xff] %vm276_vm3, %v7034_v33  ;;  %v6779_v45 = vadd.f32 %v12756_v60, %v6263_v39  ;;  %v6391_v56 = vld [vmem:[#allocation2 + $0x5f0] sm:$0xff]  ;;  %v13191_v14 = vpop.f32.mrf.mxu0  ;;  %9212 = vmatmul.msk.bf16.gmra.mxu0 %vm3108_vm2, %v9485_v27  ;;  %v1238_v39 = vld [vmem:[#allocation2 + $0xe08] sm:$0xff] }
 0x406   : > { %7674 = vst.msk [vmem:[%s10192_s12 + $0xde8] sm:$0xff] %vm276_vm3, %v7162_v2  ;;  %v6907_v31 = vadd.f32 %v12756_v60, %v6391_v56  ;;  %v6519_v3 = vld [vmem:[#allocation2 + $0x9f0] sm:$0xff]  ;;  %9276 = vmatmul.msk.bf16.gmra.mxu1 %vm3108_vm2, %v9549_v22 }
 0x407   : > { %7291 = vst.msk [vmem:[%s10192_s12 + $0x1f0] sm:$0xff] %vm276_vm3, %v6779_v45  ;;  %v7035_v48 = vadd.f32 %v12756_v60, %v6519_v3  ;;  %v13211_v10 = vpop.f32.mrf.mxu3  ;;  %9340 = vmatmul.msk.bf16.gmra.mxu2 %vm3108_vm2, %v9613_v41  ;;  %9404 = vmatmul.msk.bf16.gmra.mxu3 %vm3108_vm2, %v9677_v36  ;;  %v5366_v45 = vadd.f32 %v13128_v4, %v982_v62  ;;  %v855_v56 = vld [vmem:[#allocation2 + $0x210] sm:$0xff] }
 0x408   : > { %7419 = vst.msk [vmem:[%s10192_s12 + $0x5f0] sm:$0xff] %vm276_vm3, %v6907_v31  ;;  %v5494_v31 = vadd.f32 %v13144_v17, %v1110_v28  ;;  %v983_v3 = vld [vmem:[#allocation2 + $0x610] sm:$0xff]  ;;  %v5239_v42 = vadd.f32 %v13151_v8, %v855_v56  ;;  %v856_v17 = vld [vmem:[#allocation2 + $0x218] sm:$0xff] }
 0x409   : > { %7547 = vst.msk [vmem:[%s10192_s12 + $0x9f0] sm:$0xff] %vm276_vm3, %v7035_v48  ;;  %v5622_v48 = vadd.f32 %v13149_v30, %v1238_v39  ;;  %v5240_v8 = vadd.f32 %v13191_v14, %v856_v17  ;;  %v9550_v14 = vld [vmem:[%s10011_s7 + $0x358] sm:$0xff]  ;;  %v1113_v39 = vld [vmem:[#allocation2 + $0xa20] sm:$0xff] }
 0x40a   : > { %6132 = vst.msk [vmem:[#allocation2 + $0xdf0] sm:$0xff] %vm276_vm3, %v5619_v35  ;;  %v13247_v52 = vpop.f32.mrf.mxu2 }
 0x40b   : > { %5749 = vst.msk [vmem:[#allocation2 + $0x1f8] sm:$0xff] %vm276_vm3, %v5236_v58  ;;  %v1111_v58 = vld [vmem:[#allocation2 + $0xa10] sm:$0xff]  ;;  %v13260_v4 = vpop.f32.mrf.mxu1 }
 0x40c   : > { %5877 = vst.msk [vmem:[#allocation2 + $0x5f8] sm:$0xff] %vm276_vm3, %v5364_v0  ;;  %v1239_v0 = vld [vmem:[#allocation2 + $0xe10] sm:$0xff]  ;;  %v5495_v43 = vadd.f32 %v13185_v13, %v1111_v58  ;;  %v1242_v58 = vld [vmem:[#allocation2 + $0xe28] sm:$0xff] }
 0x40d   : > { %6005 = vst.msk [vmem:[#allocation2 + $0x9f8] sm:$0xff] %vm276_vm3, %v5492_v32  ;;  %v13213_v1 = vpop.f32.mrf.mxu0  ;;  %v984_v32 = vld [vmem:[#allocation2 + $0x618] sm:$0xff]  ;;  %v5623_v30 = vadd.f32 %v13189_v20, %v1239_v0 }
 0x40e   : > { %6133 = vst.msk [vmem:[#allocation2 + $0xdf8] sm:$0xff] %vm276_vm3, %v5620_v40  ;;  %v9486_v20 = vld [vmem:[%s10011_s7 + $0x158] sm:$0xff] }
 0x40f   : > { %5750 = vst.msk [vmem:[#allocation2 + $0x200] sm:$0xff] %vm276_vm3, %v5237_v55  ;;  %v13253_v35 = vpop.f32.mrf.mxu3 }
 0x410   : > { %5878 = vst.msk [vmem:[#allocation2 + $0x600] sm:$0xff] %vm276_vm3, %v5365_v7 }
 0x411   : > { %v6647_v44 = vld [vmem:[#allocation2 + $0xdf0] sm:$0xff]  ;;  %6006 = vst.msk [vmem:[#allocation2 + $0xa00] sm:$0xff] %vm276_vm3, %v5493_v61 }
 0x412   : > { %v7163_v63 = vadd.f32 %v12756_v60, %v6647_v44  ;;  %v6264_v38 = vld [vmem:[#allocation2 + $0x1f8] sm:$0xff]  ;;  %6134 = vst.msk [vmem:[#allocation2 + $0xe00] sm:$0xff] %vm276_vm3, %v5621_v34  ;;  %v13275_v40 = vpop.f32.mrf.mxu2 }
 0x413   : > { %v6780_v5 = vadd.f32 %v12756_v60, %v6264_v38  ;;  %v6392_v26 = vld [vmem:[#allocation2 + $0x5f8] sm:$0xff]  ;;  %5751 = vst.msk [vmem:[#allocation2 + $0x208] sm:$0xff] %vm276_vm3, %v5238_v21  ;;  %v13284_v37 = vpop.f32.mrf.mxu1 }
 0x414   : > { %7675 = vst.msk [vmem:[%s10192_s12 + $0xdf0] sm:$0xff] %vm276_vm3, %v7163_v63  ;;  %v6908_v53 = vadd.f32 %v12756_v60, %v6392_v26  ;;  %v6520_v6 = vld [vmem:[#allocation2 + $0x9f8] sm:$0xff] }
 0x415   : > { %7292 = vst.msk [vmem:[%s10192_s12 + $0x1f8] sm:$0xff] %vm276_vm3, %v6780_v5  ;;  %v7036_v54 = vadd.f32 %v12756_v60, %v6520_v6  ;;  %v6648_v9 = vld [vmem:[#allocation2 + $0xdf8] sm:$0xff]  ;;  %v13255_v11 = vpop.f32.mrf.mxu0  ;;  %9213 = vmatmul.msk.bf16.gmra.mxu0 %vm3108_vm2, %v9486_v20 }
 0x416   : > { %7420 = vst.msk [vmem:[%s10192_s12 + $0x5f8] sm:$0xff] %vm276_vm3, %v6908_v53  ;;  %v7164_v24 = vadd.f32 %v12756_v60, %v6648_v9  ;;  %v6265_v49 = vld [vmem:[#allocation2 + $0x200] sm:$0xff]  ;;  %9277 = vmatmul.msk.bf16.gmra.mxu1 %vm3108_vm2, %v9550_v14  ;;  %v9678_v21 = vld [vmem:[%s10011_s7 + $0x758] sm:$0xff] }
 0x417   : > { %7548 = vst.msk [vmem:[%s10192_s12 + $0x9f8] sm:$0xff] %vm276_vm3, %v7036_v54  ;;  %v6781_v16 = vadd.f32 %v12756_v60, %v6265_v49  ;;  %v6393_v23 = vld [vmem:[#allocation2 + $0x600] sm:$0xff]  ;;  %v13279_v13 = vpop.f32.mrf.mxu3  ;;  %9341 = vmatmul.msk.bf16.gmra.mxu2 %vm3108_vm2, %v9614_v47  ;;  %9405 = vmatmul.msk.bf16.gmra.mxu3 %vm3108_vm2, %v9678_v21  ;;  %v1240_v9 = vld [vmem:[#allocation2 + $0xe18] sm:$0xff] }
 0x418   : > { %7676 = vst.msk [vmem:[%s10192_s12 + $0xdf8] sm:$0xff] %vm276_vm3, %v7164_v24  ;;  %v6909_v33 = vadd.f32 %v12756_v60, %v6393_v23  ;;  %v6521_v57 = vld [vmem:[#allocation2 + $0xa00] sm:$0xff]  ;;  %v5626_v29 = vadd.f32 %v13279_v13, %v1242_v58 }
 0x419   : > { %7293 = vst.msk [vmem:[%s10192_s12 + $0x200] sm:$0xff] %vm276_vm3, %v6781_v16  ;;  %v7037_v25 = vadd.f32 %v12756_v60, %v6521_v57  ;;  %v6649_v2 = vld [vmem:[#allocation2 + $0xe00] sm:$0xff] }
 0x41a   : > { %7421 = vst.msk [vmem:[%s10192_s12 + $0x600] sm:$0xff] %vm276_vm3, %v6909_v33  ;;  %v7165_v59 = vadd.f32 %v12756_v60, %v6649_v2  ;;  %v6266_v12 = vld [vmem:[#allocation2 + $0x208] sm:$0xff]  ;;  %v13313_v27 = vpop.f32.mrf.mxu2  ;;  %v857_v16 = vld [vmem:[#allocation2 + $0x220] sm:$0xff]  ;;  %v5624_v2 = vadd.f32 %v13211_v10, %v1240_v9  ;;  %v1243_v9 = vld [vmem:[#allocation2 + $0xe30] sm:$0xff] }
 0x41b   : > { %7549 = vst.msk [vmem:[%s10192_s12 + $0xa00] sm:$0xff] %vm276_vm3, %v7037_v25  ;;  %v6782_v50 = vadd.f32 %v12756_v60, %v6266_v12  ;;  %v5367_v60 = vadd.f32 %v13156_v15, %v983_v3  ;;  %v5368_v15 = vadd.f32 %v13195_v19, %v984_v32  ;;  %v13293_v19 = vld [vmem:[%s15225_s2] ss:$0 sm:$0xff]  ;;  %v13325_v23 = vpop.f32.mrf.mxu1  ;;  %v5241_v12 = vadd.f32 %v13213_v1, %v857_v16  ;;  %v986_v10 = vld [vmem:[#allocation2 + $0x628] sm:$0xff] }
 0x41c   : > { %7677 = vst.msk [vmem:[%s10192_s12 + $0xe00] sm:$0xff] %vm276_vm3, %v7165_v59  ;;  %v985_v57 = vld [vmem:[#allocation2 + $0x620] sm:$0xff] }
 0x41d   : > { %7294 = vst.msk [vmem:[%s10192_s12 + $0x208] sm:$0xff] %vm276_vm3, %v6782_v50  ;;  %v13281_v55 = vpop.f32.mrf.mxu0  ;;  %v5369_v56 = vadd.f32 %v13218_v18, %v985_v57  ;;  %v858_v50 = vld [vmem:[#allocation2 + $0x228] sm:$0xff]  ;;  %v9615_v32 = vld [vmem:[%s10011_s7 + $0x560] sm:$0xff] }
 0x41e   : > { %5879 = vst.msk [vmem:[#allocation2 + $0x608] sm:$0xff] %vm276_vm3, %v5366_v45  ;;  %v1241_v45 = vld [vmem:[#allocation2 + $0xe20] sm:$0xff]  ;;  %v5242_v18 = vadd.f32 %v13255_v11, %v858_v50  ;;  %v9616_v50 = vld [vmem:[%s10011_s7 + $0x568] sm:$0xff] }
 0x41f   : > { %6007 = vst.msk [vmem:[#allocation2 + $0xa08] sm:$0xff] %vm276_vm3, %v5494_v31  ;;  %v13318_v41 = vpop.f32.mrf.mxu3  ;;  %v5497_v31 = vadd.f32 %v13247_v52, %v1113_v39  ;;  %v5625_v3 = vadd.f32 %v13253_v35, %v1241_v45  ;;  %v9487_v35 = vld [vmem:[%s10011_s7 + $0x160] sm:$0xff]  ;;  %v9488_v45 = vld [vmem:[%s10011_s7 + $0x168] sm:$0xff] }
 0x420   : > { %6135 = vst.msk [vmem:[#allocation2 + $0xe08] sm:$0xff] %vm276_vm3, %v5622_v48  ;;  %v1114_v48 = vld [vmem:[#allocation2 + $0xa28] sm:$0xff]  ;;  %v9679_v11 = vld [vmem:[%s10011_s7 + $0x760] sm:$0xff] }
 0x421   : > { %5752 = vst.msk [vmem:[#allocation2 + $0x210] sm:$0xff] %vm276_vm3, %v5239_v42  ;;  %v859_v42 = vld [vmem:[#allocation2 + $0x230] sm:$0xff]  ;;  %v1117_v58 = vld [vmem:[#allocation2 + $0xa40] sm:$0xff] }
 0x422   : > { %5880 = vst.msk [vmem:[#allocation2 + $0x610] sm:$0xff] %vm276_vm3, %v5367_v60  ;;  %v13346_v1 = vpop.f32.mrf.mxu2  ;;  %v5370_v60 = vadd.f32 %v13260_v4, %v986_v10  ;;  %v5243_v4 = vadd.f32 %v13281_v55, %v859_v42  ;;  %v9680_v10 = vld [vmem:[%s10011_s7 + $0x768] sm:$0xff] }
 0x423   : > { %6008 = vst.msk [vmem:[#allocation2 + $0xa10] sm:$0xff] %vm276_vm3, %v5495_v43  ;;  %v13356_v17 = vpop.f32.mrf.mxu1  ;;  %v9551_v43 = vld [vmem:[%s10011_s7 + $0x360] sm:$0xff] }
 0x424   : > { %6136 = vst.msk [vmem:[#allocation2 + $0xe10] sm:$0xff] %vm276_vm3, %v5623_v30  ;;  %v5498_v30 = vadd.f32 %v13275_v40, %v1114_v48  ;;  %v861_v48 = vld [vmem:[#allocation2 + $0x240] sm:$0xff] }
 0x425   : > { %v6394_v7 = vld [vmem:[#allocation2 + $0x608] sm:$0xff]  ;;  %5753 = vst.msk [vmem:[#allocation2 + $0x218] sm:$0xff] %vm276_vm3, %v5240_v8  ;;  %v13320_v36 = vpop.f32.mrf.mxu0  ;;  %9214 = vmatmul.msk.bf16.gmra.mxu0 %vm3108_vm2, %v9487_v35 }
 0x426   : > { %v6910_v61 = vadd.f32 %v13293_v19, %v6394_v7  ;;  %v6522_v34 = vld [vmem:[#allocation2 + $0xa08] sm:$0xff]  ;;  %5881 = vst.msk [vmem:[#allocation2 + $0x618] sm:$0xff] %vm276_vm3, %v5368_v15  ;;  %9278 = vmatmul.msk.bf16.gmra.mxu1 %vm3108_vm2, %v9551_v43 }
 0x427   : > { %v7038_v44 = vadd.f32 %v13293_v19, %v6522_v34  ;;  %v6650_v63 = vld [vmem:[#allocation2 + $0xe08] sm:$0xff]  ;;  %6009 = vst.msk [vmem:[#allocation2 + $0xa18] sm:$0xff] %vm276_vm3, %v5496_v51  ;;  %v13350_v0 = vpop.f32.mrf.mxu3  ;;  %9342 = vmatmul.msk.bf16.gmra.mxu2 %vm3108_vm2, %v9615_v32  ;;  %9406 = vmatmul.msk.bf16.gmra.mxu3 %vm3108_vm2, %v9679_v11 }
 0x428   : > { %7422 = vst.msk [vmem:[%s10192_s12 + $0x608] sm:$0xff] %vm276_vm3, %v6910_v61  ;;  %v7166_v38 = vadd.f32 %v13293_v19, %v6650_v63  ;;  %v6267_v46 = vld [vmem:[#allocation2 + $0x210] sm:$0xff] }
 0x429   : > { %7550 = vst.msk [vmem:[%s10192_s12 + $0xa08] sm:$0xff] %vm276_vm3, %v7038_v44  ;;  %v6783_v5 = vadd.f32 %v13293_v19, %v6267_v46  ;;  %v6395_v26 = vld [vmem:[#allocation2 + $0x610] sm:$0xff] }
 0x42a   : > { %7678 = vst.msk [vmem:[%s10192_s12 + $0xe08] sm:$0xff] %vm276_vm3, %v7166_v38  ;;  %v6911_v53 = vadd.f32 %v13293_v19, %v6395_v26  ;;  %v6523_v6 = vld [vmem:[#allocation2 + $0xa10] sm:$0xff]  ;;  %v13376_v51 = vpop.f32.mrf.mxu2 }
 0x42b   : > { %7295 = vst.msk [vmem:[%s10192_s12 + $0x210] sm:$0xff] %vm276_vm3, %v6783_v5  ;;  %v7039_v22 = vadd.f32 %v13293_v19, %v6523_v6  ;;  %v6651_v54 = vld [vmem:[#allocation2 + $0xe10] sm:$0xff]  ;;  %v13387_v61 = vpop.f32.mrf.mxu1 }
 0x42c   : > { %7423 = vst.msk [vmem:[%s10192_s12 + $0x610] sm:$0xff] %vm276_vm3, %v6911_v53  ;;  %v7167_v24 = vadd.f32 %v13293_v19, %v6651_v54  ;;  %v6268_v49 = vld [vmem:[#allocation2 + $0x218] sm:$0xff]  ;;  %v987_v5 = vld [vmem:[#allocation2 + $0x630] sm:$0xff] }
 0x42d   : > { %7551 = vst.msk [vmem:[%s10192_s12 + $0xa10] sm:$0xff] %vm276_vm3, %v7039_v22  ;;  %v6784_v62 = vadd.f32 %v13293_v19, %v6268_v49  ;;  %v6396_v33 = vld [vmem:[#allocation2 + $0x618] sm:$0xff]  ;;  %v13352_v52 = vpop.f32.mrf.mxu0  ;;  %v1115_v6 = vld [vmem:[#allocation2 + $0xa30] sm:$0xff]  ;;  %v5371_v16 = vadd.f32 %v13284_v37, %v987_v5  ;;  %v5627_v37 = vadd.f32 %v13318_v41, %v1243_v9 }
 0x42e   : > { %7679 = vst.msk [vmem:[%s10192_s12 + $0xe10] sm:$0xff] %vm276_vm3, %v7167_v24  ;;  %v6912_v28 = vadd.f32 %v13293_v19, %v6396_v33  ;;  %v6524_v25 = vld [vmem:[#allocation2 + $0xa18] sm:$0xff]  ;;  %v9681_v9 = vld [vmem:[%s10011_s7 + $0x770] sm:$0xff] }
 0x42f   : > { %7296 = vst.msk [vmem:[%s10192_s12 + $0x218] sm:$0xff] %vm276_vm3, %v6784_v62  ;;  %v7040_v59 = vadd.f32 %v13293_v19, %v6524_v25  ;;  %v13380_v20 = vpop.f32.mrf.mxu3  ;;  %v860_v62 = vld [vmem:[#allocation2 + $0x238] sm:$0xff] }
 0x430   : > { %7424 = vst.msk [vmem:[%s10192_s12 + $0x618] sm:$0xff] %vm276_vm3, %v6912_v28  ;;  %v5499_v28 = vadd.f32 %v13313_v27, %v1115_v6  ;;  %v988_v25 = vld [vmem:[#allocation2 + $0x638] sm:$0xff] }
 0x431   : > { %7552 = vst.msk [vmem:[%s10192_s12 + $0xa18] sm:$0xff] %vm276_vm3, %v7040_v59  ;;  %v1244_v27 = vld [vmem:[#allocation2 + $0xe38] sm:$0xff] }
 0x432   : > { %6137 = vst.msk [vmem:[#allocation2 + $0xe18] sm:$0xff] %vm276_vm3, %v5624_v2  ;;  %v13408_v33 = vpop.f32.mrf.mxu2  ;;  %v1116_v2 = vld [vmem:[#allocation2 + $0xa38] sm:$0xff] }
 0x433   : > { %5754 = vst.msk [vmem:[#allocation2 + $0x220] sm:$0xff] %vm276_vm3, %v5241_v12  ;;  %v13421_v12 = vpop.f32.mrf.mxu1  ;;  %v5500_v41 = vadd.f32 %v13346_v1, %v1116_v2 }
 0x434   : > { %5882 = vst.msk [vmem:[#allocation2 + $0x620] sm:$0xff] %vm276_vm3, %v5369_v56  ;;  %v9552_v56 = vld [vmem:[%s10011_s7 + $0x368] sm:$0xff] }
 0x435   : > { %6010 = vst.msk [vmem:[#allocation2 + $0xa20] sm:$0xff] %vm276_vm3, %v5497_v31  ;;  %v13382_v14 = vpop.f32.mrf.mxu0  ;;  %v5244_v31 = vadd.f32 %v13320_v36, %v860_v62  ;;  %9215 = vmatmul.msk.bf16.gmra.mxu0 %vm3108_vm2, %v9488_v45  ;;  %v5628_v36 = vadd.f32 %v13350_v0, %v1244_v27  ;;  %v1118_v62 = vld [vmem:[#allocation2 + $0xa48] sm:$0xff]  ;;  %v991_v45 = vld [vmem:[#allocation2 + $0x650] sm:$0xff] }
 0x436   : > { %6138 = vst.msk [vmem:[#allocation2 + $0xe20] sm:$0xff] %vm276_vm3, %v5625_v3  ;;  %v5372_v3 = vadd.f32 %v13325_v23, %v988_v25  ;;  %9279 = vmatmul.msk.bf16.gmra.mxu1 %vm3108_vm2, %v9552_v56  ;;  %v5245_v23 = vadd.f32 %v13352_v52, %v861_v48  ;;  %v1246_v25 = vld [vmem:[#allocation2 + $0xe48] sm:$0xff] }
 0x437   : > { %5755 = vst.msk [vmem:[#allocation2 + $0x228] sm:$0xff] %vm276_vm3, %v5242_v18  ;;  %v13414_v39 = vpop.f32.mrf.mxu3  ;;  %v989_v18 = vld [vmem:[#allocation2 + $0x640] sm:$0xff]  ;;  %9343 = vmatmul.msk.bf16.gmra.mxu2 %vm3108_vm2, %v9616_v50  ;;  %9407 = vmatmul.msk.bf16.gmra.mxu3 %vm3108_vm2, %v9680_v10 }
 0x438   : > { %5883 = vst.msk [vmem:[#allocation2 + $0x628] sm:$0xff] %vm276_vm3, %v5370_v60  ;;  %v5373_v42 = vadd.f32 %v13356_v17, %v989_v18  ;;  %v5501_v60 = vadd.f32 %v13376_v51, %v1117_v58  ;;  %v5630_v56 = vadd.f32 %v13414_v39, %v1246_v25 }
 0x439   : > { %v6652_v8 = vld [vmem:[#allocation2 + $0xe18] sm:$0xff]  ;;  %6011 = vst.msk [vmem:[#allocation2 + $0xa28] sm:$0xff] %vm276_vm3, %v5498_v30 }
 0x43a   : > { %v7168_v15 = vadd.f32 %v13293_v19, %v6652_v8  ;;  %v6269_v40 = vld [vmem:[#allocation2 + $0x220] sm:$0xff]  ;;  %6139 = vst.msk [vmem:[#allocation2 + $0xe28] sm:$0xff] %vm276_vm3, %v5626_v29  ;;  %v13444_v1 = vpop.f32.mrf.mxu2 }
 0x43b   : > { %v6785_v13 = vadd.f32 %v13293_v19, %v6269_v40  ;;  %v6397_v55 = vld [vmem:[#allocation2 + $0x620] sm:$0xff]  ;;  %5756 = vst.msk [vmem:[#allocation2 + $0x230] sm:$0xff] %vm276_vm3, %v5243_v4  ;;  %v13453_v52 = vpop.f32.mrf.mxu1 }
 0x43c   : > { %7680 = vst.msk [vmem:[%s10192_s12 + $0xe18] sm:$0xff] %vm276_vm3, %v7168_v15  ;;  %v6913_v7 = vadd.f32 %v13293_v19, %v6397_v55  ;;  %v6525_v47 = vld [vmem:[#allocation2 + $0xa20] sm:$0xff] }
 0x43d   : > { %7297 = vst.msk [vmem:[%s10192_s12 + $0x220] sm:$0xff] %vm276_vm3, %v6785_v13  ;;  %v7041_v34 = vadd.f32 %v13293_v19, %v6525_v47  ;;  %v6653_v21 = vld [vmem:[#allocation2 + $0xe20] sm:$0xff]  ;;  %v13416_v59 = vpop.f32.mrf.mxu0 }
 0x43e   : > { %7425 = vst.msk [vmem:[%s10192_s12 + $0x620] sm:$0xff] %vm276_vm3, %v6913_v7  ;;  %v7169_v44 = vadd.f32 %v13293_v19, %v6653_v21  ;;  %v6270_v63 = vld [vmem:[#allocation2 + $0x228] sm:$0xff]  ;;  %v1245_v13 = vld [vmem:[#allocation2 + $0xe40] sm:$0xff] }
 0x43f   : > { %7553 = vst.msk [vmem:[%s10192_s12 + $0xa20] sm:$0xff] %vm276_vm3, %v7041_v34  ;;  %v6786_v38 = vadd.f32 %v13293_v19, %v6270_v63  ;;  %v6398_v46 = vld [vmem:[#allocation2 + $0x628] sm:$0xff]  ;;  %v13448_v0 = vpop.f32.mrf.mxu3 }
 0x440   : > { %7681 = vst.msk [vmem:[%s10192_s12 + $0xe20] sm:$0xff] %vm276_vm3, %v7169_v44  ;;  %v6914_v26 = vadd.f32 %v13293_v19, %v6398_v46  ;;  %v6526_v53 = vld [vmem:[#allocation2 + $0xa28] sm:$0xff] }
 0x441   : > { %7298 = vst.msk [vmem:[%s10192_s12 + $0x228] sm:$0xff] %vm276_vm3, %v6786_v38  ;;  %v7042_v22 = vadd.f32 %v13293_v19, %v6526_v53  ;;  %v6654_v54 = vld [vmem:[#allocation2 + $0xe28] sm:$0xff]  ;;  %v9553_v53 = vld [vmem:[%s10011_s7 + $0x370] sm:$0xff] }
 0x442   : > { %7426 = vst.msk [vmem:[%s10192_s12 + $0x628] sm:$0xff] %vm276_vm3, %v6914_v26  ;;  %v7170_v24 = vadd.f32 %v13293_v19, %v6654_v54  ;;  %v6271_v49 = vld [vmem:[#allocation2 + $0x230] sm:$0xff]  ;;  %v13469_v55 = vpop.f32.mrf.mxu2  ;;  %v862_v34 = vld [vmem:[#allocation2 + $0x248] sm:$0xff] }
 0x443   : > { %7554 = vst.msk [vmem:[%s10192_s12 + $0xa28] sm:$0xff] %vm276_vm3, %v7042_v22  ;;  %v6787_v57 = vadd.f32 %v13293_v19, %v6271_v49  ;;  %v990_v21 = vld [vmem:[#allocation2 + $0x648] sm:$0xff]  ;;  %v13481_v5 = vpop.f32.mrf.mxu1  ;;  %v9489_v26 = vld [vmem:[%s10011_s7 + $0x170] sm:$0xff] }
 0x444   : > { %7682 = vst.msk [vmem:[%s10192_s12 + $0xe28] sm:$0xff] %vm276_vm3, %v7170_v24  ;;  %v9617_v54 = vld [vmem:[%s10011_s7 + $0x570] sm:$0xff]  ;;  %v5374_v2 = vadd.f32 %v13387_v61, %v990_v21 }
 0x445   : > { %7299 = vst.msk [vmem:[%s10192_s12 + $0x230] sm:$0xff] %vm276_vm3, %v6787_v57  ;;  %v13450_v35 = vpop.f32.mrf.mxu0  ;;  %9216 = vmatmul.msk.bf16.gmra.mxu0 %vm3108_vm2, %v9489_v26  ;;  %v1247_v61 = vld [vmem:[#allocation2 + $0xe50] sm:$0xff] }
 0x446   : > { %5884 = vst.msk [vmem:[#allocation2 + $0x630] sm:$0xff] %vm276_vm3, %v5371_v16  ;;  %v5629_v16 = vadd.f32 %v13380_v20, %v1245_v13  ;;  %9280 = vmatmul.msk.bf16.gmra.mxu1 %vm3108_vm2, %v9553_v53  ;;  %v5502_v20 = vadd.f32 %v13408_v33, %v1118_v62  ;;  %v5375_v33 = vadd.f32 %v13421_v12, %v991_v45  ;;  %v992_v13 = vld [vmem:[#allocation2 + $0x658] sm:$0xff]  ;;  %v994_v45 = vld [vmem:[#allocation2 + $0x668] sm:$0xff] }
 0x447   : > { %6012 = vst.msk [vmem:[#allocation2 + $0xa30] sm:$0xff] %vm276_vm3, %v5499_v28  ;;  %v13474_v44 = vpop.f32.mrf.mxu3  ;;  %v5246_v28 = vadd.f32 %v13382_v14, %v862_v34  ;;  %9344 = vmatmul.msk.bf16.gmra.mxu2 %vm3108_vm2, %v9617_v54  ;;  %9408 = vmatmul.msk.bf16.gmra.mxu3 %vm3108_vm2, %v9681_v9  ;;  %v1119_v14 = vld [vmem:[#allocation2 + $0xa50] sm:$0xff]  ;;  %v1120_v34 = vld [vmem:[#allocation2 + $0xa58] sm:$0xff] }
 0x448   : > { %6140 = vst.msk [vmem:[#allocation2 + $0xe30] sm:$0xff] %vm276_vm3, %v5627_v37  ;;  %v863_v37 = vld [vmem:[#allocation2 + $0x250] sm:$0xff]  ;;  %v5503_v39 = vadd.f32 %v13444_v1, %v1119_v14 }
 0x449   : > { %5757 = vst.msk [vmem:[#allocation2 + $0x238] sm:$0xff] %vm276_vm3, %v5244_v31  ;;  %v5247_v31 = vadd.f32 %v13416_v59, %v863_v37  ;;  %v5631_v59 = vadd.f32 %v13448_v0, %v1247_v61  ;;  %v866_v37 = vld [vmem:[#allocation2 + $0x268] sm:$0xff] }
 0x44a   : > { %5885 = vst.msk [vmem:[#allocation2 + $0x638] sm:$0xff] %vm276_vm3, %v5372_v3  ;;  %v13510_v50 = vpop.f32.mrf.mxu2  ;;  %v864_v3 = vld [vmem:[#allocation2 + $0x258] sm:$0xff] }
 0x44b   : > { %6013 = vst.msk [vmem:[#allocation2 + $0xa38] sm:$0xff] %vm276_vm3, %v5500_v41  ;;  %v13520_v48 = vpop.f32.mrf.mxu1  ;;  %v5248_v41 = vadd.f32 %v13450_v35, %v864_v3 }
 0x44c   : > { %6141 = vst.msk [vmem:[#allocation2 + $0xe38] sm:$0xff] %vm276_vm3, %v5628_v36 }
 0x44d   : > { %v6399_v43 = vld [vmem:[#allocation2 + $0x630] sm:$0xff]  ;;  %5758 = vst.msk [vmem:[#allocation2 + $0x240] sm:$0xff] %vm276_vm3, %v5245_v23  ;;  %v13476_v63 = vpop.f32.mrf.mxu0 }
 0x44e   : > { %v6915_v17 = vadd.f32 %v13293_v19, %v6399_v43  ;;  %v6527_v32 = vld [vmem:[#allocation2 + $0xa30] sm:$0xff]  ;;  %5886 = vst.msk [vmem:[#allocation2 + $0x640] sm:$0xff] %vm276_vm3, %v5373_v42 }
 0x44f   : > { %v7043_v30 = vadd.f32 %v13293_v19, %v6527_v32  ;;  %v6655_v11 = vld [vmem:[#allocation2 + $0xe30] sm:$0xff]  ;;  %6014 = vst.msk [vmem:[#allocation2 + $0xa40] sm:$0xff] %vm276_vm3, %v5501_v60  ;;  %v13514_v27 = vpop.f32.mrf.mxu3  ;;  %v9554_v32 = vld [vmem:[%s10011_s7 + $0x378] sm:$0xff] }
 0x450   : > { %7427 = vst.msk [vmem:[%s10192_s12 + $0x630] sm:$0xff] %vm276_vm3, %v6915_v17  ;;  %v7171_v29 = vadd.f32 %v13293_v19, %v6655_v11  ;;  %v6272_v4 = vld [vmem:[#allocation2 + $0x238] sm:$0xff] }
 0x451   : > { %7555 = vst.msk [vmem:[%s10192_s12 + $0xa30] sm:$0xff] %vm276_vm3, %v7043_v30  ;;  %v6788_v8 = vadd.f32 %v13293_v19, %v6272_v4  ;;  %v6400_v15 = vld [vmem:[#allocation2 + $0x638] sm:$0xff] }
 0x452   : > { %7683 = vst.msk [vmem:[%s10192_s12 + $0xe30] sm:$0xff] %vm276_vm3, %v7171_v29  ;;  %v6916_v40 = vadd.f32 %v13293_v19, %v6400_v15  ;;  %v6528_v51 = vld [vmem:[#allocation2 + $0xa38] sm:$0xff]  ;;  %v13532_v58 = vpop.f32.mrf.mxu2 }
 0x453   : > { %7300 = vst.msk [vmem:[%s10192_s12 + $0x238] sm:$0xff] %vm276_vm3, %v6788_v8  ;;  %v7044_v7 = vadd.f32 %v13293_v19, %v6528_v51  ;;  %v6656_v47 = vld [vmem:[#allocation2 + $0xe38] sm:$0xff]  ;;  %v13543_v43 = vpop.f32.mrf.mxu1 }
 0x454   : > { %7428 = vst.msk [vmem:[%s10192_s12 + $0x638] sm:$0xff] %vm276_vm3, %v6916_v40  ;;  %v7172_v38 = vadd.f32 %v13293_v19, %v6656_v47  ;;  %v6273_v46 = vld [vmem:[#allocation2 + $0x240] sm:$0xff]  ;;  %v9490_v17 = vld [vmem:[%s10011_s7 + $0x178] sm:$0xff] }
 0x455   : > { %7556 = vst.msk [vmem:[%s10192_s12 + $0xa38] sm:$0xff] %vm276_vm3, %v7044_v7  ;;  %v6789_v6 = vadd.f32 %v13293_v19, %v6273_v46  ;;  %v6401_v22 = vld [vmem:[#allocation2 + $0x640] sm:$0xff]  ;;  %v13516_v10 = vpop.f32.mrf.mxu0  ;;  %v9618_v29 = vld [vmem:[%s10011_s7 + $0x578] sm:$0xff]  ;;  %9217 = vmatmul.msk.bf16.gmra.mxu0 %vm3108_vm2, %v9490_v17 }
 0x456   : > { %7684 = vst.msk [vmem:[%s10192_s12 + $0xe38] sm:$0xff] %vm276_vm3, %v7172_v38  ;;  %v6917_v24 = vadd.f32 %v13293_v19, %v6401_v22  ;;  %v6529_v49 = vld [vmem:[#allocation2 + $0xa40] sm:$0xff]  ;;  %v9682_v4 = vld [vmem:[%s10011_s7 + $0x778] sm:$0xff]  ;;  %9281 = vmatmul.msk.bf16.gmra.mxu1 %vm3108_vm2, %v9554_v32 }
 0x457   : > { %7301 = vst.msk [vmem:[%s10192_s12 + $0x240] sm:$0xff] %vm276_vm3, %v6789_v6  ;;  %v7045_v57 = vadd.f32 %v13293_v19, %v6529_v49  ;;  %v13536_v1 = vpop.f32.mrf.mxu3  ;;  %9345 = vmatmul.msk.bf16.gmra.mxu2 %vm3108_vm2, %v9618_v29  ;;  %9409 = vmatmul.msk.bf16.gmra.mxu3 %vm3108_vm2, %v9682_v4  ;;  %v1248_v46 = vld [vmem:[#allocation2 + $0xe58] sm:$0xff]  ;;  %v5376_v6 = vadd.f32 %v13453_v52, %v992_v13  ;;  %v865_v22 = vld [vmem:[#allocation2 + $0x260] sm:$0xff] }
 0x458   : > { %7429 = vst.msk [vmem:[%s10192_s12 + $0x640] sm:$0xff] %vm276_vm3, %v6917_v24  ;;  %v5504_v24 = vadd.f32 %v13469_v55, %v1120_v34  ;;  %v993_v49 = vld [vmem:[#allocation2 + $0x660] sm:$0xff]  ;;  %v5249_v25 = vadd.f32 %v13476_v63, %v865_v22  ;;  %v5250_v63 = vadd.f32 %v13516_v10, %v866_v37 }
 0x459   : > { %7557 = vst.msk [vmem:[%s10192_s12 + $0xa40] sm:$0xff] %vm276_vm3, %v7045_v57  ;;  %v5632_v57 = vadd.f32 %v13474_v44, %v1248_v46  ;;  %v5377_v55 = vadd.f32 %v13481_v5, %v993_v49  ;;  %v5378_v5 = vadd.f32 %v13520_v48, %v994_v45  ;;  %v9491_v10 = vld [vmem:[%s10011_s7 + $0x180] sm:$0xff]  ;;  %v1123_v46 = vld [vmem:[#allocation2 + $0xa70] sm:$0xff]  ;;  %v9620_v45 = vld [vmem:[%s10011_s7 + $0x588] sm:$0xff] }
 0x45a   : > { %6142 = vst.msk [vmem:[#allocation2 + $0xe40] sm:$0xff] %vm276_vm3, %v5629_v16  ;;  %v13572_v54 = vpop.f32.mrf.mxu2  ;;  %v9619_v48 = vld [vmem:[%s10011_s7 + $0x580] sm:$0xff] }
 0x45b   : > { %5759 = vst.msk [vmem:[#allocation2 + $0x248] sm:$0xff] %vm276_vm3, %v5246_v28  ;;  %v1121_v28 = vld [vmem:[#allocation2 + $0xa60] sm:$0xff]  ;;  %v13585_v52 = vpop.f32.mrf.mxu1 }
 0x45c   : > { %5887 = vst.msk [vmem:[#allocation2 + $0x648] sm:$0xff] %vm276_vm3, %v5374_v2  ;;  %v1249_v2 = vld [vmem:[#allocation2 + $0xe60] sm:$0xff] }
 0x45d   : > { %6015 = vst.msk [vmem:[#allocation2 + $0xa48] sm:$0xff] %vm276_vm3, %v5502_v20  ;;  %v13538_v60 = vpop.f32.mrf.mxu0  ;;  %v5505_v20 = vadd.f32 %v13510_v50, %v1121_v28  ;;  %v5633_v44 = vadd.f32 %v13514_v27, %v1249_v2  ;;  %v1252_v28 = vld [vmem:[#allocation2 + $0xe78] sm:$0xff] }
 0x45e   : > { %6143 = vst.msk [vmem:[#allocation2 + $0xe48] sm:$0xff] %vm276_vm3, %v5630_v56  ;;  %v1122_v56 = vld [vmem:[#allocation2 + $0xa68] sm:$0xff] }
 0x45f   : > { %5760 = vst.msk [vmem:[#allocation2 + $0x250] sm:$0xff] %vm276_vm3, %v5247_v31  ;;  %v13578_v16 = vpop.f32.mrf.mxu3  ;;  %v5506_v50 = vadd.f32 %v13532_v58, %v1122_v56 }
 0x460   : > { %5888 = vst.msk [vmem:[#allocation2 + $0x650] sm:$0xff] %vm276_vm3, %v5375_v33  ;;  %v9555_v33 = vld [vmem:[%s10011_s7 + $0x380] sm:$0xff] }
 0x461   : > { %v6657_v12 = vld [vmem:[#allocation2 + $0xe40] sm:$0xff]  ;;  %6016 = vst.msk [vmem:[#allocation2 + $0xa50] sm:$0xff] %vm276_vm3, %v5503_v39 }
 0x462   : > { %v7173_v18 = vadd.f32 %v13293_v19, %v6657_v12  ;;  %v6274_v36 = vld [vmem:[#allocation2 + $0x248] sm:$0xff]  ;;  %6144 = vst.msk [vmem:[#allocation2 + $0xe50] sm:$0xff] %vm276_vm3, %v5631_v59  ;;  %v13600_v14 = vpop.f32.mrf.mxu2 }
 0x463   : > { %v6790_v23 = vadd.f32 %v13293_v19, %v6274_v36  ;;  %v6402_v42 = vld [vmem:[#allocation2 + $0x648] sm:$0xff]  ;;  %5761 = vst.msk [vmem:[#allocation2 + $0x258] sm:$0xff] %vm276_vm3, %v5248_v41  ;;  %v13609_v27 = vpop.f32.mrf.mxu1  ;;  %v9683_v41 = vld [vmem:[%s10011_s7 + $0x780] sm:$0xff] }
 0x464   : > { %7685 = vst.msk [vmem:[%s10192_s12 + $0xe40] sm:$0xff] %vm276_vm3, %v7173_v18  ;;  %v6918_v0 = vadd.f32 %v13293_v19, %v6402_v42  ;;  %v6530_v35 = vld [vmem:[#allocation2 + $0xa48] sm:$0xff] }
 0x465   : > { %7302 = vst.msk [vmem:[%s10192_s12 + $0x248] sm:$0xff] %vm276_vm3, %v6790_v23  ;;  %v7046_v30 = vadd.f32 %v13293_v19, %v6530_v35  ;;  %v6658_v11 = vld [vmem:[#allocation2 + $0xe48] sm:$0xff]  ;;  %v13580_v62 = vpop.f32.mrf.mxu0  ;;  %9218 = vmatmul.msk.bf16.gmra.mxu0 %vm3108_vm2, %v9491_v10 }
 0x466   : > { %7430 = vst.msk [vmem:[%s10192_s12 + $0x648] sm:$0xff] %vm276_vm3, %v6918_v0  ;;  %v7174_v8 = vadd.f32 %v13293_v19, %v6658_v11  ;;  %v6275_v15 = vld [vmem:[#allocation2 + $0x250] sm:$0xff]  ;;  %9282 = vmatmul.msk.bf16.gmra.mxu1 %vm3108_vm2, %v9555_v33  ;;  %v1250_v11 = vld [vmem:[#allocation2 + $0xe68] sm:$0xff] }
 0x467   : > { %7558 = vst.msk [vmem:[%s10192_s12 + $0xa48] sm:$0xff] %vm276_vm3, %v7046_v30  ;;  %v6791_v40 = vadd.f32 %v13293_v19, %v6275_v15  ;;  %v6403_v51 = vld [vmem:[#allocation2 + $0x650] sm:$0xff]  ;;  %v13604_v31 = vpop.f32.mrf.mxu3  ;;  %9346 = vmatmul.msk.bf16.gmra.mxu2 %vm3108_vm2, %v9619_v48  ;;  %9410 = vmatmul.msk.bf16.gmra.mxu3 %vm3108_vm2, %v9683_v41 }
 0x468   : > { %7686 = vst.msk [vmem:[%s10192_s12 + $0xe48] sm:$0xff] %vm276_vm3, %v7174_v8  ;;  %v6919_v7 = vadd.f32 %v13293_v19, %v6403_v51  ;;  %v6531_v47 = vld [vmem:[#allocation2 + $0xa50] sm:$0xff]  ;;  %v5636_v56 = vadd.f32 %v13604_v31, %v1252_v28 }
 0x469   : > { %7303 = vst.msk [vmem:[%s10192_s12 + $0x250] sm:$0xff] %vm276_vm3, %v6791_v40  ;;  %v7047_v21 = vadd.f32 %v13293_v19, %v6531_v47  ;;  %v6659_v38 = vld [vmem:[#allocation2 + $0xe50] sm:$0xff] }
 0x46a   : > { %7431 = vst.msk [vmem:[%s10192_s12 + $0x650] sm:$0xff] %vm276_vm3, %v6919_v7  ;;  %v7175_v26 = vadd.f32 %v13293_v19, %v6659_v38  ;;  %v6276_v53 = vld [vmem:[#allocation2 + $0x258] sm:$0xff]  ;;  %v13633_v17 = vpop.f32.mrf.mxu2  ;;  %v867_v40 = vld [vmem:[#allocation2 + $0x270] sm:$0xff]  ;;  %v5634_v38 = vadd.f32 %v13536_v1, %v1250_v11  ;;  %v1253_v11 = vld [vmem:[#allocation2 + $0xe80] sm:$0xff] }
 0x46b   : > { %7559 = vst.msk [vmem:[%s10192_s12 + $0xa50] sm:$0xff] %vm276_vm3, %v7047_v21  ;;  %v6792_v9 = vadd.f32 %v13293_v19, %v6276_v53  ;;  %v13645_v51 = vpop.f32.mrf.mxu1  ;;  %v995_v47 = vld [vmem:[#allocation2 + $0x670] sm:$0xff]  ;;  %v5251_v53 = vadd.f32 %v13538_v60, %v867_v40  ;;  %v996_v1 = vld [vmem:[#allocation2 + $0x678] sm:$0xff] }
 0x46c   : > { %7687 = vst.msk [vmem:[%s10192_s12 + $0xe50] sm:$0xff] %vm276_vm3, %v7175_v26  ;;  %v5379_v22 = vadd.f32 %v13543_v43, %v995_v47  ;;  %v1127_v28 = vld [vmem:[#allocation2 + $0xa90] sm:$0xff] }
 0x46d   : > { %7304 = vst.msk [vmem:[%s10192_s12 + $0x258] sm:$0xff] %vm276_vm3, %v6792_v9  ;;  %v13606_v61 = vpop.f32.mrf.mxu0  ;;  %v868_v9 = vld [vmem:[#allocation2 + $0x278] sm:$0xff] }
 0x46e   : > { %5889 = vst.msk [vmem:[#allocation2 + $0x658] sm:$0xff] %vm276_vm3, %v5376_v6  ;;  %v1251_v6 = vld [vmem:[#allocation2 + $0xe70] sm:$0xff]  ;;  %v5252_v43 = vadd.f32 %v13580_v62, %v868_v9  ;;  %v9684_v62 = vld [vmem:[%s10011_s7 + $0x788] sm:$0xff] }
 0x46f   : > { %6017 = vst.msk [vmem:[#allocation2 + $0xa58] sm:$0xff] %vm276_vm3, %v5504_v24  ;;  %v13638_v29 = vpop.f32.mrf.mxu3  ;;  %v5507_v24 = vadd.f32 %v13572_v54, %v1123_v46  ;;  %v5635_v49 = vadd.f32 %v13578_v16, %v1251_v6  ;;  %v9492_v16 = vld [vmem:[%s10011_s7 + $0x188] sm:$0xff]  ;;  %v9493_v6 = vld [vmem:[%s10011_s7 + $0x190] sm:$0xff] }
 0x470   : > { %6145 = vst.msk [vmem:[#allocation2 + $0xe58] sm:$0xff] %vm276_vm3, %v5632_v57  ;;  %v1124_v57 = vld [vmem:[#allocation2 + $0xa78] sm:$0xff]  ;;  %v9621_v9 = vld [vmem:[%s10011_s7 + $0x590] sm:$0xff] }
 0x471   : > { %5762 = vst.msk [vmem:[#allocation2 + $0x260] sm:$0xff] %vm276_vm3, %v5249_v25  ;;  %v869_v25 = vld [vmem:[#allocation2 + $0x280] sm:$0xff] }
 0x472   : > { %5890 = vst.msk [vmem:[#allocation2 + $0x660] sm:$0xff] %vm276_vm3, %v5377_v55  ;;  %v13666_v60 = vpop.f32.mrf.mxu2  ;;  %v5380_v55 = vadd.f32 %v13585_v52, %v996_v1  ;;  %v5253_v52 = vadd.f32 %v13606_v61, %v869_v25  ;;  %v9685_v1 = vld [vmem:[%s10011_s7 + $0x790] sm:$0xff] }
 0x473   : > { %6018 = vst.msk [vmem:[#allocation2 + $0xa60] sm:$0xff] %vm276_vm3, %v5505_v20  ;;  %v13676_v37 = vpop.f32.mrf.mxu1  ;;  %v9556_v20 = vld [vmem:[%s10011_s7 + $0x388] sm:$0xff] }
 0x474   : > { %6146 = vst.msk [vmem:[#allocation2 + $0xe60] sm:$0xff] %vm276_vm3, %v5633_v44  ;;  %v5508_v44 = vadd.f32 %v13600_v14, %v1124_v57  ;;  %v871_v57 = vld [vmem:[#allocation2 + $0x290] sm:$0xff] }
 0x475   : > { %v6404_v3 = vld [vmem:[#allocation2 + $0x658] sm:$0xff]  ;;  %5763 = vst.msk [vmem:[#allocation2 + $0x268] sm:$0xff] %vm276_vm3, %v5250_v63  ;;  %v13640_v4 = vpop.f32.mrf.mxu0  ;;  %9219 = vmatmul.msk.bf16.gmra.mxu0 %vm3108_vm2, %v9492_v16 }
 0x476   : > { %v6920_v39 = vadd.f32 %v13293_v19, %v6404_v3  ;;  %v6532_v59 = vld [vmem:[#allocation2 + $0xa58] sm:$0xff]  ;;  %5891 = vst.msk [vmem:[#allocation2 + $0x668] sm:$0xff] %vm276_vm3, %v5378_v5  ;;  %9283 = vmatmul.msk.bf16.gmra.mxu1 %vm3108_vm2, %v9556_v20 }
 0x477   : > { %v7048_v12 = vadd.f32 %v13293_v19, %v6532_v59  ;;  %v6660_v18 = vld [vmem:[#allocation2 + $0xe58] sm:$0xff]  ;;  %6019 = vst.msk [vmem:[#allocation2 + $0xa68] sm:$0xff] %vm276_vm3, %v5506_v50  ;;  %v13670_v2 = vpop.f32.mrf.mxu3  ;;  %9347 = vmatmul.msk.bf16.gmra.mxu2 %vm3108_vm2, %v9620_v45  ;;  %9411 = vmatmul.msk.bf16.gmra.mxu3 %vm3108_vm2, %v9684_v62 }
 0x478   : > { %7432 = vst.msk [vmem:[%s10192_s12 + $0x658] sm:$0xff] %vm276_vm3, %v6920_v39  ;;  %v7176_v36 = vadd.f32 %v13293_v19, %v6660_v18  ;;  %v6277_v58 = vld [vmem:[#allocation2 + $0x260] sm:$0xff] }
 0x479   : > { %7560 = vst.msk [vmem:[%s10192_s12 + $0xa58] sm:$0xff] %vm276_vm3, %v7048_v12  ;;  %v6793_v23 = vadd.f32 %v13293_v19, %v6277_v58  ;;  %v6405_v42 = vld [vmem:[#allocation2 + $0x660] sm:$0xff] }
 0x47a   : > { %7688 = vst.msk [vmem:[%s10192_s12 + $0xe58] sm:$0xff] %vm276_vm3, %v7176_v36  ;;  %v6921_v0 = vadd.f32 %v13293_v19, %v6405_v42  ;;  %v6533_v35 = vld [vmem:[#allocation2 + $0xa60] sm:$0xff]  ;;  %v13696_v50 = vpop.f32.mrf.mxu2 }
 0x47b   : > { %7305 = vst.msk [vmem:[%s10192_s12 + $0x260] sm:$0xff] %vm276_vm3, %v6793_v23  ;;  %v7049_v32 = vadd.f32 %v13293_v19, %v6533_v35  ;;  %v6661_v30 = vld [vmem:[#allocation2 + $0xe60] sm:$0xff]  ;;  %v13707_v39 = vpop.f32.mrf.mxu1 }
 0x47c   : > { %7433 = vst.msk [vmem:[%s10192_s12 + $0x660] sm:$0xff] %vm276_vm3, %v6921_v0  ;;  %v7177_v8 = vadd.f32 %v13293_v19, %v6661_v30  ;;  %v6278_v15 = vld [vmem:[#allocation2 + $0x268] sm:$0xff]  ;;  %v997_v23 = vld [vmem:[#allocation2 + $0x680] sm:$0xff] }
 0x47d   : > { %7561 = vst.msk [vmem:[%s10192_s12 + $0xa60] sm:$0xff] %vm276_vm3, %v7049_v32  ;;  %v6794_v13 = vadd.f32 %v13293_v19, %v6278_v15  ;;  %v6406_v7 = vld [vmem:[#allocation2 + $0x668] sm:$0xff]  ;;  %v13672_v54 = vpop.f32.mrf.mxu0  ;;  %v1125_v35 = vld [vmem:[#allocation2 + $0xa80] sm:$0xff]  ;;  %v5381_v40 = vadd.f32 %v13609_v27, %v997_v23  ;;  %v5637_v27 = vadd.f32 %v13638_v29, %v1253_v11  ;;  %v9622_v11 = vld [vmem:[%s10011_s7 + $0x598] sm:$0xff] }
 0x47e   : > { %7689 = vst.msk [vmem:[%s10192_s12 + $0xe60] sm:$0xff] %vm276_vm3, %v7177_v8  ;;  %v6922_v34 = vadd.f32 %v13293_v19, %v6406_v7  ;;  %v6534_v21 = vld [vmem:[#allocation2 + $0xa68] sm:$0xff] }
 0x47f   : > { %7306 = vst.msk [vmem:[%s10192_s12 + $0x268] sm:$0xff] %vm276_vm3, %v6794_v13  ;;  %v7050_v26 = vadd.f32 %v13293_v19, %v6534_v21  ;;  %v13700_v10 = vpop.f32.mrf.mxu3  ;;  %v870_v13 = vld [vmem:[#allocation2 + $0x288] sm:$0xff] }
 0x480   : > { %7434 = vst.msk [vmem:[%s10192_s12 + $0x668] sm:$0xff] %vm276_vm3, %v6922_v34  ;;  %v5509_v34 = vadd.f32 %v13633_v17, %v1125_v35  ;;  %v998_v21 = vld [vmem:[#allocation2 + $0x688] sm:$0xff]  ;;  %v13810_v35 = vld [vmem:[%s15225_s2] ss:$0 sm:$0xff] }
 0x481   : > { %7562 = vst.msk [vmem:[%s10192_s12 + $0xa68] sm:$0xff] %vm276_vm3, %v7050_v26  ;;  %v1254_v17 = vld [vmem:[#allocation2 + $0xe88] sm:$0xff] }
 0x482   : > { %6147 = vst.msk [vmem:[#allocation2 + $0xe68] sm:$0xff] %vm276_vm3, %v5634_v38  ;;  %v13728_v7 = vpop.f32.mrf.mxu2  ;;  %v1126_v38 = vld [vmem:[#allocation2 + $0xa88] sm:$0xff] }
 0x483   : > { %5764 = vst.msk [vmem:[#allocation2 + $0x270] sm:$0xff] %vm276_vm3, %v5251_v53  ;;  %v13741_v53 = vpop.f32.mrf.mxu1  ;;  %v5510_v29 = vadd.f32 %v13666_v60, %v1126_v38 }
 0x484   : > { %5892 = vst.msk [vmem:[#allocation2 + $0x670] sm:$0xff] %vm276_vm3, %v5379_v22  ;;  %v9557_v22 = vld [vmem:[%s10011_s7 + $0x390] sm:$0xff] }
 0x485   : > { %6020 = vst.msk [vmem:[#allocation2 + $0xa70] sm:$0xff] %vm276_vm3, %v5507_v24  ;;  %v13702_v33 = vpop.f32.mrf.mxu0  ;;  %v5254_v24 = vadd.f32 %v13640_v4, %v870_v13  ;;  %9220 = vmatmul.msk.bf16.gmra.mxu0 %vm3108_vm2, %v9493_v6  ;;  %v5638_v4 = vadd.f32 %v13670_v2, %v1254_v17  ;;  %v1128_v13 = vld [vmem:[#allocation2 + $0xa98] sm:$0xff]  ;;  %v1001_v6 = vld [vmem:[#allocation2 + $0x6a0] sm:$0xff] }
 0x486   : > { %6148 = vst.msk [vmem:[#allocation2 + $0xe70] sm:$0xff] %vm276_vm3, %v5635_v49  ;;  %v5382_v49 = vadd.f32 %v13645_v51, %v998_v21  ;;  %9284 = vmatmul.msk.bf16.gmra.mxu1 %vm3108_vm2, %v9557_v22  ;;  %v5255_v51 = vadd.f32 %v13672_v54, %v871_v57  ;;  %v1256_v21 = vld [vmem:[#allocation2 + $0xe98] sm:$0xff] }
 0x487   : > { %5765 = vst.msk [vmem:[#allocation2 + $0x278] sm:$0xff] %vm276_vm3, %v5252_v43  ;;  %v13734_v46 = vpop.f32.mrf.mxu3  ;;  %v999_v43 = vld [vmem:[#allocation2 + $0x690] sm:$0xff]  ;;  %9348 = vmatmul.msk.bf16.gmra.mxu2 %vm3108_vm2, %v9621_v9  ;;  %9412 = vmatmul.msk.bf16.gmra.mxu3 %vm3108_vm2, %v9685_v1 }
 0x488   : > { %5893 = vst.msk [vmem:[#allocation2 + $0x678] sm:$0xff] %vm276_vm3, %v5380_v55  ;;  %v5383_v25 = vadd.f32 %v13676_v37, %v999_v43  ;;  %v5511_v55 = vadd.f32 %v13696_v50, %v1127_v28  ;;  %v5640_v22 = vadd.f32 %v13734_v46, %v1256_v21 }
 0x489   : > { %v6662_v63 = vld [vmem:[#allocation2 + $0xe68] sm:$0xff]  ;;  %6021 = vst.msk [vmem:[#allocation2 + $0xa78] sm:$0xff] %vm276_vm3, %v5508_v44 }
 0x48a   : > { %v7178_v5 = vadd.f32 %v13293_v19, %v6662_v63  ;;  %v6279_v14 = vld [vmem:[#allocation2 + $0x270] sm:$0xff]  ;;  %6149 = vst.msk [vmem:[#allocation2 + $0xe78] sm:$0xff] %vm276_vm3, %v5636_v56  ;;  %v13764_v60 = vpop.f32.mrf.mxu2 }
 0x48b   : > { %v6795_v31 = vadd.f32 %v13293_v19, %v6279_v14  ;;  %v6407_v61 = vld [vmem:[#allocation2 + $0x670] sm:$0xff]  ;;  %5766 = vst.msk [vmem:[#allocation2 + $0x280] sm:$0xff] %vm276_vm3, %v5253_v52  ;;  %v13773_v54 = vpop.f32.mrf.mxu1 }
 0x48c   : > { %7690 = vst.msk [vmem:[%s10192_s12 + $0xe68] sm:$0xff] %vm276_vm3, %v7178_v5  ;;  %v6923_v3 = vadd.f32 %v13293_v19, %v6407_v61  ;;  %v6535_v48 = vld [vmem:[#allocation2 + $0xa70] sm:$0xff] }
 0x48d   : > { %7307 = vst.msk [vmem:[%s10192_s12 + $0x270] sm:$0xff] %vm276_vm3, %v6795_v31  ;;  %v7051_v59 = vadd.f32 %v13293_v19, %v6535_v48  ;;  %v6663_v41 = vld [vmem:[#allocation2 + $0xe70] sm:$0xff]  ;;  %v13736_v26 = vpop.f32.mrf.mxu0 }
 0x48e   : > { %7435 = vst.msk [vmem:[%s10192_s12 + $0x670] sm:$0xff] %vm276_vm3, %v6923_v3  ;;  %v7179_v12 = vadd.f32 %v13293_v19, %v6663_v41  ;;  %v6280_v18 = vld [vmem:[#allocation2 + $0x278] sm:$0xff]  ;;  %v1255_v31 = vld [vmem:[#allocation2 + $0xe90] sm:$0xff] }
 0x48f   : > { %7563 = vst.msk [vmem:[%s10192_s12 + $0xa70] sm:$0xff] %vm276_vm3, %v7051_v59  ;;  %v6796_v36 = vadd.f32 %v13293_v19, %v6280_v18  ;;  %v6408_v58 = vld [vmem:[#allocation2 + $0x678] sm:$0xff]  ;;  %v13768_v2 = vpop.f32.mrf.mxu3 }
 0x490   : > { %7691 = vst.msk [vmem:[%s10192_s12 + $0xe70] sm:$0xff] %vm276_vm3, %v7179_v12  ;;  %v6924_v42 = vadd.f32 %v13293_v19, %v6408_v58  ;;  %v6536_v0 = vld [vmem:[#allocation2 + $0xa78] sm:$0xff] }
 0x491   : > { %7308 = vst.msk [vmem:[%s10192_s12 + $0x278] sm:$0xff] %vm276_vm3, %v6796_v36  ;;  %v7052_v32 = vadd.f32 %v13293_v19, %v6536_v0  ;;  %v6664_v30 = vld [vmem:[#allocation2 + $0xe78] sm:$0xff] }
 0x492   : > { %7436 = vst.msk [vmem:[%s10192_s12 + $0x678] sm:$0xff] %vm276_vm3, %v6924_v42  ;;  %v7180_v8 = vadd.f32 %v13293_v19, %v6664_v30  ;;  %v6281_v15 = vld [vmem:[#allocation2 + $0x280] sm:$0xff]  ;;  %v13789_v61 = vpop.f32.mrf.mxu2  ;;  %v872_v59 = vld [vmem:[#allocation2 + $0x298] sm:$0xff] }
 0x493   : > { %7564 = vst.msk [vmem:[%s10192_s12 + $0xa78] sm:$0xff] %vm276_vm3, %v7052_v32  ;;  %v6797_v47 = vadd.f32 %v13293_v19, %v6281_v15  ;;  %v1000_v41 = vld [vmem:[#allocation2 + $0x698] sm:$0xff]  ;;  %v13801_v23 = vpop.f32.mrf.mxu1 }
 0x494   : > { %7692 = vst.msk [vmem:[%s10192_s12 + $0xe78] sm:$0xff] %vm276_vm3, %v7180_v8  ;;  %v9494_v42 = vld [vmem:[%s10011_s7 + $0x198] sm:$0xff]  ;;  %v5384_v38 = vadd.f32 %v13707_v39, %v1000_v41  ;;  %v1257_v39 = vld [vmem:[#allocation2 + $0xea0] sm:$0xff] }
 0x495   : > { %7309 = vst.msk [vmem:[%s10192_s12 + $0x280] sm:$0xff] %vm276_vm3, %v6797_v47  ;;  %v13770_v16 = vpop.f32.mrf.mxu0  ;;  %v9558_v0 = vld [vmem:[%s10011_s7 + $0x398] sm:$0xff]  ;;  %9221 = vmatmul.msk.bf16.gmra.mxu0 %vm3108_vm2, %v9494_v42 }
 0x496   : > { %5894 = vst.msk [vmem:[#allocation2 + $0x680] sm:$0xff] %vm276_vm3, %v5381_v40  ;;  %v9686_v8 = vld [vmem:[%s10011_s7 + $0x798] sm:$0xff]  ;;  %v5639_v40 = vadd.f32 %v13700_v10, %v1255_v31  ;;  %9285 = vmatmul.msk.bf16.gmra.mxu1 %vm3108_vm2, %v9558_v0  ;;  %v5512_v10 = vadd.f32 %v13728_v7, %v1128_v13  ;;  %v5385_v7 = vadd.f32 %v13741_v53, %v1001_v6  ;;  %v1002_v31 = vld [vmem:[#allocation2 + $0x6a8] sm:$0xff] }
 0x497   : > { %6022 = vst.msk [vmem:[#allocation2 + $0xa80] sm:$0xff] %vm276_vm3, %v5509_v34  ;;  %v13794_v12 = vpop.f32.mrf.mxu3  ;;  %v5256_v34 = vadd.f32 %v13702_v33, %v872_v59  ;;  %9349 = vmatmul.msk.bf16.gmra.mxu2 %vm3108_vm2, %v9622_v11  ;;  %9413 = vmatmul.msk.bf16.gmra.mxu3 %vm3108_vm2, %v9686_v8  ;;  %v1129_v33 = vld [vmem:[#allocation2 + $0xaa0] sm:$0xff]  ;;  %v1130_v59 = vld [vmem:[#allocation2 + $0xaa8] sm:$0xff]  ;;  %v1004_v6 = vld [vmem:[#allocation2 + $0x6b8] sm:$0xff] }
 0x498   : > { %6150 = vst.msk [vmem:[#allocation2 + $0xe80] sm:$0xff] %vm276_vm3, %v5637_v27  ;;  %v873_v27 = vld [vmem:[#allocation2 + $0x2a0] sm:$0xff]  ;;  %v5513_v46 = vadd.f32 %v13764_v60, %v1129_v33 }
 0x499   : > { %5767 = vst.msk [vmem:[#allocation2 + $0x288] sm:$0xff] %vm276_vm3, %v5254_v24  ;;  %v5257_v24 = vadd.f32 %v13736_v26, %v873_v27  ;;  %v5641_v26 = vadd.f32 %v13768_v2, %v1257_v39  ;;  %v876_v27 = vld [vmem:[#allocation2 + $0x2b8] sm:$0xff] }
 0x49a   : > { %5895 = vst.msk [vmem:[#allocation2 + $0x688] sm:$0xff] %vm276_vm3, %v5382_v49  ;;  %v13835_v9 = vpop.f32.mrf.mxu2  ;;  %v874_v49 = vld [vmem:[#allocation2 + $0x2a8] sm:$0xff] }
 0x49b   : > { %6023 = vst.msk [vmem:[#allocation2 + $0xa88] sm:$0xff] %vm276_vm3, %v5510_v29  ;;  %v13845_v57 = vpop.f32.mrf.mxu1  ;;  %v5258_v29 = vadd.f32 %v13770_v16, %v874_v49 }
 0x49c   : > { %6151 = vst.msk [vmem:[#allocation2 + $0xe88] sm:$0xff] %vm276_vm3, %v5638_v4 }
 0x49d   : > { %v6409_v20 = vld [vmem:[#allocation2 + $0x680] sm:$0xff]  ;;  %5768 = vst.msk [vmem:[#allocation2 + $0x290] sm:$0xff] %vm276_vm3, %v5255_v51  ;;  %v13796_v18 = vpop.f32.mrf.mxu0 }
 0x49e   : > { %v6925_v37 = vadd.f32 %v13293_v19, %v6409_v20  ;;  %v6537_v45 = vld [vmem:[#allocation2 + $0xa80] sm:$0xff]  ;;  %5896 = vst.msk [vmem:[#allocation2 + $0x690] sm:$0xff] %vm276_vm3, %v5383_v25 }
 0x49f   : > { %v7053_v44 = vadd.f32 %v13293_v19, %v6537_v45  ;;  %v6665_v62 = vld [vmem:[#allocation2 + $0xe80] sm:$0xff]  ;;  %6024 = vst.msk [vmem:[#allocation2 + $0xa90] sm:$0xff] %vm276_vm3, %v5511_v55  ;;  %v13839_v17 = vpop.f32.mrf.mxu3 }
 0x4a0   : > { %7437 = vst.msk [vmem:[%s10192_s12 + $0x680] sm:$0xff] %vm276_vm3, %v6925_v37  ;;  %v7181_v56 = vadd.f32 %v13293_v19, %v6665_v62  ;;  %v6282_v52 = vld [vmem:[#allocation2 + $0x288] sm:$0xff]  ;;  %v9495_v37 = vld [vmem:[%s10011_s7 + $0x1a0] sm:$0xff] }
 0x4a1   : > { %7565 = vst.msk [vmem:[%s10192_s12 + $0xa80] sm:$0xff] %vm276_vm3, %v7053_v44  ;;  %v6798_v63 = vadd.f32 %v13293_v19, %v6282_v52  ;;  %v6410_v5 = vld [vmem:[#allocation2 + $0x688] sm:$0xff]  ;;  %v9559_v45 = vld [vmem:[%s10011_s7 + $0x3a0] sm:$0xff] }
 0x4a2   : > { %7693 = vst.msk [vmem:[%s10192_s12 + $0xe80] sm:$0xff] %vm276_vm3, %v7181_v56  ;;  %v6926_v14 = vadd.f32 %v13293_v19, %v6410_v5  ;;  %v6538_v50 = vld [vmem:[#allocation2 + $0xa88] sm:$0xff]  ;;  %v13857_v28 = vpop.f32.mrf.mxu2  ;;  %v9623_v56 = vld [vmem:[%s10011_s7 + $0x5a0] sm:$0xff] }
 0x4a3   : > { %7310 = vst.msk [vmem:[%s10192_s12 + $0x288] sm:$0xff] %vm276_vm3, %v6798_v63  ;;  %v7054_v3 = vadd.f32 %v13293_v19, %v6538_v50  ;;  %v6666_v48 = vld [vmem:[#allocation2 + $0xe88] sm:$0xff]  ;;  %v13868_v20 = vpop.f32.mrf.mxu1  ;;  %v9687_v52 = vld [vmem:[%s10011_s7 + $0x7a0] sm:$0xff] }
 0x4a4   : > { %7438 = vst.msk [vmem:[%s10192_s12 + $0x688] sm:$0xff] %vm276_vm3, %v6926_v14  ;;  %v7182_v36 = vadd.f32 %v13293_v19, %v6666_v48  ;;  %v6283_v58 = vld [vmem:[#allocation2 + $0x290] sm:$0xff] }
 0x4a5   : > { %7566 = vst.msk [vmem:[%s10192_s12 + $0xa88] sm:$0xff] %vm276_vm3, %v7054_v3  ;;  %v6799_v32 = vadd.f32 %v13810_v35, %v6283_v58  ;;  %v6411_v30 = vld [vmem:[#allocation2 + $0x690] sm:$0xff]  ;;  %v13841_v1 = vpop.f32.mrf.mxu0  ;;  %9222 = vmatmul.msk.bf16.gmra.mxu0 %vm3108_vm2, %v9495_v37  ;;  %v1258_v58 = vld [vmem:[#allocation2 + $0xea8] sm:$0xff] }
 0x4a6   : > { %7694 = vst.msk [vmem:[%s10192_s12 + $0xe88] sm:$0xff] %vm276_vm3, %v7182_v36  ;;  %v6927_v19 = vadd.f32 %v13810_v35, %v6411_v30  ;;  %v6539_v15 = vld [vmem:[#allocation2 + $0xa90] sm:$0xff]  ;;  %9286 = vmatmul.msk.bf16.gmra.mxu1 %vm3108_vm2, %v9559_v45 }
 0x4a7   : > { %7311 = vst.msk [vmem:[%s10192_s12 + $0x290] sm:$0xff] %vm276_vm3, %v6799_v32  ;;  %v7055_v47 = vadd.f32 %v13810_v35, %v6539_v15  ;;  %v13861_v60 = vpop.f32.mrf.mxu3  ;;  %9350 = vmatmul.msk.bf16.gmra.mxu2 %vm3108_vm2, %v9623_v56  ;;  %9414 = vmatmul.msk.bf16.gmra.mxu3 %vm3108_vm2, %v9687_v52  ;;  %v5386_v32 = vadd.f32 %v13773_v54, %v1002_v31  ;;  %v875_v30 = vld [vmem:[#allocation2 + $0x2b0] sm:$0xff] }
 0x4a8   : > { %7439 = vst.msk [vmem:[%s10192_s12 + $0x690] sm:$0xff] %vm276_vm3, %v6927_v19  ;;  %v5514_v19 = vadd.f32 %v13789_v61, %v1130_v59  ;;  %v1003_v15 = vld [vmem:[#allocation2 + $0x6b0] sm:$0xff]  ;;  %v5259_v21 = vadd.f32 %v13796_v18, %v875_v30  ;;  %v5260_v18 = vadd.f32 %v13841_v1, %v876_v27  ;;  %v9496_v1 = vld [vmem:[%s10011_s7 + $0x1a8] sm:$0xff] }
 0x4a9   : > { %7567 = vst.msk [vmem:[%s10192_s12 + $0xa90] sm:$0xff] %vm276_vm3, %v7055_v47  ;;  %v5642_v47 = vadd.f32 %v13794_v12, %v1258_v58  ;;  %v5387_v61 = vadd.f32 %v13801_v23, %v1003_v15  ;;  %v5388_v23 = vadd.f32 %v13845_v57, %v1004_v6  ;;  %v9624_v57 = vld [vmem:[%s10011_s7 + $0x5a8] sm:$0xff]  ;;  %v1133_v58 = vld [vmem:[#allocation2 + $0xac0] sm:$0xff]  ;;  %v9625_v6 = vld [vmem:[%s10011_s7 + $0x5b0] sm:$0xff] }
 0x4aa   : > { %6152 = vst.msk [vmem:[#allocation2 + $0xe90] sm:$0xff] %vm276_vm3, %v5639_v40  ;;  %v13897_v11 = vpop.f32.mrf.mxu2 }
 0x4ab   : > { %5769 = vst.msk [vmem:[#allocation2 + $0x298] sm:$0xff] %vm276_vm3, %v5256_v34  ;;  %v1131_v34 = vld [vmem:[#allocation2 + $0xab0] sm:$0xff]  ;;  %v13910_v54 = vpop.f32.mrf.mxu1 }
 0x4ac   : > { %5897 = vst.msk [vmem:[#allocation2 + $0x698] sm:$0xff] %vm276_vm3, %v5384_v38  ;;  %v1259_v38 = vld [vmem:[#allocation2 + $0xeb0] sm:$0xff] }
 0x4ad   : > { %6025 = vst.msk [vmem:[#allocation2 + $0xa98] sm:$0xff] %vm276_vm3, %v5512_v10  ;;  %v13863_v55 = vpop.f32.mrf.mxu0  ;;  %v5515_v10 = vadd.f32 %v13835_v9, %v1131_v34  ;;  %v5643_v12 = vadd.f32 %v13839_v17, %v1259_v38  ;;  %v1262_v34 = vld [vmem:[#allocation2 + $0xec8] sm:$0xff] }
 0x4ae   : > { %6153 = vst.msk [vmem:[#allocation2 + $0xe98] sm:$0xff] %vm276_vm3, %v5640_v22  ;;  %v1132_v22 = vld [vmem:[#allocation2 + $0xab8] sm:$0xff] }
 0x4af   : > { %5770 = vst.msk [vmem:[#allocation2 + $0x2a0] sm:$0xff] %vm276_vm3, %v5257_v24  ;;  %v13903_v40 = vpop.f32.mrf.mxu3  ;;  %v5516_v9 = vadd.f32 %v13857_v28, %v1132_v22 }
 0x4b0   : > { %5898 = vst.msk [vmem:[#allocation2 + $0x6a0] sm:$0xff] %vm276_vm3, %v5385_v7  ;;  %v9560_v7 = vld [vmem:[%s10011_s7 + $0x3a8] sm:$0xff] }
 0x4b1   : > { %v6667_v53 = vld [vmem:[#allocation2 + $0xe90] sm:$0xff]  ;;  %6026 = vst.msk [vmem:[#allocation2 + $0xaa0] sm:$0xff] %vm276_vm3, %v5513_v46 }
 0x4b2   : > { %v7183_v43 = vadd.f32 %v13810_v35, %v6667_v53  ;;  %v6284_v4 = vld [vmem:[#allocation2 + $0x298] sm:$0xff]  ;;  %6154 = vst.msk [vmem:[#allocation2 + $0xea0] sm:$0xff] %vm276_vm3, %v5641_v26  ;;  %v13925_v33 = vpop.f32.mrf.mxu2 }
 0x4b3   : > { %v6800_v51 = vadd.f32 %v13810_v35, %v6284_v4  ;;  %v6412_v25 = vld [vmem:[#allocation2 + $0x698] sm:$0xff]  ;;  %5771 = vst.msk [vmem:[#allocation2 + $0x2a8] sm:$0xff] %vm276_vm3, %v5258_v29  ;;  %v13934_v17 = vpop.f32.mrf.mxu1  ;;  %v9688_v29 = vld [vmem:[%s10011_s7 + $0x7a8] sm:$0xff] }
 0x4b4   : > { %7695 = vst.msk [vmem:[%s10192_s12 + $0xe90] sm:$0xff] %vm276_vm3, %v7183_v43  ;;  %v6928_v2 = vadd.f32 %v13810_v35, %v6412_v25  ;;  %v6540_v16 = vld [vmem:[#allocation2 + $0xa98] sm:$0xff] }
 0x4b5   : > { %7312 = vst.msk [vmem:[%s10192_s12 + $0x298] sm:$0xff] %vm276_vm3, %v6800_v51  ;;  %v7056_v44 = vadd.f32 %v13810_v35, %v6540_v16  ;;  %v6668_v62 = vld [vmem:[#allocation2 + $0xe98] sm:$0xff]  ;;  %v13905_v13 = vpop.f32.mrf.mxu0  ;;  %9223 = vmatmul.msk.bf16.gmra.mxu0 %vm3108_vm2, %v9496_v1 }
 0x4b6   : > { %7440 = vst.msk [vmem:[%s10192_s12 + $0x698] sm:$0xff] %vm276_vm3, %v6928_v2  ;;  %v7184_v63 = vadd.f32 %v13810_v35, %v6668_v62  ;;  %v6285_v5 = vld [vmem:[#allocation2 + $0x2a0] sm:$0xff]  ;;  %9287 = vmatmul.msk.bf16.gmra.mxu1 %vm3108_vm2, %v9560_v7  ;;  %v1260_v62 = vld [vmem:[#allocation2 + $0xeb8] sm:$0xff] }
 0x4b7   : > { %7568 = vst.msk [vmem:[%s10192_s12 + $0xa98] sm:$0xff] %vm276_vm3, %v7056_v44  ;;  %v6801_v14 = vadd.f32 %v13810_v35, %v6285_v5  ;;  %v6413_v50 = vld [vmem:[#allocation2 + $0x6a0] sm:$0xff]  ;;  %v13929_v24 = vpop.f32.mrf.mxu3  ;;  %9351 = vmatmul.msk.bf16.gmra.mxu2 %vm3108_vm2, %v9624_v57  ;;  %9415 = vmatmul.msk.bf16.gmra.mxu3 %vm3108_vm2, %v9688_v29 }
 0x4b8   : > { %7696 = vst.msk [vmem:[%s10192_s12 + $0xe98] sm:$0xff] %vm276_vm3, %v7184_v63  ;;  %v6929_v3 = vadd.f32 %v13810_v35, %v6413_v50  ;;  %v6541_v48 = vld [vmem:[#allocation2 + $0xaa0] sm:$0xff]  ;;  %v5646_v22 = vadd.f32 %v13929_v24, %v1262_v34 }
 0x4b9   : > { %7313 = vst.msk [vmem:[%s10192_s12 + $0x2a0] sm:$0xff] %vm276_vm3, %v6801_v14  ;;  %v7057_v41 = vadd.f32 %v13810_v35, %v6541_v48  ;;  %v6669_v36 = vld [vmem:[#allocation2 + $0xea0] sm:$0xff] }
 0x4ba   : > { %7441 = vst.msk [vmem:[%s10192_s12 + $0x6a0] sm:$0xff] %vm276_vm3, %v6929_v3  ;;  %v7185_v42 = vadd.f32 %v13810_v35, %v6669_v36  ;;  %v6286_v0 = vld [vmem:[#allocation2 + $0x2a8] sm:$0xff]  ;;  %v13958_v37 = vpop.f32.mrf.mxu2  ;;  %v877_v14 = vld [vmem:[#allocation2 + $0x2c0] sm:$0xff]  ;;  %v5644_v36 = vadd.f32 %v13861_v60, %v1260_v62  ;;  %v1263_v62 = vld [vmem:[#allocation2 + $0xed0] sm:$0xff] }
 0x4bb   : > { %7569 = vst.msk [vmem:[%s10192_s12 + $0xaa0] sm:$0xff] %vm276_vm3, %v7057_v41  ;;  %v6802_v8 = vadd.f32 %v13810_v35, %v6286_v0  ;;  %v13970_v50 = vpop.f32.mrf.mxu1  ;;  %v1005_v48 = vld [vmem:[#allocation2 + $0x6c0] sm:$0xff]  ;;  %v5261_v0 = vadd.f32 %v13863_v55, %v877_v14  ;;  %v1006_v60 = vld [vmem:[#allocation2 + $0x6c8] sm:$0xff] }
 0x4bc   : > { %7697 = vst.msk [vmem:[%s10192_s12 + $0xea0] sm:$0xff] %vm276_vm3, %v7185_v42  ;;  %v5389_v30 = vadd.f32 %v13868_v20, %v1005_v48  ;;  %v1137_v34 = vld [vmem:[#allocation2 + $0xae0] sm:$0xff] }
 0x4bd   : > { %7314 = vst.msk [vmem:[%s10192_s12 + $0x2a8] sm:$0xff] %vm276_vm3, %v6802_v8  ;;  %v13931_v39 = vpop.f32.mrf.mxu0  ;;  %v878_v8 = vld [vmem:[#allocation2 + $0x2c8] sm:$0xff] }
 0x4be   : > { %5899 = vst.msk [vmem:[#allocation2 + $0x6a8] sm:$0xff] %vm276_vm3, %v5386_v32  ;;  %v1261_v32 = vld [vmem:[#allocation2 + $0xec0] sm:$0xff]  ;;  %v5262_v20 = vadd.f32 %v13905_v13, %v878_v8  ;;  %v9689_v13 = vld [vmem:[%s10011_s7 + $0x7b0] sm:$0xff]  ;;  %v9626_v8 = vld [vmem:[%s10011_s7 + $0x5b8] sm:$0xff] }
 0x4bf   : > { %6027 = vst.msk [vmem:[#allocation2 + $0xaa8] sm:$0xff] %vm276_vm3, %v5514_v19  ;;  %v13963_v56 = vpop.f32.mrf.mxu3  ;;  %v5517_v19 = vadd.f32 %v13897_v11, %v1133_v58  ;;  %v5645_v15 = vadd.f32 %v13903_v40, %v1261_v32  ;;  %v9497_v40 = vld [vmem:[%s10011_s7 + $0x1b0] sm:$0xff]  ;;  %v9498_v32 = vld [vmem:[%s10011_s7 + $0x1b8] sm:$0xff] }
 0x4c0   : > { %6155 = vst.msk [vmem:[#allocation2 + $0xea8] sm:$0xff] %vm276_vm3, %v5642_v47  ;;  %v1134_v47 = vld [vmem:[#allocation2 + $0xac8] sm:$0xff] }
 0x4c1   : > { %5772 = vst.msk [vmem:[#allocation2 + $0x2b0] sm:$0xff] %vm276_vm3, %v5259_v21  ;;  %v879_v21 = vld [vmem:[#allocation2 + $0x2d0] sm:$0xff] }
 0x4c2   : > { %5900 = vst.msk [vmem:[#allocation2 + $0x6b0] sm:$0xff] %vm276_vm3, %v5387_v61  ;;  %v13991_v55 = vpop.f32.mrf.mxu2  ;;  %v5390_v61 = vadd.f32 %v13910_v54, %v1006_v60  ;;  %v5263_v54 = vadd.f32 %v13931_v39, %v879_v21  ;;  %v9690_v60 = vld [vmem:[%s10011_s7 + $0x7b8] sm:$0xff] }
 0x4c3   : > { %6028 = vst.msk [vmem:[#allocation2 + $0xab0] sm:$0xff] %vm276_vm3, %v5515_v10  ;;  %v14001_v27 = vpop.f32.mrf.mxu1  ;;  %v9561_v10 = vld [vmem:[%s10011_s7 + $0x3b0] sm:$0xff] }
 0x4c4   : > { %6156 = vst.msk [vmem:[#allocation2 + $0xeb0] sm:$0xff] %vm276_vm3, %v5643_v12  ;;  %v5518_v12 = vadd.f32 %v13925_v33, %v1134_v47  ;;  %v881_v47 = vld [vmem:[#allocation2 + $0x2e0] sm:$0xff] }
 0x4c5   : > { %v6414_v49 = vld [vmem:[#allocation2 + $0x6a8] sm:$0xff]  ;;  %5773 = vst.msk [vmem:[#allocation2 + $0x2b8] sm:$0xff] %vm276_vm3, %v5260_v18  ;;  %v13965_v52 = vpop.f32.mrf.mxu0  ;;  %9224 = vmatmul.msk.bf16.gmra.mxu0 %vm3108_vm2, %v9497_v40 }
 0x4c6   : > { %v6930_v46 = vadd.f32 %v13810_v35, %v6414_v49  ;;  %v6542_v26 = vld [vmem:[#allocation2 + $0xaa8] sm:$0xff]  ;;  %5901 = vst.msk [vmem:[#allocation2 + $0x6b8] sm:$0xff] %vm276_vm3, %v5388_v23  ;;  %9288 = vmatmul.msk.bf16.gmra.mxu1 %vm3108_vm2, %v9561_v10 }
 0x4c7   : > { %v7058_v53 = vadd.f32 %v13810_v35, %v6542_v26  ;;  %v6670_v43 = vld [vmem:[#allocation2 + $0xea8] sm:$0xff]  ;;  %6029 = vst.msk [vmem:[#allocation2 + $0xab8] sm:$0xff] %vm276_vm3, %v5516_v9  ;;  %v13995_v38 = vpop.f32.mrf.mxu3  ;;  %9352 = vmatmul.msk.bf16.gmra.mxu2 %vm3108_vm2, %v9625_v6  ;;  %9416 = vmatmul.msk.bf16.gmra.mxu3 %vm3108_vm2, %v9689_v13 }
 0x4c8   : > { %7442 = vst.msk [vmem:[%s10192_s12 + $0x6a8] sm:$0xff] %vm276_vm3, %v6930_v46  ;;  %v7186_v4 = vadd.f32 %v13810_v35, %v6670_v43  ;;  %v6287_v28 = vld [vmem:[#allocation2 + $0x2b0] sm:$0xff] }
 0x4c9   : > { %7570 = vst.msk [vmem:[%s10192_s12 + $0xaa8] sm:$0xff] %vm276_vm3, %v7058_v53  ;;  %v6803_v51 = vadd.f32 %v13810_v35, %v6287_v28  ;;  %v6415_v25 = vld [vmem:[#allocation2 + $0x6b0] sm:$0xff] }
 0x4ca   : > { %7698 = vst.msk [vmem:[%s10192_s12 + $0xea8] sm:$0xff] %vm276_vm3, %v7186_v4  ;;  %v6931_v2 = vadd.f32 %v13810_v35, %v6415_v25  ;;  %v6543_v16 = vld [vmem:[#allocation2 + $0xab0] sm:$0xff]  ;;  %v14021_v9 = vpop.f32.mrf.mxu2 }
 0x4cb   : > { %7315 = vst.msk [vmem:[%s10192_s12 + $0x2b0] sm:$0xff] %vm276_vm3, %v6803_v51  ;;  %v7059_v45 = vadd.f32 %v13810_v35, %v6543_v16  ;;  %v6671_v44 = vld [vmem:[#allocation2 + $0xeb0] sm:$0xff]  ;;  %v14032_v46 = vpop.f32.mrf.mxu1 }
 0x4cc   : > { %7443 = vst.msk [vmem:[%s10192_s12 + $0x6b0] sm:$0xff] %vm276_vm3, %v6931_v2  ;;  %v7187_v63 = vadd.f32 %v13810_v35, %v6671_v44  ;;  %v6288_v5 = vld [vmem:[#allocation2 + $0x2b8] sm:$0xff]  ;;  %v1007_v51 = vld [vmem:[#allocation2 + $0x6d0] sm:$0xff] }
 0x4cd   : > { %7571 = vst.msk [vmem:[%s10192_s12 + $0xab0] sm:$0xff] %vm276_vm3, %v7059_v45  ;;  %v6804_v31 = vadd.f32 %v13810_v35, %v6288_v5  ;;  %v6416_v3 = vld [vmem:[#allocation2 + $0x6b8] sm:$0xff]  ;;  %v13997_v11 = vpop.f32.mrf.mxu0  ;;  %v1135_v16 = vld [vmem:[#allocation2 + $0xad0] sm:$0xff]  ;;  %v5391_v14 = vadd.f32 %v13934_v17, %v1007_v51  ;;  %v5647_v17 = vadd.f32 %v13963_v56, %v1263_v62  ;;  %v9691_v62 = vld [vmem:[%s10011_s7 + $0x7c0] sm:$0xff] }
 0x4ce   : > { %7699 = vst.msk [vmem:[%s10192_s12 + $0xeb0] sm:$0xff] %vm276_vm3, %v7187_v63  ;;  %v6932_v59 = vadd.f32 %v13810_v35, %v6416_v3  ;;  %v6544_v41 = vld [vmem:[#allocation2 + $0xab8] sm:$0xff] }
 0x4cf   : > { %7316 = vst.msk [vmem:[%s10192_s12 + $0x2b8] sm:$0xff] %vm276_vm3, %v6804_v31  ;;  %v7060_v42 = vadd.f32 %v13810_v35, %v6544_v41  ;;  %v14025_v1 = vpop.f32.mrf.mxu3  ;;  %v880_v31 = vld [vmem:[#allocation2 + $0x2d8] sm:$0xff] }
 0x4d0   : > { %7444 = vst.msk [vmem:[%s10192_s12 + $0x6b8] sm:$0xff] %vm276_vm3, %v6932_v59  ;;  %v5519_v59 = vadd.f32 %v13958_v37, %v1135_v16  ;;  %v1008_v41 = vld [vmem:[#allocation2 + $0x6d8] sm:$0xff] }
 0x4d1   : > { %7572 = vst.msk [vmem:[%s10192_s12 + $0xab8] sm:$0xff] %vm276_vm3, %v7060_v42  ;;  %v1264_v37 = vld [vmem:[#allocation2 + $0xed8] sm:$0xff] }
 0x4d2   : > { %6157 = vst.msk [vmem:[#allocation2 + $0xeb8] sm:$0xff] %vm276_vm3, %v5644_v36  ;;  %v14053_v3 = vpop.f32.mrf.mxu2  ;;  %v1136_v36 = vld [vmem:[#allocation2 + $0xad8] sm:$0xff] }
 0x4d3   : > { %5774 = vst.msk [vmem:[#allocation2 + $0x2c0] sm:$0xff] %vm276_vm3, %v5261_v0  ;;  %v14066_v0 = vpop.f32.mrf.mxu1  ;;  %v5520_v56 = vadd.f32 %v13991_v55, %v1136_v36 }
 0x4d4   : > { %5902 = vst.msk [vmem:[#allocation2 + $0x6c0] sm:$0xff] %vm276_vm3, %v5389_v30  ;;  %v9562_v30 = vld [vmem:[%s10011_s7 + $0x3b8] sm:$0xff] }
 0x4d5   : > { %6030 = vst.msk [vmem:[#allocation2 + $0xac0] sm:$0xff] %vm276_vm3, %v5517_v19  ;;  %v14027_v7 = vpop.f32.mrf.mxu0  ;;  %v5264_v19 = vadd.f32 %v13965_v52, %v880_v31  ;;  %9225 = vmatmul.msk.bf16.gmra.mxu0 %vm3108_vm2, %v9498_v32  ;;  %v5648_v52 = vadd.f32 %v13995_v38, %v1264_v37  ;;  %v1138_v31 = vld [vmem:[#allocation2 + $0xae8] sm:$0xff]  ;;  %v1011_v32 = vld [vmem:[#allocation2 + $0x6f0] sm:$0xff] }
 0x4d6   : > { %6158 = vst.msk [vmem:[#allocation2 + $0xec0] sm:$0xff] %vm276_vm3, %v5645_v15  ;;  %v5392_v15 = vadd.f32 %v13970_v50, %v1008_v41  ;;  %9289 = vmatmul.msk.bf16.gmra.mxu1 %vm3108_vm2, %v9562_v30  ;;  %v5265_v50 = vadd.f32 %v13997_v11, %v881_v47  ;;  %v1266_v41 = vld [vmem:[#allocation2 + $0xee8] sm:$0xff] }
 0x4d7   : > { %5775 = vst.msk [vmem:[#allocation2 + $0x2c8] sm:$0xff] %vm276_vm3, %v5262_v20  ;;  %v14059_v58 = vpop.f32.mrf.mxu3  ;;  %v1009_v20 = vld [vmem:[#allocation2 + $0x6e0] sm:$0xff]  ;;  %9353 = vmatmul.msk.bf16.gmra.mxu2 %vm3108_vm2, %v9626_v8  ;;  %9417 = vmatmul.msk.bf16.gmra.mxu3 %vm3108_vm2, %v9690_v60 }
 0x4d8   : > { %5903 = vst.msk [vmem:[#allocation2 + $0x6c8] sm:$0xff] %vm276_vm3, %v5390_v61  ;;  %v5393_v21 = vadd.f32 %v14001_v27, %v1009_v20  ;;  %v5521_v61 = vadd.f32 %v14021_v9, %v1137_v34  ;;  %v5650_v30 = vadd.f32 %v14059_v58, %v1266_v41 }
 0x4d9   : > { %v6672_v18 = vld [vmem:[#allocation2 + $0xeb8] sm:$0xff]  ;;  %6031 = vst.msk [vmem:[#allocation2 + $0xac8] sm:$0xff] %vm276_vm3, %v5518_v12 }
 0x4da   : > { %v7188_v23 = vadd.f32 %v13810_v35, %v6672_v18  ;;  %v6289_v33 = vld [vmem:[#allocation2 + $0x2c0] sm:$0xff]  ;;  %6159 = vst.msk [vmem:[#allocation2 + $0xec8] sm:$0xff] %vm276_vm3, %v5646_v22  ;;  %v14089_v55 = vpop.f32.mrf.mxu2 }
 0x4db   : > { %v6805_v24 = vadd.f32 %v13810_v35, %v6289_v33  ;;  %v6417_v39 = vld [vmem:[#allocation2 + $0x6c0] sm:$0xff]  ;;  %5776 = vst.msk [vmem:[#allocation2 + $0x2d0] sm:$0xff] %vm276_vm3, %v5263_v54  ;;  %v14098_v11 = vpop.f32.mrf.mxu1 }
 0x4dc   : > { %7700 = vst.msk [vmem:[%s10192_s12 + $0xeb8] sm:$0xff] %vm276_vm3, %v7188_v23  ;;  %v6933_v49 = vadd.f32 %v13810_v35, %v6417_v39  ;;  %v6545_v57 = vld [vmem:[#allocation2 + $0xac0] sm:$0xff] }
 0x4dd   : > { %7317 = vst.msk [vmem:[%s10192_s12 + $0x2c0] sm:$0xff] %vm276_vm3, %v6805_v24  ;;  %v7061_v26 = vadd.f32 %v13810_v35, %v6545_v57  ;;  %v6673_v29 = vld [vmem:[#allocation2 + $0xec0] sm:$0xff]  ;;  %v14061_v42 = vpop.f32.mrf.mxu0 }
 0x4de   : > { %7445 = vst.msk [vmem:[%s10192_s12 + $0x6c0] sm:$0xff] %vm276_vm3, %v6933_v49  ;;  %v7189_v53 = vadd.f32 %v13810_v35, %v6673_v29  ;;  %v6290_v43 = vld [vmem:[#allocation2 + $0x2c8] sm:$0xff]  ;;  %v1265_v24 = vld [vmem:[#allocation2 + $0xee0] sm:$0xff] }
 0x4df   : > { %7573 = vst.msk [vmem:[%s10192_s12 + $0xac0] sm:$0xff] %vm276_vm3, %v7061_v26  ;;  %v6806_v4 = vadd.f32 %v13810_v35, %v6290_v43  ;;  %v6418_v28 = vld [vmem:[#allocation2 + $0x6c8] sm:$0xff]  ;;  %v14093_v38 = vpop.f32.mrf.mxu3 }
 0x4e0   : > { %7701 = vst.msk [vmem:[%s10192_s12 + $0xec0] sm:$0xff] %vm276_vm3, %v7189_v53  ;;  %v6934_v25 = vadd.f32 %v13810_v35, %v6418_v28  ;;  %v6546_v2 = vld [vmem:[#allocation2 + $0xac8] sm:$0xff] }
 0x4e1   : > { %7318 = vst.msk [vmem:[%s10192_s12 + $0x2c8] sm:$0xff] %vm276_vm3, %v6806_v4  ;;  %v7062_v45 = vadd.f32 %v13810_v35, %v6546_v2  ;;  %v6674_v44 = vld [vmem:[#allocation2 + $0xec8] sm:$0xff]  ;;  %v9563_v2 = vld [vmem:[%s10011_s7 + $0x3c0] sm:$0xff] }
 0x4e2   : > { %7446 = vst.msk [vmem:[%s10192_s12 + $0x6c8] sm:$0xff] %vm276_vm3, %v6934_v25  ;;  %v7190_v63 = vadd.f32 %v13810_v35, %v6674_v44  ;;  %v6291_v5 = vld [vmem:[#allocation2 + $0x2d0] sm:$0xff]  ;;  %v14114_v39 = vpop.f32.mrf.mxu2  ;;  %v882_v26 = vld [vmem:[#allocation2 + $0x2e8] sm:$0xff]  ;;  %v9499_v25 = vld [vmem:[%s10011_s7 + $0x1c0] sm:$0xff] }
 0x4e3   : > { %7574 = vst.msk [vmem:[%s10192_s12 + $0xac8] sm:$0xff] %vm276_vm3, %v7062_v45  ;;  %v6807_v48 = vadd.f32 %v13810_v35, %v6291_v5  ;;  %v1010_v29 = vld [vmem:[#allocation2 + $0x6e8] sm:$0xff]  ;;  %v14126_v51 = vpop.f32.mrf.mxu1  ;;  %v9627_v44 = vld [vmem:[%s10011_s7 + $0x5c0] sm:$0xff] }
 0x4e4   : > { %7702 = vst.msk [vmem:[%s10192_s12 + $0xec8] sm:$0xff] %vm276_vm3, %v7190_v63  ;;  %v5394_v36 = vadd.f32 %v14032_v46, %v1010_v29  ;;  %v1267_v46 = vld [vmem:[#allocation2 + $0xef0] sm:$0xff] }
 0x4e5   : > { %7319 = vst.msk [vmem:[%s10192_s12 + $0x2d0] sm:$0xff] %vm276_vm3, %v6807_v48  ;;  %v14095_v40 = vpop.f32.mrf.mxu0  ;;  %9226 = vmatmul.msk.bf16.gmra.mxu0 %vm3108_vm2, %v9499_v25 }
 0x4e6   : > { %5904 = vst.msk [vmem:[#allocation2 + $0x6d0] sm:$0xff] %vm276_vm3, %v5391_v14  ;;  %v5649_v14 = vadd.f32 %v14025_v1, %v1265_v24  ;;  %9290 = vmatmul.msk.bf16.gmra.mxu1 %vm3108_vm2, %v9563_v2  ;;  %v5522_v1 = vadd.f32 %v14053_v3, %v1138_v31  ;;  %v5395_v3 = vadd.f32 %v14066_v0, %v1011_v32  ;;  %v1012_v24 = vld [vmem:[#allocation2 + $0x6f8] sm:$0xff]  ;;  %v1014_v32 = vld [vmem:[#allocation2 + $0x708] sm:$0xff] }
 0x4e7   : > { %6032 = vst.msk [vmem:[#allocation2 + $0xad0] sm:$0xff] %vm276_vm3, %v5519_v59  ;;  %v14119_v53 = vpop.f32.mrf.mxu3  ;;  %v5266_v59 = vadd.f32 %v14027_v7, %v882_v26  ;;  %9354 = vmatmul.msk.bf16.gmra.mxu2 %vm3108_vm2, %v9627_v44  ;;  %9418 = vmatmul.msk.bf16.gmra.mxu3 %vm3108_vm2, %v9691_v62  ;;  %v1139_v7 = vld [vmem:[#allocation2 + $0xaf0] sm:$0xff]  ;;  %v1140_v26 = vld [vmem:[#allocation2 + $0xaf8] sm:$0xff] }
 0x4e8   : > { %6160 = vst.msk [vmem:[#allocation2 + $0xed0] sm:$0xff] %vm276_vm3, %v5647_v17  ;;  %v883_v17 = vld [vmem:[#allocation2 + $0x2f0] sm:$0xff]  ;;  %v5523_v58 = vadd.f32 %v14089_v55, %v1139_v7 }
 0x4e9   : > { %5777 = vst.msk [vmem:[#allocation2 + $0x2d8] sm:$0xff] %vm276_vm3, %v5264_v19  ;;  %v5267_v19 = vadd.f32 %v14061_v42, %v883_v17  ;;  %v5651_v42 = vadd.f32 %v14093_v38, %v1267_v46  ;;  %v886_v17 = vld [vmem:[#allocation2 + $0x308] sm:$0xff] }
 0x4ea   : > { %5905 = vst.msk [vmem:[#allocation2 + $0x6d8] sm:$0xff] %vm276_vm3, %v5392_v15  ;;  %v14155_v8 = vpop.f32.mrf.mxu2  ;;  %v884_v15 = vld [vmem:[#allocation2 + $0x2f8] sm:$0xff] }
 0x4eb   : > { %6033 = vst.msk [vmem:[#allocation2 + $0xad8] sm:$0xff] %vm276_vm3, %v5520_v56  ;;  %v14165_v47 = vpop.f32.mrf.mxu1  ;;  %v5268_v56 = vadd.f32 %v14095_v40, %v884_v15 }
 0x4ec   : > { %6161 = vst.msk [vmem:[#allocation2 + $0xed8] sm:$0xff] %vm276_vm3, %v5648_v52 }
 0x4ed   : > { %v6419_v10 = vld [vmem:[#allocation2 + $0x6d0] sm:$0xff]  ;;  %5778 = vst.msk [vmem:[#allocation2 + $0x2e0] sm:$0xff] %vm276_vm3, %v5265_v50  ;;  %v14121_v43 = vpop.f32.mrf.mxu0 }
 0x4ee   : > { %v6935_v27 = vadd.f32 %v13810_v35, %v6419_v10  ;;  %v6547_v6 = vld [vmem:[#allocation2 + $0xad0] sm:$0xff]  ;;  %5906 = vst.msk [vmem:[#allocation2 + $0x6e0] sm:$0xff] %vm276_vm3, %v5393_v21 }
 0x4ef   : > { %v7063_v12 = vadd.f32 %v13810_v35, %v6547_v6  ;;  %v6675_v13 = vld [vmem:[#allocation2 + $0xed0] sm:$0xff]  ;;  %6034 = vst.msk [vmem:[#allocation2 + $0xae0] sm:$0xff] %vm276_vm3, %v5521_v61  ;;  %v14159_v37 = vpop.f32.mrf.mxu3  ;;  %v9564_v6 = vld [vmem:[%s10011_s7 + $0x3c8] sm:$0xff] }
 0x4f0   : > { %7447 = vst.msk [vmem:[%s10192_s12 + $0x6d0] sm:$0xff] %vm276_vm3, %v6935_v27  ;;  %v7191_v22 = vadd.f32 %v13810_v35, %v6675_v13  ;;  %v6292_v54 = vld [vmem:[#allocation2 + $0x2d8] sm:$0xff]  ;;  %v9500_v27 = vld [vmem:[%s10011_s7 + $0x1c8] sm:$0xff] }
 0x4f1   : > { %7575 = vst.msk [vmem:[%s10192_s12 + $0xad0] sm:$0xff] %vm276_vm3, %v7063_v12  ;;  %v6808_v18 = vadd.f32 %v13810_v35, %v6292_v54  ;;  %v6420_v23 = vld [vmem:[#allocation2 + $0x6d8] sm:$0xff]  ;;  %v9692_v54 = vld [vmem:[%s10011_s7 + $0x7c8] sm:$0xff] }
 0x4f2   : > { %7703 = vst.msk [vmem:[%s10192_s12 + $0xed0] sm:$0xff] %vm276_vm3, %v7191_v22  ;;  %v6936_v33 = vadd.f32 %v13810_v35, %v6420_v23  ;;  %v6548_v9 = vld [vmem:[#allocation2 + $0xad8] sm:$0xff]  ;;  %v14177_v34 = vpop.f32.mrf.mxu2  ;;  %v9628_v22 = vld [vmem:[%s10011_s7 + $0x5c8] sm:$0xff] }
 0x4f3   : > { %7320 = vst.msk [vmem:[%s10192_s12 + $0x2d8] sm:$0xff] %vm276_vm3, %v6808_v18  ;;  %v7064_v49 = vadd.f32 %v13810_v35, %v6548_v9  ;;  %v6676_v57 = vld [vmem:[#allocation2 + $0xed8] sm:$0xff]  ;;  %v14188_v10 = vpop.f32.mrf.mxu1 }
 0x4f4   : > { %7448 = vst.msk [vmem:[%s10192_s12 + $0x6d8] sm:$0xff] %vm276_vm3, %v6936_v33  ;;  %v7192_v4 = vadd.f32 %v13810_v35, %v6676_v57  ;;  %v6293_v28 = vld [vmem:[#allocation2 + $0x2e0] sm:$0xff] }
 0x4f5   : > { %7576 = vst.msk [vmem:[%s10192_s12 + $0xad8] sm:$0xff] %vm276_vm3, %v7064_v49  ;;  %v6809_v16 = vadd.f32 %v13810_v35, %v6293_v28  ;;  %v6421_v45 = vld [vmem:[#allocation2 + $0x6e0] sm:$0xff]  ;;  %v14161_v60 = vpop.f32.mrf.mxu0  ;;  %9227 = vmatmul.msk.bf16.gmra.mxu0 %vm3108_vm2, %v9500_v27  ;;  %v1268_v28 = vld [vmem:[#allocation2 + $0xef8] sm:$0xff] }
 0x4f6   : > { %7704 = vst.msk [vmem:[%s10192_s12 + $0xed8] sm:$0xff] %vm276_vm3, %v7192_v4  ;;  %v6937_v63 = vadd.f32 %v13810_v35, %v6421_v45  ;;  %v6549_v5 = vld [vmem:[#allocation2 + $0xae0] sm:$0xff]  ;;  %9291 = vmatmul.msk.bf16.gmra.mxu1 %vm3108_vm2, %v9564_v6 }
 0x4f7   : > { %7321 = vst.msk [vmem:[%s10192_s12 + $0x2e0] sm:$0xff] %vm276_vm3, %v6809_v16  ;;  %v7065_v48 = vadd.f32 %v13810_v35, %v6549_v5  ;;  %v14181_v55 = vpop.f32.mrf.mxu3  ;;  %9355 = vmatmul.msk.bf16.gmra.mxu2 %vm3108_vm2, %v9628_v22  ;;  %9419 = vmatmul.msk.bf16.gmra.mxu3 %vm3108_vm2, %v9692_v54  ;;  %v5396_v16 = vadd.f32 %v14098_v11, %v1012_v24  ;;  %v885_v45 = vld [vmem:[#allocation2 + $0x300] sm:$0xff] }
 0x4f8   : > { %7449 = vst.msk [vmem:[%s10192_s12 + $0x6e0] sm:$0xff] %vm276_vm3, %v6937_v63  ;;  %v5524_v63 = vadd.f32 %v14114_v39, %v1140_v26  ;;  %v1013_v5 = vld [vmem:[#allocation2 + $0x700] sm:$0xff]  ;;  %v5269_v41 = vadd.f32 %v14121_v43, %v885_v45  ;;  %v5270_v43 = vadd.f32 %v14161_v60, %v886_v17  ;;  %v9501_v60 = vld [vmem:[%s10011_s7 + $0x1d0] sm:$0xff]  ;;  %v9566_v17 = vld [vmem:[%s10011_s7 + $0x3d8] sm:$0xff] }
 0x4f9   : > { %7577 = vst.msk [vmem:[%s10192_s12 + $0xae0] sm:$0xff] %vm276_vm3, %v7065_v48  ;;  %v5652_v48 = vadd.f32 %v14119_v53, %v1268_v28  ;;  %v5397_v39 = vadd.f32 %v14126_v51, %v1013_v5  ;;  %v5398_v51 = vadd.f32 %v14165_v47, %v1014_v32  ;;  %v9629_v47 = vld [vmem:[%s10011_s7 + $0x5d0] sm:$0xff]  ;;  %v1144_v5 = vld [vmem:[#allocation2 + $0xb18] sm:$0xff] }
 0x4fa   : > { %6162 = vst.msk [vmem:[#allocation2 + $0xee0] sm:$0xff] %vm276_vm3, %v5649_v14  ;;  %v14217_v44 = vpop.f32.mrf.mxu2  ;;  %v1143_v28 = vld [vmem:[#allocation2 + $0xb10] sm:$0xff] }
 0x4fb   : > { %5779 = vst.msk [vmem:[#allocation2 + $0x2e8] sm:$0xff] %vm276_vm3, %v5266_v59  ;;  %v1141_v59 = vld [vmem:[#allocation2 + $0xb00] sm:$0xff]  ;;  %v14230_v11 = vpop.f32.mrf.mxu1 }
 0x4fc   : > { %5907 = vst.msk [vmem:[#allocation2 + $0x6e8] sm:$0xff] %vm276_vm3, %v5394_v36  ;;  %v1269_v36 = vld [vmem:[#allocation2 + $0xf00] sm:$0xff] }
 0x4fd   : > { %6035 = vst.msk [vmem:[#allocation2 + $0xae8] sm:$0xff] %vm276_vm3, %v5522_v1  ;;  %v14183_v61 = vpop.f32.mrf.mxu0  ;;  %v5525_v1 = vadd.f32 %v14155_v8, %v1141_v59  ;;  %v5653_v53 = vadd.f32 %v14159_v37, %v1269_v36  ;;  %v889_v59 = vld [vmem:[#allocation2 + $0x320] sm:$0xff] }
 0x4fe   : > { %6163 = vst.msk [vmem:[#allocation2 + $0xee8] sm:$0xff] %vm276_vm3, %v5650_v30  ;;  %v1142_v30 = vld [vmem:[#allocation2 + $0xb08] sm:$0xff] }
 0x4ff   : > { %5780 = vst.msk [vmem:[#allocation2 + $0x2f0] sm:$0xff] %vm276_vm3, %v5267_v19  ;;  %v14223_v14 = vpop.f32.mrf.mxu3  ;;  %v5526_v8 = vadd.f32 %v14177_v34, %v1142_v30 }
 0x500   : > { %5908 = vst.msk [vmem:[#allocation2 + $0x6f0] sm:$0xff] %vm276_vm3, %v5395_v3  ;;  %v9565_v3 = vld [vmem:[%s10011_s7 + $0x3d0] sm:$0xff] }
 0x501   : > { %v6677_v0 = vld [vmem:[#allocation2 + $0xee0] sm:$0xff]  ;;  %6036 = vst.msk [vmem:[#allocation2 + $0xaf0] sm:$0xff] %vm276_vm3, %v5523_v58 }
 0x502   : > { %v7193_v20 = vadd.f32 %v13810_v35, %v6677_v0  ;;  %v6294_v52 = vld [vmem:[#allocation2 + $0x2e8] sm:$0xff]  ;;  %6164 = vst.msk [vmem:[#allocation2 + $0xef0] sm:$0xff] %vm276_vm3, %v5651_v42  ;;  %v14245_v7 = vpop.f32.mrf.mxu2 }
 0x503   : > { %v6810_v50 = vadd.f32 %v13810_v35, %v6294_v52  ;;  %v6422_v21 = vld [vmem:[#allocation2 + $0x6e8] sm:$0xff]  ;;  %5781 = vst.msk [vmem:[#allocation2 + $0x2f8] sm:$0xff] %vm276_vm3, %v5268_v56  ;;  %v14254_v37 = vpop.f32.mrf.mxu1  ;;  %v9693_v56 = vld [vmem:[%s10011_s7 + $0x7d0] sm:$0xff]  ;;  %v5528_v32 = vadd.f32 %v14245_v7, %v1144_v5 }
 0x504   : > { %7705 = vst.msk [vmem:[%s10192_s12 + $0xee0] sm:$0xff] %vm276_vm3, %v7193_v20  ;;  %v6938_v38 = vadd.f32 %v13810_v35, %v6422_v21  ;;  %v6550_v40 = vld [vmem:[#allocation2 + $0xae8] sm:$0xff]  ;;  %v891_v5 = vld [vmem:[#allocation2 + $0x330] sm:$0xff] }
 0x505   : > { %7322 = vst.msk [vmem:[%s10192_s12 + $0x2e8] sm:$0xff] %vm276_vm3, %v6810_v50  ;;  %v7066_v12 = vadd.f32 %v13810_v35, %v6550_v40  ;;  %v6678_v13 = vld [vmem:[#allocation2 + $0xee8] sm:$0xff]  ;;  %v14225_v31 = vpop.f32.mrf.mxu0  ;;  %9228 = vmatmul.msk.bf16.gmra.mxu0 %vm3108_vm2, %v9501_v60 }
 0x506   : > { %7450 = vst.msk [vmem:[%s10192_s12 + $0x6e8] sm:$0xff] %vm276_vm3, %v6938_v38  ;;  %v7194_v18 = vadd.f32 %v13810_v35, %v6678_v13  ;;  %v6295_v23 = vld [vmem:[#allocation2 + $0x2f0] sm:$0xff]  ;;  %9292 = vmatmul.msk.bf16.gmra.mxu1 %vm3108_vm2, %v9565_v3  ;;  %v1270_v13 = vld [vmem:[#allocation2 + $0xf08] sm:$0xff] }
 0x507   : > { %7578 = vst.msk [vmem:[%s10192_s12 + $0xae8] sm:$0xff] %vm276_vm3, %v7066_v12  ;;  %v6811_v33 = vadd.f32 %v13810_v35, %v6295_v23  ;;  %v6423_v9 = vld [vmem:[#allocation2 + $0x6f0] sm:$0xff]  ;;  %v14249_v19 = vpop.f32.mrf.mxu3  ;;  %9356 = vmatmul.msk.bf16.gmra.mxu2 %vm3108_vm2, %v9629_v47  ;;  %9420 = vmatmul.msk.bf16.gmra.mxu3 %vm3108_vm2, %v9693_v56 }
 0x508   : > { %7706 = vst.msk [vmem:[%s10192_s12 + $0xee8] sm:$0xff] %vm276_vm3, %v7194_v18  ;;  %v6939_v49 = vadd.f32 %v13810_v35, %v6423_v9  ;;  %v6551_v57 = vld [vmem:[#allocation2 + $0xaf0] sm:$0xff] }
 0x509   : > { %7323 = vst.msk [vmem:[%s10192_s12 + $0x2f0] sm:$0xff] %vm276_vm3, %v6811_v33  ;;  %v7067_v29 = vadd.f32 %v13810_v35, %v6551_v57  ;;  %v6679_v4 = vld [vmem:[#allocation2 + $0xef0] sm:$0xff] }
 0x50a   : > { %7451 = vst.msk [vmem:[%s10192_s12 + $0x6f0] sm:$0xff] %vm276_vm3, %v6939_v49  ;;  %v7195_v25 = vadd.f32 %v13810_v35, %v6679_v4  ;;  %v6296_v2 = vld [vmem:[#allocation2 + $0x2f8] sm:$0xff]  ;;  %v14278_v27 = vpop.f32.mrf.mxu2  ;;  %v887_v33 = vld [vmem:[#allocation2 + $0x310] sm:$0xff]  ;;  %v5654_v4 = vadd.f32 %v14181_v55, %v1270_v13  ;;  %v1273_v13 = vld [vmem:[#allocation2 + $0xf20] sm:$0xff] }
 0x50b   : > { %7579 = vst.msk [vmem:[%s10192_s12 + $0xaf0] sm:$0xff] %vm276_vm3, %v7067_v29  ;;  %v6812_v62 = vadd.f32 %v13810_v35, %v6296_v2  ;;  %v14290_v9 = vpop.f32.mrf.mxu1  ;;  %v1015_v57 = vld [vmem:[#allocation2 + $0x710] sm:$0xff]  ;;  %v5271_v2 = vadd.f32 %v14183_v61, %v887_v33  ;;  %v1016_v55 = vld [vmem:[#allocation2 + $0x718] sm:$0xff] }
 0x50c   : > { %7707 = vst.msk [vmem:[%s10192_s12 + $0xef0] sm:$0xff] %vm276_vm3, %v7195_v25  ;;  %v5399_v45 = vadd.f32 %v14188_v10, %v1015_v57  ;;  %v5400_v36 = vadd.f32 %v14230_v11, %v1016_v55  ;;  %v9695_v55 = vld [vmem:[%s10011_s7 + $0x7e0] sm:$0xff] }
 0x50d   : > { %7324 = vst.msk [vmem:[%s10192_s12 + $0x2f8] sm:$0xff] %vm276_vm3, %v6812_v62  ;;  %v14251_v46 = vpop.f32.mrf.mxu0  ;;  %v888_v62 = vld [vmem:[#allocation2 + $0x318] sm:$0xff] }
 0x50e   : > { %5909 = vst.msk [vmem:[#allocation2 + $0x6f8] sm:$0xff] %vm276_vm3, %v5396_v16  ;;  %v1271_v16 = vld [vmem:[#allocation2 + $0xf10] sm:$0xff]  ;;  %v5272_v10 = vadd.f32 %v14225_v31, %v888_v62  ;;  %v9694_v31 = vld [vmem:[%s10011_s7 + $0x7d8] sm:$0xff]  ;;  %v5273_v11 = vadd.f32 %v14251_v46, %v889_v59  ;;  %v9631_v62 = vld [vmem:[%s10011_s7 + $0x5e0] sm:$0xff] }
 0x50f   : > { %6037 = vst.msk [vmem:[#allocation2 + $0xaf8] sm:$0xff] %vm276_vm3, %v5524_v63  ;;  %v14283_v22 = vpop.f32.mrf.mxu3  ;;  %v5527_v63 = vadd.f32 %v14217_v44, %v1143_v28 }
 0x510   : > { %6165 = vst.msk [vmem:[#allocation2 + $0xef8] sm:$0xff] %vm276_vm3, %v5652_v48  ;;  %v1272_v48 = vld [vmem:[#allocation2 + $0xf18] sm:$0xff] }
 0x511   : > { %5782 = vst.msk [vmem:[#allocation2 + $0x300] sm:$0xff] %vm276_vm3, %v5269_v41 }
 0x512   : > { %5910 = vst.msk [vmem:[#allocation2 + $0x700] sm:$0xff] %vm276_vm3, %v5397_v39  ;;  %v14311_v61 = vpop.f32.mrf.mxu2 }
 0x513   : > { %6038 = vst.msk [vmem:[#allocation2 + $0xb00] sm:$0xff] %vm276_vm3, %v5525_v1  ;;  %v14321_v39 = vpop.f32.mrf.mxu1  ;;  %v9630_v1 = vld [vmem:[%s10011_s7 + $0x5d8] sm:$0xff] }
 0x514   : > { %6166 = vst.msk [vmem:[#allocation2 + $0xf00] sm:$0xff] %vm276_vm3, %v5653_v53  ;;  %v5656_v53 = vadd.f32 %v14249_v19, %v1272_v48  ;;  %v1147_v48 = vld [vmem:[#allocation2 + $0xb30] sm:$0xff] }
 0x515   : > { %v6424_v15 = vld [vmem:[#allocation2 + $0x6f8] sm:$0xff]  ;;  %5783 = vst.msk [vmem:[#allocation2 + $0x308] sm:$0xff] %vm276_vm3, %v5270_v43  ;;  %v14285_v54 = vpop.f32.mrf.mxu0  ;;  %v14342_v43 = vld [vmem:[%s15225_s2] ss:$0 sm:$0xff] }
 0x516   : > { %v6940_v58 = vadd.f32 %v13810_v35, %v6424_v15  ;;  %v6552_v42 = vld [vmem:[#allocation2 + $0xaf8] sm:$0xff]  ;;  %5911 = vst.msk [vmem:[#allocation2 + $0x708] sm:$0xff] %vm276_vm3, %v5398_v51  ;;  %9293 = vmatmul.msk.bf16.gmra.mxu1 %vm3108_vm2, %v9566_v17 }
 0x517   : > { %v7068_v0 = vadd.f32 %v13810_v35, %v6552_v42  ;;  %v6680_v20 = vld [vmem:[#allocation2 + $0xef8] sm:$0xff]  ;;  %6039 = vst.msk [vmem:[#allocation2 + $0xb08] sm:$0xff] %vm276_vm3, %v5526_v8  ;;  %v14315_v41 = vpop.f32.mrf.mxu3  ;;  %9357 = vmatmul.msk.bf16.gmra.mxu2 %vm3108_vm2, %v9630_v1  ;;  %9421 = vmatmul.msk.bf16.gmra.mxu3 %vm3108_vm2, %v9694_v31 }
 0x518   : > { %7452 = vst.msk [vmem:[%s10192_s12 + $0x6f8] sm:$0xff] %vm276_vm3, %v6940_v58  ;;  %v7196_v52 = vadd.f32 %v13810_v35, %v6680_v20  ;;  %v6297_v34 = vld [vmem:[#allocation2 + $0x300] sm:$0xff] }
 0x519   : > { %7580 = vst.msk [vmem:[%s10192_s12 + $0xaf8] sm:$0xff] %vm276_vm3, %v7068_v0  ;;  %v6813_v50 = vadd.f32 %v13810_v35, %v6297_v34  ;;  %v6425_v21 = vld [vmem:[#allocation2 + $0x700] sm:$0xff] }
 0x51a   : > { %7708 = vst.msk [vmem:[%s10192_s12 + $0xef8] sm:$0xff] %vm276_vm3, %v7196_v52  ;;  %v6941_v38 = vadd.f32 %v13810_v35, %v6425_v21  ;;  %v6553_v40 = vld [vmem:[#allocation2 + $0xb00] sm:$0xff]  ;;  %v14346_v8 = vpop.f32.mrf.mxu2 }
 0x51b   : > { %7325 = vst.msk [vmem:[%s10192_s12 + $0x300] sm:$0xff] %vm276_vm3, %v6813_v50  ;;  %v7069_v6 = vadd.f32 %v13810_v35, %v6553_v40  ;;  %v6681_v12 = vld [vmem:[#allocation2 + $0xf00] sm:$0xff]  ;;  %v14357_v58 = vpop.f32.mrf.mxu1 }
 0x51c   : > { %7453 = vst.msk [vmem:[%s10192_s12 + $0x700] sm:$0xff] %vm276_vm3, %v6941_v38  ;;  %v7197_v18 = vadd.f32 %v13810_v35, %v6681_v12  ;;  %v6298_v23 = vld [vmem:[#allocation2 + $0x308] sm:$0xff]  ;;  %v1017_v50 = vld [vmem:[#allocation2 + $0x720] sm:$0xff] }
 0x51d   : > { %7581 = vst.msk [vmem:[%s10192_s12 + $0xb00] sm:$0xff] %vm276_vm3, %v7069_v6  ;;  %v6814_v24 = vadd.f32 %v13810_v35, %v6298_v23  ;;  %v6426_v49 = vld [vmem:[#allocation2 + $0x708] sm:$0xff]  ;;  %v14317_v44 = vpop.f32.mrf.mxu0  ;;  %v1145_v40 = vld [vmem:[#allocation2 + $0xb20] sm:$0xff]  ;;  %v5401_v33 = vadd.f32 %v14254_v37, %v1017_v50  ;;  %v5657_v37 = vadd.f32 %v14283_v22, %v1273_v13 }
 0x51e   : > { %7709 = vst.msk [vmem:[%s10192_s12 + $0xf00] sm:$0xff] %vm276_vm3, %v7197_v18  ;;  %v6942_v26 = vadd.f32 %v13810_v35, %v6426_v49  ;;  %v6554_v29 = vld [vmem:[#allocation2 + $0xb08] sm:$0xff] }
 0x51f   : > { %7326 = vst.msk [vmem:[%s10192_s12 + $0x308] sm:$0xff] %vm276_vm3, %v6814_v24  ;;  %v7070_v25 = vadd.f32 %v13810_v35, %v6554_v29  ;;  %v5655_v35 = vadd.f32 %v14223_v14, %v1271_v16  ;;  %v9502_v14 = vld [vmem:[%s10011_s7 + $0x1d8] sm:$0xff]  ;;  %v14350_v60 = vpop.f32.mrf.mxu3  ;;  %v890_v24 = vld [vmem:[#allocation2 + $0x328] sm:$0xff]  ;;  %v9503_v16 = vld [vmem:[%s10011_s7 + $0x1e0] sm:$0xff] }
 0x520   : > { %7454 = vst.msk [vmem:[%s10192_s12 + $0x708] sm:$0xff] %vm276_vm3, %v6942_v26  ;;  %9229 = vmatmul.msk.bf16.gmra.mxu0 %vm3108_vm2, %v9502_v14  ;;  %v5529_v26 = vadd.f32 %v14278_v27, %v1145_v40  ;;  %v1018_v29 = vld [vmem:[#allocation2 + $0x728] sm:$0xff] }
 0x521   : > { %7582 = vst.msk [vmem:[%s10192_s12 + $0xb08] sm:$0xff] %vm276_vm3, %v7070_v25  ;;  %v1274_v27 = vld [vmem:[#allocation2 + $0xf28] sm:$0xff] }
 0x522   : > { %6167 = vst.msk [vmem:[#allocation2 + $0xf08] sm:$0xff] %vm276_vm3, %v5654_v4  ;;  %v14378_v49 = vpop.f32.mrf.mxu2  ;;  %v1146_v4 = vld [vmem:[#allocation2 + $0xb28] sm:$0xff] }
 0x523   : > { %5784 = vst.msk [vmem:[#allocation2 + $0x310] sm:$0xff] %vm276_vm3, %v5271_v2  ;;  %v14391_v2 = vpop.f32.mrf.mxu1  ;;  %v5530_v22 = vadd.f32 %v14311_v61, %v1146_v4  ;;  %v9696_v13 = vld [vmem:[%s10011_s7 + $0x7e8] sm:$0xff] }
 0x524   : > { %5912 = vst.msk [vmem:[#allocation2 + $0x710] sm:$0xff] %vm276_vm3, %v5399_v45  ;;  %v9567_v45 = vld [vmem:[%s10011_s7 + $0x3e0] sm:$0xff] }
 0x525   : > { %6040 = vst.msk [vmem:[#allocation2 + $0xb10] sm:$0xff] %vm276_vm3, %v5527_v63  ;;  %v14352_v3 = vpop.f32.mrf.mxu0  ;;  %v5274_v63 = vadd.f32 %v14285_v54, %v890_v24  ;;  %v5658_v54 = vadd.f32 %v14315_v41, %v1274_v27  ;;  %v1148_v24 = vld [vmem:[#allocation2 + $0xb38] sm:$0xff] }
 0x526   : > { %6168 = vst.msk [vmem:[#allocation2 + $0xf10] sm:$0xff] %vm276_vm3, %v5655_v35  ;;  %v5402_v35 = vadd.f32 %v14290_v9, %v1018_v29  ;;  %9294 = vmatmul.msk.bf16.gmra.mxu1 %vm3108_vm2, %v9567_v45  ;;  %v5275_v9 = vadd.f32 %v14317_v44, %v891_v5  ;;  %v1276_v29 = vld [vmem:[#allocation2 + $0xf38] sm:$0xff] }
 0x527   : > { %5785 = vst.msk [vmem:[#allocation2 + $0x318] sm:$0xff] %vm276_vm3, %v5272_v10  ;;  %v14384_v28 = vpop.f32.mrf.mxu3  ;;  %v1019_v10 = vld [vmem:[#allocation2 + $0x730] sm:$0xff]  ;;  %9358 = vmatmul.msk.bf16.gmra.mxu2 %vm3108_vm2, %v9631_v62  ;;  %9422 = vmatmul.msk.bf16.gmra.mxu3 %vm3108_vm2, %v9695_v55 }
 0x528   : > { %5913 = vst.msk [vmem:[#allocation2 + $0x718] sm:$0xff] %vm276_vm3, %v5400_v36  ;;  %v5403_v59 = vadd.f32 %v14321_v39, %v1019_v10  ;;  %v5531_v36 = vadd.f32 %v14346_v8, %v1147_v48  ;;  %v5660_v45 = vadd.f32 %v14384_v28, %v1276_v29 }
 0x529   : > { %v6682_v30 = vld [vmem:[#allocation2 + $0xf08] sm:$0xff]  ;;  %6041 = vst.msk [vmem:[#allocation2 + $0xb18] sm:$0xff] %vm276_vm3, %v5528_v32 }
 0x52a   : > { %v7198_v51 = vadd.f32 %v14342_v43, %v6682_v30  ;;  %v6299_v7 = vld [vmem:[#allocation2 + $0x310] sm:$0xff]  ;;  %6169 = vst.msk [vmem:[#allocation2 + $0xf18] sm:$0xff] %vm276_vm3, %v5656_v53  ;;  %v14414_v61 = vpop.f32.mrf.mxu2 }
 0x52b   : > { %v6815_v19 = vadd.f32 %v14342_v43, %v6299_v7  ;;  %v6427_v46 = vld [vmem:[#allocation2 + $0x710] sm:$0xff]  ;;  %5786 = vst.msk [vmem:[#allocation2 + $0x320] sm:$0xff] %vm276_vm3, %v5273_v11  ;;  %v14423_v44 = vpop.f32.mrf.mxu1 }
 0x52c   : > { %7710 = vst.msk [vmem:[%s10192_s12 + $0xf08] sm:$0xff] %vm276_vm3, %v7198_v51  ;;  %v6943_v15 = vadd.f32 %v14342_v43, %v6427_v46  ;;  %v6555_v47 = vld [vmem:[#allocation2 + $0xb10] sm:$0xff] }
 0x52d   : > { %7327 = vst.msk [vmem:[%s10192_s12 + $0x310] sm:$0xff] %vm276_vm3, %v6815_v19  ;;  %v7071_v42 = vadd.f32 %v14342_v43, %v6555_v47  ;;  %v6683_v56 = vld [vmem:[#allocation2 + $0xf10] sm:$0xff]  ;;  %v14386_v25 = vpop.f32.mrf.mxu0 }
 0x52e   : > { %7455 = vst.msk [vmem:[%s10192_s12 + $0x710] sm:$0xff] %vm276_vm3, %v6943_v15  ;;  %v7199_v0 = vadd.f32 %v14342_v43, %v6683_v56  ;;  %v6300_v20 = vld [vmem:[#allocation2 + $0x318] sm:$0xff]  ;;  %v1275_v19 = vld [vmem:[#allocation2 + $0xf30] sm:$0xff] }
 0x52f   : > { %7583 = vst.msk [vmem:[%s10192_s12 + $0xb10] sm:$0xff] %vm276_vm3, %v7071_v42  ;;  %v6816_v52 = vadd.f32 %v14342_v43, %v6300_v20  ;;  %v6428_v34 = vld [vmem:[#allocation2 + $0x718] sm:$0xff]  ;;  %v14418_v41 = vpop.f32.mrf.mxu3 }
 0x530   : > { %7711 = vst.msk [vmem:[%s10192_s12 + $0xf10] sm:$0xff] %vm276_vm3, %v7199_v0  ;;  %v6944_v21 = vadd.f32 %v14342_v43, %v6428_v34  ;;  %v6556_v38 = vld [vmem:[#allocation2 + $0xb18] sm:$0xff]  ;;  %9230 = vmatmul.msk.bf16.gmra.mxu0 %vm3108_vm2, %v9503_v16  ;;  %v1021_v16 = vld [vmem:[#allocation2 + $0x740] sm:$0xff] }
 0x531   : > { %7328 = vst.msk [vmem:[%s10192_s12 + $0x318] sm:$0xff] %vm276_vm3, %v6816_v52  ;;  %v7072_v6 = vadd.f32 %v14342_v43, %v6556_v38  ;;  %v6684_v12 = vld [vmem:[#allocation2 + $0xf18] sm:$0xff]  ;;  %v9568_v38 = vld [vmem:[%s10011_s7 + $0x3e8] sm:$0xff] }
 0x532   : > { %7456 = vst.msk [vmem:[%s10192_s12 + $0x718] sm:$0xff] %vm276_vm3, %v6944_v21  ;;  %v7200_v18 = vadd.f32 %v14342_v43, %v6684_v12  ;;  %v6301_v23 = vld [vmem:[#allocation2 + $0x320] sm:$0xff]  ;;  %v14439_v46 = vpop.f32.mrf.mxu2  ;;  %v892_v42 = vld [vmem:[#allocation2 + $0x338] sm:$0xff]  ;;  %v9504_v21 = vld [vmem:[%s10011_s7 + $0x1e8] sm:$0xff] }
 0x533   : > { %7584 = vst.msk [vmem:[%s10192_s12 + $0xb18] sm:$0xff] %vm276_vm3, %v7072_v6  ;;  %v6817_v57 = vadd.f32 %v14342_v43, %v6301_v23  ;;  %v1020_v56 = vld [vmem:[#allocation2 + $0x738] sm:$0xff]  ;;  %v14451_v50 = vpop.f32.mrf.mxu1  ;;  %v9632_v12 = vld [vmem:[%s10011_s7 + $0x5e8] sm:$0xff] }
 0x534   : > { %7712 = vst.msk [vmem:[%s10192_s12 + $0xf18] sm:$0xff] %vm276_vm3, %v7200_v18  ;;  %v5404_v4 = vadd.f32 %v14357_v58, %v1020_v56  ;;  %v1277_v58 = vld [vmem:[#allocation2 + $0xf40] sm:$0xff] }
 0x535   : > { %7329 = vst.msk [vmem:[%s10192_s12 + $0x320] sm:$0xff] %vm276_vm3, %v6817_v57  ;;  %v14420_v14 = vpop.f32.mrf.mxu0 }
 0x536   : > { %5914 = vst.msk [vmem:[#allocation2 + $0x720] sm:$0xff] %vm276_vm3, %v5401_v33  ;;  %v5659_v33 = vadd.f32 %v14350_v60, %v1275_v19  ;;  %9295 = vmatmul.msk.bf16.gmra.mxu1 %vm3108_vm2, %v9568_v38  ;;  %v5532_v60 = vadd.f32 %v14378_v49, %v1148_v24  ;;  %v5405_v49 = vadd.f32 %v14391_v2, %v1021_v16  ;;  %v1022_v19 = vld [vmem:[#allocation2 + $0x748] sm:$0xff]  ;;  %v1024_v16 = vld [vmem:[#allocation2 + $0x758] sm:$0xff] }
 0x537   : > { %6042 = vst.msk [vmem:[#allocation2 + $0xb20] sm:$0xff] %vm276_vm3, %v5529_v26  ;;  %v14444_v0 = vpop.f32.mrf.mxu3  ;;  %v5276_v26 = vadd.f32 %v14352_v3, %v892_v42  ;;  %9359 = vmatmul.msk.bf16.gmra.mxu2 %vm3108_vm2, %v9632_v12  ;;  %9423 = vmatmul.msk.bf16.gmra.mxu3 %vm3108_vm2, %v9696_v13  ;;  %v1149_v3 = vld [vmem:[#allocation2 + $0xb40] sm:$0xff]  ;;  %v1150_v42 = vld [vmem:[#allocation2 + $0xb48] sm:$0xff] }
 0x538   : > { %6170 = vst.msk [vmem:[#allocation2 + $0xf20] sm:$0xff] %vm276_vm3, %v5657_v37  ;;  %v893_v37 = vld [vmem:[#allocation2 + $0x340] sm:$0xff]  ;;  %v5533_v28 = vadd.f32 %v14414_v61, %v1149_v3 }
 0x539   : > { %5787 = vst.msk [vmem:[#allocation2 + $0x328] sm:$0xff] %vm276_vm3, %v5274_v63  ;;  %v5277_v63 = vadd.f32 %v14386_v25, %v893_v37  ;;  %v5661_v25 = vadd.f32 %v14418_v41, %v1277_v58  ;;  %v896_v37 = vld [vmem:[#allocation2 + $0x358] sm:$0xff] }
 0x53a   : > { %5915 = vst.msk [vmem:[#allocation2 + $0x728] sm:$0xff] %vm276_vm3, %v5402_v35  ;;  %v14480_v62 = vpop.f32.mrf.mxu2  ;;  %v894_v35 = vld [vmem:[#allocation2 + $0x348] sm:$0xff] }
 0x53b   : > { %6043 = vst.msk [vmem:[#allocation2 + $0xb28] sm:$0xff] %vm276_vm3, %v5530_v22  ;;  %v14490_v5 = vpop.f32.mrf.mxu1  ;;  %v5278_v22 = vadd.f32 %v14420_v14, %v894_v35 }
 0x53c   : > { %6171 = vst.msk [vmem:[#allocation2 + $0xf28] sm:$0xff] %vm276_vm3, %v5658_v54 }
 0x53d   : > { %v6429_v17 = vld [vmem:[#allocation2 + $0x720] sm:$0xff]  ;;  %5788 = vst.msk [vmem:[#allocation2 + $0x330] sm:$0xff] %vm276_vm3, %v5275_v9  ;;  %v14446_v20 = vpop.f32.mrf.mxu0 }
 0x53e   : > { %v6945_v39 = vadd.f32 %v14342_v43, %v6429_v17  ;;  %v6557_v1 = vld [vmem:[#allocation2 + $0xb20] sm:$0xff]  ;;  %5916 = vst.msk [vmem:[#allocation2 + $0x730] sm:$0xff] %vm276_vm3, %v5403_v59 }
 0x53f   : > { %v7073_v32 = vadd.f32 %v14342_v43, %v6557_v1  ;;  %v6685_v31 = vld [vmem:[#allocation2 + $0xf20] sm:$0xff]  ;;  %6044 = vst.msk [vmem:[#allocation2 + $0xb30] sm:$0xff] %vm276_vm3, %v5531_v36  ;;  %v14484_v27 = vpop.f32.mrf.mxu3  ;;  %v9569_v1 = vld [vmem:[%s10011_s7 + $0x3f0] sm:$0xff] }
 0x540   : > { %7457 = vst.msk [vmem:[%s10192_s12 + $0x720] sm:$0xff] %vm276_vm3, %v6945_v39  ;;  %v7201_v53 = vadd.f32 %v14342_v43, %v6685_v31  ;;  %v6302_v11 = vld [vmem:[#allocation2 + $0x328] sm:$0xff]  ;;  %9231 = vmatmul.msk.bf16.gmra.mxu0 %vm3108_vm2, %v9504_v21  ;;  %v9505_v39 = vld [vmem:[%s10011_s7 + $0x1f0] sm:$0xff] }
 0x541   : > { %7585 = vst.msk [vmem:[%s10192_s12 + $0xb20] sm:$0xff] %vm276_vm3, %v7073_v32  ;;  %v6818_v30 = vadd.f32 %v14342_v43, %v6302_v11  ;;  %v6430_v51 = vld [vmem:[#allocation2 + $0x728] sm:$0xff]  ;;  %v9697_v11 = vld [vmem:[%s10011_s7 + $0x7f0] sm:$0xff] }
 0x542   : > { %7713 = vst.msk [vmem:[%s10192_s12 + $0xf20] sm:$0xff] %vm276_vm3, %v7201_v53  ;;  %v6946_v7 = vadd.f32 %v14342_v43, %v6430_v51  ;;  %v6558_v8 = vld [vmem:[#allocation2 + $0xb28] sm:$0xff]  ;;  %v14502_v48 = vpop.f32.mrf.mxu2  ;;  %v9633_v53 = vld [vmem:[%s10011_s7 + $0x5f0] sm:$0xff] }
 0x543   : > { %7330 = vst.msk [vmem:[%s10192_s12 + $0x328] sm:$0xff] %vm276_vm3, %v6818_v30  ;;  %v7074_v15 = vadd.f32 %v14342_v43, %v6558_v8  ;;  %v6686_v47 = vld [vmem:[#allocation2 + $0xf28] sm:$0xff]  ;;  %v14513_v17 = vpop.f32.mrf.mxu1 }
 0x544   : > { %7458 = vst.msk [vmem:[%s10192_s12 + $0x728] sm:$0xff] %vm276_vm3, %v6946_v7  ;;  %v7202_v52 = vadd.f32 %v14342_v43, %v6686_v47  ;;  %v6303_v34 = vld [vmem:[#allocation2 + $0x330] sm:$0xff] }
 0x545   : > { %7586 = vst.msk [vmem:[%s10192_s12 + $0xb28] sm:$0xff] %vm276_vm3, %v7074_v15  ;;  %v6819_v40 = vadd.f32 %v14342_v43, %v6303_v34  ;;  %v6431_v6 = vld [vmem:[#allocation2 + $0x730] sm:$0xff]  ;;  %v14486_v55 = vpop.f32.mrf.mxu0  ;;  %v1278_v34 = vld [vmem:[#allocation2 + $0xf48] sm:$0xff] }
 0x546   : > { %7714 = vst.msk [vmem:[%s10192_s12 + $0xf28] sm:$0xff] %vm276_vm3, %v7202_v52  ;;  %v6947_v18 = vadd.f32 %v14342_v43, %v6431_v6  ;;  %v6559_v23 = vld [vmem:[#allocation2 + $0xb30] sm:$0xff]  ;;  %9296 = vmatmul.msk.bf16.gmra.mxu1 %vm3108_vm2, %v9569_v1 }
 0x547   : > { %7331 = vst.msk [vmem:[%s10192_s12 + $0x330] sm:$0xff] %vm276_vm3, %v6819_v40  ;;  %v7075_v57 = vadd.f32 %v14342_v43, %v6559_v23  ;;  %v14506_v61 = vpop.f32.mrf.mxu3  ;;  %9360 = vmatmul.msk.bf16.gmra.mxu2 %vm3108_vm2, %v9633_v53  ;;  %9424 = vmatmul.msk.bf16.gmra.mxu3 %vm3108_vm2, %v9697_v11  ;;  %v5406_v40 = vadd.f32 %v14423_v44, %v1022_v19  ;;  %v895_v6 = vld [vmem:[#allocation2 + $0x350] sm:$0xff] }
 0x548   : > { %7459 = vst.msk [vmem:[%s10192_s12 + $0x730] sm:$0xff] %vm276_vm3, %v6947_v18  ;;  %v5534_v18 = vadd.f32 %v14439_v46, %v1150_v42  ;;  %v1023_v23 = vld [vmem:[#allocation2 + $0x750] sm:$0xff]  ;;  %v5279_v29 = vadd.f32 %v14446_v20, %v895_v6  ;;  %v5280_v20 = vadd.f32 %v14486_v55, %v896_v37  ;;  %v9506_v55 = vld [vmem:[%s10011_s7 + $0x1f8] sm:$0xff] }
 0x549   : > { %7587 = vst.msk [vmem:[%s10192_s12 + $0xb30] sm:$0xff] %vm276_vm3, %v7075_v57  ;;  %v5662_v57 = vadd.f32 %v14444_v0, %v1278_v34  ;;  %v5407_v46 = vadd.f32 %v14451_v50, %v1023_v23  ;;  %v5408_v50 = vadd.f32 %v14490_v5, %v1024_v16  ;;  %v9634_v5 = vld [vmem:[%s10011_s7 + $0x5f8] sm:$0xff]  ;;  %v1153_v34 = vld [vmem:[#allocation2 + $0xb60] sm:$0xff]  ;;  %v1026_v23 = vld [vmem:[#allocation2 + $0x768] sm:$0xff] }
 0x54a   : > { %6172 = vst.msk [vmem:[#allocation2 + $0xf30] sm:$0xff] %vm276_vm3, %v5659_v33  ;;  %v14542_v12 = vpop.f32.mrf.mxu2 }
 0x54b   : > { %5789 = vst.msk [vmem:[#allocation2 + $0x338] sm:$0xff] %vm276_vm3, %v5276_v26  ;;  %v1151_v26 = vld [vmem:[#allocation2 + $0xb50] sm:$0xff]  ;;  %v14555_v44 = vpop.f32.mrf.mxu1 }
 0x54c   : > { %5917 = vst.msk [vmem:[#allocation2 + $0x738] sm:$0xff] %vm276_vm3, %v5404_v4  ;;  %v1279_v4 = vld [vmem:[#allocation2 + $0xf50] sm:$0xff] }
 0x54d   : > { %6045 = vst.msk [vmem:[#allocation2 + $0xb38] sm:$0xff] %vm276_vm3, %v5532_v60  ;;  %v14508_v36 = vpop.f32.mrf.mxu0  ;;  %v5535_v60 = vadd.f32 %v14480_v62, %v1151_v26  ;;  %v5663_v0 = vadd.f32 %v14484_v27, %v1279_v4 }
 0x54e   : > { %6173 = vst.msk [vmem:[#allocation2 + $0xf38] sm:$0xff] %vm276_vm3, %v5660_v45  ;;  %v1152_v45 = vld [vmem:[#allocation2 + $0xb58] sm:$0xff] }
 0x54f   : > { %5790 = vst.msk [vmem:[#allocation2 + $0x340] sm:$0xff] %vm276_vm3, %v5277_v63  ;;  %v14548_v33 = vpop.f32.mrf.mxu3  ;;  %v5536_v62 = vadd.f32 %v14502_v48, %v1152_v45 }
 0x550   : > { %5918 = vst.msk [vmem:[#allocation2 + $0x740] sm:$0xff] %vm276_vm3, %v5405_v49  ;;  %9232 = vmatmul.msk.bf16.gmra.mxu0 %vm3108_vm2, %v9505_v39  ;;  %v9570_v49 = vld [vmem:[%s10011_s7 + $0x3f8] sm:$0xff] }
 0x551   : > { %v6687_v2 = vld [vmem:[#allocation2 + $0xf30] sm:$0xff]  ;;  %6046 = vst.msk [vmem:[#allocation2 + $0xb40] sm:$0xff] %vm276_vm3, %v5533_v28 }
 0x552   : > { %v7203_v10 = vadd.f32 %v14342_v43, %v6687_v2  ;;  %v6304_v54 = vld [vmem:[#allocation2 + $0x338] sm:$0xff]  ;;  %6174 = vst.msk [vmem:[#allocation2 + $0xf40] sm:$0xff] %vm276_vm3, %v5661_v25  ;;  %v14570_v3 = vpop.f32.mrf.mxu2 }
 0x553   : > { %v6820_v9 = vadd.f32 %v14342_v43, %v6304_v54  ;;  %v6432_v59 = vld [vmem:[#allocation2 + $0x738] sm:$0xff]  ;;  %5791 = vst.msk [vmem:[#allocation2 + $0x348] sm:$0xff] %vm276_vm3, %v5278_v22  ;;  %v14579_v27 = vpop.f32.mrf.mxu1 }
 0x554   : > { %7715 = vst.msk [vmem:[%s10192_s12 + $0xf30] sm:$0xff] %vm276_vm3, %v7203_v10  ;;  %v6948_v41 = vadd.f32 %v14342_v43, %v6432_v59  ;;  %v6560_v14 = vld [vmem:[#allocation2 + $0xb38] sm:$0xff] }
 0x555   : > { %7332 = vst.msk [vmem:[%s10192_s12 + $0x338] sm:$0xff] %vm276_vm3, %v6820_v9  ;;  %v7076_v32 = vadd.f32 %v14342_v43, %v6560_v14  ;;  %v6688_v31 = vld [vmem:[#allocation2 + $0xf38] sm:$0xff]  ;;  %v14550_v24 = vpop.f32.mrf.mxu0 }
 0x556   : > { %7460 = vst.msk [vmem:[%s10192_s12 + $0x738] sm:$0xff] %vm276_vm3, %v6948_v41  ;;  %v7204_v30 = vadd.f32 %v14342_v43, %v6688_v31  ;;  %v6305_v51 = vld [vmem:[#allocation2 + $0x340] sm:$0xff]  ;;  %9297 = vmatmul.msk.bf16.gmra.mxu1 %vm3108_vm2, %v9570_v49  ;;  %v9698_v22 = vld [vmem:[%s10011_s7 + $0x7f8] sm:$0xff] }
 0x557   : > { %7588 = vst.msk [vmem:[%s10192_s12 + $0xb38] sm:$0xff] %vm276_vm3, %v7076_v32  ;;  %v6821_v7 = vadd.f32 %v14342_v43, %v6305_v51  ;;  %v6433_v8 = vld [vmem:[#allocation2 + $0x740] sm:$0xff]  ;;  %v14574_v63 = vpop.f32.mrf.mxu3  ;;  %9361 = vmatmul.msk.bf16.gmra.mxu2 %vm3108_vm2, %v9634_v5  ;;  %9425 = vmatmul.msk.bf16.gmra.mxu3 %vm3108_vm2, %v9698_v22  ;;  %v1280_v31 = vld [vmem:[#allocation2 + $0xf58] sm:$0xff] }
 0x558   : > { %7716 = vst.msk [vmem:[%s10192_s12 + $0xf38] sm:$0xff] %vm276_vm3, %v7204_v30  ;;  %v6949_v15 = vadd.f32 %v14342_v43, %v6433_v8  ;;  %v6561_v47 = vld [vmem:[#allocation2 + $0xb40] sm:$0xff] }
 0x559   : > { %7333 = vst.msk [vmem:[%s10192_s12 + $0x340] sm:$0xff] %vm276_vm3, %v6821_v7  ;;  %v7077_v56 = vadd.f32 %v14342_v43, %v6561_v47  ;;  %v6689_v52 = vld [vmem:[#allocation2 + $0xf40] sm:$0xff] }
 0x55a   : > { %7461 = vst.msk [vmem:[%s10192_s12 + $0x740] sm:$0xff] %vm276_vm3, %v6949_v15  ;;  %v7205_v21 = vadd.f32 %v14342_v43, %v6689_v52  ;;  %v6306_v38 = vld [vmem:[#allocation2 + $0x348] sm:$0xff]  ;;  %v14603_v39 = vpop.f32.mrf.mxu2  ;;  %v897_v7 = vld [vmem:[#allocation2 + $0x360] sm:$0xff]  ;;  %v5664_v52 = vadd.f32 %v14506_v61, %v1280_v31  ;;  %v900_v31 = vld [vmem:[#allocation2 + $0x378] sm:$0xff] }
 0x55b   : > { %7589 = vst.msk [vmem:[%s10192_s12 + $0xb40] sm:$0xff] %vm276_vm3, %v7077_v56  ;;  %v6822_v13 = vadd.f32 %v14342_v43, %v6306_v38  ;;  %v14615_v8 = vpop.f32.mrf.mxu1  ;;  %v1025_v47 = vld [vmem:[#allocation2 + $0x760] sm:$0xff]  ;;  %v5281_v38 = vadd.f32 %v14508_v36, %v897_v7 }
 0x55c   : > { %7717 = vst.msk [vmem:[%s10192_s12 + $0xf40] sm:$0xff] %vm276_vm3, %v7205_v21  ;;  %v5409_v6 = vadd.f32 %v14513_v17, %v1025_v47 }
 0x55d   : > { %7334 = vst.msk [vmem:[%s10192_s12 + $0x348] sm:$0xff] %vm276_vm3, %v6822_v13  ;;  %v14576_v58 = vpop.f32.mrf.mxu0  ;;  %v898_v13 = vld [vmem:[#allocation2 + $0x368] sm:$0xff] }
 0x55e   : > { %5919 = vst.msk [vmem:[#allocation2 + $0x748] sm:$0xff] %vm276_vm3, %v5406_v40  ;;  %v1281_v40 = vld [vmem:[#allocation2 + $0xf60] sm:$0xff]  ;;  %v5282_v36 = vadd.f32 %v14550_v24, %v898_v13 }
 0x55f   : > { %6047 = vst.msk [vmem:[#allocation2 + $0xb48] sm:$0xff] %vm276_vm3, %v5534_v18  ;;  %v14608_v53 = vpop.f32.mrf.mxu3  ;;  %v5537_v18 = vadd.f32 %v14542_v12, %v1153_v34  ;;  %v5665_v61 = vadd.f32 %v14548_v33, %v1281_v40  ;;  %v5410_v12 = vadd.f32 %v14555_v44, %v1026_v23  ;;  %v1284_v34 = vld [vmem:[#allocation2 + $0xf78] sm:$0xff]  ;;  %v1029_v40 = vld [vmem:[#allocation2 + $0x780] sm:$0xff] }
 0x560   : > { %6175 = vst.msk [vmem:[#allocation2 + $0xf48] sm:$0xff] %vm276_vm3, %v5662_v57  ;;  %9233 = vmatmul.msk.bf16.gmra.mxu0 %vm3108_vm2, %v9506_v55  ;;  %v1154_v57 = vld [vmem:[#allocation2 + $0xb68] sm:$0xff] }
 0x561   : > { %5792 = vst.msk [vmem:[#allocation2 + $0x350] sm:$0xff] %vm276_vm3, %v5279_v29  ;;  %v1282_v29 = vld [vmem:[#allocation2 + $0xf68] sm:$0xff]  ;;  %v5538_v33 = vadd.f32 %v14570_v3, %v1154_v57 }
 0x562   : > { %5920 = vst.msk [vmem:[#allocation2 + $0x750] sm:$0xff] %vm276_vm3, %v5407_v46  ;;  %v14636_v26 = vpop.f32.mrf.mxu2  ;;  %v899_v46 = vld [vmem:[#allocation2 + $0x370] sm:$0xff]  ;;  %v5666_v24 = vadd.f32 %v14574_v63, %v1282_v29 }
 0x563   : > { %6048 = vst.msk [vmem:[#allocation2 + $0xb50] sm:$0xff] %vm276_vm3, %v5535_v60  ;;  %v14646_v37 = vpop.f32.mrf.mxu1  ;;  %v5283_v60 = vadd.f32 %v14576_v58, %v899_v46 }
 0x564   : > { %6176 = vst.msk [vmem:[#allocation2 + $0xf50] sm:$0xff] %vm276_vm3, %v5663_v0  ;;  %v5413_v13 = vadd.f32 %v14646_v37, %v1029_v40 }
 0x565   : > { %v6434_v35 = vld [vmem:[#allocation2 + $0x748] sm:$0xff]  ;;  %5793 = vst.msk [vmem:[#allocation2 + $0x358] sm:$0xff] %vm276_vm3, %v5280_v20  ;;  %v14610_v11 = vpop.f32.mrf.mxu0 }
 0x566   : > { %v6950_v28 = vadd.f32 %v14342_v43, %v6434_v35  ;;  %v6562_v25 = vld [vmem:[#allocation2 + $0xb48] sm:$0xff]  ;;  %5921 = vst.msk [vmem:[#allocation2 + $0x758] sm:$0xff] %vm276_vm3, %v5408_v50 }
 0x567   : > { %v7078_v2 = vadd.f32 %v14342_v43, %v6562_v25  ;;  %v6690_v10 = vld [vmem:[#allocation2 + $0xf48] sm:$0xff]  ;;  %6049 = vst.msk [vmem:[#allocation2 + $0xb58] sm:$0xff] %vm276_vm3, %v5536_v62  ;;  %v14640_v4 = vpop.f32.mrf.mxu3 }
 0x568   : > { %7462 = vst.msk [vmem:[%s10192_s12 + $0x748] sm:$0xff] %vm276_vm3, %v6950_v28  ;;  %v7206_v54 = vadd.f32 %v14342_v43, %v6690_v10  ;;  %v6307_v48 = vld [vmem:[#allocation2 + $0x350] sm:$0xff] }
 0x569   : > { %7590 = vst.msk [vmem:[%s10192_s12 + $0xb48] sm:$0xff] %vm276_vm3, %v7078_v2  ;;  %v6823_v9 = vadd.f32 %v14342_v43, %v6307_v48  ;;  %v6435_v59 = vld [vmem:[#allocation2 + $0x750] sm:$0xff] }
 0x56a   : > { %7718 = vst.msk [vmem:[%s10192_s12 + $0xf48] sm:$0xff] %vm276_vm3, %v7206_v54  ;;  %v6951_v41 = vadd.f32 %v14342_v43, %v6435_v59  ;;  %v6563_v14 = vld [vmem:[#allocation2 + $0xb50] sm:$0xff]  ;;  %v4813_v45 = vpop.f32.mrf.mxu2 }
 0x56b   : > { %7335 = vst.msk [vmem:[%s10192_s12 + $0x350] sm:$0xff] %vm276_vm3, %v6823_v9  ;;  %v7079_v1 = vadd.f32 %v14342_v43, %v6563_v14  ;;  %v6691_v32 = vld [vmem:[#allocation2 + $0xf50] sm:$0xff]  ;;  %v14667_v55 = vpop.f32.mrf.mxu1 }
 0x56c   : > { %7463 = vst.msk [vmem:[%s10192_s12 + $0x750] sm:$0xff] %vm276_vm3, %v6951_v41  ;;  %v7207_v30 = vadd.f32 %v14342_v43, %v6691_v32  ;;  %v6308_v51 = vld [vmem:[#allocation2 + $0x358] sm:$0xff]  ;;  %v1027_v2 = vld [vmem:[#allocation2 + $0x770] sm:$0xff] }
 0x56d   : > { %7591 = vst.msk [vmem:[%s10192_s12 + $0xb50] sm:$0xff] %vm276_vm3, %v7079_v1  ;;  %v6824_v19 = vadd.f32 %v14342_v43, %v6308_v51  ;;  %v6436_v15 = vld [vmem:[#allocation2 + $0x758] sm:$0xff]  ;;  %v14642_v17 = vpop.f32.mrf.mxu0  ;;  %v1155_v48 = vld [vmem:[#allocation2 + $0xb70] sm:$0xff]  ;;  %v5411_v32 = vadd.f32 %v14579_v27, %v1027_v2 }
 0x56e   : > { %7719 = vst.msk [vmem:[%s10192_s12 + $0xf50] sm:$0xff] %vm276_vm3, %v7207_v30  ;;  %v6952_v42 = vadd.f32 %v14342_v43, %v6436_v15  ;;  %v6564_v56 = vld [vmem:[#allocation2 + $0xb58] sm:$0xff]  ;;  %v1283_v41 = vld [vmem:[#allocation2 + $0xf70] sm:$0xff]  ;;  %v5539_v7 = vadd.f32 %v14603_v39, %v1155_v48 }
 0x56f   : > { %7336 = vst.msk [vmem:[%s10192_s12 + $0x358] sm:$0xff] %vm276_vm3, %v6824_v19  ;;  %v7080_v21 = vadd.f32 %v14342_v43, %v6564_v56  ;;  %v14660_v3 = vpop.f32.mrf.mxu3  ;;  %v1028_v19 = vld [vmem:[#allocation2 + $0x778] sm:$0xff] }
 0x570   : > { %7464 = vst.msk [vmem:[%s10192_s12 + $0x758] sm:$0xff] %vm276_vm3, %v6952_v42  ;;  %v5667_v42 = vadd.f32 %v14608_v53, %v1283_v41  ;;  %v1156_v56 = vld [vmem:[#allocation2 + $0xb78] sm:$0xff]  ;;  %v5412_v39 = vadd.f32 %v14615_v8, %v1028_v19  ;;  %v5668_v53 = vadd.f32 %v14640_v4, %v1284_v34 }
 0x571   : > { %7592 = vst.msk [vmem:[%s10192_s12 + $0xb58] sm:$0xff] %vm276_vm3, %v7080_v21  ;;  %v901_v21 = vld [vmem:[#allocation2 + $0x380] sm:$0xff] }
 0x572   : > { %6177 = vst.msk [vmem:[#allocation2 + $0xf58] sm:$0xff] %vm276_vm3, %v5664_v52  ;;  %v14688_v30 = vpop.f32.mrf.mxu2  ;;  %v5284_v52 = vadd.f32 %v14610_v11, %v900_v31  ;;  %v5285_v11 = vadd.f32 %v14642_v17, %v901_v21  ;;  %v1159_v31 = vld [vmem:[#allocation2 + $0xb90] sm:$0xff] }
 0x573   : > { %5794 = vst.msk [vmem:[#allocation2 + $0x360] sm:$0xff] %vm276_vm3, %v5281_v38  ;;  %v14701_v27 = vpop.f32.mrf.mxu1  ;;  %v5540_v38 = vadd.f32 %v14636_v26, %v1156_v56 }
 0x574   : > { %5922 = vst.msk [vmem:[#allocation2 + $0x760] sm:$0xff] %vm276_vm3, %v5409_v6  ;;  %v1157_v6 = vld [vmem:[#allocation2 + $0xb80] sm:$0xff] }
 0x575   : > { %6050 = vst.msk [vmem:[#allocation2 + $0xb60] sm:$0xff] %vm276_vm3, %v5537_v18  ;;  %v14662_v62 = vpop.f32.mrf.mxu0  ;;  %v5541_v18 = vadd.f32 %v4813_v45, %v1157_v6  ;;  %v1285_v45 = vld [vmem:[#allocation2 + $0xf80] sm:$0xff] }
 0x576   : > { %6178 = vst.msk [vmem:[#allocation2 + $0xf60] sm:$0xff] %vm276_vm3, %v5665_v61 }
 0x577   : > { %5795 = vst.msk [vmem:[#allocation2 + $0x368] sm:$0xff] %vm276_vm3, %v5282_v36  ;;  %v14694_v15 = vpop.f32.mrf.mxu3 }
 0x578   : > { %5923 = vst.msk [vmem:[#allocation2 + $0x768] sm:$0xff] %vm276_vm3, %v5410_v12 }
 0x579   : > { %v6692_v44 = vld [vmem:[#allocation2 + $0xf58] sm:$0xff]  ;;  %6051 = vst.msk [vmem:[#allocation2 + $0xb68] sm:$0xff] %vm276_vm3, %v5538_v33 }
 0x57a   : > { %v7208_v16 = vadd.f32 %v14342_v43, %v6692_v44  ;;  %v6309_v0 = vld [vmem:[#allocation2 + $0x360] sm:$0xff]  ;;  %6179 = vst.msk [vmem:[#allocation2 + $0xf68] sm:$0xff] %vm276_vm3, %v5666_v24  ;;  %v14716_v8 = vpop.f32.mrf.mxu2 }
 0x57b   : > { %v6825_v20 = vadd.f32 %v14342_v43, %v6309_v0  ;;  %v6437_v50 = vld [vmem:[#allocation2 + $0x760] sm:$0xff]  ;;  %5796 = vst.msk [vmem:[#allocation2 + $0x370] sm:$0xff] %vm276_vm3, %v5283_v60  ;;  %v14724_v57 = vpop.f32.mrf.mxu1 }
 0x57c   : > { %7720 = vst.msk [vmem:[%s10192_s12 + $0xf58] sm:$0xff] %vm276_vm3, %v7208_v16  ;;  %v6953_v63 = vadd.f32 %v14342_v43, %v6437_v50  ;;  %v6565_v58 = vld [vmem:[#allocation2 + $0xb60] sm:$0xff] }
 0x57d   : > { %7337 = vst.msk [vmem:[%s10192_s12 + $0x360] sm:$0xff] %vm276_vm3, %v6825_v20  ;;  %v7081_v49 = vadd.f32 %v14342_v43, %v6565_v58  ;;  %v6693_v35 = vld [vmem:[#allocation2 + $0xf60] sm:$0xff]  ;;  %v14696_v47 = vpop.f32.mrf.mxu0 }
 0x57e   : > { %7465 = vst.msk [vmem:[%s10192_s12 + $0x760] sm:$0xff] %vm276_vm3, %v6953_v63  ;;  %v7209_v5 = vadd.f32 %v14342_v43, %v6693_v35  ;;  %v6310_v28 = vld [vmem:[#allocation2 + $0x368] sm:$0xff] }
 0x57f   : > { %7593 = vst.msk [vmem:[%s10192_s12 + $0xb60] sm:$0xff] %vm276_vm3, %v7081_v49  ;;  %v6826_v25 = vadd.f32 %v14342_v43, %v6310_v28  ;;  %v6438_v22 = vld [vmem:[#allocation2 + $0x768] sm:$0xff]  ;;  %v14719_v23 = vpop.f32.mrf.mxu3 }
 0x580   : > { %7721 = vst.msk [vmem:[%s10192_s12 + $0xf60] sm:$0xff] %vm276_vm3, %v7209_v5  ;;  %v6954_v10 = vadd.f32 %v14342_v43, %v6438_v22  ;;  %v6566_v54 = vld [vmem:[#allocation2 + $0xb68] sm:$0xff] }
 0x581   : > { %7338 = vst.msk [vmem:[%s10192_s12 + $0x368] sm:$0xff] %vm276_vm3, %v6826_v25  ;;  %v7082_v9 = vadd.f32 %v14342_v43, %v6566_v54  ;;  %v6694_v59 = vld [vmem:[#allocation2 + $0xf68] sm:$0xff] }
 0x582   : > { %7466 = vst.msk [vmem:[%s10192_s12 + $0x768] sm:$0xff] %vm276_vm3, %v6954_v10  ;;  %v7210_v14 = vadd.f32 %v14342_v43, %v6694_v59  ;;  %v6311_v1 = vld [vmem:[#allocation2 + $0x370] sm:$0xff]  ;;  %v14740_v44 = vpop.f32.mrf.mxu2  ;;  %v902_v49 = vld [vmem:[#allocation2 + $0x388] sm:$0xff]  ;;  %v5669_v10 = vadd.f32 %v14660_v3, %v1285_v45  ;;  %v905_v45 = vld [vmem:[#allocation2 + $0x3a0] sm:$0xff] }
 0x583   : > { %7594 = vst.msk [vmem:[%s10192_s12 + $0xb68] sm:$0xff] %vm276_vm3, %v7082_v9  ;;  %v6827_v51 = vadd.f32 %v14342_v43, %v6311_v1  ;;  %v14752_v35 = vpop.f32.mrf.mxu1  ;;  %v1030_v25 = vld [vmem:[#allocation2 + $0x788] sm:$0xff]  ;;  %v5286_v9 = vadd.f32 %v14662_v62, %v902_v49 }
 0x584   : > { %7722 = vst.msk [vmem:[%s10192_s12 + $0xf68] sm:$0xff] %vm276_vm3, %v7210_v14  ;;  %v1158_v54 = vld [vmem:[#allocation2 + $0xb88] sm:$0xff]  ;;  %v5414_v41 = vadd.f32 %v14667_v55, %v1030_v25  ;;  %v903_v14 = vld [vmem:[#allocation2 + $0x390] sm:$0xff]  ;;  %v1161_v25 = vld [vmem:[#allocation2 + $0xba0] sm:$0xff] }
 0x585   : > { %7339 = vst.msk [vmem:[%s10192_s12 + $0x370] sm:$0xff] %vm276_vm3, %v6827_v51  ;;  %v14721_v61 = vpop.f32.mrf.mxu0  ;;  %v1286_v59 = vld [vmem:[#allocation2 + $0xf88] sm:$0xff]  ;;  %v5542_v1 = vadd.f32 %v14688_v30, %v1158_v54  ;;  %v5287_v62 = vadd.f32 %v14696_v47, %v903_v14 }
 0x586   : > { %5924 = vst.msk [vmem:[#allocation2 + $0x770] sm:$0xff] %vm276_vm3, %v5411_v32  ;;  %v1031_v32 = vld [vmem:[#allocation2 + $0x790] sm:$0xff]  ;;  %v5670_v3 = vadd.f32 %v14694_v15, %v1286_v59  ;;  %v5543_v15 = vadd.f32 %v14716_v8, %v1159_v31 }
 0x587   : > { %6052 = vst.msk [vmem:[#allocation2 + $0xb70] sm:$0xff] %vm276_vm3, %v5539_v7  ;;  %v14745_v20 = vpop.f32.mrf.mxu3  ;;  %v1287_v7 = vld [vmem:[#allocation2 + $0xf90] sm:$0xff]  ;;  %v5415_v30 = vadd.f32 %v14701_v27, %v1031_v32  ;;  %v14861_v32 = vld [vmem:[%s15225_s2] ss:$0 sm:$0xff] }
 0x588   : > { %6180 = vst.msk [vmem:[#allocation2 + $0xf70] sm:$0xff] %vm276_vm3, %v5667_v42  ;;  %v904_v42 = vld [vmem:[#allocation2 + $0x398] sm:$0xff]  ;;  %v5671_v47 = vadd.f32 %v14719_v23, %v1287_v7 }
 0x589   : > { %5797 = vst.msk [vmem:[#allocation2 + $0x378] sm:$0xff] %vm276_vm3, %v5284_v52  ;;  %v5288_v52 = vadd.f32 %v14721_v61, %v904_v42 }
 0x58a   : > { %5925 = vst.msk [vmem:[#allocation2 + $0x778] sm:$0xff] %vm276_vm3, %v5412_v39  ;;  %v14773_v51 = vpop.f32.mrf.mxu2 }
 0x58b   : > { %6053 = vst.msk [vmem:[#allocation2 + $0xb78] sm:$0xff] %vm276_vm3, %v5540_v38  ;;  %v14783_v56 = vpop.f32.mrf.mxu1 }
 0x58c   : > { %6181 = vst.msk [vmem:[#allocation2 + $0xf78] sm:$0xff] %vm276_vm3, %v5668_v53 }
 0x58d   : > { %v6439_v26 = vld [vmem:[#allocation2 + $0x770] sm:$0xff]  ;;  %5798 = vst.msk [vmem:[#allocation2 + $0x380] sm:$0xff] %vm276_vm3, %v5285_v11  ;;  %v14747_v50 = vpop.f32.mrf.mxu0 }
 0x58e   : > { %v6955_v36 = vadd.f32 %v14342_v43, %v6439_v26  ;;  %v6567_v29 = vld [vmem:[#allocation2 + $0xb70] sm:$0xff]  ;;  %5926 = vst.msk [vmem:[#allocation2 + $0x780] sm:$0xff] %vm276_vm3, %v5413_v13 }
 0x58f   : > { %v7083_v4 = vadd.f32 %v14342_v43, %v6567_v29  ;;  %v6695_v17 = vld [vmem:[#allocation2 + $0xf70] sm:$0xff]  ;;  %6054 = vst.msk [vmem:[#allocation2 + $0xb80] sm:$0xff] %vm276_vm3, %v5541_v18  ;;  %v14777_v19 = vpop.f32.mrf.mxu3 }
 0x590   : > { %7467 = vst.msk [vmem:[%s10192_s12 + $0x770] sm:$0xff] %vm276_vm3, %v6955_v36  ;;  %v7211_v12 = vadd.f32 %v14342_v43, %v6695_v17  ;;  %v6312_v46 = vld [vmem:[#allocation2 + $0x378] sm:$0xff] }
 0x591   : > { %7595 = vst.msk [vmem:[%s10192_s12 + $0xb70] sm:$0xff] %vm276_vm3, %v7083_v4  ;;  %v6828_v37 = vadd.f32 %v14342_v43, %v6312_v46  ;;  %v6440_v33 = vld [vmem:[#allocation2 + $0x778] sm:$0xff] }
 0x592   : > { %7723 = vst.msk [vmem:[%s10192_s12 + $0xf70] sm:$0xff] %vm276_vm3, %v7211_v12  ;;  %v6956_v24 = vadd.f32 %v14342_v43, %v6440_v33  ;;  %v6568_v60 = vld [vmem:[#allocation2 + $0xb78] sm:$0xff]  ;;  %v4825_v21 = vpop.f32.mrf.mxu2 }
 0x593   : > { %7340 = vst.msk [vmem:[%s10192_s12 + $0x378] sm:$0xff] %vm276_vm3, %v6828_v37  ;;  %v7084_v16 = vadd.f32 %v14342_v43, %v6568_v60  ;;  %v6696_v0 = vld [vmem:[#allocation2 + $0xf78] sm:$0xff]  ;;  %v14807_v23 = vpop.f32.mrf.mxu1 }
 0x594   : > { %7468 = vst.msk [vmem:[%s10192_s12 + $0x778] sm:$0xff] %vm276_vm3, %v6956_v24  ;;  %v7212_v63 = vadd.f32 %v14342_v43, %v6696_v0  ;;  %v6313_v58 = vld [vmem:[#allocation2 + $0x380] sm:$0xff]  ;;  %v1032_v4 = vld [vmem:[#allocation2 + $0x798] sm:$0xff] }
 0x595   : > { %7596 = vst.msk [vmem:[%s10192_s12 + $0xb78] sm:$0xff] %vm276_vm3, %v7084_v16  ;;  %v6829_v5 = vadd.f32 %v14342_v43, %v6313_v58  ;;  %v6441_v28 = vld [vmem:[#allocation2 + $0x780] sm:$0xff]  ;;  %v14779_v55 = vpop.f32.mrf.mxu0  ;;  %v1160_v46 = vld [vmem:[#allocation2 + $0xb98] sm:$0xff]  ;;  %v5416_v0 = vadd.f32 %v14724_v57, %v1032_v4 }
 0x596   : > { %7724 = vst.msk [vmem:[%s10192_s12 + $0xf78] sm:$0xff] %vm276_vm3, %v7212_v63  ;;  %v6957_v22 = vadd.f32 %v14342_v43, %v6441_v28  ;;  %v6569_v2 = vld [vmem:[#allocation2 + $0xb80] sm:$0xff]  ;;  %v1288_v24 = vld [vmem:[#allocation2 + $0xf98] sm:$0xff]  ;;  %v5544_v49 = vadd.f32 %v14740_v44, %v1160_v46  ;;  %v5545_v44 = vadd.f32 %v14773_v51, %v1161_v25 }
 0x597   : > { %7341 = vst.msk [vmem:[%s10192_s12 + $0x380] sm:$0xff] %vm276_vm3, %v6829_v5  ;;  %v7085_v48 = vadd.f32 %v14342_v43, %v6569_v2  ;;  %v14797_v53 = vpop.f32.mrf.mxu3  ;;  %v1033_v5 = vld [vmem:[#allocation2 + $0x7a0] sm:$0xff]  ;;  %v5672_v28 = vadd.f32 %v14745_v20, %v1288_v24  ;;  %v1034_v20 = vld [vmem:[#allocation2 + $0x7a8] sm:$0xff]  ;;  %v1036_v24 = vld [vmem:[#allocation2 + $0x7b8] sm:$0xff] }
 0x598   : > { %7469 = vst.msk [vmem:[%s10192_s12 + $0x780] sm:$0xff] %vm276_vm3, %v6957_v22  ;;  %v5289_v22 = vadd.f32 %v14747_v50, %v905_v45  ;;  %v1289_v57 = vld [vmem:[#allocation2 + $0xfa0] sm:$0xff]  ;;  %v1292_v45 = vld [vmem:[#allocation2 + $0xfb8] sm:$0xff] }
 0x599   : > { %7597 = vst.msk [vmem:[%s10192_s12 + $0xb80] sm:$0xff] %vm276_vm3, %v7085_v48  ;;  %v5673_v50 = vadd.f32 %v14777_v19, %v1289_v57 }
 0x59a   : > { %6182 = vst.msk [vmem:[#allocation2 + $0xf80] sm:$0xff] %vm276_vm3, %v5669_v10  ;;  %v14825_v63 = vpop.f32.mrf.mxu2  ;;  %v5417_v10 = vadd.f32 %v14752_v35, %v1033_v5  ;;  %v5418_v35 = vadd.f32 %v14783_v56, %v1034_v20 }
 0x59b   : > { %5799 = vst.msk [vmem:[#allocation2 + $0x388] sm:$0xff] %vm276_vm3, %v5286_v9  ;;  %v14845_v48 = vpop.f32.mrf.mxu1  ;;  %v1162_v9 = vld [vmem:[#allocation2 + $0xba8] sm:$0xff] }
 0x59c   : > { %5927 = vst.msk [vmem:[#allocation2 + $0x788] sm:$0xff] %vm276_vm3, %v5414_v41  ;;  %v5546_v14 = vadd.f32 %v4825_v21, %v1162_v9  ;;  %v1290_v21 = vld [vmem:[#allocation2 + $0xfa8] sm:$0xff] }
 0x59d   : > { %6055 = vst.msk [vmem:[#allocation2 + $0xb88] sm:$0xff] %vm276_vm3, %v5542_v1  ;;  %v14802_v13 = vpop.f32.mrf.mxu0 }
 0x59e   : > { %6183 = vst.msk [vmem:[#allocation2 + $0xf88] sm:$0xff] %vm276_vm3, %v5670_v3 }
 0x59f   : > { %5800 = vst.msk [vmem:[#allocation2 + $0x390] sm:$0xff] %vm276_vm3, %v5287_v62  ;;  %v14837_v2 = vpop.f32.mrf.mxu3 }
 0x5a0   : > { %5928 = vst.msk [vmem:[#allocation2 + $0x790] sm:$0xff] %vm276_vm3, %v5415_v30 }
 0x5a1   : > { %v6697_v27 = vld [vmem:[#allocation2 + $0xf80] sm:$0xff]  ;;  %6056 = vst.msk [vmem:[#allocation2 + $0xb90] sm:$0xff] %vm276_vm3, %v5543_v15 }
 0x5a2   : > { %v7213_v34 = vadd.f32 %v14342_v43, %v6697_v27  ;;  %v6314_v39 = vld [vmem:[#allocation2 + $0x388] sm:$0xff]  ;;  %6184 = vst.msk [vmem:[#allocation2 + $0xf90] sm:$0xff] %vm276_vm3, %v5671_v47  ;;  %v14853_v41 = vpop.f32.mrf.mxu2 }
 0x5a3   : > { %v6830_v38 = vadd.f32 %v14342_v43, %v6314_v39  ;;  %v6442_v40 = vld [vmem:[#allocation2 + $0x788] sm:$0xff]  ;;  %5801 = vst.msk [vmem:[#allocation2 + $0x398] sm:$0xff] %vm276_vm3, %v5288_v52  ;;  %v14873_v15 = vpop.f32.mrf.mxu1 }
 0x5a4   : > { %7725 = vst.msk [vmem:[%s10192_s12 + $0xf80] sm:$0xff] %vm276_vm3, %v7213_v34  ;;  %v6958_v6 = vadd.f32 %v14342_v43, %v6442_v40  ;;  %v6570_v11 = vld [vmem:[#allocation2 + $0xb88] sm:$0xff] }
 0x5a5   : > { %7342 = vst.msk [vmem:[%s10192_s12 + $0x388] sm:$0xff] %vm276_vm3, %v6830_v38  ;;  %v7086_v8 = vadd.f32 %v14342_v43, %v6570_v11  ;;  %v6698_v18 = vld [vmem:[#allocation2 + $0xf88] sm:$0xff]  ;;  %v14841_v54 = vpop.f32.mrf.mxu0 }
 0x5a6   : > { %7470 = vst.msk [vmem:[%s10192_s12 + $0x788] sm:$0xff] %vm276_vm3, %v6958_v6  ;;  %v7214_v61 = vadd.f32 %v14342_v43, %v6698_v18  ;;  %v6315_v26 = vld [vmem:[#allocation2 + $0x390] sm:$0xff] }
 0x5a7   : > { %7598 = vst.msk [vmem:[%s10192_s12 + $0xb88] sm:$0xff] %vm276_vm3, %v7086_v8  ;;  %v6831_v36 = vadd.f32 %v14342_v43, %v6315_v26  ;;  %v6443_v29 = vld [vmem:[#allocation2 + $0x790] sm:$0xff]  ;;  %v5150_v7 = vpop.f32.mrf.mxu3 }
 0x5a8   : > { %7726 = vst.msk [vmem:[%s10192_s12 + $0xf88] sm:$0xff] %vm276_vm3, %v7214_v61  ;;  %v6959_v17 = vadd.f32 %v14342_v43, %v6443_v29  ;;  %v6571_v12 = vld [vmem:[#allocation2 + $0xb90] sm:$0xff] }
 0x5a9   : > { %7343 = vst.msk [vmem:[%s10192_s12 + $0x390] sm:$0xff] %vm276_vm3, %v6831_v36  ;;  %v7087_v37 = vadd.f32 %v14342_v43, %v6571_v12  ;;  %v6699_v33 = vld [vmem:[#allocation2 + $0xf90] sm:$0xff]  ;;  %v5674_v36 = vadd.f32 %v14797_v53, %v1290_v21  ;;  %v1038_v21 = vld [vmem:[#allocation2 + $0x7c8] sm:$0xff] }
 0x5aa   : > { %7471 = vst.msk [vmem:[%s10192_s12 + $0x790] sm:$0xff] %vm276_vm3, %v6959_v17  ;;  %v7215_v60 = vadd.f32 %v14342_v43, %v6699_v33  ;;  %v6316_v16 = vld [vmem:[#allocation2 + $0x398] sm:$0xff]  ;;  %v14878_v27 = vpop.f32.mrf.mxu2  ;;  %v907_v6 = vld [vmem:[#allocation2 + $0x3b0] sm:$0xff] }
 0x5ab   : > { %7599 = vst.msk [vmem:[%s10192_s12 + $0xb90] sm:$0xff] %vm276_vm3, %v7087_v37  ;;  %v6832_v58 = vadd.f32 %v14342_v43, %v6316_v16  ;;  %v906_v43 = vld [vmem:[#allocation2 + $0x3a8] sm:$0xff]  ;;  %v1035_v18 = vld [vmem:[#allocation2 + $0x7b0] sm:$0xff]  ;;  %v5291_v17 = vadd.f32 %v14802_v13, %v907_v6  ;;  %v908_v37 = vld [vmem:[#allocation2 + $0x3b8] sm:$0xff] }
 0x5ac   : > { %7727 = vst.msk [vmem:[%s10192_s12 + $0xf90] sm:$0xff] %vm276_vm3, %v7215_v60  ;;  %v5290_v59 = vadd.f32 %v14779_v55, %v906_v43  ;;  %v1163_v29 = vld [vmem:[#allocation2 + $0xbb0] sm:$0xff]  ;;  %v5419_v46 = vadd.f32 %v14807_v23, %v1035_v18  ;;  %v1164_v16 = vld [vmem:[#allocation2 + $0xbb8] sm:$0xff]  ;;  %v5292_v13 = vadd.f32 %v14841_v54, %v908_v37  ;;  %v4515_v23 = vpop.f32.mrf.mxu1 }
 0x5ad   : > { %7344 = vst.msk [vmem:[%s10192_s12 + $0x398] sm:$0xff] %vm276_vm3, %v6832_v58  ;;  %v4193_v30 = vpop.f32.mrf.mxu0  ;;  %v1291_v12 = vld [vmem:[#allocation2 + $0xfb0] sm:$0xff]  ;;  %v5547_v33 = vadd.f32 %v14825_v63, %v1163_v29  ;;  %v5420_v58 = vadd.f32 %v14845_v48, %v1036_v24  ;;  %v909_v63 = vld [vmem:[#allocation2 + $0x3c0] sm:$0xff]  ;;  %v5548_v5 = vadd.f32 %v14853_v41, %v1164_v16 }
 0x5ae   : > { %5929 = vst.msk [vmem:[#allocation2 + $0x798] sm:$0xff] %vm276_vm3, %v5416_v0  ;;  %v5675_v53 = vadd.f32 %v14837_v2, %v1291_v12  ;;  %v5293_v25 = vadd.f32 %v4193_v30, %v909_v63  ;;  %v1293_v30 = vld [vmem:[#allocation2 + $0xfc0] sm:$0xff]  ;;  %v911_v18 = vld [vmem:[#allocation2 + $0x3d0] sm:$0xff] }
 0x5af   : > { %6057 = vst.msk [vmem:[#allocation2 + $0xb98] sm:$0xff] %vm276_vm3, %v5544_v49  ;;  %v14903_v60 = vpop.f32.mrf.mxu3 }
 0x5b0   : > { %6185 = vst.msk [vmem:[#allocation2 + $0xf98] sm:$0xff] %vm276_vm3, %v5672_v28  ;;  %v5676_v28 = vadd.f32 %v5150_v7, %v1292_v45  ;;  %v1165_v7 = vld [vmem:[#allocation2 + $0xbc0] sm:$0xff] }
 0x5b1   : > { %5802 = vst.msk [vmem:[#allocation2 + $0x3a0] sm:$0xff] %vm276_vm3, %v5289_v22 }
 0x5b2   : > { %5930 = vst.msk [vmem:[#allocation2 + $0x7a0] sm:$0xff] %vm276_vm3, %v5417_v10  ;;  %v4835_v49 = vpop.f32.mrf.mxu2 }
 0x5b3   : > { %6058 = vst.msk [vmem:[#allocation2 + $0xba0] sm:$0xff] %vm276_vm3, %v5545_v44 }
 0x5b4   : > { %6186 = vst.msk [vmem:[#allocation2 + $0xfa0] sm:$0xff] %vm276_vm3, %v5673_v50 }
 0x5b5   : > { %v6444_v1 = vld [vmem:[#allocation2 + $0x798] sm:$0xff]  ;;  %5803 = vst.msk [vmem:[#allocation2 + $0x3a8] sm:$0xff] %vm276_vm3, %v5290_v59  ;;  %v4195_v0 = vpop.f32.mrf.mxu0  ;;  %v4518_v59 = vpop.f32.mrf.mxu1 }
 0x5b6   : > { %v6960_v3 = vadd.f32 %v14861_v32, %v6444_v1  ;;  %v6572_v31 = vld [vmem:[#allocation2 + $0xb98] sm:$0xff]  ;;  %5931 = vst.msk [vmem:[#allocation2 + $0x7a8] sm:$0xff] %vm276_vm3, %v5418_v35 }
 0x5b7   : > { %v7088_v51 = vadd.f32 %v14861_v32, %v6572_v31  ;;  %v6700_v62 = vld [vmem:[#allocation2 + $0xf98] sm:$0xff]  ;;  %6059 = vst.msk [vmem:[#allocation2 + $0xba8] sm:$0xff] %vm276_vm3, %v5546_v14  ;;  %v5155_v54 = vpop.f32.mrf.mxu3  ;;  %v1037_v31 = vld [vmem:[#allocation2 + $0x7c0] sm:$0xff] }
 0x5b8   : > { %7472 = vst.msk [vmem:[%s10192_s12 + $0x798] sm:$0xff] %vm276_vm3, %v6960_v3  ;;  %v7216_v19 = vadd.f32 %v14861_v32, %v6700_v62  ;;  %v6317_v55 = vld [vmem:[#allocation2 + $0x3a0] sm:$0xff] }
 0x5b9   : > { %7600 = vst.msk [vmem:[%s10192_s12 + $0xb98] sm:$0xff] %vm276_vm3, %v7088_v51  ;;  %v6833_v42 = vadd.f32 %v14861_v32, %v6317_v55  ;;  %v6445_v56 = vld [vmem:[#allocation2 + $0x7a0] sm:$0xff] }
 0x5ba   : > { %7728 = vst.msk [vmem:[%s10192_s12 + $0xf98] sm:$0xff] %vm276_vm3, %v7216_v19  ;;  %v6961_v47 = vadd.f32 %v14861_v32, %v6445_v56  ;;  %v6573_v52 = vld [vmem:[#allocation2 + $0xba0] sm:$0xff]  ;;  %v4838_v14 = vpop.f32.mrf.mxu2 }
 0x5bb   : > { %7345 = vst.msk [vmem:[%s10192_s12 + $0x3a0] sm:$0xff] %vm276_vm3, %v6833_v42  ;;  %v7089_v34 = vadd.f32 %v14861_v32, %v6573_v52  ;;  %v6701_v39 = vld [vmem:[#allocation2 + $0xfa0] sm:$0xff]  ;;  %v910_v52 = vld [vmem:[#allocation2 + $0x3c8] sm:$0xff] }
 0x5bc   : > { %7473 = vst.msk [vmem:[%s10192_s12 + $0x7a0] sm:$0xff] %vm276_vm3, %v6961_v47  ;;  %v7217_v38 = vadd.f32 %v14861_v32, %v6701_v39  ;;  %v6318_v40 = vld [vmem:[#allocation2 + $0x3a8] sm:$0xff]  ;;  %v5421_v47 = vadd.f32 %v14873_v15, %v1037_v31  ;;  %v5549_v39 = vadd.f32 %v14878_v27, %v1165_v7  ;;  %v5294_v6 = vadd.f32 %v4195_v0, %v910_v52  ;;  %v1039_v27 = vld [vmem:[#allocation2 + $0x7d0] sm:$0xff]  ;;  %v913_v31 = vld [vmem:[#allocation2 + $0x3e0] sm:$0xff] }
 0x5bd   : > { %7601 = vst.msk [vmem:[%s10192_s12 + $0xba0] sm:$0xff] %vm276_vm3, %v7089_v34  ;;  %v6834_v11 = vadd.f32 %v14861_v32, %v6318_v40  ;;  %v6446_v8 = vld [vmem:[#allocation2 + $0x7a8] sm:$0xff]  ;;  %v4198_v48 = vpop.f32.mrf.mxu0  ;;  %v5422_v15 = vadd.f32 %v4515_v23, %v1038_v21 }
 0x5be   : > { %7729 = vst.msk [vmem:[%s10192_s12 + $0xfa0] sm:$0xff] %vm276_vm3, %v7217_v38  ;;  %v6962_v61 = vadd.f32 %v14861_v32, %v6446_v8  ;;  %v6574_v26 = vld [vmem:[#allocation2 + $0xba8] sm:$0xff]  ;;  %v5677_v38 = vadd.f32 %v14903_v60, %v1293_v30  ;;  %v5295_v12 = vadd.f32 %v4198_v48, %v911_v18  ;;  %v1040_v48 = vld [vmem:[#allocation2 + $0x7d8] sm:$0xff] }
 0x5bf   : > { %7346 = vst.msk [vmem:[%s10192_s12 + $0x3a8] sm:$0xff] %vm276_vm3, %v6834_v11  ;;  %v7090_v4 = vadd.f32 %v14861_v32, %v6574_v26  ;;  %v1166_v40 = vld [vmem:[#allocation2 + $0xbc8] sm:$0xff]  ;;  %v5158_v8 = vpop.f32.mrf.mxu3 }
 0x5c0   : > { %7474 = vst.msk [vmem:[%s10192_s12 + $0x7a8] sm:$0xff] %vm276_vm3, %v6962_v61  ;;  %v1294_v11 = vld [vmem:[#allocation2 + $0xfc8] sm:$0xff]  ;;  %v5550_v26 = vadd.f32 %v4835_v49, %v1166_v40 }
 0x5c1   : > { %7602 = vst.msk [vmem:[%s10192_s12 + $0xba8] sm:$0xff] %vm276_vm3, %v7090_v4  ;;  %v5678_v29 = vadd.f32 %v5155_v54, %v1294_v11  ;;  %v1167_v4 = vld [vmem:[#allocation2 + $0xbd0] sm:$0xff]  ;;  %v912_v54 = vld [vmem:[#allocation2 + $0x3d8] sm:$0xff] }
 0x5c2   : > { %6187 = vst.msk [vmem:[#allocation2 + $0xfa8] sm:$0xff] %vm276_vm3, %v5674_v36  ;;  %v4520_v36 = vpop.f32.mrf.mxu1  ;;  %v5551_v37 = vadd.f32 %v4838_v14, %v1167_v4 }
 0x5c3   : > { %5804 = vst.msk [vmem:[#allocation2 + $0x3b0] sm:$0xff] %vm276_vm3, %v5291_v17  ;;  %v4840_v17 = vpop.f32.mrf.mxu2 }
 0x5c4   : > { %5932 = vst.msk [vmem:[#allocation2 + $0x7b0] sm:$0xff] %vm276_vm3, %v5419_v46  ;;  %v5423_v46 = vadd.f32 %v4518_v59, %v1039_v27 }
 0x5c5   : > { %6060 = vst.msk [vmem:[#allocation2 + $0xbb0] sm:$0xff] %vm276_vm3, %v5547_v33  ;;  %v4200_v61 = vpop.f32.mrf.mxu0 }
 0x5c6   : > { %6188 = vst.msk [vmem:[#allocation2 + $0xfb0] sm:$0xff] %vm276_vm3, %v5675_v53  ;;  %v5296_v14 = vadd.f32 %v4200_v61, %v912_v54 }
 0x5c7   : > { %5805 = vst.msk [vmem:[#allocation2 + $0x3b8] sm:$0xff] %vm276_vm3, %v5292_v13  ;;  %v5160_v0 = vpop.f32.mrf.mxu3 }
 0x5c8   : > { %5933 = vst.msk [vmem:[#allocation2 + $0x7b8] sm:$0xff] %vm276_vm3, %v5420_v58 }
 0x5c9   : > { %v6702_v22 = vld [vmem:[#allocation2 + $0xfa8] sm:$0xff]  ;;  %6061 = vst.msk [vmem:[#allocation2 + $0xbb8] sm:$0xff] %vm276_vm3, %v5548_v5 }
 0x5ca   : > { %v7218_v57 = vadd.f32 %v14861_v32, %v6702_v22  ;;  %v6319_v2 = vld [vmem:[#allocation2 + $0x3b0] sm:$0xff]  ;;  %6189 = vst.msk [vmem:[#allocation2 + $0xfb8] sm:$0xff] %vm276_vm3, %v5676_v28  ;;  %v4523_v49 = vpop.f32.mrf.mxu1 }
 0x5cb   : > { %v6835_v10 = vadd.f32 %v14861_v32, %v6319_v2  ;;  %v6447_v43 = vld [vmem:[#allocation2 + $0x7b0] sm:$0xff]  ;;  %5806 = vst.msk [vmem:[#allocation2 + $0x3c0] sm:$0xff] %vm276_vm3, %v5293_v25  ;;  %v4843_v25 = vpop.f32.mrf.mxu2 }
 0x5cc   : > { %7730 = vst.msk [vmem:[%s10192_s12 + $0xfa8] sm:$0xff] %vm276_vm3, %v7218_v57  ;;  %v6963_v44 = vadd.f32 %v14861_v32, %v6447_v43  ;;  %v6575_v20 = vld [vmem:[#allocation2 + $0xbb0] sm:$0xff] }
 0x5cd   : > { %7347 = vst.msk [vmem:[%s10192_s12 + $0x3b0] sm:$0xff] %vm276_vm3, %v6835_v10  ;;  %v7091_v50 = vadd.f32 %v14861_v32, %v6575_v20  ;;  %v6703_v9 = vld [vmem:[#allocation2 + $0xfb0] sm:$0xff]  ;;  %v4203_v23 = vpop.f32.mrf.mxu0 }
 0x5ce   : > { %7475 = vst.msk [vmem:[%s10192_s12 + $0x7b0] sm:$0xff] %vm276_vm3, %v6963_v44  ;;  %v7219_v35 = vadd.f32 %v14861_v32, %v6703_v9  ;;  %v6320_v41 = vld [vmem:[#allocation2 + $0x3b8] sm:$0xff]  ;;  %v1295_v2 = vld [vmem:[#allocation2 + $0xfd0] sm:$0xff] }
 0x5cf   : > { %7603 = vst.msk [vmem:[%s10192_s12 + $0xbb0] sm:$0xff] %vm276_vm3, %v7091_v50  ;;  %v6836_v1 = vadd.f32 %v14861_v32, %v6320_v41  ;;  %v6448_v3 = vld [vmem:[#allocation2 + $0x7b8] sm:$0xff]  ;;  %v5679_v59 = vadd.f32 %v5158_v8, %v1295_v2  ;;  %v5163_v7 = vpop.f32.mrf.mxu3  ;;  %v1171_v2 = vld [vmem:[#allocation2 + $0xbf0] sm:$0xff] }
 0x5d0   : > { %7731 = vst.msk [vmem:[%s10192_s12 + $0xfb0] sm:$0xff] %vm276_vm3, %v7219_v35  ;;  %v6964_v51 = vadd.f32 %v14861_v32, %v6448_v3  ;;  %v6576_v62 = vld [vmem:[#allocation2 + $0xbb8] sm:$0xff]  ;;  %v5424_v3 = vadd.f32 %v4520_v36, %v1040_v48 }
 0x5d1   : > { %7348 = vst.msk [vmem:[%s10192_s12 + $0x3b8] sm:$0xff] %vm276_vm3, %v6836_v1  ;;  %v7092_v19 = vadd.f32 %v14861_v32, %v6576_v62  ;;  %v6704_v55 = vld [vmem:[#allocation2 + $0xfb8] sm:$0xff]  ;;  %v1041_v62 = vld [vmem:[#allocation2 + $0x7e0] sm:$0xff] }
 0x5d2   : > { %7476 = vst.msk [vmem:[%s10192_s12 + $0x7b8] sm:$0xff] %vm276_vm3, %v6964_v51  ;;  %v7220_v42 = vadd.f32 %v14861_v32, %v6704_v55  ;;  %v6321_v56 = vld [vmem:[#allocation2 + $0x3c0] sm:$0xff]  ;;  %v1168_v35 = vld [vmem:[#allocation2 + $0xbd8] sm:$0xff]  ;;  %v5425_v52 = vadd.f32 %v4523_v49, %v1041_v62 }
 0x5d3   : > { %7604 = vst.msk [vmem:[%s10192_s12 + $0xbb8] sm:$0xff] %vm276_vm3, %v7092_v19  ;;  %v6837_v34 = vadd.f32 %v14861_v32, %v6321_v56  ;;  %v1296_v1 = vld [vmem:[#allocation2 + $0xfd8] sm:$0xff]  ;;  %v5552_v51 = vadd.f32 %v4840_v17, %v1168_v35  ;;  %v1169_v55 = vld [vmem:[#allocation2 + $0xbe0] sm:$0xff] }
 0x5d4   : > { %7732 = vst.msk [vmem:[%s10192_s12 + $0xfb8] sm:$0xff] %vm276_vm3, %v7220_v42  ;;  %v5680_v19 = vadd.f32 %v5160_v0, %v1296_v1  ;;  %v5297_v42 = vadd.f32 %v4203_v23, %v913_v31  ;;  %v1297_v56 = vld [vmem:[#allocation2 + $0xfe0] sm:$0xff]  ;;  %v5553_v21 = vadd.f32 %v4843_v25, %v1169_v55  ;;  %v1170_v0 = vld [vmem:[#allocation2 + $0xbe8] sm:$0xff] }
 0x5d5   : > { %7349 = vst.msk [vmem:[%s10192_s12 + $0x3c0] sm:$0xff] %vm276_vm3, %v6837_v34  ;;  %v4205_v30 = vpop.f32.mrf.mxu0  ;;  %v914_v34 = vld [vmem:[#allocation2 + $0x3e8] sm:$0xff] }
 0x5d6   : > { %5934 = vst.msk [vmem:[#allocation2 + $0x7c0] sm:$0xff] %vm276_vm3, %v5421_v47  ;;  %v4525_v47 = vpop.f32.mrf.mxu1  ;;  %v5298_v40 = vadd.f32 %v4205_v30, %v914_v34  ;;  %v1298_v23 = vld [vmem:[#allocation2 + $0xfe8] sm:$0xff] }
 0x5d7   : > { %6062 = vst.msk [vmem:[#allocation2 + $0xbc0] sm:$0xff] %vm276_vm3, %v5549_v39  ;;  %v4845_v39 = vpop.f32.mrf.mxu2  ;;  %v5165_v61 = vpop.f32.mrf.mxu3 }
 0x5d8   : > { %6190 = vst.msk [vmem:[#allocation2 + $0xfc0] sm:$0xff] %vm276_vm3, %v5677_v38  ;;  %v5681_v38 = vadd.f32 %v5163_v7, %v1297_v56  ;;  %v5554_v25 = vadd.f32 %v4845_v39, %v1170_v0 }
 0x5d9   : > { %5807 = vst.msk [vmem:[#allocation2 + $0x3c8] sm:$0xff] %vm276_vm3, %v5294_v6 }
 0x5da   : > { %5935 = vst.msk [vmem:[#allocation2 + $0x7c8] sm:$0xff] %vm276_vm3, %v5422_v15 }
 0x5db   : > { %6063 = vst.msk [vmem:[#allocation2 + $0xbc8] sm:$0xff] %vm276_vm3, %v5550_v26 }
 0x5dc   : > { %6191 = vst.msk [vmem:[#allocation2 + $0xfc8] sm:$0xff] %vm276_vm3, %v5678_v29 }
 0x5dd   : > { %v6449_v33 = vld [vmem:[#allocation2 + $0x7c0] sm:$0xff]  ;;  %5808 = vst.msk [vmem:[#allocation2 + $0x3d0] sm:$0xff] %vm276_vm3, %v5295_v12  ;;  %v4208_v36 = vpop.f32.mrf.mxu0 }
 0x5de   : > { %v6965_v24 = vadd.f32 %v14861_v32, %v6449_v33  ;;  %v6577_v60 = vld [vmem:[#allocation2 + $0xbc0] sm:$0xff]  ;;  %5936 = vst.msk [vmem:[#allocation2 + $0x7d0] sm:$0xff] %vm276_vm3, %v5423_v46  ;;  %v4528_v17 = vpop.f32.mrf.mxu1 }
 0x5df   : > { %v7093_v53 = vadd.f32 %v14861_v32, %v6577_v60  ;;  %v6705_v16 = vld [vmem:[#allocation2 + $0xfc0] sm:$0xff]  ;;  %6064 = vst.msk [vmem:[#allocation2 + $0xbd0] sm:$0xff] %vm276_vm3, %v5551_v37  ;;  %v4848_v37 = vpop.f32.mrf.mxu2  ;;  %v1042_v60 = vld [vmem:[#allocation2 + $0x7e8] sm:$0xff]  ;;  %v5168_v54 = vpop.f32.mrf.mxu3 }
 0x5e0   : > { %7477 = vst.msk [vmem:[%s10192_s12 + $0x7c0] sm:$0xff] %vm276_vm3, %v6965_v24  ;;  %v7221_v13 = vadd.f32 %v14861_v32, %v6705_v16  ;;  %v6322_v45 = vld [vmem:[#allocation2 + $0x3c8] sm:$0xff]  ;;  %v5426_v49 = vadd.f32 %v4525_v47, %v1042_v60 }
 0x5e1   : > { %7605 = vst.msk [vmem:[%s10192_s12 + $0xbc0] sm:$0xff] %vm276_vm3, %v7093_v53  ;;  %v6838_v58 = vadd.f32 %v14861_v32, %v6322_v45  ;;  %v6450_v63 = vld [vmem:[#allocation2 + $0x7c8] sm:$0xff] }
 0x5e2   : > { %7733 = vst.msk [vmem:[%s10192_s12 + $0xfc0] sm:$0xff] %vm276_vm3, %v7221_v13  ;;  %v6966_v5 = vadd.f32 %v14861_v32, %v6450_v63  ;;  %v6578_v28 = vld [vmem:[#allocation2 + $0xbc8] sm:$0xff] }
 0x5e3   : > { %7350 = vst.msk [vmem:[%s10192_s12 + $0x3c8] sm:$0xff] %vm276_vm3, %v6838_v58  ;;  %v7094_v22 = vadd.f32 %v14861_v32, %v6578_v28  ;;  %v6706_v57 = vld [vmem:[#allocation2 + $0xfc8] sm:$0xff] }
 0x5e4   : > { %7478 = vst.msk [vmem:[%s10192_s12 + $0x7c8] sm:$0xff] %vm276_vm3, %v6966_v5  ;;  %v7222_v10 = vadd.f32 %v14861_v32, %v6706_v57  ;;  %v6323_v43 = vld [vmem:[#allocation2 + $0x3d0] sm:$0xff]  ;;  %v5682_v57 = vadd.f32 %v5165_v61, %v1298_v23 }
 0x5e5   : > { %7606 = vst.msk [vmem:[%s10192_s12 + $0xbc8] sm:$0xff] %vm276_vm3, %v7094_v22  ;;  %v6839_v44 = vadd.f32 %v14861_v32, %v6323_v43  ;;  %v6451_v20 = vld [vmem:[#allocation2 + $0x7d0] sm:$0xff]  ;;  %v4210_v48 = vpop.f32.mrf.mxu0 }
 0x5e6   : > { %7734 = vst.msk [vmem:[%s10192_s12 + $0xfc8] sm:$0xff] %vm276_vm3, %v7222_v10  ;;  %v6967_v50 = vadd.f32 %v14861_v32, %v6451_v20  ;;  %v6579_v9 = vld [vmem:[#allocation2 + $0xbd0] sm:$0xff]  ;;  %v916_v20 = vld [vmem:[#allocation2 + $0x3f8] sm:$0xff] }
 0x5e7   : > { %7351 = vst.msk [vmem:[%s10192_s12 + $0x3d0] sm:$0xff] %vm276_vm3, %v6839_v44  ;;  %v7095_v41 = vadd.f32 %v14861_v32, %v6579_v9  ;;  %v915_v5 = vld [vmem:[#allocation2 + $0x3f0] sm:$0xff]  ;;  %v1044_v9 = vld [vmem:[#allocation2 + $0x7f8] sm:$0xff]  ;;  %v5300_v1 = vadd.f32 %v4210_v48, %v916_v20 }
 0x5e8   : > { %7479 = vst.msk [vmem:[%s10192_s12 + $0x7d0] sm:$0xff] %vm276_vm3, %v6967_v50  ;;  %v1043_v22 = vld [vmem:[#allocation2 + $0x7f0] sm:$0xff]  ;;  %v5299_v10 = vadd.f32 %v4208_v36, %v915_v5  ;;  %v5555_v50 = vadd.f32 %v4848_v37, %v1171_v2 }
 0x5e9   : > { %7607 = vst.msk [vmem:[%s10192_s12 + $0xbd0] sm:$0xff] %vm276_vm3, %v7095_v41  ;;  %v1299_v43 = vld [vmem:[#allocation2 + $0xff0] sm:$0xff]  ;;  %v5427_v44 = vadd.f32 %v4528_v17, %v1043_v22  ;;  %v1172_v41 = vld [vmem:[#allocation2 + $0xbf8] sm:$0xff] }
 0x5ea   : > { %6192 = vst.msk [vmem:[#allocation2 + $0xfd0] sm:$0xff] %vm276_vm3, %v5679_v59  ;;  %v4530_v59 = vpop.f32.mrf.mxu1  ;;  %v5683_v35 = vadd.f32 %v5168_v54, %v1299_v43 }
 0x5eb   : > { %5809 = vst.msk [vmem:[#allocation2 + $0x3d8] sm:$0xff] %vm276_vm3, %v5296_v14  ;;  %v4850_v14 = vpop.f32.mrf.mxu2 }
 0x5ec   : > { %5937 = vst.msk [vmem:[#allocation2 + $0x7d8] sm:$0xff] %vm276_vm3, %v5424_v3  ;;  %v5428_v3 = vadd.f32 %v4530_v59, %v1044_v9  ;;  %v5556_v31 = vadd.f32 %v4850_v14, %v1172_v41 }
 0x5ed   : > { %6065 = vst.msk [vmem:[#allocation2 + $0xbd8] sm:$0xff] %vm276_vm3, %v5552_v51 }
 0x5ee   : > { %6193 = vst.msk [vmem:[#allocation2 + $0xfd8] sm:$0xff] %vm276_vm3, %v5680_v19 }
 0x5ef   : > { %5810 = vst.msk [vmem:[#allocation2 + $0x3e0] sm:$0xff] %vm276_vm3, %v5297_v42 }
 0x5f0   : > { %5938 = vst.msk [vmem:[#allocation2 + $0x7e0] sm:$0xff] %vm276_vm3, %v5425_v52 }
 0x5f1   : > { %v6707_v6 = vld [vmem:[#allocation2 + $0xfd0] sm:$0xff]  ;;  %6066 = vst.msk [vmem:[#allocation2 + $0xbe0] sm:$0xff] %vm276_vm3, %v5553_v21 }
 0x5f2   : > { %v7223_v11 = vadd.f32 %v14861_v32, %v6707_v6  ;;  %v6324_v8 = vld [vmem:[#allocation2 + $0x3d8] sm:$0xff]  ;;  %6194 = vst.msk [vmem:[#allocation2 + $0xfe0] sm:$0xff] %vm276_vm3, %v5681_v38 }
 0x5f3   : > { %v6840_v15 = vadd.f32 %v14861_v32, %v6324_v8  ;;  %v6452_v18 = vld [vmem:[#allocation2 + $0x7d8] sm:$0xff]  ;;  %5811 = vst.msk [vmem:[#allocation2 + $0x3e8] sm:$0xff] %vm276_vm3, %v5298_v40  ;;  %v5170_v40 = vpop.f32.mrf.mxu3 }
 0x5f4   : > { %7735 = vst.msk [vmem:[%s10192_s12 + $0xfd0] sm:$0xff] %vm276_vm3, %v7223_v11  ;;  %v6968_v26 = vadd.f32 %v14861_v32, %v6452_v18  ;;  %v6580_v27 = vld [vmem:[#allocation2 + $0xbd8] sm:$0xff] }
 0x5f5   : > { %7352 = vst.msk [vmem:[%s10192_s12 + $0x3d8] sm:$0xff] %vm276_vm3, %v6840_v15  ;;  %v7096_v29 = vadd.f32 %v14861_v32, %v6580_v27  ;;  %v6708_v4 = vld [vmem:[#allocation2 + $0xfd8] sm:$0xff] }
 0x5f6   : > { %7480 = vst.msk [vmem:[%s10192_s12 + $0x7d8] sm:$0xff] %vm276_vm3, %v6968_v26  ;;  %v7224_v12 = vadd.f32 %v14861_v32, %v6708_v4  ;;  %v6325_v46 = vld [vmem:[#allocation2 + $0x3e0] sm:$0xff]  ;;  %v1300_v38 = vld [vmem:[#allocation2 + $0xff8] sm:$0xff] }
 0x5f7   : > { %7608 = vst.msk [vmem:[%s10192_s12 + $0xbd8] sm:$0xff] %vm276_vm3, %v7096_v29  ;;  %v6841_v33 = vadd.f32 %v14861_v32, %v6325_v46  ;;  %v6453_v24 = vld [vmem:[#allocation2 + $0x7e0] sm:$0xff]  ;;  %v5684_v26 = vadd.f32 %v5170_v40, %v1300_v38 }
 0x5f8   : > { %7736 = vst.msk [vmem:[%s10192_s12 + $0xfd8] sm:$0xff] %vm276_vm3, %v7224_v12  ;;  %v6969_v53 = vadd.f32 %v14861_v32, %v6453_v24  ;;  %v6581_v16 = vld [vmem:[#allocation2 + $0xbe0] sm:$0xff] }
 0x5f9   : > { %7353 = vst.msk [vmem:[%s10192_s12 + $0x3e0] sm:$0xff] %vm276_vm3, %v6841_v33  ;;  %v7097_v13 = vadd.f32 %v14861_v32, %v6581_v16  ;;  %v6709_v45 = vld [vmem:[#allocation2 + $0xfe0] sm:$0xff] }
 0x5fa   : > { %7481 = vst.msk [vmem:[%s10192_s12 + $0x7e0] sm:$0xff] %vm276_vm3, %v6969_v53  ;;  %v7225_v58 = vadd.f32 %v14861_v32, %v6709_v45  ;;  %v6326_v63 = vld [vmem:[#allocation2 + $0x3e8] sm:$0xff] }
 0x5fb   : > { %7609 = vst.msk [vmem:[%s10192_s12 + $0xbe0] sm:$0xff] %vm276_vm3, %v7097_v13  ;;  %v6842_v28 = vadd.f32 %v14861_v32, %v6326_v63 }
 0x5fc   : > { %7737 = vst.msk [vmem:[%s10192_s12 + $0xfe0] sm:$0xff] %vm276_vm3, %v7225_v58 }
 0x5fd   : > { %7354 = vst.msk [vmem:[%s10192_s12 + $0x3e8] sm:$0xff] %vm276_vm3, %v6842_v28 }
 0x5fe   : > { %5939 = vst.msk [vmem:[#allocation2 + $0x7e8] sm:$0xff] %vm276_vm3, %v5426_v49 }
 0x5ff   : > { %6067 = vst.msk [vmem:[#allocation2 + $0xbe8] sm:$0xff] %vm276_vm3, %v5554_v25 }
 0x600   : > { %6195 = vst.msk [vmem:[#allocation2 + $0xfe8] sm:$0xff] %vm276_vm3, %v5682_v57 }
 0x601   : > { %5812 = vst.msk [vmem:[#allocation2 + $0x3f0] sm:$0xff] %vm276_vm3, %v5299_v10 }
 0x602   : > { %5940 = vst.msk [vmem:[#allocation2 + $0x7f0] sm:$0xff] %vm276_vm3, %v5427_v44 }
 0x603   : > { %6068 = vst.msk [vmem:[#allocation2 + $0xbf0] sm:$0xff] %vm276_vm3, %v5555_v50 }
 0x604   : > { %6196 = vst.msk [vmem:[#allocation2 + $0xff0] sm:$0xff] %vm276_vm3, %v5683_v35 }
 0x605   : > { %v6454_v51 = vld [vmem:[#allocation2 + $0x7e8] sm:$0xff]  ;;  %5813 = vst.msk [vmem:[#allocation2 + $0x3f8] sm:$0xff] %vm276_vm3, %v5300_v1 }
 0x606   : > { %v6970_v62 = vadd.f32 %v14861_v32, %v6454_v51  ;;  %v6582_v7 = vld [vmem:[#allocation2 + $0xbe8] sm:$0xff]  ;;  %5941 = vst.msk [vmem:[#allocation2 + $0x7f8] sm:$0xff] %vm276_vm3, %v5428_v3 }
 0x607   : > { %v7098_v19 = vadd.f32 %v14861_v32, %v6582_v7  ;;  %v6710_v55 = vld [vmem:[#allocation2 + $0xfe8] sm:$0xff]  ;;  %6069 = vst.msk [vmem:[#allocation2 + $0xbf8] sm:$0xff] %vm276_vm3, %v5556_v31 }
 0x608   : > { %7482 = vst.msk [vmem:[%s10192_s12 + $0x7e8] sm:$0xff] %vm276_vm3, %v6970_v62  ;;  %v7226_v30 = vadd.f32 %v14861_v32, %v6710_v55  ;;  %v6327_v42 = vld [vmem:[#allocation2 + $0x3f0] sm:$0xff] }
 0x609   : > { %7610 = vst.msk [vmem:[%s10192_s12 + $0xbe8] sm:$0xff] %vm276_vm3, %v7098_v19  ;;  %v6843_v56 = vadd.f32 %v14861_v32, %v6327_v42  ;;  %v6455_v47 = vld [vmem:[#allocation2 + $0x7f0] sm:$0xff] }
 0x60a   : > { %7738 = vst.msk [vmem:[%s10192_s12 + $0xfe8] sm:$0xff] %vm276_vm3, %v7226_v30  ;;  %v6971_v52 = vadd.f32 %v14861_v32, %v6455_v47  ;;  %v6583_v34 = vld [vmem:[#allocation2 + $0xbf0] sm:$0xff] }
 0x60b   : > { %7355 = vst.msk [vmem:[%s10192_s12 + $0x3f0] sm:$0xff] %vm276_vm3, %v6843_v56  ;;  %v7099_v39 = vadd.f32 %v14861_v32, %v6583_v34  ;;  %v6711_v21 = vld [vmem:[#allocation2 + $0xff0] sm:$0xff] }
 0x60c   : > { %7483 = vst.msk [vmem:[%s10192_s12 + $0x7f0] sm:$0xff] %vm276_vm3, %v6971_v52  ;;  %v7227_v6 = vadd.f32 %v14861_v32, %v6711_v21  ;;  %v6328_v11 = vld [vmem:[#allocation2 + $0x3f8] sm:$0xff] }
 0x60d   : > { %7611 = vst.msk [vmem:[%s10192_s12 + $0xbf0] sm:$0xff] %vm276_vm3, %v7099_v39  ;;  %v6844_v8 = vadd.f32 %v14861_v32, %v6328_v11  ;;  %v6456_v15 = vld [vmem:[#allocation2 + $0x7f8] sm:$0xff] }
 0x60e   : > { %7739 = vst.msk [vmem:[%s10192_s12 + $0xff0] sm:$0xff] %vm276_vm3, %v7227_v6  ;;  %v6972_v18 = vadd.f32 %v14861_v32, %v6456_v15  ;;  %v6584_v61 = vld [vmem:[#allocation2 + $0xbf8] sm:$0xff] }
 0x60f   : > { %7356 = vst.msk [vmem:[%s10192_s12 + $0x3f8] sm:$0xff] %vm276_vm3, %v6844_v8  ;;  %v7100_v27 = vadd.f32 %v14861_v32, %v6584_v61 }
 0x610   : > { %7484 = vst.msk [vmem:[%s10192_s12 + $0x7f8] sm:$0xff] %vm276_vm3, %v6972_v18 }
 0x611   : > { %7612 = vst.msk [vmem:[%s10192_s12 + $0xbf8] sm:$0xff] %vm276_vm3, %v7100_v27 }
 0x612   : > { %6197 = vst.msk [vmem:[#allocation2 + $0xff8] sm:$0xff] %vm276_vm3, %v5684_v26 }
 0x618   : > { %7747 = sbr.rel (!%p9983_p3) target bundleno = 1629 (0x65d), region = 44 }
 0x619   : > { %v6712_v36 = vld [vmem:[#allocation2 + $0xff8] sm:$0xff] }
 0x61a   : > { %v7228_v29 = vadd.f32 %v14861_v32, %v6712_v36 }
 0x61c   : > { %7740 = vst.msk [vmem:[%s10192_s12 + $0xff8] sm:$0xff] %vm276_vm3, %v7228_v29 }
 0x61d   : > { %s15240_s10 = smov (!%p7750_p9, %s7749_s10), 512 }
 0x61e   : > { %s9428_s23 = sshll.u32 %s15240_s10, 3 }
 0x61f   : > { %p9431_p10 = scmp.eq.s32.totalorder %s9428_s23, 0 }
 0x620   : > { %s15089_s24 = sshrl.u32 (!%p9431_p10), %s15240_s10, 5 }
 0x621   : > { %7759 = sbr.rel (%p9431_p10) target bundleno = 1629 (0x65d), region = 48  ;;  %p9432_p11 = scmp.le.s32.totalorder (!%p9431_p10), %s15089_s24, 0 }
 0x626   : > { %8055 = sbr.rel (%p9432_p11) target bundleno = 1612 (0x64c), region = 130  ;;  %s15228_s14 = smov (!%p9432_p11), %s15083_s21 }
 0x627   : > { %s15229_s20 = smov (!%p9432_p11), %s10192_s12  ;;  %s15098_s27 = smov (!%p9432_p11), 0  }
 0x628   : > { %s15100_s25 = smov (!%p9432_p11), 0  }
 0x62b LB: >> { %v7884_v32 = vld [vmem:[%s9903_s20] sm:$0xff]  ;;  %v7886_v4 = vld [vmem:[%s9903_s20 + $0x8] sm:$0xff]  ;;  %v7888_v17 = vld [vmem:[%s9903_s20 + $0x10] sm:$0xff]  ;;  %s7948_s26 = sadd.s32 1, %s9907_s27  ;;  %s7878_s25 = sadd.s32 1, %s9911_s25   ;;  %s9911_s25 = sphi %s15100_s25, %s7878_s25   ;;  %s9907_s27 = sphi %s15098_s27, %s15232_s27   ;;  %s9903_s20 = sphi %s15229_s20, %s15231_s20   ;;  %s9899_s14 = sphi %s15228_s14, %s15230_s14  }
 0x62c   : >> { %7885 = vst [vmem:[%s9899_s14] sm:$0xff] %v7884_v32  ;;  %v7890_v12 = vld [vmem:[%s9903_s20 + $0x18] sm:$0xff]  ;;  %p7949_p12 = scmp.ge.s32.totalorder %s7948_s26, %s15089_s24  ;;  %v7892_v46 = vld [vmem:[%s9903_s20 + $0x20] sm:$0xff]  ;;  %v7894_v37 = vld [vmem:[%s9903_s20 + $0x28] sm:$0xff]  ;;  %p7877_p13 = scmp.ge.s32.totalorder %s7878_s25, %s15089_s24 }
 0x62d   : >> { %7887 = vst [vmem:[%s9899_s14 + $0x8] sm:$0xff] %v7886_v4  ;;  %v7896_v33 = vld [vmem:[%s9903_s20 + $0x30] sm:$0xff]  ;;  %v7898_v24 = vld [vmem:[%s9903_s20 + $0x38] sm:$0xff]  ;;  %v7900_v60 = vld [vmem:[%s9903_s20 + $0x40] sm:$0xff] }
 0x62e   : >> { %7889 = vst [vmem:[%s9899_s14 + $0x10] sm:$0xff] %v7888_v17  ;;  %s15242_s26 = smov (%p7949_p12, %s7948_s26), 0  ;;  %v7902_v53 = vld [vmem:[%s9903_s20 + $0x48] sm:$0xff]  ;;  %v7904_v16 = vld [vmem:[%s9903_s20 + $0x50] sm:$0xff]  ;;  %v7906_v0 = vld [vmem:[%s9903_s20 + $0x58] sm:$0xff] }
 0x62f   : >> { %7891 = vst [vmem:[%s9899_s14 + $0x18] sm:$0xff] %v7890_v12  ;;  %s9433_s28 = sshll.u32 %s15242_s26, 8  ;;  %v7908_v13 = vld [vmem:[%s9903_s20 + $0x60] sm:$0xff]  ;;  %v7910_v45 = vld [vmem:[%s9903_s20 + $0x68] sm:$0xff]  ;;  %v7912_v23 = vld [vmem:[%s9903_s20 + $0x70] sm:$0xff]  ;;  %s15232_s27 = smov %s15242_s26 }
 0x630   : >> { %7893 = vst [vmem:[%s9899_s14 + $0x20] sm:$0xff] %v7892_v46  ;;  %s15132_s29 = scalar_lea.vmem %s10192_s12, %s9433_s28 [#allocation3]   ;;  %s15135_s30 = scalar_lea.vmem %s15083_s21, %s9433_s28   ;;  %v7914_v58 = vld [vmem:[%s9903_s20 + $0x78] sm:$0xff]  ;;  %v7916_v63 = vld [vmem:[%s9903_s20 + $0x80] sm:$0xff]  ;;  %v7918_v49 = vld [vmem:[%s9903_s20 + $0x88] sm:$0xff] }
 0x631   : >> { %7895 = vst [vmem:[%s9899_s14 + $0x28] sm:$0xff] %v7894_v37  ;;  %v7920_v5 = vld [vmem:[%s9903_s20 + $0x90] sm:$0xff]  ;;  %v7922_v28 = vld [vmem:[%s9903_s20 + $0x98] sm:$0xff]  ;;  %v7924_v25 = vld [vmem:[%s9903_s20 + $0xa0] sm:$0xff] }
 0x632   : >> { %7897 = vst [vmem:[%s9899_s14 + $0x30] sm:$0xff] %v7896_v33  ;;  %v7926_v22 = vld [vmem:[%s9903_s20 + $0xa8] sm:$0xff]  ;;  %v7928_v57 = vld [vmem:[%s9903_s20 + $0xb0] sm:$0xff]  ;;  %v7930_v2 = vld [vmem:[%s9903_s20 + $0xb8] sm:$0xff] }
 0x633   : >> { %7899 = vst [vmem:[%s9899_s14 + $0x38] sm:$0xff] %v7898_v24  ;;  %v7932_v10 = vld [vmem:[%s9903_s20 + $0xc0] sm:$0xff]  ;;  %v7934_v43 = vld [vmem:[%s9903_s20 + $0xc8] sm:$0xff]  ;;  %v7936_v54 = vld [vmem:[%s9903_s20 + $0xd0] sm:$0xff] }
 0x634   : >> { %7901 = vst [vmem:[%s9899_s14 + $0x40] sm:$0xff] %v7900_v60  ;;  %v7938_v44 = vld [vmem:[%s9903_s20 + $0xd8] sm:$0xff]  ;;  %v7940_v20 = vld [vmem:[%s9903_s20 + $0xe0] sm:$0xff]  ;;  %v7942_v48 = vld [vmem:[%s9903_s20 + $0xe8] sm:$0xff] }
 0x635   : >> { %7903 = vst [vmem:[%s9899_s14 + $0x48] sm:$0xff] %v7902_v53  ;;  %v7944_v50 = vld [vmem:[%s9903_s20 + $0xf0] sm:$0xff]  ;;  %v7946_v9 = vld [vmem:[%s9903_s20 + $0xf8] sm:$0xff]  ;;  %s15231_s20 = smov %s15132_s29 }
 0x636   : >> { %7905 = vst [vmem:[%s9899_s14 + $0x50] sm:$0xff] %v7904_v16 }
 0x637   : >> { %7907 = vst [vmem:[%s9899_s14 + $0x58] sm:$0xff] %v7906_v0 }
 0x638   : >> { %7909 = vst [vmem:[%s9899_s14 + $0x60] sm:$0xff] %v7908_v13 }
 0x639   : >> { %7911 = vst [vmem:[%s9899_s14 + $0x68] sm:$0xff] %v7910_v45 }
 0x63a   : >> { %7913 = vst [vmem:[%s9899_s14 + $0x70] sm:$0xff] %v7912_v23 }
 0x63b   : >> { %7915 = vst [vmem:[%s9899_s14 + $0x78] sm:$0xff] %v7914_v58 }
 0x63c   : >> { %7917 = vst [vmem:[%s9899_s14 + $0x80] sm:$0xff] %v7916_v63 }
 0x63d   : >> { %7919 = vst [vmem:[%s9899_s14 + $0x88] sm:$0xff] %v7918_v49 }
 0x63e   : >> { %7921 = vst [vmem:[%s9899_s14 + $0x90] sm:$0xff] %v7920_v5 }
 0x63f   : >> { %7923 = vst [vmem:[%s9899_s14 + $0x98] sm:$0xff] %v7922_v28 }
 0x640   : >> { %7925 = vst [vmem:[%s9899_s14 + $0xa0] sm:$0xff] %v7924_v25 }
 0x641   : >> { %7927 = vst [vmem:[%s9899_s14 + $0xa8] sm:$0xff] %v7926_v22 }
 0x642   : >> { %7929 = vst [vmem:[%s9899_s14 + $0xb0] sm:$0xff] %v7928_v57 }
 0x643   : >> { %7931 = vst [vmem:[%s9899_s14 + $0xb8] sm:$0xff] %v7930_v2 }
 0x644   : >> { %7933 = vst [vmem:[%s9899_s14 + $0xc0] sm:$0xff] %v7932_v10 }
 0x645   : >> { %7935 = vst [vmem:[%s9899_s14 + $0xc8] sm:$0xff] %v7934_v43 }
 0x646   : >> { %7937 = vst [vmem:[%s9899_s14 + $0xd0] sm:$0xff] %v7936_v54 }
 0x647   : >> { %7939 = vst [vmem:[%s9899_s14 + $0xd8] sm:$0xff] %v7938_v44  ;;  %7880 = sbr.rel (!%p7877_p13) target bundleno = 1579 (0x62b), region = 136 }
 0x648   : >> { %7941 = vst [vmem:[%s9899_s14 + $0xe0] sm:$0xff] %v7940_v20 }
 0x649   : >> { %7943 = vst [vmem:[%s9899_s14 + $0xe8] sm:$0xff] %v7942_v48 }
 0x64a   : >> { %7945 = vst [vmem:[%s9899_s14 + $0xf0] sm:$0xff] %v7944_v50 }
 0x64b   : >> { %7947 = vst [vmem:[%s9899_s14 + $0xf8] sm:$0xff] %v7946_v9  ;;  %s15230_s14 = smov %s15135_s30 }
 0x64c PF: > { %s15200_s4 = sand.u32 31, %s15240_s10   ;;  %s9702_s5 = sshll.u32 %s15089_s24, 8 }
 0x64d   : > { %s7959_s6 = scalar_lea.vmem %s10192_s12, %s9702_s5 [#allocation3]   ;;  %s7961_s8 = scalar_lea.vmem %s15083_s21, %s9702_s5  }
 0x64e   : > { %p9438_p0 = scmp.le.s32.totalorder %s15200_s4, 0 }
 0x64f   : > { %s9913_s7 = smov (!%p9438_p0), %s7961_s8   ;;  %s9917_s9 = smov (!%p9438_p0), %s7959_s6  }
 0x650   : > { %8069 = sbr.rel (%p9438_p0) target bundleno = 1629 (0x65d), region = 141  ;;  %s9921_s11 = smov (!%p9438_p0), 0  }
 0x651   : > { %s9925_s17 = smov (!%p9438_p0), 0  }
 0x655 LB: >> { %v7971_v59 = vld [vmem:[%s9919_s9] sm:$0xff]  ;;  %s7973_s10 = sadd.s32 1, %s9923_s11  ;;  %s7965_s17 = sadd.s32 1, %s9927_s17   ;;  %s9927_s17 = sphi %s9925_s17, %s7965_s17   ;;  %s9923_s11 = sphi %s9921_s11, %s9922_s11   ;;  %s9919_s9 = sphi %s9917_s9, %s7978_s9   ;;  %s9915_s7 = sphi %s9913_s7, %s7979_s7  }
 0x656   : >> { %7972 = vst [vmem:[%s9915_s7] sm:$0xff] %v7971_v59  ;;  %p7974_p1 = scmp.ge.s32.totalorder %s7973_s10, %s15200_s4  ;;  %p7964_p2 = scmp.ge.s32.totalorder %s7965_s17, %s15200_s4 }
 0x658   : >> { %s15244_s10 = smov (%p7974_p1, %s7973_s10), 0  ;;  %7967 = sbr.rel (!%p7964_p2) target bundleno = 1621 (0x655), region = 147 }
 0x659   : >> { %s9439_s12 = sshll.u32 %s15244_s10, 3  ;;  %s9922_s11 = smov %s15244_s10  }
 0x65a   : >> { %s7978_s9 = scalar_lea.vmem %s7959_s6, %s9439_s12 [#allocation3]   ;;  %s7979_s7 = scalar_lea.vmem %s7961_s8, %s9439_s12  }
 0x65d PF: > { %s13_s16 = sadd.s32 1, %s9895_s16   ;;  %s15233_s12 = smov %s9883_s13 }
 0x65e   : > { %p10_p3 = scmp.ge.s32.totalorder %s13_s16, 15   ;;  %s15234_s13 = smov %s9992_s22 }
 0x65f   : > { %s15235_s14 = smov %s9891_s15  ;;  %s15236_s15 = smov %s15238_s18 }
 0x660   :  { %12 = sbr.rel (!%p10_p3) target bundleno = 3 (0x3), region = 158 }

</bundles_post_ra>
